<compile_context>
chip_gen: v7x
topology: tpu7x:2x2x1
jax: 0.10.0
libtpu: 0.0.40
codegen_flags: <defaults>
</compile_context>

<pallas_src>
import jax
import jax.numpy as jnp
from jax.experimental import pallas as pl
from jax.experimental.pallas import tpu as pltpu

FEATURE_NUM = 2


def _fusion_kernel(z0_ref, z1_ref, w1a_ref, w1b_ref, b1_ref, w2d_ref, b2d_ref, o_ref):
    z0 = z0_ref[...]
    z1 = z1_ref[...]

    # h = tanh(concat(z0, z1) @ W1 + b1), computed without the lane concat:
    # two MXU dots on the static halves of W1, accumulated in f32.
    h = jnp.tanh(
        jnp.dot(z0, w1a_ref[...], preferred_element_type=jnp.float32)
        + jnp.dot(z1, w1b_ref[...], preferred_element_type=jnp.float32)
        + b1_ref[...].astype(jnp.float32)
    )  # (tm, D)

    # 2-way softmax over (logit0, logit1) == sigmoid(logit0 - logit1).
    # logit_diff = h @ (w2[:,0]-w2[:,1]) + (b2_0 - b2_1): VPU mul + XLU reduce,
    # no 2-lane-wide MXU result and no width-2 softmax.
    diff = (
        jnp.sum(h * w2d_ref[...].astype(jnp.float32), axis=-1, keepdims=True)
        + b2d_ref[0]
    )                                                   # (tm, 1)
    a0 = jax.nn.sigmoid(diff)                           # attn[:,0]; attn[:,1] = 1-a0

    # fused = a0*z0 + (1-a0)*z1  ==  z1 + a0*(z0 - z1)   (one fewer multiply)
    z0f = z0.astype(jnp.float32)
    z1f = z1.astype(jnp.float32)
    fused = z1f + a0 * (z0f - z1f)                      # (tm, D)
    o_ref[...] = fused.astype(o_ref.dtype)


def _round_up(x, m):
    return ((x + m - 1) // m) * m


def attention_fusion(z0, z1, w1, b1, w2, b2, *, tm=None,
                     single_buffer_weights=False, vmem_limit_bytes=None):
    N, D = z0.shape
    assert z1.shape == (N, D)
    assert w1.shape == (FEATURE_NUM * D, D) and b1.shape == (1, D)
    assert w2.shape == (D, FEATURE_NUM) and b2.shape == (1, FEATURE_NUM)
    # TODO(synk): for best store bandwidth keep D a multiple of 128 (lane-dense
    # output); other D still runs correctly but uses masked partial stores.

    # Tiny host-side parameter prep: split W1 (no in-kernel concat) and collapse
    # the 2-wide attention head + softmax into a single direction vector + scalar.
    w1a = w1[:D, :]
    w1b = w1[D:, :]
    w2d = (w2[:, 0] - w2[:, 1]).reshape(1, D)
    b2d = (b2[0, 0] - b2[0, 1]).reshape(1)

    # Tile sizing: big tiles amortize the ~0.35us/grid-step overhead; cap so the
    # double-buffered z0/z1/out tiles stay within a conservative VMEM budget;
    # keep >=2 grid steps so both TensorCores get work; sublane-align to 8.
    if tm is None:
        tm = 2048
    vmem_budget = 20 * 1024 * 1024                      # leave headroom of the 32MiB default
    tm = min(int(tm), max(256, vmem_budget // (24 * D)))  # 3 arrays x 2 bufs x 4B
    tm = _round_up(max(8, min(tm, N)), 8)
    if -(-N // tm) < 2 and N > 8:
        tm = _round_up(max(N // 2, 8), 8)
    grid = (pl.cdiv(N, tm),)                            # ragged last block handled by Pallas

    def _const_spec(shape):
        if single_buffer_weights:
            # Constant-index blocks are fetched once; drop the dead second buffer
            # (matters for large D on v7x's 64 MiB VMEM).
            return pl.BlockSpec(shape, lambda i: (0, 0), pipeline_mode=pl.Buffered(1))
        return pl.BlockSpec(shape, lambda i: (0, 0))

    cp_kwargs = dict(dimension_semantics=("parallel",))
    if vmem_limit_bytes is not None:
        cp_kwargs["vmem_limit_bytes"] = vmem_limit_bytes

    out = pl.pallas_call(
        _fusion_kernel,
        out_shape=jax.ShapeDtypeStruct((N, D), z0.dtype),
        grid_spec=pltpu.PrefetchScalarGridSpec(
            num_scalar_prefetch=0,
            grid=grid,
            in_specs=[
                pl.BlockSpec((tm, D), lambda i: (i, 0)),            # z0 tile
                pl.BlockSpec((tm, D), lambda i: (i, 0)),            # z1 tile
                _const_spec((D, D)),                                # W1[:D, :]
                _const_spec((D, D)),                                # W1[D:, :]
                _const_spec((1, D)),                                # b1
                _const_spec((1, D)),                                # w2[:,0]-w2[:,1]
                pl.BlockSpec(memory_space=pltpu.MemorySpace.SMEM),  # b2 diff (scalar)
            ],
            out_specs=pl.BlockSpec((tm, D), lambda i: (i, 0)),
        ),
        compiler_params=pltpu.CompilerParams(**cp_kwargs),
    )(z0, z1, w1a, w1b, b1, w2d, b2d)

    return out


def attention_fusion_ref(z0, z1, w1, b1, w2, b2):
    combined = jnp.concatenate([z0, z1], axis=1)
    h = jnp.tanh(combined @ w1 + b1)
    logits = h @ w2 + b2
    attn = jax.nn.softmax(logits, axis=-1)
    return attn[:, 0:1] * z0 + attn[:, 1:2] * z1


if __name__ == "__main__":
    # Use full-precision f32 matmuls on both the kernel and the reference path so
    # the numerical comparison is apples-to-apples.
    jax.config.update("jax_default_matmul_precision", "highest")

    key = jax.random.PRNGKey(0)
    k_z0, k_z1, k_w1, k_b1, k_w2, k_b2 = jax.random.split(key, 6)

    # Small but hardware-friendly shapes: D multiple of 128 (lane-dense output),
    # N not a multiple of the tile (exercises the ragged-boundary path, 2 grid steps).
    N, D = 1000, 128

    z0 = jax.random.normal(k_z0, (N, D), dtype=jnp.float32)
    z1 = jax.random.normal(k_z1, (N, D), dtype=jnp.float32)

    # Deterministic parameter init (Linear weights stored as (in, out)).
    w1 = jax.random.normal(k_w1, (FEATURE_NUM * D, D), dtype=jnp.float32) * 0.1
    b1 = jax.random.normal(k_b1, (1, D), dtype=jnp.float32) * 0.1
    w2 = jax.random.normal(k_w2, (D, FEATURE_NUM), dtype=jnp.float32) * 0.1
    b2 = jax.random.normal(k_b2, (1, FEATURE_NUM), dtype=jnp.float32) * 0.1

    out = attention_fusion(z0, z1, w1, b1, w2, b2)
    out = jax.block_until_ready(out)

    ref = attention_fusion_ref(z0, z1, w1, b1, w2, b2)
    assert out.shape == (N, D)
    assert jnp.allclose(out, ref, atol=1e-4, rtol=1e-5), "mismatch vs reference"

    print("KERNEL_OK")
</pallas_src>

<mosaic_0001>
module attributes {stable_mosaic.version = 11 : i64} {
  func.func @_fusion_kernel(%arg0: i32, %arg1: memref<504x128xf32, #tpu.memory_space<vmem>>, %arg2: memref<504x128xf32, #tpu.memory_space<vmem>>, %arg3: memref<128x128xf32, #tpu.memory_space<vmem>>, %arg4: memref<128x128xf32, #tpu.memory_space<vmem>>, %arg5: memref<1x128xf32, #tpu.memory_space<vmem>>, %arg6: memref<1x128xf32, #tpu.memory_space<vmem>>, %arg7: memref<1xf32, #tpu.memory_space<smem>>, %arg8: memref<504x128xf32, #tpu.memory_space<vmem>>) attributes {dimension_semantics = [#tpu.dimension_semantics<parallel>], iteration_bounds = array<i64: 2>, scalar_prefetch = 0 : i64, scratch_operands = 0 : i64, tpu.core_type = #tpu.core_type<tc>, window_params = [{transform_indices = @transform_0, window_bounds = array<i64: 504, 128>}, {transform_indices = @transform_1, window_bounds = array<i64: 504, 128>}, {pipeline_mode = #tpu.pipeline_mode<synchronous>, transform_indices = @transform_2, window_bounds = array<i64: 128, 128>}, {pipeline_mode = #tpu.pipeline_mode<synchronous>, transform_indices = @transform_3, window_bounds = array<i64: 128, 128>}, {pipeline_mode = #tpu.pipeline_mode<synchronous>, transform_indices = @transform_4, window_bounds = array<i64: 1, 128>}, {pipeline_mode = #tpu.pipeline_mode<synchronous>, transform_indices = @transform_5, window_bounds = array<i64: 1, 128>}, {transform_indices = @transform_6, window_bounds = array<i64: 1>}, {transform_indices = @transform_7, window_bounds = array<i64: 504, 128>}]} {
    %c0 = arith.constant 0 : index
    %c0_0 = arith.constant 0 : index
    %0 = vector.load %arg1[%c0, %c0_0] : memref<504x128xf32, #tpu.memory_space<vmem>>, vector<504x128xf32>
    %c0_1 = arith.constant 0 : index
    %c0_2 = arith.constant 0 : index
    %1 = vector.load %arg2[%c0_1, %c0_2] : memref<504x128xf32, #tpu.memory_space<vmem>>, vector<504x128xf32>
    %c0_3 = arith.constant 0 : index
    %c0_4 = arith.constant 0 : index
    %2 = vector.load %arg3[%c0_3, %c0_4] : memref<128x128xf32, #tpu.memory_space<vmem>>, vector<128x128xf32>
    %cst = arith.constant dense<0.000000e+00> : vector<504x128xf32>
    %3 = tpu.matmul %0, %2, %cst {dimension_numbers = #tpu.dot_dimension_numbers<[1], [0], [0], [1], [0, 0, 1, 1], [], []>, precision = #tpu.contract_precision<fp32>} : vector<504x128xf32>, vector<128x128xf32>, vector<504x128xf32> -> vector<504x128xf32>
    %c0_5 = arith.constant 0 : index
    %c0_6 = arith.constant 0 : index
    %4 = vector.load %arg4[%c0_5, %c0_6] : memref<128x128xf32, #tpu.memory_space<vmem>>, vector<128x128xf32>
    %cst_7 = arith.constant dense<0.000000e+00> : vector<504x128xf32>
    %5 = tpu.matmul %1, %4, %cst_7 {dimension_numbers = #tpu.dot_dimension_numbers<[1], [0], [0], [1], [0, 0, 1, 1], [], []>, precision = #tpu.contract_precision<fp32>} : vector<504x128xf32>, vector<128x128xf32>, vector<504x128xf32> -> vector<504x128xf32>
    %6 = arith.addf %3, %5 : vector<504x128xf32>
    %c0_8 = arith.constant 0 : index
    %c0_9 = arith.constant 0 : index
    %7 = vector.load %arg5[%c0_8, %c0_9] : memref<1x128xf32, #tpu.memory_space<vmem>>, vector<1x128xf32>
    %8 = vector.broadcast %7 : vector<1x128xf32> to vector<504x128xf32>
    %9 = arith.addf %6, %8 : vector<504x128xf32>
    %10 = math.tanh %9 : vector<504x128xf32>
    %c0_10 = arith.constant 0 : index
    %c0_11 = arith.constant 0 : index
    %11 = vector.load %arg6[%c0_10, %c0_11] : memref<1x128xf32, #tpu.memory_space<vmem>>, vector<1x128xf32>
    %12 = vector.broadcast %11 : vector<1x128xf32> to vector<504x128xf32>
    %13 = arith.mulf %10, %12 : vector<504x128xf32>
    %cst_12 = arith.constant dense<0.000000e+00> : vector<504xf32>
    %14 = vector.multi_reduction <add>, %13, %cst_12 [1] : vector<504x128xf32> to vector<504xf32>
    %15 = vector.shape_cast %14 : vector<504xf32> to vector<504x1xf32>
    %c0_13 = arith.constant 0 : index
    %16 = memref.load %arg7[%c0_13] : memref<1xf32, #tpu.memory_space<smem>>
    %17 = vector.broadcast %16 : f32 to vector<504x1xf32>
    %18 = arith.addf %15, %17 : vector<504x1xf32>
    %19 = arith.negf %18 : vector<504x1xf32>
    %20 = math.exp %19 : vector<504x1xf32>
    %cst_14 = arith.constant 1.000000e+00 : f32
    %21 = vector.broadcast %cst_14 : f32 to vector<504x1xf32>
    %22 = arith.addf %21, %20 : vector<504x1xf32>
    %23 = arith.divf %21, %22 : vector<504x1xf32>
    %24 = arith.subf %0, %1 : vector<504x128xf32>
    %25 = vector.broadcast %23 : vector<504x1xf32> to vector<504x128xf32>
    %26 = arith.mulf %25, %24 : vector<504x128xf32>
    %27 = arith.addf %1, %26 : vector<504x128xf32>
    %c0_15 = arith.constant 0 : index
    %c0_16 = arith.constant 0 : index
    %28 = vector.load %arg8[%c0_15, %c0_16] : memref<504x128xf32, #tpu.memory_space<vmem>>, vector<504x128xf32>
    tpu.vector_store %arg8[%c0_15, %c0_16], %27 {strides = array<i32>} : memref<504x128xf32, #tpu.memory_space<vmem>>, vector<504x128xf32>,
    return
  }
  func.func @transform_0(%arg0: i32) -> (i32, i32) {
    %c0_i32 = arith.constant 0 : i32
    %c0_i32_0 = arith.constant 0 : i32
    return %arg0, %c0_i32 : i32, i32
  }
  func.func @transform_1(%arg0: i32) -> (i32, i32) {
    %c0_i32 = arith.constant 0 : i32
    %c0_i32_0 = arith.constant 0 : i32
    return %arg0, %c0_i32 : i32, i32
  }
  func.func @transform_2(%arg0: i32) -> (i32, i32) {
    %c0_i32 = arith.constant 0 : i32
    %c0_i32_0 = arith.constant 0 : i32
    %c0_i32_1 = arith.constant 0 : i32
    return %c0_i32, %c0_i32_0 : i32, i32
  }
  func.func @transform_3(%arg0: i32) -> (i32, i32) {
    %c0_i32 = arith.constant 0 : i32
    %c0_i32_0 = arith.constant 0 : i32
    %c0_i32_1 = arith.constant 0 : i32
    return %c0_i32, %c0_i32_0 : i32, i32
  }
  func.func @transform_4(%arg0: i32) -> (i32, i32) {
    %c0_i32 = arith.constant 0 : i32
    %c0_i32_0 = arith.constant 0 : i32
    %c0_i32_1 = arith.constant 0 : i32
    return %c0_i32, %c0_i32_0 : i32, i32
  }
  func.func @transform_5(%arg0: i32) -> (i32, i32) {
    %c0_i32 = arith.constant 0 : i32
    %c0_i32_0 = arith.constant 0 : i32
    %c0_i32_1 = arith.constant 0 : i32
    return %c0_i32, %c0_i32_0 : i32, i32
  }
  func.func @transform_6(%arg0: i32) -> i32 {
    %c0_i32 = arith.constant 0 : i32
    %c0_i32_0 = arith.constant 0 : i32
    return %c0_i32 : i32
  }
  func.func @transform_7(%arg0: i32) -> (i32, i32) {
    %c0_i32 = arith.constant 0 : i32
    %c0_i32_0 = arith.constant 0 : i32
    return %arg0, %c0_i32 : i32, i32
  }
}

</mosaic_0001>

<bundles_post_ra>
// kernel: tpu_custom_call.1
= control target key start
LH: loop header
LB: loop body
LE: loop exit
PB: predicated region body
PF: predicated region fallthrough
CT: control target
= control target key end

     0   :  { %s18846_s0 = inlined_call_operand.hbm [shape: f32[1000,128], index: 0, kind: input, shape index: {}]   ;;  %s18847_s1 = inlined_call_operand.hbm [shape: f32[1000,128], index: 1, kind: input, shape index: {}]   ;;  %s18848_s2 = inlined_call_operand.hbm [shape: f32[128,128], index: 2, kind: input, shape index: {}]   ;;  %s18849_s3 = inlined_call_operand.hbm [shape: f32[128,128], index: 3, kind: input, shape index: {}]   ;;  %s18850_s4 = inlined_call_operand.vmem [shape: f32[1,128], index: 4, kind: input, shape index: {}]   ;;  %s18851_s5 = inlined_call_operand.vmem [shape: f32[1,128], index: 5, kind: input, shape index: {}]   ;;  %s18852_s6 = inlined_call_operand.<no memory space> [shape: f32[1], index: 6, kind: input, shape index: {}]   ;;  %s18853_s7 = inlined_call_operand.hbm [shape: f32[1000,128], index: 7, kind: output, shape index: {}]  }
   0x1   :  { %12 = sst [smem:[#allocation2]] %s18852_s6 }
   0x2   :  { %13 = vsyncpa [#allocation4], 0 }
   0x3   :  { %15 = vsyncpa [#allocation4 + $0x1], 0 }
   0x4   :  { %16 = vsyncpa [#allocation7], 0 }
   0x5   :  { %18 = vsyncpa [#allocation7 + $0x1], 0 }
   0x6   :  { %19 = vsyncpa [#allocation10], 0 }
   0x7   :  { %20 = vsyncpa [#allocation5], 0 }
   0x8   :  { %22 = vsyncpa [#allocation5 + $0x1], 0  ;;  %s13138_s26 = smov 0   ;;  %s13140_s27 = smov 0  }
   0x9   :  { %s13142_s28 = smov 0   ;;  %s13144_s29 = smov 0  }
   0xa LB: > { %s13159_s6 = sadd.s32 4294967295, %s13077_s29   ;;  %s8325_s30 = sadd.s32 4294967294, %s13077_s29   ;;  %s13077_s29 = sphi %s13144_s29, %s20468_s29   ;;  %s13073_s28 = sphi %s13142_s28, %s20472_s28   ;;  %s13069_s27 = sphi %s13140_s27, %s20471_s27   ;;  %s13065_s26 = sphi %s13138_s26, %s20470_s26  }
   0xb   : > { %s13163_s8 = sadd.s32 1, %s13077_s29   ;;  %s35_s9 = sadd.s32 1, %s13073_s28 }
   0xc   : > { %19461 = sst [smem:[#allocation17_spill]] %s13163_s8  ;;  %s32_s10 = ssub.s32 %s13077_s29, %s13163_s8 }
   0xd   : > { %p42_p0 = scmp.ne.s32.totalorder %s13073_s28, %s13069_s27  ;;  %p33_p1 = scmp.eq.s32.totalorder %s32_s10, 0 }
   0xe   : > { %p43_p2 = scmp.eq.s32.totalorder %s13077_s29, 0  ;;  %p48_p3 = scmp.ne.s32.totalorder %s13069_s27, %s13065_s26 }
   0xf   : > { %p18854_p4 = scmp.eq.s32.totalorder %s13159_s6, 0  ;;  %p203_p7 = scmp.eq.s32.totalorder %s13159_s6, 1 }
  0x10   : > { %s13175_s11 = scalar_select %p33_p1, %s13073_s28, %s35_s9  }
  0x11   : > { %p13177_p5 = por %p43_p2, %p42_p0  ;;  %p13183_p6 = por %p18854_p4, %p48_p3 }
  0x12   : > { %19462 = sst [smem:[#allocation18_spill]] %s13175_s11  ;;  %p209_p8 = scmp.eq.s32.totalorder %s8325_s30, 1 }
  0x13   : > { %s19463_s12 = scalar_select %p13177_p5, 1, 0 }
  0x14   : > { %s19464_s13 = scalar_select %p13183_p6, 1, 0 }
  0x15   : > { %p8326_p9 = scmp.ge.s32.totalorder %s13077_s29, 1  ;;  %p216_p10 = scmp.lt.s32.totalorder %s13077_s29, 3 }
  0x16   : > { %p13190_p11 = por %p203_p7, %p42_p0  ;;  %p13194_p12 = por %p209_p8, %p48_p3 }
  0x17   : > { %p13198_p13 = pnand %p8326_p9, %p216_p10  ;;  %s13079_s17 = smov [#allocation8]  }
  0x18   : > { %s19465_s14 = scalar_select %p13190_p11, 1, 0 }
  0x19   : > { %s19466_s15 = scalar_select %p13194_p12, 1, 0 }
  0x1a   : > { %s19467_s16 = scalar_select %p13198_p13, 1, 0 }
  0x1b   : > { %p12320_p1 = pneg %p13198_p13  ;;  %s228_s18 = sshll.u32 %s13079_s17, 4  ;;  %s229_s18 = int_to_ptr.vmem [resolvable:$true] %s228_s18 }
  0x1c   : > { %s13080_s20 = smov [#allocation9]   ;;  %s12887_s24 = scalar_lea.hbm %s18848_s2, 2048 }
  0x1d   : > { %p13206_p2 = pnand %p12320_p1, %p18854_p4  ;;  %s241_s21 = sshll.u32 %s13080_s20, 4  ;;  %s13210_s21 = int_to_ptr.vmem [resolvable:$true] %s241_s21 }
  0x1e   : > { %p12888_p0 = scmp.ne.s32.totalorder %s18848_s2, %s12887_s24  ;;  %p12894_p9 = scmp.lt.u32.totalorder %s12887_s24, %s18848_s2 }
  0x1f   : > { %p12889_p3 = pneg %p13206_p2 }
  0x21   : > { %p12890_p7 = pnand %p12889_p3, %p12888_p0 }
  0x23   : > { %p12891_p8 = pneg %p12890_p7 }
  0x25   : > { %p12896_p10 = pnand %p12894_p9, %p12891_p8 }
  0x27   : > { %12899 = shalt.err (!%p12896_p10)
}
  0x28   : > { %s12900_s17 = scalar_lea.vmem %s229_s18, 2048  ;;  %p12908_p11 = scmp.lt.s32.totalorder %s229_s18, %s229_s18 }
  0x29   : > { %p12901_p1 = scmp.ne.s32.totalorder %s229_s18, %s12900_s17  ;;  %p12909_p6 = scmp.lt.s32.totalorder %s12900_s17, %s12900_s17 }
  0x2b   : > { %p12903_p4 = pnand %p12901_p1, %p12889_p3  ;;  %p12910_p13 = por %p12909_p6, %p12908_p11 }
  0x2d   : > { %p12904_p12 = pneg %p12903_p4 }
  0x2f   : > { %p12911_p5 = pnand %p12910_p13, %p12904_p12 }
  0x31   : > { %12914 = shalt.err (!%p12911_p5)
}
  0x32   : > { %s13081_s20 = smov 128   ;;  %s13082_s22 = smov 8  }
  0x33   : > { %12323 = dma.hbm_to_vmem [thread:$0]  (!%p13206_p2), %s18848_s2, 2048, %s229_s18, [#allocation7], %s13081_s20, %s13081_s20, %s13082_s22  }
  0x34   : > { %s12915_s9 = scalar_lea.hbm %s18849_s3, 2048 }
  0x35   : > { %p12916_p4 = scmp.ne.s32.totalorder %s18849_s3, %s12915_s9  ;;  %p12922_p11 = scmp.lt.u32.totalorder %s12915_s9, %s18849_s3 }
  0x37   : > { %p12918_p5 = pnand %p12916_p4, %p12889_p3 }
  0x39   : > { %p12919_p6 = pneg %p12918_p5 }
  0x3b   : > { %p12924_p12 = pnand %p12922_p11, %p12919_p6 }
  0x3d   : > { %12927 = shalt.err (!%p12924_p12)
}
  0x3e   : > { %s12928_s18 = scalar_lea.vmem %s13210_s21, 2048  ;;  %p12936_p8 = scmp.lt.s32.totalorder %s13210_s21, %s13210_s21 }
  0x3f   : > { %p12929_p13 = scmp.ne.s32.totalorder %s13210_s21, %s12928_s18  ;;  %p12937_p9 = scmp.lt.s32.totalorder %s12928_s18, %s12928_s18 }
  0x41   : > { %p12931_p0 = pnand %p12929_p13, %p12889_p3  ;;  %p12938_p10 = por %p12937_p9, %p12936_p8 }
  0x43   : > { %p12932_p7 = pneg %p12931_p0 }
  0x45   : > { %p12939_p1 = pnand %p12938_p10, %p12932_p7 }
  0x47   : > { %12942 = shalt.err (!%p12939_p1)
}
  0x48   : > { %12326 = dma.hbm_to_vmem [thread:$0]  (!%p13206_p2), %s18849_s3, 2048, %s13210_s21, [#allocation10], %s13081_s20, %s13081_s20, %s13082_s22  }
  0x49   : > { %p8329_p4 = scmp.ge.s32.totalorder %s13077_s29, 2 }
  0x4a   : > { %p19469_p3 = scmp.ne.s32.totalorder (!%p8329_p4), %s19463_s12, 0 }
  0x4b   : > { %260 = sbr.rel (%p8329_p4) target bundleno = 154 (0x9a), region = 36 }
  0x52   : > { %263 = sbr.rel (!%p19469_p3) target bundleno = 117 (0x75), region = 40  ;;  %s264_s23 = sand.u32 (%p19469_p3), 1, %s13073_s28  }
  0x53   : > { %s269_s24 = smul.u32 (%p19469_p3), 63, %s13077_s29  ;;  %s13269_s20 = scalar_lea.sflag (%p19469_p3), [#allocation4], %s264_s23 }
  0x54   : > { %s12306_s25 = smul.u32 (%p19469_p3), 504, %s264_s23 }
  0x55   : > { %s270_s30 = ssub.s32 (%p19469_p3), 125, %s269_s24 }
  0x56   : > { %p271_p5 = scmp.lt.s32.totalorder (%p19469_p3), %s270_s30, 63  ;;  %s268_s22 = scalar_lea.vmem (%p19469_p3), [#allocation3], %s12306_s25 }
  0x59   : > { %s20474_s30 = smov (!%p271_p5, %s270_s30), 63 }
  0x5a   : > { %s13266_s19 = sshll.u32 %s20474_s30, 7 }
  0x5b   : > { %s275_s21 = ssub.s32 8064, %s13266_s19 }
  0x5c   : > { %276 = vsyncadd %s13269_s20, %s275_s21  ;;  %p8331_p2 = scmp.ne.s32.totalorder %s13266_s19, 0  ;;  %s8415_s9 = smul.u32 8064, %s13077_s29 }
  0x5d   : > { %s281_s10 = sshll.u32 %s268_s22, 4  ;;  %s12947_s25 = scalar_lea.hbm %s18846_s0, 16000  ;;  %s13279_s10 = int_to_ptr.vmem [resolvable:$true] %s281_s10 }
  0x5e   : > { %s13277_s8 = scalar_lea.hbm %s18846_s0, %s8415_s9 }
  0x5f   : > { %s12943_s11 = scalar_lea.hbm %s13277_s8, %s13266_s19  ;;  %p12948_p13 = scmp.lt.u32.totalorder %s13277_s8, %s18846_s0 }
  0x60   : > { %p12944_p6 = scmp.ne.s32.totalorder %s13277_s8, %s12943_s11  ;;  %p12949_p0 = scmp.lt.u32.totalorder %s12947_s25, %s12943_s11 }
  0x61   : > { %p12951_p8 = scmp.lt.u32.totalorder %s12943_s11, %s13277_s8 }
  0x62   : > { %p12945_p11 = pnand %p12944_p6, %p8331_p2  ;;  %p12950_p7 = por %p12949_p0, %p12948_p13 }
  0x64   : > { %p12946_p12 = pneg %p12945_p11  ;;  %p12952_p9 = por %p12951_p8, %p12950_p7 }
  0x66   : > { %p12953_p10 = pnand %p12952_p9, %p12946_p12 }
  0x68   : > { %12956 = shalt.err (!%p12953_p10)
}
  0x69   : > { %s12957_s22 = scalar_lea.vmem %s13279_s10, %s13266_s19  ;;  %s13083_s9 = smov [#allocation3]  }
  0x6a   : > { %p12958_p1 = scmp.ne.s32.totalorder %s13279_s10, %s12957_s22  ;;  %s12961_s17 = sshll.u32 %s13083_s9, 4  ;;  %s12962_s17 = int_to_ptr.vmem [resolvable:$false] %s12961_s17 }
  0x6b   : > { %s12963_s18 = scalar_lea.vmem %s12962_s17, 16128  ;;  %p12964_p6 = scmp.lt.s32.totalorder %s13279_s10, %s12962_s17 }
  0x6c   : > { %p12959_p3 = pnand %p12958_p1, %p8331_p2  ;;  %p12965_p11 = scmp.lt.s32.totalorder %s12963_s18, %s12957_s22 }
  0x6e   : > { %p12960_p5 = pneg %p12959_p3  ;;  %p12966_p13 = por %p12965_p11, %p12964_p6 }
  0x70   : > { %p12967_p0 = pnand %p12966_p13, %p12960_p5 }
  0x72   : > { %12970 = shalt.err (!%p12967_p0)
}
  0x73   : > { %s13084_s11 = smov 128   ;;  %s13085_s23 = smov 8  }
  0x74   : > { %287 = dma.hbm_to_vmem [thread:$0]  (%p8331_p2), %s13277_s8, %s13266_s19, %s13279_s10, %s13269_s20, %s13084_s11, %s13084_s11, %s13085_s23  }
  0x75 PF: > { %p19470_p12 = scmp.ne.s32.totalorder %s19463_s12, 0 }
  0x76   : > { %s291_s24 = sand.u32 (%p19470_p12), 1, %s13077_s29   ;;  %s293_s25 = sand.u32 (%p19470_p12), 1, %s13073_s28  }
  0x77   : > { %290 = sbr.rel (!%p19470_p12) target bundleno = 154 (0x9a), region = 44  ;;  %s13314_s18 = scalar_lea.sflag (%p19470_p12), [#allocation7], %s291_s24 }
  0x78   : > { %s12307_s30 = smul.u32 (%p19470_p12), 504, %s293_s25 }
  0x79   : > { %s296_s21 = smul.u32 (%p19470_p12), 63, %s13077_s29 }
  0x7a   : > { %s295_s19 = scalar_lea.vmem (%p19470_p12), [#allocation6], %s12307_s30 }
  0x7b   : > { %s297_s22 = ssub.s32 (%p19470_p12), 125, %s296_s21 }
  0x7c   : > { %p298_p7 = scmp.lt.s32.totalorder (%p19470_p12), %s297_s22, 63 }
  0x7e   : > { %s20476_s22 = smov (!%p298_p7, %s297_s22), 63 }
  0x7f   : > { %s13311_s9 = sshll.u32 %s20476_s22, 7 }
  0x80   : > { %s302_s17 = ssub.s32 8064, %s13311_s9 }
  0x81   : > { %303 = vsyncadd %s13314_s18, %s302_s17  ;;  %p8336_p2 = scmp.ne.s32.totalorder %s13311_s9, 0  ;;  %s8416_s12 = smul.u32 8064, %s13077_s29 }
  0x82   : > { %s308_s20 = sshll.u32 %s295_s19, 4  ;;  %s12975_s30 = scalar_lea.hbm %s18847_s1, 16000  ;;  %s13324_s20 = int_to_ptr.vmem [resolvable:$true] %s308_s20 }
  0x83   : > { %s13322_s11 = scalar_lea.hbm %s18847_s1, %s8416_s12 }
  0x84   : > { %s12971_s23 = scalar_lea.hbm %s13322_s11, %s13311_s9  ;;  %p12976_p1 = scmp.lt.u32.totalorder %s13322_s11, %s18847_s1 }
  0x85   : > { %p12972_p8 = scmp.ne.s32.totalorder %s13322_s11, %s12971_s23  ;;  %p12977_p3 = scmp.lt.u32.totalorder %s12975_s30, %s12971_s23 }
  0x86   : > { %p12979_p6 = scmp.lt.u32.totalorder %s12971_s23, %s13322_s11 }
  0x87   : > { %p12973_p9 = pnand %p12972_p8, %p8336_p2  ;;  %p12978_p5 = por %p12977_p3, %p12976_p1 }
  0x89   : > { %p12974_p10 = pneg %p12973_p9  ;;  %p12980_p11 = por %p12979_p6, %p12978_p5 }
  0x8b   : > { %p12981_p13 = pnand %p12980_p11, %p12974_p10 }
  0x8d   : > { %12984 = shalt.err (!%p12981_p13)
}
  0x8e   : > { %s12985_s17 = scalar_lea.vmem %s13324_s20, %s13311_s9  ;;  %s13086_s19 = smov [#allocation6]  }
  0x8f   : > { %p12986_p0 = scmp.ne.s32.totalorder %s13324_s20, %s12985_s17  ;;  %s12989_s12 = sshll.u32 %s13086_s19, 4  ;;  %s12990_s12 = int_to_ptr.vmem [resolvable:$false] %s12989_s12 }
  0x90   : > { %s12991_s10 = scalar_lea.vmem %s12990_s12, 16128  ;;  %p12992_p8 = scmp.lt.s32.totalorder %s13324_s20, %s12990_s12 }
  0x91   : > { %p12987_p12 = pnand %p12986_p0, %p8336_p2  ;;  %p12993_p9 = scmp.lt.s32.totalorder %s12991_s10, %s12985_s17 }
  0x93   : > { %p12988_p7 = pneg %p12987_p12  ;;  %p12994_p1 = por %p12993_p9, %p12992_p8 }
  0x95   : > { %p12995_p3 = pnand %p12994_p1, %p12988_p7 }
  0x97   : > { %12998 = shalt.err (!%p12995_p3)
}
  0x98   : > { %s13087_s8 = smov 128   ;;  %s13088_s23 = smov 8  }
  0x99   : > { %314 = dma.hbm_to_vmem [thread:$0]  (%p8336_p2), %s13322_s11, %s13311_s9, %s13324_s20, %s13314_s18, %s13087_s8, %s13087_s8, %s13088_s23  }
  0x9a PF: > { %p19471_p10 = scmp.ne.s32.totalorder %s19467_s16, 0 }
  0x9c   : > { %320 = sbr.rel (%p19471_p10) target bundleno = 2163 (0x873), region = 48 }
  0xa3   : > { %s13354_s24 = sand.u32 1, %s13069_s27   ;;  %p19472_p5 = scmp.ne.s32.totalorder %s19464_s13, 0 }
  0xa4   : > { %s13357_s25 = smul.u32 504, %s13354_s24  ;;  %s323_s30 = scalar_lea.sflag [#allocation4], %s13354_s24 }
  0xa6   : > { %s13361_s21 = scalar_lea.vmem [#allocation3], %s13357_s25 }
  0xa7   : > { %13044 = dma.done.wait (%p19472_p5), %s323_s30, 8064  }
  0xa8   : > { %13046 = vsyncadd (%p19472_p5), %s323_s30, 4294959232  ;;  %s331_s16 = sand.u32 1, %s13159_s6   ;;  %s13369_s18 = scalar_lea.vmem [#allocation6], %s13357_s25 }
  0xa9   : > { %s332_s9 = scalar_lea.sflag [#allocation7], %s331_s16 }
  0xaa   : > { %13048 = dma.done.wait (%p19472_p5), %s332_s9, 8064  }
  0xab   : > { %13050 = vsyncadd (%p19472_p5), %s332_s9, 4294959232  ;;  %p19473_p2 = scmp.eq.s32.totalorder %s13159_s6, 0 }
  0xad   : > { %13052 = dma.done.wait (%p19473_p2), [#allocation7], 2048   ;;  %p19474_p6 = pmov %p19473_p2 }
  0xae   : > { %p19475_p11 = pmov %p19473_p2 }
  0xaf   : > { %13054 = vsyncadd (%p19474_p6), [#allocation7], 4294965248 }
  0xb0   : > { %13056 = dma.done.wait (%p19475_p11), [#allocation10], 2048   ;;  %p19476_p13 = pmov %p19473_p2 }
  0xb1   : > { %v18892_v0 = vmov 0.0|0.0   ;;  %vm13090_vm0 = vmmov 0   ;;  %v18887_v1 = vmov 0.0   ;;  %v536_v2 = vld [vmem:[#allocation9] sm:$0xff]  ;;  %v537_v3 = vld [vmem:[#allocation9 + $0x8] sm:$0xff]  ;;  %v538_v4 = vld [vmem:[#allocation9 + $0x10] sm:$0xff] }
  0xb2   : > { %13058 = vsyncadd (%p19476_p13), [#allocation10], 4294965248  ;;  %12018 = vmatprep.subr.bf16.mxu0 %v18892_v0  ;;  %12042 = vmatprep.subr.bf16.mxu1 %v18892_v0  ;;  %v553_v5 = vand.u32 4294901760, %v536_v2  ;;  %v556_v6 = vand.u32 4294901760, %v537_v3  ;;  %v539_v7 = vld [vmem:[#allocation9 + $0x18] sm:$0xff]  ;;  %v559_v8 = vand.u32 4294901760, %v538_v4 }
  0xb3   : > { %9398 = vmatprep.mubr.msk.f32.mxu0 %vm13090_vm0, %v18887_v1  ;;  %9619 = vmatprep.mubr.msk.f32.mxu1 %vm13090_vm0, %v18887_v1  ;;  %v540_v9 = vld [vmem:[#allocation9 + $0x20] sm:$0xff]  ;;  %v541_v10 = vld [vmem:[#allocation9 + $0x28] sm:$0xff]  ;;  %v562_v11 = vand.u32 4294901760, %v539_v7  ;;  %v542_v14 = vld [vmem:[#allocation9 + $0x30] sm:$0xff]  ;;  %s7495_s17 = sld [smem:[#allocation2]]  ;;  %s18496_s23 = scalar_lea.vmem [#allocation11], %s13357_s25 }
  0xb4   : > { %v565_v12 = vand.u32 4294901760, %v540_v9  ;;  %v568_v13 = vand.u32 4294901760, %v541_v10  ;;  %v13389_v15 = vpack.c.bf16 %v556_v6, %v553_v5  ;;  %v13391_v16 = vsub.f32 %v536_v2, %v553_v5  ;;  %v543_v19 = vld [vmem:[#allocation9 + $0x38] sm:$0xff]  ;;  %v544_v20 = vld [vmem:[#allocation9 + $0x40] sm:$0xff]  ;;  %v545_v27 = vld [vmem:[#allocation9 + $0x48] sm:$0xff]  ;;  %s8191_s25 = scalar_lea.sflag [#allocation5], %s13354_s24 }
  0xb5   : > { %v13393_v17 = vsub.f32 %v537_v3, %v556_v6  ;;  %v13395_v18 = vsub.f32 %v538_v4, %v559_v8  ;;  %v13397_v21 = vpack.c.bf16 %v562_v11, %v559_v8  ;;  %v13399_v22 = vsub.f32 %v539_v7, %v562_v11  ;;  %v546_v40 = vld [vmem:[#allocation9 + $0x50] sm:$0xff]  ;;  %v547_v41 = vld [vmem:[#allocation9 + $0x58] sm:$0xff]  ;;  %v13434_v49 = vld [vmem:[#allocation9 + $0x60] sm:$0xff]  ;;  %p20466_p0 = scmp.ne.s32.totalorder %s19465_s14, 0 }
  0xb6   : > { %12020 = vmatpush3.bf16.msra.mxu0 %v13389_v15  ;;  %v13402_v23 = vsub.f32 %v540_v9, %v565_v12  ;;  %v18885_v24 = vand.u32 4294901760, %v13391_v16  ;;  %v571_v26 = vand.u32 4294901760, %v542_v14  ;;  %v574_v28 = vand.u32 4294901760, %v543_v19  ;;  %v13444_v58 = vld [vmem:[#allocation9 + $0x68] sm:$0xff]  ;;  %v550_v5 = vld [vmem:[#allocation9 + $0x70] sm:$0xff]  ;;  %s8198_s30 = smul.u32 (%p20466_p0), 63, %s13159_s6 }
  0xb7   : > { %v18884_v25 = vand.u32 4294901760, %v13393_v17  ;;  %12021 = vmatprep.subr.bf16.mxu0 %v18892_v0  ;;  %v18883_v29 = vand.u32 4294901760, %v13395_v18  ;;  %v18881_v30 = vand.u32 4294901760, %v13399_v22  ;;  %v577_v31 = vand.u32 4294901760, %v544_v20 }
  0xb8   : > { %v13409_v32 = vsub.f32 %v541_v10, %v568_v13  ;;  %v1267_v33 = vsub.f32 %v13391_v16, %v18885_v24  ;;  %v13417_v35 = vsub.f32 %v542_v14, %v571_v26  ;;  %v13419_v36 = vsub.f32 %v543_v19, %v574_v28  ;;  %v551_v10 = vld [vmem:[#allocation9 + $0x78] sm:$0xff]  ;;  %s8199_s16 = ssub.s32 (%p20466_p0), 125, %s8198_s30 }
  0xb9   : > { %v1274_v34 = vsub.f32 %v13393_v17, %v18884_v25  ;;  %v1281_v37 = vsub.f32 %v13395_v18, %v18883_v29  ;;  %v1288_v38 = vsub.f32 %v13399_v22, %v18881_v30  ;;  %v580_v39 = vand.u32 4294901760, %v545_v27  ;;  %p8200_p12 = scmp.lt.s32.totalorder (%p20466_p0), %s8199_s16, 63 }
  0xba   : > { %12023 = vmatpush3.bf16.msra.mxu0 %v13397_v21  ;;  %v13428_v42 = vpack.c.bf16 %v568_v13, %v565_v12  ;;  %v1268_v43 = vand.u32 4294901760, %v1267_v33  ;;  %v13431_v47 = vsub.f32 %v544_v20, %v577_v31  ;;  %v18879_v48 = vand.u32 4294901760, %v13402_v23 }
  0xbb   : > { %v1275_v44 = vand.u32 4294901760, %v1274_v34  ;;  %12024 = vmatprep.subr.bf16.mxu0 %v18892_v0  ;;  %v1282_v45 = vand.u32 4294901760, %v1281_v37  ;;  %v1289_v46 = vand.u32 4294901760, %v1288_v38  ;;  %v18878_v51 = vand.u32 4294901760, %v13409_v32 }
  0xbc   : > { %v583_v52 = vand.u32 4294901760, %v546_v40  ;;  %v586_v53 = vand.u32 4294901760, %v547_v41  ;;  %v13437_v54 = vsub.f32 %v545_v27, %v580_v39  ;;  %v1295_v55 = vsub.f32 %v13402_v23, %v18879_v48  ;;  %v470_v48 = vld [vmem:[%s13369_s18 + $0x68] sm:$0xff] }
  0xbd   : > { %v12043_v50 = vpack.c.bf16 %v1275_v44, %v1268_v43  ;;  %v18875_v56 = vand.u32 4294901760, %v13417_v35  ;;  %v18873_v57 = vand.u32 4294901760, %v13419_v36  ;;  %v13447_v59 = vpack.c.bf16 %v574_v28, %v571_v26  ;;  %v457_v28 = vld [vmem:[%s13369_s18] sm:$0xff]  ;;  %v458_v44 = vld [vmem:[%s13369_s18 + $0x8] sm:$0xff] }
  0xbe   : > { %12026 = vmatpush3.bf16.msra.mxu0 %v13428_v42  ;;  %v12046_v60 = vpack.c.bf16 %v1289_v46, %v1282_v45  ;;  %v1302_v61 = vsub.f32 %v13409_v32, %v18878_v51  ;;  %v589_v62 = vand.u32 4294901760, %v13434_v49  ;;  %v1296_v63 = vand.u32 4294901760, %v1295_v55 }
  0xbf   : > { %12044 = vmatpush3.bf16.msra.mxu1 %v12043_v50  ;;  %12027 = vmatprep.subr.bf16.mxu0 %v18892_v0  ;;  %v13455_v2 = vsub.f32 %v546_v40, %v583_v52  ;;  %v1309_v3 = vsub.f32 %v13417_v35, %v18875_v56  ;;  %v1316_v4 = vsub.f32 %v13419_v36, %v18873_v57  ;;  %v592_v8 = vand.u32 4294901760, %v13444_v58 }
  0xc0   : > { %12045 = vmatprep.subr.bf16.mxu1 %v18892_v0  ;;  %v1303_v6 = vand.u32 4294901760, %v1302_v61  ;;  %v13463_v7 = vsub.f32 %v547_v41, %v586_v53  ;;  %v18871_v9 = vand.u32 4294901760, %v13431_v47  ;;  %v13467_v11 = vpack.c.bf16 %v580_v39, %v577_v31 }
  0xc1   : > { %v1310_v12 = vand.u32 4294901760, %v1309_v3  ;;  %v1317_v13 = vand.u32 4294901760, %v1316_v4  ;;  %v18869_v14 = vand.u32 4294901760, %v13437_v54  ;;  %v13472_v20 = vsub.f32 %v13434_v49, %v589_v62 }
  0xc2   : > { %12029 = vmatpush3.bf16.msra.mxu0 %v13447_v59  ;;  %v12049_v19 = vpack.c.bf16 %v1303_v6, %v1296_v63  ;;  %v13475_v26 = vsub.f32 %v13444_v58, %v592_v8  ;;  %v595_v27 = vand.u32 4294901760, %v550_v5  ;;  %v1323_v31 = vsub.f32 %v13431_v47, %v18871_v9  ;;  %v459_v6 = vld [vmem:[%s13369_s18 + $0x10] sm:$0xff] }
  0xc3   : > { %12047 = vmatpush3.bf16.msra.mxu1 %v12046_v60  ;;  %19477 = vst [vmem:[#allocation19_spill] sm:$0xff] %v13472_v20  ;;  %12030 = vmatprep.subr.bf16.mxu0 %v18892_v0  ;;  %v1330_v33 = vsub.f32 %v13437_v54, %v18869_v14  ;;  %v598_v34 = vand.u32 4294901760, %v551_v10  ;;  %v18864_v37 = vand.u32 4294901760, %v13455_v2  ;;  %v18863_v38 = vand.u32 4294901760, %v13463_v7 }
  0xc4   : > { %19478 = vst [vmem:[#allocation20_spill] sm:$0xff] %v13475_v26  ;;  %12048 = vmatprep.subr.bf16.mxu1 %v18892_v0  ;;  %v13488_v39 = vpack.c.bf16 %v586_v53, %v583_v52  ;;  %v12052_v40 = vpack.c.bf16 %v1317_v13, %v1310_v12  ;;  %v13493_v43 = vand.u32 4294901760, %v457_v28  ;;  %v1324_v45 = vand.u32 4294901760, %v1323_v31  ;;  %v460_v31 = vld [vmem:[%s13369_s18 + $0x18] sm:$0xff] }
  0xc5   : > { %v1337_v41 = vsub.f32 %v13455_v2, %v18864_v37  ;;  %v1331_v46 = vand.u32 4294901760, %v1330_v33  ;;  %v1344_v49 = vsub.f32 %v13463_v7, %v18863_v38  ;;  %v18862_v50 = vand.u32 4294901760, %v13472_v20 }
  0xc6   : > { %19479 = vst [vmem:[#allocation21_spill] sm:$0xff] %v13493_v43  ;;  %12032 = vmatpush3.bf16.msra.mxu0 %v13467_v11  ;;  %v13503_v52 = vsub.f32 %v550_v5, %v595_v27  ;;  %v13505_v53 = vsub.f32 %v551_v10, %v598_v34  ;;  %v13508_v55 = vsub.f32 %v457_v28, %v13493_v43  ;;  %v18861_v58 = vand.u32 4294901760, %v13475_v26 }
  0xc7   : > { %12050 = vmatpush3.bf16.msra.mxu1 %v12049_v19  ;;  %12033 = vmatprep.subr.bf16.mxu0 %v18892_v0  ;;  %v1338_v60 = vand.u32 4294901760, %v1337_v41  ;;  %v13511_v61 = vand.u32 4294901760, %v458_v44  ;;  %v1345_v63 = vand.u32 4294901760, %v1344_v49  ;;  %v1351_v4 = vsub.f32 %v13472_v20, %v18862_v50 }
  0xc8   : > { %12051 = vmatprep.subr.bf16.mxu1 %v18892_v0  ;;  %19480 = vst [vmem:[#allocation22_spill] sm:$0xff] %v13503_v52  ;;  %19481 = vst [vmem:[#allocation23_spill] sm:$0xff] %v13505_v53  ;;  %v18877_v3 = vand.u32 4294901760, %v13508_v55  ;;  %v1358_v5 = vsub.f32 %v13475_v26, %v18861_v58  ;;  %v13522_v10 = vpack.c.bf16 %v592_v8, %v589_v62  ;;  %v18860_v19 = vand.u32 4294901760, %v13503_v52 }
  0xc9   : > { %19482 = vst [vmem:[#allocation24_spill] sm:$0xff] %v13511_v61  ;;  %v12055_v12 = vpack.c.bf16 %v1331_v46, %v1324_v45  ;;  %v13525_v13 = vsub.f32 %v458_v44, %v13511_v61  ;;  %v18859_v28 = vand.u32 4294901760, %v13505_v53  ;;  %v13532_v33 = vpack.c.bf16 %v598_v34, %v595_v27 }
  0xca   : > { %12035 = vmatpush3.bf16.msra.mxu0 %v13488_v39  ;;  %v636_v62 = vsub.f32 %v13508_v55, %v18877_v3  ;;  %v13537_v8 = vand.u32 4294901760, %v459_v6  ;;  %v1352_v41 = vand.u32 4294901760, %v1351_v4  ;;  %v1359_v44 = vand.u32 4294901760, %v1358_v5 }
  0xcb   : > { %12053 = vmatpush3.bf16.msra.mxu1 %v12052_v40  ;;  %12036 = vmatprep.subr.bf16.mxu0 %v18892_v0  ;;  %v12058_v40 = vpack.c.bf16 %v1345_v63, %v1338_v60  ;;  %v18872_v45 = vand.u32 4294901760, %v13525_v13  ;;  %v1365_v27 = vsub.f32 %v13503_v52, %v18860_v19  ;;  %v1372_v34 = vsub.f32 %v13505_v53, %v18859_v28  ;;  %v461_v60 = vld [vmem:[%s13369_s18 + $0x20] sm:$0xff] }
  0xcc   : > { %12054 = vmatprep.subr.bf16.mxu1 %v18892_v0  ;;  %19483 = vst [vmem:[#allocation25_spill] sm:$0xff] %v13537_v8  ;;  %v13548_v46 = vsub.f32 %v459_v6, %v13537_v8  ;;  %v13550_v49 = vand.u32 4294901760, %v460_v31  ;;  %v637_v63 = vand.u32 4294901760, %v636_v62  ;;  %v13562_v28 = vand.u32 4294901760, %v461_v60  ;;  %v462_v6 = vld [vmem:[%s13369_s18 + $0x28] sm:$0xff] }
  0xcd   : > { %v646_v4 = vsub.f32 %v13525_v13, %v18872_v45  ;;  %v12061_v19 = vpack.c.bf16 %v1359_v44, %v1352_v41  ;;  %v1366_v58 = vand.u32 4294901760, %v1365_v27  ;;  %v1373_v50 = vand.u32 4294901760, %v1372_v34  ;;  %v463_v27 = vld [vmem:[%s13369_s18 + $0x30] sm:$0xff] }
  0xce   : > { %12038 = vmatpush3.bf16.msra.mxu0 %v13522_v10  ;;  %19484 = vst [vmem:[#allocation26_spill] sm:$0xff] %v13550_v49  ;;  %v18868_v5 = vand.u32 4294901760, %v13548_v46  ;;  %19485 = vst [vmem:[#allocation27_spill] sm:$0xff] %v13562_v28  ;;  %v12067_v62 = vpack.c.bf16 %v13393_v17, %v13391_v16  ;;  %v13570_v38 = vand.u32 4294901760, %v462_v6  ;;  %v13577_v41 = vsub.f32 %v461_v60, %v13562_v28 }
  0xcf   : > { %12056 = vmatpush3.bf16.msra.mxu1 %v12055_v12  ;;  %12039 = vmatprep.subr.bf16.mxu0 %v18892_v0  ;;  %v13560_v12 = vsub.f32 %v460_v31, %v13550_v49  ;;  %v647_v31 = vand.u32 4294901760, %v646_v4  ;;  %v12064_v44 = vpack.c.bf16 %v1373_v50, %v1366_v58  ;;  %v13591_v4 = vand.u32 4294901760, %v463_v27  ;;  %v464_v50 = vld [vmem:[%s13369_s18 + $0x38] sm:$0xff] }
  0xd0   : > { %12057 = vmatprep.subr.bf16.mxu1 %v18892_v0  ;;  %19486 = vst [vmem:[#allocation28_spill] sm:$0xff] %v13570_v38  ;;  %v656_v37 = vsub.f32 %v13548_v46, %v18868_v5  ;;  %v13584_v34 = vsub.f32 %v462_v6, %v13570_v38  ;;  %v12070_v58 = vpack.c.bf16 %v13399_v22, %v13395_v18 }
  0xd1   : > { %19487 = vst [vmem:[#allocation29_spill] sm:$0xff] %v13591_v4 }
  0xd2   : > { %12041 = vmatpush3.bf16.msra.mxu0 %v13532_v33 }
  0xd3   : > { %12059 = vmatpush3.bf16.msra.mxu1 %v12058_v40  ;;  %12066 = vmatprep.subr.bf16.mxu0 %v18892_v0  ;;  %v18865_v40 = vand.u32 4294901760, %v13560_v12 }
  0xd4   : > { %12060 = vmatprep.subr.bf16.mxu1 %v18892_v0 }
  0xd5   : > { %9399 = vmatmul.mubr.f32.vlgmr.msra.gmra.mrb[0].mxu0 %v637_v63  ;;  %v657_v63 = vand.u32 4294901760, %v656_v37  ;;  %v666_v60 = vsub.f32 %v13560_v12, %v18865_v40  ;;  %v18867_v37 = vand.u32 4294901760, %v13584_v34  ;;  %v465_v40 = vld [vmem:[%s13369_s18 + $0x40] sm:$0xff] }
  0xd6   : > { %9401 = vmatprep.mubr.msk.f32.mxu0 %vm13090_vm0, %v18887_v1  ;;  %12068 = vmatpush3.bf16.msra.mxu0 %v12067_v62 }
  0xd7   : > { %12062 = vmatpush3.bf16.msra.mxu1 %v12061_v19  ;;  %12069 = vmatprep.subr.bf16.mxu0 %v18892_v0  ;;  %v18866_v19 = vand.u32 4294901760, %v13577_v41  ;;  %v667_v6 = vand.u32 4294901760, %v666_v60  ;;  %v686_v60 = vsub.f32 %v13584_v34, %v18867_v37 }
  0xd8   : > { %12063 = vmatprep.subr.bf16.mxu1 %v18892_v0 }
  0xd9   : > { %9402 = vmatmul.mubr.f32.gmra.mrb[2].mxu0 %v647_v31  ;;  %v676_v62 = vsub.f32 %v13577_v41, %v18866_v19  ;;  %v13605_v31 = vsub.f32 %v463_v27, %v13591_v4  ;;  %v687_v37 = vand.u32 4294901760, %v686_v60  ;;  %v12073_v60 = vpack.c.bf16 %v13409_v32, %v13402_v23 }
  0xda   : > { %9404 = vmatprep.mubr.msk.f32.mxu0 %vm13090_vm0, %v18887_v1  ;;  %12071 = vmatpush3.bf16.msra.mxu0 %v12070_v58 }
  0xdb   : > { %12065 = vmatpush3.bf16.msra.mxu1 %v12064_v44  ;;  %v13607_v44 = vand.u32 4294901760, %v464_v50  ;;  %12072 = vmatprep.subr.bf16.mxu0 %v18892_v0  ;;  %v677_v27 = vand.u32 4294901760, %v676_v62  ;;  %v18870_v58 = vand.u32 4294901760, %v13605_v31 }
  0xdc   : > { %12090 = vmatprep.subr.bf16.mxu1 %v18892_v0 }
  0xdd   : > { %9405 = vmatmul.mubr.f32.gmra.mrb[4].mxu0 %v657_v63  ;;  %19488 = vst [vmem:[#allocation30_spill] sm:$0xff] %v13607_v44  ;;  %v13616_v63 = vand.u32 4294901760, %v465_v40  ;;  %v13625_v19 = vsub.f32 %v464_v50, %v13607_v44  ;;  %v696_v50 = vsub.f32 %v13605_v31, %v18870_v58 }
  0xde   : > { %9620 = vmatmul.mubr.f32.vlgmr.msra.gmra.mrb[0].mxu1 %v13493_v43  ;;  %9407 = vmatprep.mubr.msk.f32.mxu0 %vm13090_vm0, %v18887_v1 }
  0xdf   : > { %12092 = vmatpush3.bf16.msra.mxu1 %v13389_v15  ;;  %9622 = vmatprep.mubr.msk.f32.mxu1 %vm13090_vm0, %v18887_v1  ;;  %19489 = vst [vmem:[#allocation31_spill] sm:$0xff] %v13616_v63  ;;  %v13634_v62 = vsub.f32 %v465_v40, %v13616_v63  ;;  %v18874_v5 = vand.u32 4294901760, %v13625_v19  ;;  %v467_v40 = vld [vmem:[%s13369_s18 + $0x50] sm:$0xff]  ;;  %v697_v58 = vand.u32 4294901760, %v696_v50 }
  0xe0   : > { %12093 = vmatprep.subr.bf16.mxu1 %v18892_v0  ;;  %v13661_v57 = vand.u32 4294901760, %v467_v40  ;;  %12074 = vmatpush3.bf16.msra.mxu0 %v12073_v60 }
  0xe1   : > { %9408 = vmatmul.mubr.f32.gmra.mrb[6].mxu0 %v667_v6  ;;  %v466_v6 = vld [vmem:[%s13369_s18 + $0x48] sm:$0xff]  ;;  %v706_v9 = vsub.f32 %v13625_v19, %v18874_v5  ;;  %12075 = vmatprep.subr.bf16.mxu0 %v18892_v0 }
  0xe2   : > { %9623 = vmatmul.mubr.f32.gmra.mrb[2].mxu1 %v13511_v61  ;;  %9410 = vmatprep.mubr.msk.f32.mxu0 %vm13090_vm0, %v18887_v1  ;;  %v13642_v14 = vand.u32 4294901760, %v466_v6  ;;  %19491 = vst [vmem:[#allocation33_spill] sm:$0xff] %v13661_v57  ;;  %v13677_v56 = vsub.f32 %v467_v40, %v13661_v57  ;;  %v478_v61 = vld [vmem:[%s13369_s18 + $0xa8] sm:$0xff] }
  0xe3   : > { %9625 = vmatprep.mubr.msk.f32.mxu1 %vm13090_vm0, %v18887_v1  ;;  %12095 = vmatpush3.bf16.msra.mxu1 %v13397_v21  ;;  %v13845_v43 = vand.u32 4294901760, %v478_v61 }
  0xe4   : > { %12096 = vmatprep.subr.bf16.mxu1 %v18892_v0  ;;  %19490 = vst [vmem:[#allocation32_spill] sm:$0xff] %v13642_v14  ;;  %v13659_v45 = vsub.f32 %v466_v6, %v13642_v14  ;;  %v707_v6 = vand.u32 4294901760, %v706_v9  ;;  %v18882_v40 = vand.u32 4294901760, %v13677_v56 }
  0xe5   : > { %9411 = vmatmul.mubr.f32.gmra.mrb[8].mxu0 %v677_v27  ;;  %v18876_v27 = vand.u32 4294901760, %v13634_v62  ;;  %19509 = vst [vmem:[#allocation49_spill] sm:$0xff] %v13845_v43 }
  0xe6   : > { %9626 = vmatmul.mubr.f32.gmra.mrb[4].mxu1 %v13537_v8  ;;  %9413 = vmatprep.mubr.msk.f32.mxu0 %vm13090_vm0, %v18887_v1  ;;  %v18880_v5 = vand.u32 4294901760, %v13659_v45 }
  0xe7   : > { %9628 = vmatprep.mubr.msk.f32.mxu1 %vm13090_vm0, %v18887_v1  ;;  %12098 = vmatpush3.bf16.msra.mxu1 %v13428_v42  ;;  %v716_v50 = vsub.f32 %v13634_v62, %v18876_v27  ;;  %v469_v27 = vld [vmem:[%s13369_s18 + $0x60] sm:$0xff] }
  0xe8   : > { %12099 = vmatprep.subr.bf16.mxu1 %v18892_v0  ;;  %v726_v9 = vsub.f32 %v13659_v45, %v18880_v5  ;;  %v13696_v51 = vand.u32 4294901760, %v469_v27 }
  0xe9   : > { %9414 = vmatmul.mubr.f32.gmra.mrb[10].mxu0 %v687_v37  ;;  %v468_v37 = vld [vmem:[%s13369_s18 + $0x58] sm:$0xff] }
  0xea   : > { %9629 = vmatmul.mubr.f32.gmra.mrb[6].mxu1 %v13550_v49  ;;  %9416 = vmatprep.mubr.msk.f32.mxu0 %vm13090_vm0, %v18887_v1  ;;  %v13679_v60 = vand.u32 4294901760, %v468_v37  ;;  %19493 = vst [vmem:[#allocation35_spill] sm:$0xff] %v13696_v51  ;;  %v13713_v30 = vsub.f32 %v469_v27, %v13696_v51 }
  0xeb   : > { %9631 = vmatprep.mubr.msk.f32.mxu1 %vm13090_vm0, %v18887_v1  ;;  %12101 = vmatpush3.bf16.msra.mxu1 %v13447_v59 }
  0xec   : > { %12102 = vmatprep.subr.bf16.mxu1 %v18892_v0  ;;  %19492 = vst [vmem:[#allocation34_spill] sm:$0xff] %v13679_v60  ;;  %v13694_v3 = vsub.f32 %v468_v37, %v13679_v60  ;;  %v727_v37 = vand.u32 4294901760, %v726_v9  ;;  %v12076_v9 = vpack.c.bf16 %v13419_v36, %v13417_v35  ;;  %v18891_v25 = vand.u32 4294901760, %v13713_v30 }
  0xed   : > { %9417 = vmatmul.mubr.f32.gmra.mrb[12].mxu0 %v697_v58  ;;  %v717_v58 = vand.u32 4294901760, %v716_v50  ;;  %v13704_v50 = vand.u32 4294901760, %v470_v48 }
  0xee   : > { %9632 = vmatmul.mubr.f32.gmra.mrb[8].mxu1 %v13562_v28  ;;  %9419 = vmatprep.mubr.msk.f32.mxu0 %vm13090_vm0, %v18887_v1  ;;  %v18886_v5 = vand.u32 4294901760, %v13694_v3 }
  0xef   : > { %9634 = vmatprep.mubr.msk.f32.mxu1 %vm13090_vm0, %v18887_v1  ;;  %12104 = vmatpush3.bf16.msra.mxu1 %v13467_v11  ;;  %19494 = vst [vmem:[#allocation36_spill] sm:$0xff] %v13704_v50 }
  0xf0   : > { %12105 = vmatprep.subr.bf16.mxu1 %v18892_v0  ;;  %12077 = vmatpush3.bf16.msra.mxu0 %v12076_v9  ;;  %v746_v29 = vsub.f32 %v13694_v3, %v18886_v5  ;;  %v756_v9 = vsub.f32 %v13713_v30, %v18891_v25 }
  0xf1   : > { %9420 = vmatmul.mubr.f32.gmra.mrb[14].mxu0 %v707_v6  ;;  %v736_v6 = vsub.f32 %v13677_v56, %v18882_v40  ;;  %v13724_v40 = vsub.f32 %v470_v48, %v13704_v50  ;;  %v472_v48 = vld [vmem:[%s13369_s18 + $0x78] sm:$0xff]  ;;  %12078 = vmatprep.subr.bf16.mxu0 %v18892_v0 }
  0xf2   : > { %9635 = vmatmul.mubr.f32.gmra.mrb[10].mxu1 %v13570_v38  ;;  %9422 = vmatprep.mubr.msk.f32.mxu0 %vm13090_vm0, %v18887_v1  ;;  %v757_v25 = vand.u32 4294901760, %v756_v9  ;;  %v12079_v38 = vpack.c.bf16 %v13437_v54, %v13431_v47 }
  0xf3   : > { %9637 = vmatprep.mubr.msk.f32.mxu1 %vm13090_vm0, %v18887_v1  ;;  %12107 = vmatpush3.bf16.msra.mxu1 %v13488_v39  ;;  %v737_v27 = vand.u32 4294901760, %v736_v6  ;;  %v747_v6 = vand.u32 4294901760, %v746_v29 }
  0xf4   : > { %12108 = vmatprep.subr.bf16.mxu1 %v18892_v0  ;;  %12080 = vmatpush3.bf16.msra.mxu0 %v12079_v38  ;;  %v476_v38 = vld [vmem:[%s13369_s18 + $0x98] sm:$0xff] }
  0xf5   : > { %9423 = vmatmul.mubr.f32.gmra.mrb[16].mxu0 %v717_v58  ;;  %v471_v58 = vld [vmem:[%s13369_s18 + $0x70] sm:$0xff] }
  0xf6   : > { %9638 = vmatmul.mubr.f32.gmra.mrb[12].mxu1 %v13591_v4  ;;  %9425 = vmatprep.mubr.msk.f32.mxu0 %vm13090_vm0, %v18887_v1  ;;  %v13732_v24 = vand.u32 4294901760, %v471_v58  ;;  %v474_v4 = vld [vmem:[%s13369_s18 + $0x88] sm:$0xff] }
  0xf7   : > { %9640 = vmatprep.mubr.msk.f32.mxu1 %vm13090_vm0, %v18887_v1  ;;  %12110 = vmatpush3.bf16.msra.mxu1 %v13522_v10 }
  0xf8   : > { %12111 = vmatprep.subr.bf16.mxu1 %v18892_v0  ;;  %19495 = vst [vmem:[#allocation37_spill] sm:$0xff] %v13732_v24  ;;  %v13748_v5 = vsub.f32 %v471_v58, %v13732_v24 }
  0xf9   : > { %9426 = vmatmul.mubr.f32.gmra.mrb[18].mxu0 %v727_v37  ;;  %v18898_v37 = vand.u32 4294901760, %v13724_v40 }
  0xfa   : > { %9641 = vmatmul.mubr.f32.gmra.mrb[14].mxu1 %v13607_v44  ;;  %9428 = vmatprep.mubr.msk.f32.mxu0 %vm13090_vm0, %v18887_v1  ;;  %v19497_v44 = vmov 0.0   ;;  %v18903_v58 = vand.u32 4294901760, %v13748_v5 }
  0xfb   : > { %9643 = vmatprep.mubr.msk.f32.mxu1 %vm13090_vm0, %v18887_v1  ;;  %12113 = vmatpush3.bf16.msra.mxu1 %v13532_v33  ;;  %v13750_v1 = vand.u32 4294901760, %v472_v48  ;;  %v766_v29 = vsub.f32 %v13724_v40, %v18898_v37 }
  0xfc   : > { %12138 = vmatprep.subr.bf16.mxu1 %v18892_v0 }
  0xfd   : > { %9429 = vmatmul.mubr.f32.gmra.mrb[20].mxu0 %v737_v27  ;;  %19496 = vst [vmem:[#allocation38_spill] sm:$0xff] %v13750_v1  ;;  %v473_v27 = vld [vmem:[%s13369_s18 + $0x80] sm:$0xff]  ;;  %v13763_v0 = vsub.f32 %v472_v48, %v13750_v1  ;;  %v767_v37 = vand.u32 4294901760, %v766_v29  ;;  %v776_v48 = vsub.f32 %v13748_v5, %v18903_v58  ;;  %v19502_v58 = vmov 0.0|0.0  }
  0xfe   : > { %9644 = vmatmul.mubr.f32.gmra.mrb[16].mxu1 %v13616_v63  ;;  %9431 = vmatprep.mubr.msk.f32.mxu0 %vm13090_vm0, %v19497_v44  ;;  %v13765_v63 = vand.u32 4294901760, %v473_v27 }
  0xff   : > { %9646 = vmatprep.mubr.msk.f32.mxu1 %vm13090_vm0, %v19497_v44  ;;  %v18910_v9 = vand.u32 4294901760, %v13763_v0  ;;  %12081 = vmatprep.subr.bf16.mxu0 %v19502_v58 }
 0x100   : > { %19498 = vst [vmem:[#allocation39_spill] sm:$0xff] %v13765_v63 }
 0x101   : > { %9432 = vmatmul.mubr.f32.gmra.mrb[22].mxu0 %v747_v6  ;;  %v13772_v6 = vand.u32 4294901760, %v474_v4 }
 0x102   : > { %9647 = vmatmul.mubr.f32.gmra.mrb[18].mxu1 %v13642_v14  ;;  %9434 = vmatprep.mubr.msk.f32.mxu0 %vm13090_vm0, %v19497_v44  ;;  %v13780_v14 = vsub.f32 %v473_v27, %v13765_v63  ;;  %v777_v27 = vand.u32 4294901760, %v776_v48 }
 0x103   : > { %9649 = vmatprep.mubr.msk.f32.mxu1 %vm13090_vm0, %v19497_v44  ;;  %19499 = vst [vmem:[#allocation40_spill] sm:$0xff] %v13772_v6  ;;  %v13790_v29 = vsub.f32 %v474_v4, %v13772_v6 }
 0x104   : > { %19500 = vst [vmem:[#allocation41_spill] sm:$0xff] %v13780_v14  ;;  %v18913_v28 = vand.u32 4294901760, %v13780_v14 }
 0x105   : > { %9435 = vmatmul.mubr.f32.gmra.mrb[24].mxu0 %v757_v25  ;;  %v475_v25 = vld [vmem:[%s13369_s18 + $0x90] sm:$0xff]  ;;  %19501 = vst [vmem:[#allocation42_spill] sm:$0xff] %v13790_v29  ;;  %v18920_v4 = vand.u32 4294901760, %v13790_v29 }
 0x106   : > { %9650 = vmatmul.mubr.f32.gmra.mrb[20].mxu1 %v13661_v57  ;;  %9437 = vmatprep.mubr.msk.f32.mxu0 %vm13090_vm0, %v19497_v44  ;;  %v786_v57 = vsub.f32 %v13763_v0, %v18910_v9  ;;  %v13798_v49 = vand.u32 4294901760, %v475_v25  ;;  %v796_v48 = vsub.f32 %v13780_v14, %v18913_v28 }
 0x107   : > { %9652 = vmatprep.mubr.msk.f32.mxu1 %vm13090_vm0, %v19497_v44 }
 0x108   : > { %19503 = vst [vmem:[#allocation43_spill] sm:$0xff] %v13798_v49  ;;  %v13811_v9 = vsub.f32 %v475_v25, %v13798_v49  ;;  %v797_v28 = vand.u32 4294901760, %v796_v48 }
 0x109   : > { %9438 = vmatmul.mubr.f32.gmra.mrb[26].mxu0 %v767_v37  ;;  %v787_v37 = vand.u32 4294901760, %v786_v57  ;;  %v806_v57 = vsub.f32 %v13790_v29, %v18920_v4  ;;  %v479_v29 = vld [vmem:[%s13369_s18 + $0xb0] sm:$0xff] }
 0x10a   : > { %9653 = vmatmul.mubr.f32.gmra.mrb[22].mxu1 %v13679_v60  ;;  %9440 = vmatprep.mubr.msk.f32.mxu0 %vm13090_vm0, %v19497_v44  ;;  %19504 = vst [vmem:[#allocation44_spill] sm:$0xff] %v13811_v9  ;;  %v13813_v60 = vand.u32 4294901760, %v476_v38  ;;  %v18927_v25 = vand.u32 4294901760, %v13811_v9 }
 0x10b   : > { %9655 = vmatprep.mubr.msk.f32.mxu1 %vm13090_vm0, %v19497_v44  ;;  %v807_v4 = vand.u32 4294901760, %v806_v57 }
 0x10c   : > { %19505 = vst [vmem:[#allocation45_spill] sm:$0xff] %v13813_v60 }
 0x10d   : > { %9441 = vmatmul.mubr.f32.gmra.mrb[28].mxu0 %v777_v27  ;;  %v477_v27 = vld [vmem:[%s13369_s18 + $0xa0] sm:$0xff] }
 0x10e   : > { %9656 = vmatmul.mubr.f32.gmra.mrb[24].mxu1 %v13696_v51  ;;  %9443 = vmatprep.mubr.msk.f32.mxu0 %vm13090_vm0, %v19497_v44  ;;  %v13826_v51 = vsub.f32 %v476_v38, %v13813_v60  ;;  %v13828_v8 = vand.u32 4294901760, %v477_v27  ;;  %v816_v38 = vsub.f32 %v13811_v9, %v18927_v25  ;;  %v480_v9 = vld [vmem:[%s13369_s18 + $0xb8] sm:$0xff] }
 0x10f   : > { %9658 = vmatprep.mubr.msk.f32.mxu1 %vm13090_vm0, %v19497_v44 }
 0x110   : > { %19506 = vst [vmem:[#allocation46_spill] sm:$0xff] %v13826_v51  ;;  %19507 = vst [vmem:[#allocation47_spill] sm:$0xff] %v13828_v8  ;;  %v18932_v48 = vand.u32 4294901760, %v13826_v51  ;;  %v817_v57 = vand.u32 4294901760, %v816_v38 }
 0x111   : > { %9444 = vmatmul.mubr.f32.gmra.mrb[30].mxu0 %v787_v37  ;;  %v12082_v37 = vpack.c.bf16 %v13463_v7, %v13455_v2 }
 0x112   : > { %9659 = vmatmul.mubr.f32.gmra.mrb[26].mxu1 %v13704_v50  ;;  %9446 = vmatprep.mubr.msk.f32.mxu0 %vm13090_vm0, %v19497_v44  ;;  %v13843_v50 = vsub.f32 %v477_v27, %v13828_v8  ;;  %v826_v27 = vsub.f32 %v13826_v51, %v18932_v48  ;;  %v12088_v51 = vpack.c.bf16 %v13505_v53, %v13503_v52  ;;  %v516_v53 = vld [vmem:[%s13369_s18 + $0x1d8] sm:$0xff] }
 0x113   : > { %9661 = vmatprep.mubr.msk.f32.mxu1 %vm13090_vm0, %v19497_v44  ;;  %12083 = vmatpush3.bf16.msra.mxu0 %v12082_v37  ;;  %v13871_v37 = vand.u32 4294901760, %v480_v9 }
 0x114   : > { %19508 = vst [vmem:[#allocation48_spill] sm:$0xff] %v13843_v50  ;;  %12084 = vmatprep.subr.bf16.mxu0 %v19502_v58  ;;  %v18935_v25 = vand.u32 4294901760, %v13843_v50  ;;  %v827_v38 = vand.u32 4294901760, %v826_v27 }
 0x115   : > { %9447 = vmatmul.mubr.f32.gmra.mrb[32].mxu0 %v797_v28  ;;  %v13852_v28 = vand.u32 4294901760, %v479_v29  ;;  %19513 = vst [vmem:[#allocation53_spill] sm:$0xff] %v13871_v37 }
 0x116   : > { %9662 = vmatmul.mubr.f32.gmra.mrb[28].mxu1 %v13732_v24  ;;  %9449 = vmatprep.mubr.msk.f32.mxu0 %vm13090_vm0, %v19497_v44  ;;  %v13861_v24 = vsub.f32 %v478_v61, %v13845_v43  ;;  %v836_v61 = vsub.f32 %v13843_v50, %v18935_v25  ;;  %v12085_v50 = vpack.c.bf16 %v13475_v26, %v13472_v20 }
 0x117   : > { %9664 = vmatprep.mubr.msk.f32.mxu1 %vm13090_vm0, %v19497_v44  ;;  %19510 = vst [vmem:[#allocation50_spill] sm:$0xff] %v13852_v28 }
 0x118   : > { %19511 = vst [vmem:[#allocation51_spill] sm:$0xff] %v13861_v24  ;;  %v18940_v48 = vand.u32 4294901760, %v13861_v24  ;;  %v837_v27 = vand.u32 4294901760, %v836_v61  ;;  %12086 = vmatpush3.bf16.msra.mxu0 %v12085_v50  ;;  %v483_v50 = vld [vmem:[%s13369_s18 + $0xd0] sm:$0xff] }
 0x119   : > { %9450 = vmatmul.mubr.f32.gmra.mrb[34].mxu0 %v807_v4  ;;  %v13869_v4 = vsub.f32 %v479_v29, %v13852_v28  ;;  %v481_v29 = vld [vmem:[%s13369_s18 + $0xc0] sm:$0xff]  ;;  %12087 = vmatprep.subr.bf16.mxu0 %v19502_v58 }
 0x11a   : > { %9665 = vmatmul.mubr.f32.gmra.mrb[30].mxu1 %v13750_v1  ;;  %9452 = vmatprep.mubr.msk.f32.mxu0 %vm13090_vm0, %v19497_v44  ;;  %v846_v25 = vsub.f32 %v13861_v24, %v18940_v48 }
 0x11b   : > { %9667 = vmatprep.mubr.msk.f32.mxu1 %vm13090_vm0, %v19497_v44  ;;  %19512 = vst [vmem:[#allocation52_spill] sm:$0xff] %v13869_v4  ;;  %v18945_v1 = vand.u32 4294901760, %v13869_v4 }
 0x11c   : > { %v847_v61 = vand.u32 4294901760, %v846_v25  ;;  %12089 = vmatpush3.bf16.msra.mxu0 %v12088_v51  ;;  %v489_v51 = vld [vmem:[%s13369_s18 + $0x100] sm:$0xff] }
 0x11d   : > { %9453 = vmatmul.mubr.f32.gmra.mrb[36].mxu0 %v817_v57  ;;  %v13885_v57 = vsub.f32 %v480_v9, %v13871_v37  ;;  %v482_v9 = vld [vmem:[%s13369_s18 + $0xc8] sm:$0xff]  ;;  %12114 = vmatprep.subr.bf16.mxu0 %v19502_v58 }
 0x11e   : > { %9668 = vmatmul.mubr.f32.gmra.mrb[32].mxu1 %v13765_v63  ;;  %9455 = vmatprep.mubr.msk.f32.mxu0 %vm13090_vm0, %v19497_v44  ;;  %v13891_v63 = vand.u32 4294901760, %v481_v29  ;;  %v13909_v24 = vand.u32 4294901760, %v482_v9 }
 0x11f   : > { %9670 = vmatprep.mubr.msk.f32.mxu1 %vm13090_vm0, %v19497_v44  ;;  %19514 = vst [vmem:[#allocation54_spill] sm:$0xff] %v13885_v57  ;;  %v18950_v48 = vand.u32 4294901760, %v13885_v57 }
 0x120   : > { %19515 = vst [vmem:[#allocation55_spill] sm:$0xff] %v13891_v63  ;;  %19517 = vst [vmem:[#allocation57_spill] sm:$0xff] %v13909_v24 }
 0x121   : > { %9456 = vmatmul.mubr.f32.gmra.mrb[38].mxu0 %v827_v38  ;;  %v856_v38 = vsub.f32 %v13869_v4, %v18945_v1  ;;  %v866_v25 = vsub.f32 %v13885_v57, %v18950_v48  ;;  %v484_v4 = vld [vmem:[%s13369_s18 + $0xd8] sm:$0xff]  ;;  %v487_v57 = vld [vmem:[%s13369_s18 + $0xf0] sm:$0xff] }
 0x122   : > { %9671 = vmatmul.mubr.f32.gmra.mrb[34].mxu1 %v13772_v6  ;;  %9458 = vmatprep.mubr.msk.f32.mxu0 %vm13090_vm0, %v19497_v44  ;;  %v13907_v6 = vsub.f32 %v481_v29, %v13891_v63 }
 0x123   : > { %9673 = vmatprep.mubr.msk.f32.mxu1 %vm13090_vm0, %v19497_v44  ;;  %v857_v1 = vand.u32 4294901760, %v856_v38  ;;  %v13931_v38 = vand.u32 4294901760, %v484_v4 }
 0x124   : > { %19516 = vst [vmem:[#allocation56_spill] sm:$0xff] %v13907_v6  ;;  %v18955_v29 = vand.u32 4294901760, %v13907_v6 }
 0x125   : > { %9459 = vmatmul.mubr.f32.gmra.mrb[40].mxu0 %v837_v27  ;;  %v13922_v27 = vsub.f32 %v482_v9, %v13909_v24  ;;  %19520 = vst [vmem:[#allocation60_spill] sm:$0xff] %v13931_v38 }
 0x126   : > { %9674 = vmatmul.mubr.f32.gmra.mrb[36].mxu1 %v13798_v49  ;;  %9461 = vmatprep.mubr.msk.f32.mxu0 %vm13090_vm0, %v19497_v44  ;;  %v13924_v49 = vand.u32 4294901760, %v483_v50  ;;  %v876_v9 = vsub.f32 %v13907_v6, %v18955_v29 }
 0x127   : > { %9676 = vmatprep.mubr.msk.f32.mxu1 %vm13090_vm0, %v19497_v44  ;;  %19518 = vst [vmem:[#allocation58_spill] sm:$0xff] %v13922_v27  ;;  %v18958_v48 = vand.u32 4294901760, %v13922_v27 }
 0x128   : > { %19519 = vst [vmem:[#allocation59_spill] sm:$0xff] %v13924_v49 }
 0x129   : > { %9462 = vmatmul.mubr.f32.gmra.mrb[42].mxu0 %v847_v61  ;;  %v867_v61 = vand.u32 4294901760, %v866_v25  ;;  %v877_v25 = vand.u32 4294901760, %v876_v9 }
 0x12a   : > { %9677 = vmatmul.mubr.f32.gmra.mrb[38].mxu1 %v13813_v60  ;;  %9464 = vmatprep.mubr.msk.f32.mxu0 %vm13090_vm0, %v19497_v44  ;;  %v13939_v60 = vsub.f32 %v483_v50, %v13924_v49  ;;  %v886_v50 = vsub.f32 %v13922_v27, %v18958_v48 }
 0x12b   : > { %9679 = vmatprep.mubr.msk.f32.mxu1 %vm13090_vm0, %v19497_v44 }
 0x12c   : > { %19521 = vst [vmem:[#allocation61_spill] sm:$0xff] %v13939_v60  ;;  %v18965_v29 = vand.u32 4294901760, %v13939_v60  ;;  %v887_v9 = vand.u32 4294901760, %v886_v50  ;;  %v13979_v50 = vand.u32 4294901760, %v487_v57 }
 0x12d   : > { %9465 = vmatmul.mubr.f32.gmra.mrb[44].mxu0 %v857_v1  ;;  %v485_v1 = vld [vmem:[%s13369_s18 + $0xe0] sm:$0xff] }
 0x12e   : > { %9680 = vmatmul.mubr.f32.gmra.mrb[40].mxu1 %v13828_v8  ;;  %9467 = vmatprep.mubr.msk.f32.mxu0 %vm13090_vm0, %v19497_v44  ;;  %v13947_v8 = vsub.f32 %v484_v4, %v13931_v38  ;;  %v13954_v6 = vand.u32 4294901760, %v485_v1  ;;  %v486_v4 = vld [vmem:[%s13369_s18 + $0xe8] sm:$0xff]  ;;  %v896_v48 = vsub.f32 %v13939_v60, %v18965_v29  ;;  %19526 = vst [vmem:[#allocation66_spill] sm:$0xff] %v13979_v50  ;;  %v488_v60 = vld [vmem:[%s13369_s18 + $0xf8] sm:$0xff] }
 0x12f   : > { %9682 = vmatprep.mubr.msk.f32.mxu1 %vm13090_vm0, %v19497_v44  ;;  %v13969_v27 = vand.u32 4294901760, %v486_v4 }
 0x130   : > { %19522 = vst [vmem:[#allocation62_spill] sm:$0xff] %v13947_v8  ;;  %19523 = vst [vmem:[#allocation63_spill] sm:$0xff] %v13954_v6 }
 0x131   : > { %9468 = vmatmul.mubr.f32.gmra.mrb[46].mxu0 %v867_v61  ;;  %v18972_v61 = vand.u32 4294901760, %v13947_v8  ;;  %19525 = vst [vmem:[#allocation65_spill] sm:$0xff] %v13969_v27 }
 0x132   : > { %9683 = vmatmul.mubr.f32.gmra.mrb[42].mxu1 %v13845_v43  ;;  %9470 = vmatprep.mubr.msk.f32.mxu0 %vm13090_vm0, %v19497_v44  ;;  %v13967_v43 = vsub.f32 %v485_v1, %v13954_v6  ;;  %v897_v1 = vand.u32 4294901760, %v896_v48 }
 0x133   : > { %9685 = vmatprep.mubr.msk.f32.mxu1 %vm13090_vm0, %v19497_v44 }
 0x134   : > { %19524 = vst [vmem:[#allocation64_spill] sm:$0xff] %v13967_v43  ;;  %v18975_v29 = vand.u32 4294901760, %v13967_v43 }
 0x135   : > { %9471 = vmatmul.mubr.f32.gmra.mrb[48].mxu0 %v877_v25  ;;  %v906_v25 = vsub.f32 %v13947_v8, %v18972_v61 }
 0x136   : > { %9686 = vmatmul.mubr.f32.gmra.mrb[44].mxu1 %v13852_v28  ;;  %9473 = vmatprep.mubr.msk.f32.mxu0 %vm13090_vm0, %v19497_v44  ;;  %v13984_v28 = vsub.f32 %v486_v4, %v13969_v27  ;;  %v916_v4 = vsub.f32 %v13967_v43, %v18975_v29  ;;  %v492_v43 = vld [vmem:[%s13369_s18 + $0x118] sm:$0xff] }
 0x137   : > { %9688 = vmatprep.mubr.msk.f32.mxu1 %vm13090_vm0, %v19497_v44  ;;  %v907_v48 = vand.u32 4294901760, %v906_v25 }
 0x138   : > { %19527 = vst [vmem:[#allocation67_spill] sm:$0xff] %v13984_v28  ;;  %v18978_v61 = vand.u32 4294901760, %v13984_v28  ;;  %v917_v25 = vand.u32 4294901760, %v916_v4 }
 0x139   : > { %9474 = vmatmul.mubr.f32.gmra.mrb[50].mxu0 %v887_v9  ;;  %v13993_v9 = vand.u32 4294901760, %v488_v60 }
 0x13a   : > { %9689 = vmatmul.mubr.f32.gmra.mrb[46].mxu1 %v13871_v37  ;;  %9476 = vmatprep.mubr.msk.f32.mxu0 %vm13090_vm0, %v19497_v44  ;;  %v14002_v37 = vsub.f32 %v487_v57, %v13979_v50  ;;  %v926_v57 = vsub.f32 %v13984_v28, %v18978_v61 }
 0x13b   : > { %9691 = vmatprep.mubr.msk.f32.mxu1 %vm13090_vm0, %v19497_v44  ;;  %19528 = vst [vmem:[#allocation68_spill] sm:$0xff] %v13993_v9 }
 0x13c   : > { %19529 = vst [vmem:[#allocation69_spill] sm:$0xff] %v14002_v37  ;;  %v18983_v29 = vand.u32 4294901760, %v14002_v37  ;;  %v927_v4 = vand.u32 4294901760, %v926_v57 }
 0x13d   : > { %9477 = vmatmul.mubr.f32.gmra.mrb[52].mxu0 %v897_v1  ;;  %v14010_v1 = vsub.f32 %v488_v60, %v13993_v9  ;;  %v490_v60 = vld [vmem:[%s13369_s18 + $0x108] sm:$0xff] }
 0x13e   : > { %9692 = vmatmul.mubr.f32.gmra.mrb[48].mxu1 %v13891_v63  ;;  %9479 = vmatprep.mubr.msk.f32.mxu0 %vm13090_vm0, %v19497_v44  ;;  %v14017_v63 = vand.u32 4294901760, %v489_v51  ;;  %v936_v61 = vsub.f32 %v14002_v37, %v18983_v29  ;;  %v14032_v28 = vand.u32 4294901760, %v490_v60 }
 0x13f   : > { %9694 = vmatprep.mubr.msk.f32.mxu1 %vm13090_vm0, %v19497_v44  ;;  %19530 = vst [vmem:[#allocation70_spill] sm:$0xff] %v14010_v1 }
 0x140   : > { %19531 = vst [vmem:[#allocation71_spill] sm:$0xff] %v14017_v63  ;;  %19533 = vst [vmem:[#allocation73_spill] sm:$0xff] %v14032_v28  ;;  %v937_v29 = vand.u32 4294901760, %v936_v61 }
 0x141   : > { %9480 = vmatmul.mubr.f32.gmra.mrb[54].mxu0 %v907_v48  ;;  %v18990_v48 = vand.u32 4294901760, %v14010_v1 }
 0x142   : > { %9695 = vmatmul.mubr.f32.gmra.mrb[50].mxu1 %v13909_v24  ;;  %9482 = vmatprep.mubr.msk.f32.mxu0 %vm13090_vm0, %v19497_v44  ;;  %v14030_v24 = vsub.f32 %v489_v51, %v14017_v63 }
 0x143   : > { %9697 = vmatprep.mubr.msk.f32.mxu1 %vm13090_vm0, %v19497_v44  ;;  %v946_v57 = vsub.f32 %v14010_v1, %v18990_v48  ;;  %v493_v1 = vld [vmem:[%s13369_s18 + $0x120] sm:$0xff] }
 0x144   : > { %19532 = vst [vmem:[#allocation72_spill] sm:$0xff] %v14030_v24  ;;  %v18995_v51 = vand.u32 4294901760, %v14030_v24 }
 0x145   : > { %9483 = vmatmul.mubr.f32.gmra.mrb[56].mxu0 %v917_v25  ;;  %v491_v25 = vld [vmem:[%s13369_s18 + $0x110] sm:$0xff]  ;;  %v947_v48 = vand.u32 4294901760, %v946_v57 }
 0x146   : > { %9698 = vmatmul.mubr.f32.gmra.mrb[52].mxu1 %v13924_v49  ;;  %9485 = vmatprep.mubr.msk.f32.mxu0 %vm13090_vm0, %v19497_v44  ;;  %v14045_v49 = vsub.f32 %v490_v60, %v14032_v28  ;;  %v14047_v37 = vand.u32 4294901760, %v491_v25  ;;  %v956_v61 = vsub.f32 %v14030_v24, %v18995_v51  ;;  %v496_v24 = vld [vmem:[%s13369_s18 + $0x138] sm:$0xff] }
 0x147   : > { %9700 = vmatprep.mubr.msk.f32.mxu1 %vm13090_vm0, %v19497_v44 }
 0x148   : > { %19534 = vst [vmem:[#allocation74_spill] sm:$0xff] %v14045_v49  ;;  %19535 = vst [vmem:[#allocation75_spill] sm:$0xff] %v14047_v37  ;;  %v19000_v60 = vand.u32 4294901760, %v14045_v49  ;;  %v957_v57 = vand.u32 4294901760, %v956_v61 }
 0x149   : > { %9486 = vmatmul.mubr.f32.gmra.mrb[58].mxu0 %v927_v4  ;;  %v14060_v4 = vsub.f32 %v491_v25, %v14047_v37 }
 0x14a   : > { %9701 = vmatmul.mubr.f32.gmra.mrb[54].mxu1 %v13931_v38  ;;  %9488 = vmatprep.mubr.msk.f32.mxu0 %vm13090_vm0, %v19497_v44  ;;  %v14062_v38 = vand.u32 4294901760, %v492_v43  ;;  %v966_v25 = vsub.f32 %v14045_v49, %v19000_v60 }
 0x14b   : > { %9703 = vmatprep.mubr.msk.f32.mxu1 %vm13090_vm0, %v19497_v44  ;;  %19536 = vst [vmem:[#allocation76_spill] sm:$0xff] %v14060_v4  ;;  %v19003_v51 = vand.u32 4294901760, %v14060_v4 }
 0x14c   : > { %19537 = vst [vmem:[#allocation77_spill] sm:$0xff] %v14062_v38  ;;  %v967_v61 = vand.u32 4294901760, %v966_v25 }
 0x14d   : > { %9489 = vmatmul.mubr.f32.gmra.mrb[60].mxu0 %v937_v29  ;;  %v14069_v29 = vand.u32 4294901760, %v493_v1 }
 0x14e   : > { %9704 = vmatmul.mubr.f32.gmra.mrb[56].mxu1 %v13954_v6  ;;  %9491 = vmatprep.mubr.msk.f32.mxu0 %vm13090_vm0, %v19497_v44  ;;  %v14077_v6 = vsub.f32 %v492_v43, %v14062_v38  ;;  %v976_v43 = vsub.f32 %v14060_v4, %v19003_v51 }
 0x14f   : > { %9706 = vmatprep.mubr.msk.f32.mxu1 %vm13090_vm0, %v19497_v44  ;;  %19538 = vst [vmem:[#allocation78_spill] sm:$0xff] %v14069_v29 }
 0x150   : > { %19539 = vst [vmem:[#allocation79_spill] sm:$0xff] %v14077_v6  ;;  %v19010_v60 = vand.u32 4294901760, %v14077_v6  ;;  %v977_v25 = vand.u32 4294901760, %v976_v43 }
 0x151   : > { %9492 = vmatmul.mubr.f32.gmra.mrb[62].mxu0 %v947_v48  ;;  %v494_v48 = vld [vmem:[%s13369_s18 + $0x128] sm:$0xff] }
 0x152   : > { %9707 = vmatmul.mubr.f32.gmra.mrb[58].mxu1 %v13969_v27  ;;  %9494 = vmatprep.mubr.msk.f32.mxu0 %vm13090_vm0, %v19497_v44  ;;  %v14085_v27 = vsub.f32 %v493_v1, %v14069_v29  ;;  %v14092_v49 = vand.u32 4294901760, %v494_v48  ;;  %v495_v1 = vld [vmem:[%s13369_s18 + $0x130] sm:$0xff]  ;;  %v986_v51 = vsub.f32 %v14077_v6, %v19010_v60 }
 0x153   : > { %9709 = vmatprep.mubr.msk.f32.mxu1 %vm13090_vm0, %v19497_v44  ;;  %v14107_v4 = vand.u32 4294901760, %v495_v1 }
 0x154   : > { %19540 = vst [vmem:[#allocation80_spill] sm:$0xff] %v14085_v27  ;;  %19541 = vst [vmem:[#allocation81_spill] sm:$0xff] %v14092_v49  ;;  %v987_v43 = vand.u32 4294901760, %v986_v51 }
 0x155   : > { %9495 = vmatmul.mubr.f32.gmra.mrb[64].mxu0 %v957_v57  ;;  %v19015_v57 = vand.u32 4294901760, %v14085_v27  ;;  %19543 = vst [vmem:[#allocation83_spill] sm:$0xff] %v14107_v4 }
 0x156   : > { %9710 = vmatmul.mubr.f32.gmra.mrb[60].mxu1 %v13979_v50  ;;  %9497 = vmatprep.mubr.msk.f32.mxu0 %vm13090_vm0, %v19497_v44  ;;  %v14105_v50 = vsub.f32 %v494_v48, %v14092_v49 }
 0x157   : > { %9712 = vmatprep.mubr.msk.f32.mxu1 %vm13090_vm0, %v19497_v44  ;;  %v996_v48 = vsub.f32 %v14085_v27, %v19015_v57  ;;  %v498_v27 = vld [vmem:[%s13369_s18 + $0x148] sm:$0xff] }
 0x158   : > { %19542 = vst [vmem:[#allocation82_spill] sm:$0xff] %v14105_v50  ;;  %v19020_v60 = vand.u32 4294901760, %v14105_v50 }
 0x159   : > { %9498 = vmatmul.mubr.f32.gmra.mrb[66].mxu0 %v967_v61  ;;  %v14114_v61 = vand.u32 4294901760, %v496_v24  ;;  %v997_v51 = vand.u32 4294901760, %v996_v48 }
 0x15a   : > { %9713 = vmatmul.mubr.f32.gmra.mrb[62].mxu1 %v13993_v9  ;;  %9500 = vmatprep.mubr.msk.f32.mxu0 %vm13090_vm0, %v19497_v44  ;;  %v14122_v9 = vsub.f32 %v495_v1, %v14107_v4  ;;  %v1006_v1 = vsub.f32 %v14105_v50, %v19020_v60  ;;  %v502_v50 = vld [vmem:[%s13369_s18 + $0x168] sm:$0xff] }
 0x15b   : > { %9715 = vmatprep.mubr.msk.f32.mxu1 %vm13090_vm0, %v19497_v44  ;;  %19544 = vst [vmem:[#allocation84_spill] sm:$0xff] %v14114_v61  ;;  %v14130_v6 = vsub.f32 %v496_v24, %v14114_v61  ;;  %v14144_v24 = vand.u32 4294901760, %v498_v27 }
 0x15c   : > { %19545 = vst [vmem:[#allocation85_spill] sm:$0xff] %v14122_v9  ;;  %v19025_v57 = vand.u32 4294901760, %v14122_v9 }
 0x15d   : > { %9501 = vmatmul.mubr.f32.gmra.mrb[68].mxu0 %v977_v25  ;;  %v497_v25 = vld [vmem:[%s13369_s18 + $0x140] sm:$0xff]  ;;  %19546 = vst [vmem:[#allocation86_spill] sm:$0xff] %v14130_v6  ;;  %19548 = vst [vmem:[#allocation88_spill] sm:$0xff] %v14144_v24  ;;  %v19028_v60 = vand.u32 4294901760, %v14130_v6 }
 0x15e   : > { %9716 = vmatmul.mubr.f32.gmra.mrb[64].mxu1 %v14017_v63  ;;  %9503 = vmatprep.mubr.msk.f32.mxu0 %vm13090_vm0, %v19497_v44  ;;  %v14137_v63 = vand.u32 4294901760, %v497_v25  ;;  %v1016_v48 = vsub.f32 %v14122_v9, %v19025_v57 }
 0x15f   : > { %9718 = vmatprep.mubr.msk.f32.mxu1 %vm13090_vm0, %v19497_v44 }
 0x160   : > { %19547 = vst [vmem:[#allocation87_spill] sm:$0xff] %v14137_v63 }
 0x161   : > { %9504 = vmatmul.mubr.f32.gmra.mrb[70].mxu0 %v987_v43  ;;  %v1007_v43 = vand.u32 4294901760, %v1006_v1  ;;  %v1017_v1 = vand.u32 4294901760, %v1016_v48 }
 0x162   : > { %9719 = vmatmul.mubr.f32.gmra.mrb[66].mxu1 %v14032_v28  ;;  %9506 = vmatprep.mubr.msk.f32.mxu0 %vm13090_vm0, %v19497_v44  ;;  %v14152_v28 = vsub.f32 %v497_v25, %v14137_v63  ;;  %v1026_v25 = vsub.f32 %v14130_v6, %v19028_v60 }
 0x163   : > { %9721 = vmatprep.mubr.msk.f32.mxu1 %vm13090_vm0, %v19497_v44 }
 0x164   : > { %19549 = vst [vmem:[#allocation89_spill] sm:$0xff] %v14152_v28  ;;  %v19033_v57 = vand.u32 4294901760, %v14152_v28  ;;  %v1027_v48 = vand.u32 4294901760, %v1026_v25 }
 0x165   : > { %9507 = vmatmul.mubr.f32.gmra.mrb[72].mxu0 %v997_v51  ;;  %v499_v51 = vld [vmem:[%s13369_s18 + $0x150] sm:$0xff] }
 0x166   : > { %9722 = vmatmul.mubr.f32.gmra.mrb[68].mxu1 %v14047_v37  ;;  %9509 = vmatprep.mubr.msk.f32.mxu0 %vm13090_vm0, %v19497_v44  ;;  %v14160_v37 = vsub.f32 %v498_v27, %v14144_v24  ;;  %v14167_v9 = vand.u32 4294901760, %v499_v51  ;;  %v500_v27 = vld [vmem:[%s13369_s18 + $0x158] sm:$0xff]  ;;  %v1036_v60 = vsub.f32 %v14152_v28, %v19033_v57 }
 0x167   : > { %9724 = vmatprep.mubr.msk.f32.mxu1 %vm13090_vm0, %v19497_v44  ;;  %v14182_v6 = vand.u32 4294901760, %v500_v27 }
 0x168   : > { %19550 = vst [vmem:[#allocation90_spill] sm:$0xff] %v14160_v37  ;;  %19551 = vst [vmem:[#allocation91_spill] sm:$0xff] %v14167_v9  ;;  %v1037_v57 = vand.u32 4294901760, %v1036_v60 }
 0x169   : > { %9510 = vmatmul.mubr.f32.gmra.mrb[74].mxu0 %v1007_v43  ;;  %v19040_v43 = vand.u32 4294901760, %v14160_v37  ;;  %19553 = vst [vmem:[#allocation93_spill] sm:$0xff] %v14182_v6 }
 0x16a   : > { %9725 = vmatmul.mubr.f32.gmra.mrb[70].mxu1 %v14062_v38  ;;  %9512 = vmatprep.mubr.msk.f32.mxu0 %vm13090_vm0, %v19497_v44  ;;  %v14180_v38 = vsub.f32 %v499_v51, %v14167_v9 }
 0x16b   : > { %9727 = vmatprep.mubr.msk.f32.mxu1 %vm13090_vm0, %v19497_v44  ;;  %v1046_v25 = vsub.f32 %v14160_v37, %v19040_v43  ;;  %v14204_v43 = vand.u32 4294901760, %v502_v50  ;;  %v506_v37 = vld [vmem:[%s13369_s18 + $0x188] sm:$0xff] }
 0x16c   : > { %19552 = vst [vmem:[#allocation92_spill] sm:$0xff] %v14180_v38  ;;  %v19045_v51 = vand.u32 4294901760, %v14180_v38 }
 0x16d   : > { %9513 = vmatmul.mubr.f32.gmra.mrb[76].mxu0 %v1017_v1  ;;  %v501_v1 = vld [vmem:[%s13369_s18 + $0x160] sm:$0xff]  ;;  %19556 = vst [vmem:[#allocation96_spill] sm:$0xff] %v14204_v43  ;;  %v1047_v60 = vand.u32 4294901760, %v1046_v25 }
 0x16e   : > { %9728 = vmatmul.mubr.f32.gmra.mrb[72].mxu1 %v14069_v29  ;;  %9515 = vmatprep.mubr.msk.f32.mxu0 %vm13090_vm0, %v19497_v44  ;;  %v14195_v29 = vsub.f32 %v500_v27, %v14182_v6  ;;  %v14197_v28 = vand.u32 4294901760, %v501_v1  ;;  %v1056_v27 = vsub.f32 %v14180_v38, %v19045_v51 }
 0x16f   : > { %9730 = vmatprep.mubr.msk.f32.mxu1 %vm13090_vm0, %v19497_v44 }
 0x170   : > { %19554 = vst [vmem:[#allocation94_spill] sm:$0xff] %v14195_v29  ;;  %19555 = vst [vmem:[#allocation95_spill] sm:$0xff] %v14197_v28  ;;  %v1057_v25 = vand.u32 4294901760, %v1056_v27 }
 0x171   : > { %9516 = vmatmul.mubr.f32.gmra.mrb[78].mxu0 %v1027_v48  ;;  %v19048_v48 = vand.u32 4294901760, %v14195_v29 }
 0x172   : > { %9731 = vmatmul.mubr.f32.gmra.mrb[74].mxu1 %v14092_v49  ;;  %9518 = vmatprep.mubr.msk.f32.mxu0 %vm13090_vm0, %v19497_v44  ;;  %v14212_v49 = vsub.f32 %v501_v1, %v14197_v28 }
 0x173   : > { %9733 = vmatprep.mubr.msk.f32.mxu1 %vm13090_vm0, %v19497_v44  ;;  %v1066_v1 = vsub.f32 %v14195_v29, %v19048_v48 }
 0x174   : > { %19557 = vst [vmem:[#allocation97_spill] sm:$0xff] %v14212_v49  ;;  %v19053_v51 = vand.u32 4294901760, %v14212_v49 }
 0x175   : > { %9519 = vmatmul.mubr.f32.gmra.mrb[80].mxu0 %v1037_v57  ;;  %v503_v57 = vld [vmem:[%s13369_s18 + $0x170] sm:$0xff]  ;;  %v1067_v27 = vand.u32 4294901760, %v1066_v1 }
 0x176   : > { %9734 = vmatmul.mubr.f32.gmra.mrb[76].mxu1 %v14107_v4  ;;  %9521 = vmatprep.mubr.msk.f32.mxu0 %vm13090_vm0, %v19497_v44  ;;  %v14220_v4 = vsub.f32 %v502_v50, %v14204_v43  ;;  %v14227_v38 = vand.u32 4294901760, %v503_v57  ;;  %v504_v50 = vld [vmem:[%s13369_s18 + $0x178] sm:$0xff]  ;;  %v1076_v48 = vsub.f32 %v14212_v49, %v19053_v51 }
 0x177   : > { %9736 = vmatprep.mubr.msk.f32.mxu1 %vm13090_vm0, %v19497_v44  ;;  %v14242_v29 = vand.u32 4294901760, %v504_v50 }
 0x178   : > { %19558 = vst [vmem:[#allocation98_spill] sm:$0xff] %v14220_v4  ;;  %19559 = vst [vmem:[#allocation99_spill] sm:$0xff] %v14227_v38  ;;  %v1077_v51 = vand.u32 4294901760, %v1076_v48 }
 0x179   : > { %9522 = vmatmul.mubr.f32.gmra.mrb[82].mxu0 %v1047_v60  ;;  %v19060_v60 = vand.u32 4294901760, %v14220_v4  ;;  %19561 = vst [vmem:[#allocation101_spill] sm:$0xff] %v14242_v29 }
 0x17a   : > { %9737 = vmatmul.mubr.f32.gmra.mrb[78].mxu1 %v14114_v61  ;;  %9524 = vmatprep.mubr.msk.f32.mxu0 %vm13090_vm0, %v19497_v44  ;;  %v14240_v61 = vsub.f32 %v503_v57, %v14227_v38 }
 0x17b   : > { %9739 = vmatprep.mubr.msk.f32.mxu1 %vm13090_vm0, %v19497_v44  ;;  %v1086_v1 = vsub.f32 %v14220_v4, %v19060_v60  ;;  %v14264_v60 = vand.u32 4294901760, %v506_v37  ;;  %v510_v4 = vld [vmem:[%s13369_s18 + $0x1a8] sm:$0xff] }
 0x17c   : > { %19560 = vst [vmem:[#allocation100_spill] sm:$0xff] %v14240_v61  ;;  %v19065_v57 = vand.u32 4294901760, %v14240_v61 }
 0x17d   : > { %9525 = vmatmul.mubr.f32.gmra.mrb[84].mxu0 %v1057_v25  ;;  %v505_v25 = vld [vmem:[%s13369_s18 + $0x180] sm:$0xff]  ;;  %19564 = vst [vmem:[#allocation104_spill] sm:$0xff] %v14264_v60  ;;  %v1087_v48 = vand.u32 4294901760, %v1086_v1 }
 0x17e   : > { %9740 = vmatmul.mubr.f32.gmra.mrb[80].mxu1 %v14137_v63  ;;  %9527 = vmatprep.mubr.msk.f32.mxu0 %vm13090_vm0, %v19497_v44  ;;  %v14255_v63 = vsub.f32 %v504_v50, %v14242_v29  ;;  %v14257_v49 = vand.u32 4294901760, %v505_v25  ;;  %v1096_v50 = vsub.f32 %v14240_v61, %v19065_v57 }
 0x17f   : > { %9742 = vmatprep.mubr.msk.f32.mxu1 %vm13090_vm0, %v19497_v44 }
 0x180   : > { %19562 = vst [vmem:[#allocation102_spill] sm:$0xff] %v14255_v63  ;;  %19563 = vst [vmem:[#allocation103_spill] sm:$0xff] %v14257_v49  ;;  %v1097_v1 = vand.u32 4294901760, %v1096_v50 }
 0x181   : > { %9528 = vmatmul.mubr.f32.gmra.mrb[86].mxu0 %v1067_v27  ;;  %v19068_v27 = vand.u32 4294901760, %v14255_v63 }
 0x182   : > { %9743 = vmatmul.mubr.f32.gmra.mrb[82].mxu1 %v14144_v24  ;;  %9530 = vmatprep.mubr.msk.f32.mxu0 %vm13090_vm0, %v19497_v44  ;;  %v14272_v24 = vsub.f32 %v505_v25, %v14257_v49 }
 0x183   : > { %9745 = vmatprep.mubr.msk.f32.mxu1 %vm13090_vm0, %v19497_v44  ;;  %v1106_v25 = vsub.f32 %v14255_v63, %v19068_v27 }
 0x184   : > { %19565 = vst [vmem:[#allocation105_spill] sm:$0xff] %v14272_v24  ;;  %v19073_v57 = vand.u32 4294901760, %v14272_v24 }
 0x185   : > { %9531 = vmatmul.mubr.f32.gmra.mrb[88].mxu0 %v1077_v51  ;;  %v507_v51 = vld [vmem:[%s13369_s18 + $0x190] sm:$0xff]  ;;  %v1107_v50 = vand.u32 4294901760, %v1106_v25 }
 0x186   : > { %9746 = vmatmul.mubr.f32.gmra.mrb[84].mxu1 %v14167_v9  ;;  %9533 = vmatprep.mubr.msk.f32.mxu0 %vm13090_vm0, %v19497_v44  ;;  %v14280_v9 = vsub.f32 %v506_v37, %v14264_v60  ;;  %v14287_v61 = vand.u32 4294901760, %v507_v51  ;;  %v508_v37 = vld [vmem:[%s13369_s18 + $0x198] sm:$0xff]  ;;  %v1116_v27 = vsub.f32 %v14272_v24, %v19073_v57 }
 0x187   : > { %9748 = vmatprep.mubr.msk.f32.mxu1 %vm13090_vm0, %v19497_v44  ;;  %v14302_v63 = vand.u32 4294901760, %v508_v37 }
 0x188   : > { %19566 = vst [vmem:[#allocation106_spill] sm:$0xff] %v14280_v9  ;;  %19567 = vst [vmem:[#allocation107_spill] sm:$0xff] %v14287_v61  ;;  %v1117_v57 = vand.u32 4294901760, %v1116_v27 }
 0x189   : > { %9534 = vmatmul.mubr.f32.gmra.mrb[90].mxu0 %v1087_v48  ;;  %v19080_v48 = vand.u32 4294901760, %v14280_v9  ;;  %19569 = vst [vmem:[#allocation109_spill] sm:$0xff] %v14302_v63 }
 0x18a   : > { %9749 = vmatmul.mubr.f32.gmra.mrb[86].mxu1 %v14182_v6  ;;  %9536 = vmatprep.mubr.msk.f32.mxu0 %vm13090_vm0, %v19497_v44  ;;  %v14300_v6 = vsub.f32 %v507_v51, %v14287_v61 }
 0x18b   : > { %9751 = vmatprep.mubr.msk.f32.mxu1 %vm13090_vm0, %v19497_v44  ;;  %v1126_v25 = vsub.f32 %v14280_v9, %v19080_v48  ;;  %v511_v9 = vld [vmem:[%s13369_s18 + $0x1b0] sm:$0xff] }
 0x18c   : > { %19568 = vst [vmem:[#allocation108_spill] sm:$0xff] %v14300_v6  ;;  %v19085_v51 = vand.u32 4294901760, %v14300_v6 }
 0x18d   : > { %9537 = vmatmul.mubr.f32.gmra.mrb[92].mxu0 %v1097_v1  ;;  %v509_v1 = vld [vmem:[%s13369_s18 + $0x1a0] sm:$0xff]  ;;  %v1127_v48 = vand.u32 4294901760, %v1126_v25 }
 0x18e   : > { %9752 = vmatmul.mubr.f32.gmra.mrb[88].mxu1 %v14197_v28  ;;  %9539 = vmatprep.mubr.msk.f32.mxu0 %vm13090_vm0, %v19497_v44  ;;  %v14315_v28 = vsub.f32 %v508_v37, %v14302_v63  ;;  %v14317_v24 = vand.u32 4294901760, %v509_v1  ;;  %v1136_v27 = vsub.f32 %v14300_v6, %v19085_v51  ;;  %v512_v6 = vld [vmem:[%s13369_s18 + $0x1b8] sm:$0xff] }
 0x18f   : > { %9754 = vmatprep.mubr.msk.f32.mxu1 %vm13090_vm0, %v19497_v44 }
 0x190   : > { %19570 = vst [vmem:[#allocation110_spill] sm:$0xff] %v14315_v28  ;;  %19571 = vst [vmem:[#allocation111_spill] sm:$0xff] %v14317_v24  ;;  %v19090_v37 = vand.u32 4294901760, %v14315_v28  ;;  %v1137_v25 = vand.u32 4294901760, %v1136_v27 }
 0x191   : > { %9540 = vmatmul.mubr.f32.gmra.mrb[94].mxu0 %v1107_v50  ;;  %v14330_v50 = vsub.f32 %v509_v1, %v14317_v24 }
 0x192   : > { %9755 = vmatmul.mubr.f32.gmra.mrb[90].mxu1 %v14204_v43  ;;  %9542 = vmatprep.mubr.msk.f32.mxu0 %vm13090_vm0, %v19497_v44  ;;  %v14332_v43 = vand.u32 4294901760, %v510_v4  ;;  %v1146_v1 = vsub.f32 %v14315_v28, %v19090_v37  ;;  %v515_v28 = vld [vmem:[%s13369_s18 + $0x1d0] sm:$0xff] }
 0x193   : > { %9757 = vmatprep.mubr.msk.f32.mxu1 %vm13090_vm0, %v19497_v44  ;;  %19572 = vst [vmem:[#allocation112_spill] sm:$0xff] %v14330_v50  ;;  %v19095_v51 = vand.u32 4294901760, %v14330_v50 }
 0x194   : > { %19573 = vst [vmem:[#allocation113_spill] sm:$0xff] %v14332_v43  ;;  %v1147_v27 = vand.u32 4294901760, %v1146_v1 }
 0x195   : > { %9543 = vmatmul.mubr.f32.gmra.mrb[96].mxu0 %v1117_v57  ;;  %v14339_v57 = vand.u32 4294901760, %v511_v9  ;;  %v1156_v37 = vsub.f32 %v14330_v50, %v19095_v51 }
 0x196   : > { %9758 = vmatmul.mubr.f32.gmra.mrb[92].mxu1 %v14227_v38  ;;  %9545 = vmatprep.mubr.msk.f32.mxu0 %vm13090_vm0, %v19497_v44  ;;  %v14347_v38 = vsub.f32 %v510_v4, %v14332_v43 }
 0x197   : > { %9760 = vmatprep.mubr.msk.f32.mxu1 %vm13090_vm0, %v19497_v44  ;;  %19574 = vst [vmem:[#allocation114_spill] sm:$0xff] %v14339_v57  ;;  %v1157_v1 = vand.u32 4294901760, %v1156_v37 }
 0x198   : > { %19575 = vst [vmem:[#allocation115_spill] sm:$0xff] %v14347_v38  ;;  %v19098_v4 = vand.u32 4294901760, %v14347_v38 }
 0x199   : > { %9546 = vmatmul.mubr.f32.gmra.mrb[98].mxu0 %v1127_v48  ;;  %v14354_v48 = vand.u32 4294901760, %v512_v6 }
 0x19a   : > { %9761 = vmatmul.mubr.f32.gmra.mrb[94].mxu1 %v14242_v29  ;;  %9548 = vmatprep.mubr.msk.f32.mxu0 %vm13090_vm0, %v19497_v44  ;;  %v14362_v29 = vsub.f32 %v511_v9, %v14339_v57  ;;  %v1166_v9 = vsub.f32 %v14347_v38, %v19098_v4 }
 0x19b   : > { %9763 = vmatprep.mubr.msk.f32.mxu1 %vm13090_vm0, %v19497_v44  ;;  %19576 = vst [vmem:[#allocation116_spill] sm:$0xff] %v14354_v48 }
 0x19c   : > { %19577 = vst [vmem:[#allocation117_spill] sm:$0xff] %v14362_v29  ;;  %v19105_v51 = vand.u32 4294901760, %v14362_v29  ;;  %v1167_v37 = vand.u32 4294901760, %v1166_v9 }
 0x19d   : > { %9549 = vmatmul.mubr.f32.gmra.mrb[100].mxu0 %v1137_v25  ;;  %v513_v25 = vld [vmem:[%s13369_s18 + $0x1c0] sm:$0xff] }
 0x19e   : > { %9764 = vmatmul.mubr.f32.gmra.mrb[96].mxu1 %v14257_v49  ;;  %9551 = vmatprep.mubr.msk.f32.mxu0 %vm13090_vm0, %v19497_v44  ;;  %v14370_v49 = vsub.f32 %v512_v6, %v14354_v48  ;;  %v14377_v50 = vand.u32 4294901760, %v513_v25  ;;  %v514_v6 = vld [vmem:[%s13369_s18 + $0x1c8] sm:$0xff]  ;;  %v1176_v4 = vsub.f32 %v14362_v29, %v19105_v51 }
 0x19f   : > { %9766 = vmatprep.mubr.msk.f32.mxu1 %vm13090_vm0, %v19497_v44  ;;  %v14392_v38 = vand.u32 4294901760, %v514_v6 }
 0x1a0   : > { %19578 = vst [vmem:[#allocation118_spill] sm:$0xff] %v14370_v49  ;;  %19579 = vst [vmem:[#allocation119_spill] sm:$0xff] %v14377_v50  ;;  %v1177_v9 = vand.u32 4294901760, %v1176_v4  ;;  %v14417_v4 = vand.u32 4294901760, %v516_v53 }
 0x1a1   : > { %9552 = vmatmul.mubr.f32.gmra.mrb[102].mxu0 %v1147_v27  ;;  %19581 = vst [vmem:[#allocation121_spill] sm:$0xff] %v14392_v38  ;;  %v14399_v27 = vand.u32 4294901760, %v515_v28  ;;  %v14407_v8 = vsub.f32 %v514_v6, %v14392_v38 }
 0x1a2   : > { %9767 = vmatmul.mubr.f32.gmra.mrb[98].mxu1 %v14264_v60  ;;  %9554 = vmatprep.mubr.msk.f32.mxu0 %vm13090_vm0, %v19497_v44  ;;  %v14390_v60 = vsub.f32 %v513_v25, %v14377_v50  ;;  %v19583_v25 = vand.u32 4294901760, %v14370_v49  ;;  %19586 = vst [vmem:[#allocation125_spill] sm:$0xff] %v14417_v4 }
 0x1a3   : > { %9769 = vmatprep.mubr.msk.f32.mxu1 %vm13090_vm0, %v19497_v44  ;;  %19582 = vst [vmem:[#allocation122_spill] sm:$0xff] %v14399_v27  ;;  %19584 = vst [vmem:[#allocation123_spill] sm:$0xff] %v14407_v8  ;;  %v19589_v26 = vand.u32 4294901760, %v14407_v8 }
 0x1a4   : > { %19580 = vst [vmem:[#allocation120_spill] sm:$0xff] %v14390_v60  ;;  %v19587_v6 = vand.u32 4294901760, %v14390_v60 }
 0x1a5   : > { %9555 = vmatmul.mubr.f32.gmra.mrb[104].mxu0 %v1157_v1  ;;  %v1206_v20 = vsub.f32 %v14407_v8, %v19589_v26 }
 0x1a6   : > { %9770 = vmatmul.mubr.f32.gmra.mrb[100].mxu1 %v14287_v61  ;;  %9557 = vmatprep.mubr.msk.f32.mxu0 %vm13090_vm0, %v19497_v44  ;;  %v1186_v61 = vsub.f32 %v14370_v49, %v19583_v25 }
 0x1a7   : > { %9772 = vmatprep.mubr.msk.f32.mxu1 %vm13090_vm0, %v19497_v44 }
 0x1a8   : > { %v639_v1 = vpop.f32.mrb[0].mxu0  ;;  %v1187_v25 = vand.u32 4294901760, %v1186_v61 }
 0x1a9   : > { %9558 = vmatmul.mubr.f32.gmra.mrb[106].mxu0 %v1167_v37  ;;  %v9400_v51 = vpop.f32.mrb[1].mxu0 }
 0x1aa   : > { %9773 = vmatmul.mubr.f32.gmra.mrb[102].mxu1 %v14302_v63  ;;  %9560 = vmatprep.mubr.msk.f32.mxu0 %vm13090_vm0, %v19497_v44  ;;  %v14415_v51 = vsub.f32 %v515_v28, %v14399_v27  ;;  %v1196_v63 = vsub.f32 %v14390_v60, %v19587_v6  ;;  %v517_v28 = vld [vmem:[%s13369_s18 + $0x1e0] sm:$0xff] }
 0x1ab   : > { %9775 = vmatprep.mubr.msk.f32.mxu1 %vm13090_vm0, %v19497_v44  ;;  %v14439_v14 = vand.u32 4294901760, %v517_v28 }
 0x1ac   : > { %v649_v37 = vpop.f32.mrb[2].mxu0  ;;  %19585 = vst [vmem:[#allocation124_spill] sm:$0xff] %v14415_v51  ;;  %v1197_v49 = vand.u32 4294901760, %v1196_v63 }
 0x1ad   : > { %9561 = vmatmul.mubr.f32.gmra.mrb[108].mxu0 %v1177_v9  ;;  %v9403_v29 = vpop.f32.mrb[3].mxu0  ;;  %19590 = vst [vmem:[#allocation127_spill] sm:$0xff] %v14439_v14  ;;  %v14454_v8 = vsub.f32 %v517_v28, %v14439_v14 }
 0x1ae   : > { %9776 = vmatmul.mubr.f32.gmra.mrb[104].mxu1 %v14317_v24  ;;  %9563 = vmatprep.mubr.msk.f32.mxu0 %vm13090_vm0, %v19497_v44  ;;  %v19130_v24 = vand.u32 4294901760, %v14415_v51  ;;  %v14431_v29 = vsub.f32 %v516_v53, %v14417_v4 }
 0x1af   : > { %9778 = vmatprep.mubr.msk.f32.mxu1 %vm13090_vm0, %v19497_v44 }
 0x1b0   : > { %v659_v9 = vpop.f32.mrb[4].mxu0  ;;  %v1216_v63 = vsub.f32 %v14415_v51, %v19130_v24  ;;  %v519_v24 = vld [vmem:[%s13369_s18 + $0x1f0] sm:$0xff] }
 0x1b1   : > { %v1410_v52 = vpop.f32.mrb[0].mxu1  ;;  %9564 = vmatmul.mubr.f32.gmra.mrb[110].mxu0 %v1187_v25  ;;  %v9406_v60 = vpop.f32.mrb[5].mxu0 }
 0x1b2   : > { %v14433_v61 = vadd.f32 %v1410_v52, %v639_v1  ;;  %v9621_v6 = vpop.f32.mrb[1].mxu1  ;;  %9779 = vmatmul.mubr.f32.gmra.mrb[106].mxu1 %v14332_v43  ;;  %9566 = vmatprep.mubr.msk.f32.mxu0 %vm13090_vm0, %v19497_v44  ;;  %v518_v52 = vld [vmem:[%s13369_s18 + $0x1e8] sm:$0xff]  ;;  %v19135_v60 = vand.u32 4294901760, %v14431_v29 }
 0x1b3   : > { %9781 = vmatprep.mubr.msk.f32.mxu1 %vm13090_vm0, %v19497_v44  ;;  %v1207_v6 = vand.u32 4294901760, %v1206_v20 }
 0x1b4   : > { %19588 = vst [vmem:[#allocation126_spill] sm:$0xff] %v14433_v61  ;;  %v669_v1 = vpop.f32.mrb[6].mxu0  ;;  %v14456_v61 = vand.u32 4294901760, %v518_v52  ;;  %v1226_v20 = vsub.f32 %v14431_v29, %v19135_v60 }
 0x1b5   : > { %v1416_v53 = vpop.f32.mrb[2].mxu1  ;;  %9567 = vmatmul.mubr.f32.gmra.mrb[112].mxu0 %v1197_v49  ;;  %v9409_v43 = vpop.f32.mrb[7].mxu0 }
 0x1b6   : > { %v14450_v25 = vadd.f32 %v1416_v53, %v649_v37  ;;  %v9624_v26 = vpop.f32.mrb[3].mxu1  ;;  %9782 = vmatmul.mubr.f32.gmra.mrb[108].mxu1 %v14339_v57  ;;  %19592 = vst [vmem:[#allocation129_spill] sm:$0xff] %v14456_v61  ;;  %9569 = vmatprep.mubr.msk.f32.mxu0 %vm13090_vm0, %v19497_v44  ;;  %v1217_v53 = vand.u32 4294901760, %v1216_v63  ;;  %v19138_v57 = vand.u32 4294901760, %v14454_v8  ;;  %v14471_v51 = vsub.f32 %v518_v52, %v14456_v61 }
 0x1b7   : > { %9784 = vmatprep.mubr.msk.f32.mxu1 %vm13090_vm0, %v19497_v44  ;;  %v1227_v63 = vand.u32 4294901760, %v1226_v20 }
 0x1b8   : > { %19591 = vst [vmem:[#allocation128_spill] sm:$0xff] %v14450_v25  ;;  %v679_v49 = vpop.f32.mrb[8].mxu0  ;;  %v14473_v25 = vand.u32 4294901760, %v519_v24  ;;  %v1236_v52 = vsub.f32 %v14454_v8, %v19138_v57  ;;  %v19139_v60 = vand.u32 4294901760, %v14471_v51 }
 0x1b9   : > { %v1422_v37 = vpop.f32.mrb[4].mxu1  ;;  %9570 = vmatmul.mubr.f32.gmra.mrb[114].mxu0 %v1207_v6  ;;  %v9412_v26 = vpop.f32.mrb[9].mxu0 }
 0x1ba   : > { %v14466_v43 = vadd.f32 %v1422_v37, %v659_v9  ;;  %v9627_v28 = vpop.f32.mrb[5].mxu1  ;;  %9785 = vmatmul.mubr.f32.gmra.mrb[110].mxu1 %v14354_v48  ;;  %19593 = vst [vmem:[#allocation130_spill] sm:$0xff] %v14473_v25  ;;  %9572 = vmatprep.mubr.msk.f32.mxu0 %vm13090_vm0, %v19497_v44  ;;  %v14487_v48 = vsub.f32 %v519_v24, %v14473_v25 }
 0x1bb   : > { %9787 = vmatprep.mubr.msk.f32.mxu1 %vm13090_vm0, %v19497_v44  ;;  %v1246_v24 = vsub.f32 %v14471_v51, %v19139_v60 }
 0x1bc   : > { %v689_v6 = vpop.f32.mrb[10].mxu0  ;;  %v19144_v57 = vand.u32 4294901760, %v14487_v48 }
 0x1bd   : > { %v1428_v9 = vpop.f32.mrb[6].mxu1  ;;  %9573 = vmatmul.mubr.f32.gmra.mrb[116].mxu0 %v1217_v53  ;;  %v9415_v26 = vpop.f32.mrb[11].mxu0 }
 0x1be   : > { %v14479_v37 = vadd.f32 %v1428_v9, %v669_v1  ;;  %v9630_v28 = vpop.f32.mrb[7].mxu1  ;;  %9788 = vmatmul.mubr.f32.gmra.mrb[112].mxu1 %v14377_v50  ;;  %9575 = vmatprep.mubr.msk.f32.mxu0 %vm13090_vm0, %v19497_v44  ;;  %v1256_v60 = vsub.f32 %v14487_v48, %v19144_v57 }
 0x1bf   : > { %9790 = vmatprep.mubr.msk.f32.mxu1 %vm13090_vm0, %v19497_v44  ;;  %v1237_v28 = vand.u32 4294901760, %v1236_v52  ;;  %v1247_v52 = vand.u32 4294901760, %v1246_v24 }
 0x1c0   : > { %v699_v53 = vpop.f32.mrb[12].mxu0  ;;  %v1257_v24 = vand.u32 4294901760, %v1256_v60  ;;  %v19594_v60 = vand.u32 4294901760, %v13391_v16  ;;  %v19596_v16 = vand.u32 4294901760, %v13395_v18 }
 0x1c1   : > { %v1434_v1 = vpop.f32.mrb[8].mxu1  ;;  %9576 = vmatmul.mubr.f32.gmra.mrb[118].mxu0 %v1227_v63  ;;  %v9418_v26 = vpop.f32.mrb[13].mxu0 }
 0x1c2   : > { %v14493_v20 = vadd.f32 %v1434_v1, %v679_v49  ;;  %v9633_v9 = vpop.f32.mrb[9].mxu1  ;;  %9791 = vmatmul.mubr.f32.gmra.mrb[114].mxu1 %v14392_v38  ;;  %9578 = vmatprep.mubr.msk.f32.mxu0 %vm13090_vm0, %v19497_v44 }
 0x1c3   : > { %9793 = vmatprep.mubr.msk.f32.mxu1 %vm13090_vm0, %v19497_v44 }
 0x1c4   : > { %v709_v1 = vpop.f32.mrb[14].mxu0 }
 0x1c5   : > { %v1440_v49 = vpop.f32.mrb[10].mxu1  ;;  %9579 = vmatmul.mubr.f32.gmra.mrb[120].mxu0 %v1237_v28  ;;  %v9421_v26 = vpop.f32.mrb[15].mxu0 }
 0x1c6   : > { %v14504_v63 = vadd.f32 %v1440_v49, %v689_v6  ;;  %v9636_v9 = vpop.f32.mrb[11].mxu1  ;;  %9794 = vmatmul.mubr.f32.gmra.mrb[116].mxu1 %v14399_v27  ;;  %9581 = vmatprep.mubr.msk.f32.mxu0 %vm13090_vm0, %v19497_v44 }
 0x1c7   : > { %9796 = vmatprep.mubr.msk.f32.mxu1 %vm13090_vm0, %v19497_v44 }
 0x1c8   : > { %v719_v50 = vpop.f32.mrb[16].mxu0 }
 0x1c9   : > { %v1446_v38 = vpop.f32.mrb[12].mxu1  ;;  %9582 = vmatmul.mubr.f32.gmra.mrb[122].mxu0 %v1247_v52  ;;  %v9424_v49 = vpop.f32.mrb[17].mxu0 }
 0x1ca   : > { %v14514_v6 = vadd.f32 %v1446_v38, %v699_v53  ;;  %v9639_v28 = vpop.f32.mrb[13].mxu1  ;;  %9797 = vmatmul.mubr.f32.gmra.mrb[118].mxu1 %v14417_v4  ;;  %9584 = vmatprep.mubr.msk.f32.mxu0 %vm13090_vm0, %v19497_v44  ;;  %v19595_v53 = vand.u32 4294901760, %v13393_v17  ;;  %v19597_v17 = vand.u32 4294901760, %v13399_v22 }
 0x1cb   : > { %9799 = vmatprep.mubr.msk.f32.mxu1 %vm13090_vm0, %v19497_v44 }
 0x1cc   : > { %v729_v26 = vpop.f32.mrb[18].mxu0  ;;  %v12115_v52 = vpack.c.bf16 %v19595_v53, %v19594_v60 }
 0x1cd   : > { %v1452_v9 = vpop.f32.mrb[14].mxu1  ;;  %9585 = vmatmul.mubr.f32.gmra.mrb[124].mxu0 %v1257_v24  ;;  %v9427_v38 = vpop.f32.mrb[19].mxu0 }
 0x1ce   : > { %v14521_v57 = vadd.f32 %v1452_v9, %v709_v1  ;;  %v9642_v27 = vpop.f32.mrb[15].mxu1  ;;  %9800 = vmatmul.mubr.f32.gmra.mrb[120].mxu1 %v14439_v14  ;;  %9840 = vmatprep.mubr.msk.f32.mxu0 %vm13090_vm0, %v19497_v44  ;;  %v12118_v9 = vpack.c.bf16 %v19597_v17, %v19596_v16  ;;  %v19600_v17 = vand.u32 4294901760, %v13508_v55 }
 0x1cf   : > { %9802 = vmatprep.mubr.msk.f32.mxu1 %vm13090_vm0, %v19497_v44 }
 0x1d0   : > { %v739_v49 = vpop.f32.mrb[20].mxu0 }
 0x1d1   : > { %v1458_v28 = vpop.f32.mrb[16].mxu1  ;;  %9841 = vmatmul.mubr.f32.vlgmr.msra.gmra.mrb[126].mxu0 %v13508_v55  ;;  %v9430_v27 = vpop.f32.mrb[21].mxu0 }
 0x1d2   : > { %v14532_v1 = vadd.f32 %v1458_v28, %v719_v50  ;;  %v9645_v24 = vpop.f32.mrb[17].mxu1  ;;  %9803 = vmatmul.mubr.f32.gmra.mrb[122].mxu1 %v14456_v61  ;;  %9843 = vmatprep.mubr.msk.f32.mxu0 %vm13090_vm0, %v19497_v44 }
 0x1d3   : > { %9805 = vmatprep.mubr.msk.f32.mxu1 %vm13090_vm0, %v19497_v44  ;;  %12116 = vmatpush3.bf16.msra.mxu0 %v12115_v52  ;;  %v19599_v52 = vand.u32 4294901760, %v13409_v32 }
 0x1d4   : > { %v749_v38 = vpop.f32.mrb[22].mxu0  ;;  %12117 = vmatprep.subr.bf16.mxu0 %v19502_v58 }
 0x1d5   : > { %v1464_v50 = vpop.f32.mrb[18].mxu1  ;;  %9844 = vmatmul.mubr.f32.gmra.mrb[128].mxu0 %v13525_v13  ;;  %v9433_v28 = vpop.f32.mrb[23].mxu0 }
 0x1d6   : > { %v14545_v60 = vadd.f32 %v1464_v50, %v729_v26  ;;  %v9648_v53 = vpop.f32.mrb[19].mxu1  ;;  %9806 = vmatmul.mubr.f32.gmra.mrb[124].mxu1 %v14473_v25  ;;  %9846 = vmatprep.mubr.msk.f32.mxu0 %vm13090_vm0, %v19497_v44  ;;  %v19598_v26 = vand.u32 4294901760, %v13402_v23 }
 0x1d7   : > { %10061 = vmatprep.mubr.msk.f32.mxu1 %vm13090_vm0, %v19497_v44  ;;  %12119 = vmatpush3.bf16.msra.mxu0 %v12118_v9  ;;  %v19602_v9 = vand.u32 4294901760, %v13419_v36 }
 0x1d8   : > { %v759_v22 = vpop.f32.mrb[24].mxu0  ;;  %12120 = vmatprep.subr.bf16.mxu0 %v19502_v58  ;;  %v12121_v24 = vpack.c.bf16 %v19599_v52, %v19598_v26 }
 0x1d9   : > { %v1470_v18 = vpop.f32.mrb[20].mxu1  ;;  %9847 = vmatmul.mubr.f32.gmra.mrb[130].mxu0 %v13548_v46  ;;  %v9436_v50 = vpop.f32.mrb[25].mxu0 }
 0x1da   : > { %v14558_v27 = vadd.f32 %v1470_v18, %v739_v49  ;;  %v9651_v16 = vpop.f32.mrb[21].mxu1  ;;  %10062 = vmatmul.mubr.f32.vlgmr.msra.gmra.mrb[126].mxu1 %v19600_v17  ;;  %9849 = vmatprep.mubr.msk.f32.mxu0 %vm13090_vm0, %v19497_v44  ;;  %v19601_v49 = vand.u32 4294901760, %v13417_v35  ;;  %v19607_v17 = vand.u32 4294901760, %v13560_v12 }
 0x1db   : > { %12140 = vmatpush3.bf16.msra.mxu1 %v13389_v15  ;;  %10064 = vmatprep.mubr.msk.f32.mxu1 %vm13090_vm0, %v19497_v44  ;;  %v19603_v15 = vand.u32 4294901760, %v13525_v13  ;;  %v19605_v13 = vand.u32 4294901760, %v13437_v54  ;;  %v19606_v16 = vand.u32 4294901760, %v13548_v46 }
 0x1dc   : > { %12141 = vmatprep.subr.bf16.mxu1 %v19502_v58  ;;  %v769_v32 = vpop.f32.mrb[26].mxu0  ;;  %12122 = vmatpush3.bf16.msra.mxu0 %v12121_v24  ;;  %v12124_v55 = vpack.c.bf16 %v19602_v9, %v19601_v49 }
 0x1dd   : > { %v1476_v23 = vpop.f32.mrb[22].mxu1  ;;  %9850 = vmatmul.mubr.f32.gmra.mrb[132].mxu0 %v13560_v12  ;;  %v9439_v18 = vpop.f32.mrb[27].mxu0  ;;  %12123 = vmatprep.subr.bf16.mxu0 %v19502_v58  ;;  %v19608_v12 = vand.u32 4294901760, %v13577_v41 }
 0x1de   : > { %v14573_v53 = vadd.f32 %v1476_v23, %v749_v38  ;;  %v9654_v28 = vpop.f32.mrb[23].mxu1  ;;  %10065 = vmatmul.mubr.f32.gmra.mrb[128].mxu1 %v19603_v15  ;;  %9852 = vmatprep.mubr.msk.f32.mxu0 %vm13090_vm0, %v19497_v44  ;;  %v19604_v38 = vand.u32 4294901760, %v13431_v47 }
 0x1df   : > { %10067 = vmatprep.mubr.msk.f32.mxu1 %vm13090_vm0, %v19497_v44  ;;  %12143 = vmatpush3.bf16.msra.mxu1 %v13397_v21 }
 0x1e0   : > { %v779_v36 = vpop.f32.mrb[28].mxu0  ;;  %12144 = vmatprep.subr.bf16.mxu1 %v19502_v58  ;;  %12125 = vmatpush3.bf16.msra.mxu0 %v12124_v55  ;;  %v12127_v26 = vpack.c.bf16 %v19605_v13, %v19604_v38 }
 0x1e1   : > { %v1482_v35 = vpop.f32.mrb[24].mxu1  ;;  %9853 = vmatmul.mubr.f32.gmra.mrb[134].mxu0 %v13577_v41  ;;  %v9442_v21 = vpop.f32.mrb[29].mxu0  ;;  %12126 = vmatprep.subr.bf16.mxu0 %v19502_v58  ;;  %v19609_v41 = vand.u32 4294901760, %v13584_v34 }
 0x1e2   : > { %v14589_v52 = vadd.f32 %v1482_v35, %v759_v22  ;;  %v9657_v24 = vpop.f32.mrb[25].mxu1  ;;  %10068 = vmatmul.mubr.f32.gmra.mrb[130].mxu1 %v19606_v16  ;;  %9855 = vmatprep.mubr.msk.f32.mxu0 %vm13090_vm0, %v19497_v44 }
 0x1e3   : > { %10070 = vmatprep.mubr.msk.f32.mxu1 %vm13090_vm0, %v19497_v44  ;;  %12146 = vmatpush3.bf16.msra.mxu1 %v13428_v42 }
 0x1e4   : > { %v789_v54 = vpop.f32.mrb[30].mxu0  ;;  %12147 = vmatprep.subr.bf16.mxu1 %v19502_v58  ;;  %12128 = vmatpush3.bf16.msra.mxu0 %v12127_v26 }
 0x1e5   : > { %v1488_v47 = vpop.f32.mrb[26].mxu1  ;;  %9856 = vmatmul.mubr.f32.gmra.mrb[136].mxu0 %v13584_v34  ;;  %v9445_v50 = vpop.f32.mrb[31].mxu0  ;;  %12129 = vmatprep.subr.bf16.mxu0 %v19502_v58  ;;  %v19610_v34 = vand.u32 4294901760, %v13605_v31 }
 0x1e6   : > { %v14601_v22 = vadd.f32 %v1488_v47, %v769_v32  ;;  %v9660_v46 = vpop.f32.mrb[27].mxu1  ;;  %10071 = vmatmul.mubr.f32.gmra.mrb[132].mxu1 %v19607_v17  ;;  %9858 = vmatprep.mubr.msk.f32.mxu0 %vm13090_vm0, %v19497_v44  ;;  %v19612_v47 = vand.u32 4294901760, %v13455_v2 }
 0x1e7   : > { %10073 = vmatprep.mubr.msk.f32.mxu1 %vm13090_vm0, %v19497_v44  ;;  %12149 = vmatpush3.bf16.msra.mxu1 %v13447_v59 }
 0x1e8   : > { %v799_v23 = vpop.f32.mrb[32].mxu0  ;;  %12150 = vmatprep.subr.bf16.mxu1 %v19502_v58 }
 0x1e9   : > { %v1494_v42 = vpop.f32.mrb[28].mxu1  ;;  %9859 = vmatmul.mubr.f32.gmra.mrb[138].mxu0 %v13605_v31  ;;  %v9448_v9 = vpop.f32.mrb[33].mxu0  ;;  %v19611_v31 = vand.u32 4294901760, %v13625_v19 }
 0x1ea   : > { %v14613_v32 = vadd.f32 %v1494_v42, %v779_v36  ;;  %v9663_v49 = vpop.f32.mrb[29].mxu1  ;;  %10074 = vmatmul.mubr.f32.gmra.mrb[134].mxu1 %v19608_v12  ;;  %9861 = vmatprep.mubr.msk.f32.mxu0 %vm13090_vm0, %v19497_v44  ;;  %v19615_v12 = vand.u32 4294901760, %v13659_v45 }
 0x1eb   : > { %10076 = vmatprep.mubr.msk.f32.mxu1 %vm13090_vm0, %v19497_v44  ;;  %12152 = vmatpush3.bf16.msra.mxu1 %v13467_v11 }
 0x1ec   : > { %v809_v55 = vpop.f32.mrb[34].mxu0  ;;  %12153 = vmatprep.subr.bf16.mxu1 %v19502_v58 }
 0x1ed   : > { %v1500_v59 = vpop.f32.mrb[30].mxu1  ;;  %9862 = vmatmul.mubr.f32.gmra.mrb[140].mxu0 %v13625_v19  ;;  %v9451_v18 = vpop.f32.mrb[35].mxu0 }
 0x1ee   : > { %v14624_v28 = vadd.f32 %v1500_v59, %v789_v54  ;;  %v9666_v15 = vpop.f32.mrb[31].mxu1  ;;  %10077 = vmatmul.mubr.f32.gmra.mrb[136].mxu1 %v19609_v41  ;;  %9864 = vmatprep.mubr.msk.f32.mxu0 %vm13090_vm0, %v19497_v44  ;;  %v19613_v54 = vand.u32 4294901760, %v13463_v7  ;;  %v19614_v7 = vand.u32 4294901760, %v13634_v62  ;;  %v19616_v41 = vand.u32 4294901760, %v13677_v56 }
 0x1ef   : > { %10079 = vmatprep.mubr.msk.f32.mxu1 %vm13090_vm0, %v19497_v44  ;;  %12155 = vmatpush3.bf16.msra.mxu1 %v13488_v39 }
 0x1f0   : > { %v819_v35 = vpop.f32.mrb[36].mxu0  ;;  %12156 = vmatprep.subr.bf16.mxu1 %v19502_v58  ;;  %v12130_v46 = vpack.c.bf16 %v19613_v54, %v19612_v47 }
 0x1f1   : > { %v1506_v11 = vpop.f32.mrb[32].mxu1  ;;  %9865 = vmatmul.mubr.f32.gmra.mrb[142].mxu0 %v13634_v62  ;;  %v9454_v13 = vpop.f32.mrb[37].mxu0 }
 0x1f2   : > { %v14635_v36 = vadd.f32 %v1506_v11, %v799_v23  ;;  %v9669_v38 = vpop.f32.mrb[33].mxu1  ;;  %10080 = vmatmul.mubr.f32.gmra.mrb[138].mxu1 %v19610_v34  ;;  %9867 = vmatprep.mubr.msk.f32.mxu0 %vm13090_vm0, %v19497_v44  ;;  %v19617_v34 = vand.u32 4294901760, %v13694_v3 }
 0x1f3   : > { %10082 = vmatprep.mubr.msk.f32.mxu1 %vm13090_vm0, %v19497_v44  ;;  %12158 = vmatpush3.bf16.msra.mxu1 %v13522_v10 }
 0x1f4   : > { %v829_v26 = vpop.f32.mrb[38].mxu0  ;;  %12159 = vmatprep.subr.bf16.mxu1 %v19502_v58  ;;  %12131 = vmatpush3.bf16.msra.mxu0 %v12130_v46 }
 0x1f5   : > { %v1512_v39 = vpop.f32.mrb[34].mxu1  ;;  %9868 = vmatmul.mubr.f32.gmra.mrb[144].mxu0 %v13659_v45  ;;  %v9457_v21 = vpop.f32.mrb[39].mxu0  ;;  %12132 = vmatprep.subr.bf16.mxu0 %v19502_v58 }
 0x1f6   : > { %v14646_v24 = vadd.f32 %v1512_v39, %v809_v55  ;;  %v9672_v16 = vpop.f32.mrb[35].mxu1  ;;  %10083 = vmatmul.mubr.f32.gmra.mrb[140].mxu1 %v19611_v31  ;;  %9870 = vmatprep.mubr.msk.f32.mxu0 %vm13090_vm0, %v19497_v44  ;;  %v19618_v31 = vand.u32 4294901760, %v13713_v30 }
 0x1f7   : > { %10085 = vmatprep.mubr.msk.f32.mxu1 %vm13090_vm0, %v19497_v44  ;;  %12161 = vmatpush3.bf16.msra.mxu1 %v13532_v33 }
 0x1f8   : > { %v839_v17 = vpop.f32.mrb[40].mxu0  ;;  %12186 = vmatprep.subr.bf16.mxu1 %v19502_v58 }
 0x1f9   : > { %v1518_v10 = vpop.f32.mrb[36].mxu1  ;;  %9871 = vmatmul.mubr.f32.gmra.mrb[146].mxu0 %v13677_v56  ;;  %v9460_v50 = vpop.f32.mrb[41].mxu0 }
 0x1fa   : > { %v14662_v19 = vadd.f32 %v1518_v10, %v819_v35  ;;  %v9675_v2 = vpop.f32.mrb[37].mxu1  ;;  %10086 = vmatmul.mubr.f32.gmra.mrb[142].mxu1 %v19614_v7  ;;  %9873 = vmatprep.mubr.msk.f32.mxu0 %vm13090_vm0, %v19497_v44  ;;  %v19619_v10 = vand.u32 4294901760, %v13724_v40 }
 0x1fb   : > { %10088 = vmatprep.mubr.msk.f32.mxu1 %vm13090_vm0, %v19497_v44 }
 0x1fc   : > { %v849_v42 = vpop.f32.mrb[42].mxu0 }
 0x1fd   : > { %v1524_v33 = vpop.f32.mrb[38].mxu1  ;;  %9874 = vmatmul.mubr.f32.gmra.mrb[148].mxu0 %v13694_v3  ;;  %v9463_v9 = vpop.f32.mrb[43].mxu0 }
 0x1fe   : > { %v14671_v23 = vadd.f32 %v1524_v33, %v829_v26  ;;  %v9678_v49 = vpop.f32.mrb[39].mxu1  ;;  %10089 = vmatmul.mubr.f32.gmra.mrb[144].mxu1 %v19615_v12  ;;  %9876 = vmatprep.mubr.msk.f32.mxu0 %vm13090_vm0, %v19497_v44  ;;  %v19620_v33 = vld [vmem:[#allocation41_spill] sm:$0xff] }
 0x1ff   : > { %10091 = vmatprep.mubr.msk.f32.mxu1 %vm13090_vm0, %v19497_v44 }
 0x200   : > { %v859_v59 = vpop.f32.mrb[44].mxu0 }
 0x201   : > { %v1530_v62 = vpop.f32.mrb[40].mxu1  ;;  %9877 = vmatmul.mubr.f32.gmra.mrb[150].mxu0 %v13713_v30  ;;  %v9466_v18 = vpop.f32.mrb[45].mxu0 }
 0x202   : > { %v14680_v55 = vadd.f32 %v1530_v62, %v839_v17  ;;  %v9681_v15 = vpop.f32.mrb[41].mxu1  ;;  %10092 = vmatmul.mubr.f32.gmra.mrb[146].mxu1 %v19616_v41  ;;  %9879 = vmatprep.mubr.msk.f32.mxu0 %vm13090_vm0, %v19497_v44 }
 0x203   : > { %10094 = vmatprep.mubr.msk.f32.mxu1 %vm13090_vm0, %v19497_v44  ;;  %v19623_v15 = vand.u32 4294901760, %v13763_v0 }
 0x204   : > { %v869_v11 = vpop.f32.mrb[46].mxu0 }
 0x205   : > { %v1536_v45 = vpop.f32.mrb[42].mxu1  ;;  %9880 = vmatmul.mubr.f32.gmra.mrb[152].mxu0 %v13724_v40  ;;  %v9469_v13 = vpop.f32.mrb[47].mxu0 }
 0x206   : > { %v14689_v35 = vadd.f32 %v1536_v45, %v849_v42  ;;  %v9684_v38 = vpop.f32.mrb[43].mxu1  ;;  %10095 = vmatmul.mubr.f32.gmra.mrb[148].mxu1 %v19617_v34  ;;  %9882 = vmatprep.mubr.msk.f32.mxu0 %vm13090_vm0, %v19497_v44  ;;  %v19621_v42 = vand.u32 4294901760, %v13748_v5  ;;  %v19626_v45 = vld [vmem:[#allocation20_spill] sm:$0xff] }
 0x207   : > { %10097 = vmatprep.mubr.msk.f32.mxu1 %vm13090_vm0, %v19497_v44 }
 0x208   : > { %v879_v39 = vpop.f32.mrb[48].mxu0 }
 0x209   : > { %v1542_v56 = vpop.f32.mrb[44].mxu1  ;;  %9883 = vmatmul.mubr.f32.gmra.mrb[154].mxu0 %v13748_v5  ;;  %v9472_v21 = vpop.f32.mrb[49].mxu0  ;;  %v19624_v5 = vld [vmem:[#allocation19_spill] sm:$0xff] }
 0x20a   : > { %v14698_v26 = vadd.f32 %v1542_v56, %v859_v59  ;;  %v9687_v16 = vpop.f32.mrb[45].mxu1  ;;  %10098 = vmatmul.mubr.f32.gmra.mrb[150].mxu1 %v19618_v31  ;;  %9885 = vmatprep.mubr.msk.f32.mxu0 %vm13090_vm0, %v19497_v44  ;;  %v19622_v59 = vld [vmem:[#allocation42_spill] sm:$0xff]  ;;  %v19625_v18 = vand.u32 4294901760, %v19624_v5  ;;  %v19634_v5 = vld [vmem:[#allocation51_spill] sm:$0xff] }
 0x20b   : > { %10100 = vmatprep.mubr.msk.f32.mxu1 %vm13090_vm0, %v19497_v44  ;;  %v19629_v16 = vand.u32 4294901760, %v19620_v33 }
 0x20c   : > { %v889_v47 = vpop.f32.mrb[50].mxu0 }
 0x20d   : > { %v1548_v3 = vpop.f32.mrb[46].mxu1  ;;  %9886 = vmatmul.mubr.f32.gmra.mrb[156].mxu0 %v13763_v0  ;;  %v9475_v17 = vpop.f32.mrb[51].mxu0 }
 0x20e   : > { %v14707_v54 = vadd.f32 %v1548_v3, %v869_v11  ;;  %v9690_v46 = vpop.f32.mrb[47].mxu1  ;;  %10101 = vmatmul.mubr.f32.gmra.mrb[152].mxu1 %v19619_v10  ;;  %9888 = vmatprep.mubr.msk.f32.mxu0 %vm13090_vm0, %v19497_v44  ;;  %v19627_v11 = vand.u32 4294901760, %v19626_v45  ;;  %v19630_v10 = vld [vmem:[#allocation46_spill] sm:$0xff]  ;;  %v19631_v17 = vand.u32 4294901760, %v19622_v59 }
 0x20f   : > { %10103 = vmatprep.mubr.msk.f32.mxu1 %vm13090_vm0, %v19497_v44 }
 0x210   : > { %v899_v2 = vpop.f32.mrb[52].mxu0  ;;  %v12133_v38 = vpack.c.bf16 %v19627_v11, %v19625_v18  ;;  %v19635_v18 = vand.u32 4294901760, %v19630_v10 }
 0x211   : > { %v1554_v30 = vpop.f32.mrb[48].mxu1  ;;  %9889 = vmatmul.mubr.f32.gmra.mrb[158].mxu0 %v19620_v33  ;;  %v9478_v49 = vpop.f32.mrb[53].mxu0 }
 0x212   : > { %v14716_v7 = vadd.f32 %v1554_v30, %v879_v39  ;;  %v9693_v50 = vpop.f32.mrb[49].mxu1  ;;  %10104 = vmatmul.mubr.f32.gmra.mrb[154].mxu1 %v19621_v42  ;;  %9891 = vmatprep.mubr.msk.f32.mxu0 %vm13090_vm0, %v19497_v44  ;;  %v19628_v39 = vld [vmem:[#allocation44_spill] sm:$0xff] }
 0x213   : > { %10106 = vmatprep.mubr.msk.f32.mxu1 %vm13090_vm0, %v19497_v44  ;;  %12134 = vmatpush3.bf16.msra.mxu0 %v12133_v38  ;;  %v19632_v49 = vld [vmem:[#allocation48_spill] sm:$0xff] }
 0x214   : > { %v909_v12 = vpop.f32.mrb[54].mxu0  ;;  %12135 = vmatprep.subr.bf16.mxu0 %v19502_v58 }
 0x215   : > { %v1560_v40 = vpop.f32.mrb[50].mxu1  ;;  %9892 = vmatmul.mubr.f32.gmra.mrb[160].mxu0 %v19622_v59  ;;  %v9481_v41 = vpop.f32.mrb[55].mxu0 }
 0x216   : > { %v14725_v9 = vadd.f32 %v1560_v40, %v889_v47  ;;  %v9696_v62 = vpop.f32.mrb[51].mxu1  ;;  %10107 = vmatmul.mubr.f32.gmra.mrb[156].mxu1 %v19623_v15  ;;  %9894 = vmatprep.mubr.msk.f32.mxu0 %vm13090_vm0, %v19497_v44  ;;  %v19633_v40 = vand.u32 4294901760, %v19628_v39 }
 0x217   : > { %10109 = vmatprep.mubr.msk.f32.mxu1 %vm13090_vm0, %v19497_v44 }
 0x218   : > { %v919_v13 = vpop.f32.mrb[56].mxu0 }
 0x219   : > { %v1566_v34 = vpop.f32.mrb[52].mxu1  ;;  %9895 = vmatmul.mubr.f32.gmra.mrb[162].mxu0 %v19628_v39  ;;  %v9484_v31 = vpop.f32.mrb[57].mxu0  ;;  %v19637_v39 = vand.u32 4294901760, %v19632_v49 }
 0x21a   : > { %v14739_v56 = vadd.f32 %v1566_v34, %v899_v2  ;;  %v9699_v0 = vpop.f32.mrb[53].mxu1  ;;  %10110 = vmatmul.mubr.f32.gmra.mrb[158].mxu1 %v19629_v16  ;;  %9897 = vmatprep.mubr.msk.f32.mxu0 %vm13090_vm0, %v19497_v44 }
 0x21b   : > { %10112 = vmatprep.mubr.msk.f32.mxu1 %vm13090_vm0, %v19497_v44  ;;  %v19636_v0 = vld [vmem:[#allocation52_spill] sm:$0xff] }
 0x21c   : > { %v929_v3 = vpop.f32.mrb[58].mxu0 }
 0x21d   : > { %v1572_v21 = vpop.f32.mrb[54].mxu1  ;;  %9898 = vmatmul.mubr.f32.gmra.mrb[164].mxu0 %v19630_v10  ;;  %v9487_v30 = vpop.f32.mrb[59].mxu0  ;;  %v19638_v10 = vld [vmem:[#allocation54_spill] sm:$0xff] }
 0x21e   : > { %v14748_v47 = vadd.f32 %v1572_v21, %v909_v12  ;;  %v9702_v46 = vpop.f32.mrb[55].mxu1  ;;  %10113 = vmatmul.mubr.f32.gmra.mrb[160].mxu1 %v19631_v17  ;;  %9900 = vmatprep.mubr.msk.f32.mxu0 %vm13090_vm0, %v19497_v44  ;;  %v19639_v17 = vand.u32 4294901760, %v19634_v5 }
 0x21f   : > { %10115 = vmatprep.mubr.msk.f32.mxu1 %vm13090_vm0, %v19497_v44 }
 0x220   : > { %v939_v50 = vpop.f32.mrb[60].mxu0 }
 0x221   : > { %v1578_v2 = vpop.f32.mrb[56].mxu1  ;;  %9901 = vmatmul.mubr.f32.gmra.mrb[166].mxu0 %v19632_v49  ;;  %v9490_v12 = vpop.f32.mrb[61].mxu0 }
 0x222   : > { %v14757_v33 = vadd.f32 %v1578_v2, %v919_v13  ;;  %v9705_v42 = vpop.f32.mrb[57].mxu1  ;;  %10116 = vmatmul.mubr.f32.gmra.mrb[162].mxu1 %v19633_v40  ;;  %9903 = vmatprep.mubr.msk.f32.mxu0 %vm13090_vm0, %v19497_v44  ;;  %v19640_v40 = vld [vmem:[#allocation56_spill] sm:$0xff]  ;;  %v19641_v12 = vand.u32 4294901760, %v19636_v0 }
 0x223   : > { %10118 = vmatprep.mubr.msk.f32.mxu1 %vm13090_vm0, %v19497_v44 }
 0x224   : > { %v949_v59 = vpop.f32.mrb[62].mxu0 }
 0x225   : > { %v1584_v62 = vpop.f32.mrb[58].mxu1  ;;  %9904 = vmatmul.mubr.f32.gmra.mrb[168].mxu0 %v19634_v5  ;;  %v9493_v45 = vpop.f32.mrb[63].mxu0 }
 0x226   : > { %v14766_v15 = vadd.f32 %v1584_v62, %v929_v3  ;;  %v9708_v41 = vpop.f32.mrb[59].mxu1  ;;  %10119 = vmatmul.mubr.f32.gmra.mrb[164].mxu1 %v19635_v18  ;;  %9906 = vmatprep.mubr.msk.f32.mxu0 %vm13090_vm0, %v19497_v44  ;;  %v19642_v45 = vld [vmem:[#allocation58_spill] sm:$0xff] }
 0x227   : > { %10121 = vmatprep.mubr.msk.f32.mxu1 %vm13090_vm0, %v19497_v44 }
 0x228   : > { %v959_v38 = vpop.f32.mrb[64].mxu0 }
 0x229   : > { %v1590_v11 = vpop.f32.mrb[60].mxu1  ;;  %9907 = vmatmul.mubr.f32.gmra.mrb[170].mxu0 %v19636_v0  ;;  %v9496_v16 = vpop.f32.mrb[65].mxu0 }
 0x22a   : > { %v14775_v34 = vadd.f32 %v1590_v11, %v939_v50  ;;  %v9711_v13 = vpop.f32.mrb[61].mxu1  ;;  %10122 = vmatmul.mubr.f32.gmra.mrb[166].mxu1 %v19637_v39  ;;  %9909 = vmatprep.mubr.msk.f32.mxu0 %vm13090_vm0, %v19497_v44  ;;  %v19643_v11 = vand.u32 4294901760, %v19638_v10  ;;  %v19646_v39 = vld [vmem:[#allocation23_spill] sm:$0xff] }
 0x22b   : > { %10124 = vmatprep.mubr.msk.f32.mxu1 %vm13090_vm0, %v19497_v44  ;;  %v19644_v13 = vld [vmem:[#allocation22_spill] sm:$0xff]  ;;  %v19647_v16 = vand.u32 4294901760, %v19646_v39 }
 0x22c   : > { %v969_v21 = vpop.f32.mrb[66].mxu0  ;;  %v19645_v0 = vand.u32 4294901760, %v19644_v13 }
 0x22d   : > { %v1596_v31 = vpop.f32.mrb[62].mxu1  ;;  %9910 = vmatmul.mubr.f32.gmra.mrb[172].mxu0 %v19638_v10  ;;  %v9499_v30 = vpop.f32.mrb[67].mxu0 }
 0x22e   : > { %v14784_v3 = vadd.f32 %v1596_v31, %v949_v59  ;;  %v9714_v46 = vpop.f32.mrb[63].mxu1  ;;  %10125 = vmatmul.mubr.f32.gmra.mrb[168].mxu1 %v19639_v17  ;;  %9912 = vmatprep.mubr.msk.f32.mxu0 %vm13090_vm0, %v19497_v44  ;;  %v12136_v31 = vpack.c.bf16 %v19647_v16, %v19645_v0  ;;  %v19648_v30 = vld [vmem:[#allocation61_spill] sm:$0xff] }
 0x22f   : > { %10127 = vmatprep.mubr.msk.f32.mxu1 %vm13090_vm0, %v19497_v44  ;;  %v19653_v16 = vand.u32 4294901760, %v19648_v30 }
 0x230   : > { %v979_v50 = vpop.f32.mrb[68].mxu0  ;;  %12137 = vmatpush3.bf16.msra.mxu0 %v12136_v31 }
 0x231   : > { %v1602_v2 = vpop.f32.mrb[64].mxu1  ;;  %9913 = vmatmul.mubr.f32.gmra.mrb[174].mxu0 %v19640_v40  ;;  %v9502_v62 = vpop.f32.mrb[69].mxu0  ;;  %12162 = vmatprep.subr.bf16.mxu0 %v19502_v58 }
 0x232   : > { %v14793_v42 = vadd.f32 %v1602_v2, %v959_v38  ;;  %v9717_v49 = vpop.f32.mrb[65].mxu1  ;;  %10128 = vmatmul.mubr.f32.gmra.mrb[170].mxu1 %v19641_v12  ;;  %9915 = vmatprep.mubr.msk.f32.mxu0 %vm13090_vm0, %v19497_v44  ;;  %v19649_v2 = vand.u32 4294901760, %v19640_v40 }
 0x233   : > { %10130 = vmatprep.mubr.msk.f32.mxu1 %vm13090_vm0, %v19497_v44 }
 0x234   : > { %v989_v41 = vpop.f32.mrb[70].mxu0 }
 0x235   : > { %v1608_v59 = vpop.f32.mrb[66].mxu1  ;;  %9916 = vmatmul.mubr.f32.gmra.mrb[176].mxu0 %v19642_v45  ;;  %v9505_v38 = vpop.f32.mrb[71].mxu0 }
 0x236   : > { %v14802_v5 = vadd.f32 %v1608_v59, %v969_v21  ;;  %v9720_v18 = vpop.f32.mrb[67].mxu1  ;;  %10131 = vmatmul.mubr.f32.gmra.mrb[172].mxu1 %v19643_v11  ;;  %9918 = vmatprep.mubr.msk.f32.mxu0 %vm13090_vm0, %v19497_v44  ;;  %v19651_v11 = vand.u32 4294901760, %v19642_v45 }
 0x237   : > { %10133 = vmatprep.mubr.msk.f32.mxu1 %vm13090_vm0, %v19497_v44 }
 0x238   : > { %v999_v46 = vpop.f32.mrb[72].mxu0 }
 0x239   : > { %v1614_v21 = vpop.f32.mrb[68].mxu1  ;;  %9919 = vmatmul.mubr.f32.gmra.mrb[178].mxu0 %v19648_v30  ;;  %v9508_v49 = vpop.f32.mrb[73].mxu0 }
 0x23a   : > { %v14816_v17 = vadd.f32 %v1614_v21, %v979_v50  ;;  %v9723_v10 = vpop.f32.mrb[69].mxu1  ;;  %10134 = vmatmul.mubr.f32.gmra.mrb[174].mxu1 %v19649_v2  ;;  %9921 = vmatprep.mubr.msk.f32.mxu0 %vm13090_vm0, %v19497_v44  ;;  %v19650_v50 = vld [vmem:[#allocation62_spill] sm:$0xff] }
 0x23b   : > { %10136 = vmatprep.mubr.msk.f32.mxu1 %vm13090_vm0, %v19497_v44  ;;  %v19655_v49 = vand.u32 4294901760, %v19650_v50 }
 0x23c   : > { %v1009_v62 = vpop.f32.mrb[74].mxu0 }
 0x23d   : > { %v1620_v12 = vpop.f32.mrb[70].mxu1  ;;  %9922 = vmatmul.mubr.f32.gmra.mrb[180].mxu0 %v19650_v50  ;;  %v9511_v38 = vpop.f32.mrb[75].mxu0 }
 0x23e   : > { %v14825_v59 = vadd.f32 %v1620_v12, %v989_v41  ;;  %v9726_v18 = vpop.f32.mrb[71].mxu1  ;;  %10137 = vmatmul.mubr.f32.gmra.mrb[176].mxu1 %v19651_v11  ;;  %9924 = vmatprep.mubr.msk.f32.mxu0 %vm13090_vm0, %v19497_v44  ;;  %v19652_v41 = vld [vmem:[#allocation64_spill] sm:$0xff] }
 0x23f   : > { %10139 = vmatprep.mubr.msk.f32.mxu1 %vm13090_vm0, %v19497_v44 }
 0x240   : > { %v1019_v13 = vpop.f32.mrb[76].mxu0 }
 0x241   : > { %v1626_v40 = vpop.f32.mrb[72].mxu1  ;;  %9925 = vmatmul.mubr.f32.gmra.mrb[182].mxu0 %v19652_v41  ;;  %v9514_v31 = vpop.f32.mrb[77].mxu0 }
 0x242   : > { %v14834_v0 = vadd.f32 %v1626_v40, %v999_v46  ;;  %v9729_v39 = vpop.f32.mrb[73].mxu1  ;;  %10140 = vmatmul.mubr.f32.gmra.mrb[178].mxu1 %v19653_v16  ;;  %9927 = vmatprep.mubr.msk.f32.mxu0 %vm13090_vm0, %v19497_v44  ;;  %v19654_v46 = vld [vmem:[#allocation67_spill] sm:$0xff]  ;;  %v19657_v40 = vand.u32 4294901760, %v19652_v41 }
 0x243   : > { %10142 = vmatprep.mubr.msk.f32.mxu1 %vm13090_vm0, %v19497_v44 }
 0x244   : > { %v1029_v21 = vpop.f32.mrb[78].mxu0 }
 0x245   : > { %v1632_v45 = vpop.f32.mrb[74].mxu1  ;;  %9928 = vmatmul.mubr.f32.gmra.mrb[184].mxu0 %v19654_v46  ;;  %v9517_v12 = vpop.f32.mrb[79].mxu0 }
 0x246   : > { %v14843_v10 = vadd.f32 %v1632_v45, %v1009_v62  ;;  %v9732_v2 = vpop.f32.mrb[75].mxu1  ;;  %10143 = vmatmul.mubr.f32.gmra.mrb[180].mxu1 %v19655_v49  ;;  %9930 = vmatprep.mubr.msk.f32.mxu0 %vm13090_vm0, %v19497_v44  ;;  %v19656_v62 = vld [vmem:[#allocation69_spill] sm:$0xff] }
 0x247   : > { %10145 = vmatprep.mubr.msk.f32.mxu1 %vm13090_vm0, %v19497_v44  ;;  %v19659_v2 = vand.u32 4294901760, %v19654_v46 }
 0x248   : > { %v1039_v18 = vpop.f32.mrb[80].mxu0 }
 0x249   : > { %v1638_v30 = vpop.f32.mrb[76].mxu1  ;;  %9931 = vmatmul.mubr.f32.gmra.mrb[186].mxu0 %v19656_v62  ;;  %v9520_v39 = vpop.f32.mrb[81].mxu0 }
 0x24a   : > { %v14852_v11 = vadd.f32 %v1638_v30, %v1019_v13  ;;  %v9735_v38 = vpop.f32.mrb[77].mxu1  ;;  %10146 = vmatmul.mubr.f32.gmra.mrb[182].mxu1 %v19657_v40  ;;  %9933 = vmatprep.mubr.msk.f32.mxu0 %vm13090_vm0, %v19497_v44  ;;  %v19658_v13 = vld [vmem:[#allocation70_spill] sm:$0xff]  ;;  %v19661_v40 = vand.u32 4294901760, %v19656_v62 }
 0x24b   : > { %10148 = vmatprep.mubr.msk.f32.mxu1 %vm13090_vm0, %v19497_v44 }
 0x24c   : > { %v1049_v16 = vpop.f32.mrb[82].mxu0 }
 0x24d   : > { %v1644_v50 = vpop.f32.mrb[78].mxu1  ;;  %9934 = vmatmul.mubr.f32.gmra.mrb[188].mxu0 %v19658_v13  ;;  %v9523_v49 = vpop.f32.mrb[83].mxu0 }
 0x24e   : > { %v14861_v31 = vadd.f32 %v1644_v50, %v1029_v21  ;;  %v9738_v45 = vpop.f32.mrb[79].mxu1  ;;  %10149 = vmatmul.mubr.f32.gmra.mrb[184].mxu1 %v19659_v2  ;;  %9936 = vmatprep.mubr.msk.f32.mxu0 %vm13090_vm0, %v19497_v44  ;;  %v19660_v21 = vld [vmem:[#allocation72_spill] sm:$0xff]  ;;  %v19663_v49 = vand.u32 4294901760, %v19658_v13 }
 0x24f   : > { %10151 = vmatprep.mubr.msk.f32.mxu1 %vm13090_vm0, %v19497_v44 }
 0x250   : > { %v1059_v12 = vpop.f32.mrb[84].mxu0 }
 0x251   : > { %v1650_v41 = vpop.f32.mrb[80].mxu1  ;;  %9937 = vmatmul.mubr.f32.gmra.mrb[190].mxu0 %v19660_v21  ;;  %v9526_v39 = vpop.f32.mrb[85].mxu0 }
 0x252   : > { %v14870_v30 = vadd.f32 %v1650_v41, %v1039_v18  ;;  %v9741_v38 = vpop.f32.mrb[81].mxu1  ;;  %10152 = vmatmul.mubr.f32.gmra.mrb[186].mxu1 %v19661_v40  ;;  %9939 = vmatprep.mubr.msk.f32.mxu0 %vm13090_vm0, %v19497_v44  ;;  %v19662_v18 = vld [vmem:[#allocation74_spill] sm:$0xff] }
 0x253   : > { %10154 = vmatprep.mubr.msk.f32.mxu1 %vm13090_vm0, %v19497_v44 }
 0x254   : > { %v1069_v50 = vpop.f32.mrb[86].mxu0 }
 0x255   : > { %v1656_v46 = vpop.f32.mrb[82].mxu1  ;;  %9940 = vmatmul.mubr.f32.gmra.mrb[192].mxu0 %v19662_v18  ;;  %v9529_v41 = vpop.f32.mrb[87].mxu0 }
 0x256   : > { %v14879_v45 = vadd.f32 %v1656_v46, %v1049_v16  ;;  %v9744_v2 = vpop.f32.mrb[83].mxu1  ;;  %10155 = vmatmul.mubr.f32.gmra.mrb[188].mxu1 %v19663_v49  ;;  %9942 = vmatprep.mubr.msk.f32.mxu0 %vm13090_vm0, %v19497_v44  ;;  %v19665_v16 = vld [vmem:[#allocation76_spill] sm:$0xff]  ;;  %v19666_v46 = vand.u32 4294901760, %v19660_v21 }
 0x257   : > { %10157 = vmatprep.mubr.msk.f32.mxu1 %vm13090_vm0, %v19497_v44 }
 0x258   : > { %v1079_v38 = vpop.f32.mrb[88].mxu0 }
 0x259   : > { %v1662_v62 = vpop.f32.mrb[84].mxu1  ;;  %9943 = vmatmul.mubr.f32.gmra.mrb[194].mxu0 %v19665_v16  ;;  %v9532_v2 = vpop.f32.mrb[89].mxu0 }
 0x25a   : > { %v14888_v40 = vadd.f32 %v1662_v62, %v1059_v12  ;;  %v9747_v39 = vpop.f32.mrb[85].mxu1  ;;  %10158 = vmatmul.mubr.f32.gmra.mrb[190].mxu1 %v19666_v46  ;;  %9945 = vmatprep.mubr.msk.f32.mxu0 %vm13090_vm0, %v19497_v44  ;;  %v19668_v12 = vld [vmem:[#allocation79_spill] sm:$0xff]  ;;  %v19669_v62 = vand.u32 4294901760, %v19662_v18 }
 0x25b   : > { %10160 = vmatprep.mubr.msk.f32.mxu1 %vm13090_vm0, %v19497_v44 }
 0x25c   : > { %19664 = vst [vmem:[#allocation41_spill] sm:$0xff] %v14888_v40  ;;  %v1089_v49 = vpop.f32.mrb[90].mxu0 }
 0x25d   : > { %v1668_v13 = vpop.f32.mrb[86].mxu1  ;;  %9946 = vmatmul.mubr.f32.gmra.mrb[196].mxu0 %v19668_v12  ;;  %v9535_v39 = vpop.f32.mrb[91].mxu0 }
 0x25e   : > { %v14897_v41 = vadd.f32 %v1668_v13, %v1069_v50  ;;  %v9750_v25 = vpop.f32.mrb[87].mxu1  ;;  %10161 = vmatmul.mubr.f32.gmra.mrb[192].mxu1 %v19669_v62  ;;  %9948 = vmatprep.mubr.msk.f32.mxu0 %vm13090_vm0, %v19497_v44  ;;  %v19671_v50 = vld [vmem:[#allocation80_spill] sm:$0xff] }
 0x25f   : > { %10163 = vmatprep.mubr.msk.f32.mxu1 %vm13090_vm0, %v19497_v44  ;;  %v19672_v25 = vand.u32 4294901760, %v19665_v16 }
 0x260   : > { %19667 = vst [vmem:[#allocation42_spill] sm:$0xff] %v14897_v41  ;;  %v1099_v46 = vpop.f32.mrb[92].mxu0  ;;  %v19753_v41 = vand.u32 4294901760, %v14454_v8 }
 0x261   : > { %v1674_v21 = vpop.f32.mrb[88].mxu1  ;;  %9949 = vmatmul.mubr.f32.gmra.mrb[198].mxu0 %v19671_v50  ;;  %v9538_v13 = vpop.f32.mrb[93].mxu0 }
 0x262   : > { %v14906_v2 = vadd.f32 %v1674_v21, %v1079_v38  ;;  %v9753_v61 = vpop.f32.mrb[89].mxu1  ;;  %10164 = vmatmul.mubr.f32.gmra.mrb[194].mxu1 %v19672_v25  ;;  %9951 = vmatprep.mubr.msk.f32.mxu0 %vm13090_vm0, %v19497_v44  ;;  %v19674_v38 = vld [vmem:[#allocation82_spill] sm:$0xff] }
 0x263   : > { %10166 = vmatprep.mubr.msk.f32.mxu1 %vm13090_vm0, %v19497_v44  ;;  %v19675_v61 = vand.u32 4294901760, %v19668_v12 }
 0x264   : > { %19670 = vst [vmem:[#allocation19_spill] sm:$0xff] %v14906_v2  ;;  %v1109_v62 = vpop.f32.mrb[94].mxu0 }
 0x265   : > { %v1680_v18 = vpop.f32.mrb[90].mxu1  ;;  %9952 = vmatmul.mubr.f32.gmra.mrb[200].mxu0 %v19674_v38  ;;  %v9541_v21 = vpop.f32.mrb[95].mxu0 }
 0x266   : > { %v14915_v39 = vadd.f32 %v1680_v18, %v1089_v49  ;;  %v9756_v14 = vpop.f32.mrb[91].mxu1  ;;  %10167 = vmatmul.mubr.f32.gmra.mrb[196].mxu1 %v19675_v61  ;;  %9954 = vmatprep.mubr.msk.f32.mxu0 %vm13090_vm0, %v19497_v44  ;;  %v19677_v49 = vld [vmem:[#allocation85_spill] sm:$0xff] }
 0x267   : > { %10169 = vmatprep.mubr.msk.f32.mxu1 %vm13090_vm0, %v19497_v44  ;;  %v19678_v14 = vand.u32 4294901760, %v19671_v50 }
 0x268   : > { %19673 = vst [vmem:[#allocation20_spill] sm:$0xff] %v14915_v39  ;;  %v1119_v25 = vpop.f32.mrb[96].mxu0 }
 0x269   : > { %v1686_v16 = vpop.f32.mrb[92].mxu1  ;;  %9955 = vmatmul.mubr.f32.gmra.mrb[202].mxu0 %v19677_v49  ;;  %v9544_v18 = vpop.f32.mrb[97].mxu0 }
 0x26a   : > { %v14924_v13 = vadd.f32 %v1686_v16, %v1099_v46  ;;  %v9759_v4 = vpop.f32.mrb[93].mxu1  ;;  %10170 = vmatmul.mubr.f32.gmra.mrb[198].mxu1 %v19678_v14  ;;  %9957 = vmatprep.mubr.msk.f32.mxu0 %vm13090_vm0, %v19497_v44  ;;  %v19680_v46 = vld [vmem:[#allocation86_spill] sm:$0xff] }
 0x26b   : > { %10172 = vmatprep.mubr.msk.f32.mxu1 %vm13090_vm0, %v19497_v44  ;;  %v19681_v4 = vand.u32 4294901760, %v19674_v38 }
 0x26c   : > { %19676 = vst [vmem:[#allocation44_spill] sm:$0xff] %v14924_v13  ;;  %v1129_v61 = vpop.f32.mrb[98].mxu0 }
 0x26d   : > { %v1692_v12 = vpop.f32.mrb[94].mxu1  ;;  %9958 = vmatmul.mubr.f32.gmra.mrb[204].mxu0 %v19680_v46  ;;  %v9547_v16 = vpop.f32.mrb[99].mxu0 }
 0x26e   : > { %v14933_v21 = vadd.f32 %v1692_v12, %v1109_v62  ;;  %v9762_v39 = vpop.f32.mrb[95].mxu1  ;;  %10173 = vmatmul.mubr.f32.gmra.mrb[200].mxu1 %v19681_v4  ;;  %9960 = vmatprep.mubr.msk.f32.mxu0 %vm13090_vm0, %v19497_v44  ;;  %v19683_v62 = vld [vmem:[#allocation89_spill] sm:$0xff] }
 0x26f   : > { %10175 = vmatprep.mubr.msk.f32.mxu1 %vm13090_vm0, %v19497_v44  ;;  %v19684_v39 = vand.u32 4294901760, %v19677_v49 }
 0x270   : > { %19679 = vst [vmem:[#allocation46_spill] sm:$0xff] %v14933_v21  ;;  %v1139_v14 = vpop.f32.mrb[100].mxu0 }
 0x271   : > { %v1698_v50 = vpop.f32.mrb[96].mxu1  ;;  %9961 = vmatmul.mubr.f32.gmra.mrb[206].mxu0 %v19683_v62  ;;  %v9550_v12 = vpop.f32.mrb[101].mxu0 }
 0x272   : > { %v14942_v18 = vadd.f32 %v1698_v50, %v1119_v25  ;;  %v9765_v13 = vpop.f32.mrb[97].mxu1  ;;  %10176 = vmatmul.mubr.f32.gmra.mrb[202].mxu1 %v19684_v39  ;;  %9963 = vmatprep.mubr.msk.f32.mxu0 %vm13090_vm0, %v19497_v44  ;;  %v19686_v25 = vld [vmem:[#allocation90_spill] sm:$0xff] }
 0x273   : > { %10178 = vmatprep.mubr.msk.f32.mxu1 %vm13090_vm0, %v19497_v44  ;;  %v19687_v13 = vand.u32 4294901760, %v19680_v46 }
 0x274   : > { %19682 = vst [vmem:[#allocation48_spill] sm:$0xff] %v14942_v18  ;;  %v1149_v4 = vpop.f32.mrb[102].mxu0 }
 0x275   : > { %v1704_v38 = vpop.f32.mrb[98].mxu1  ;;  %9964 = vmatmul.mubr.f32.gmra.mrb[208].mxu0 %v19686_v25  ;;  %v9553_v50 = vpop.f32.mrb[103].mxu0 }
 0x276   : > { %v14951_v16 = vadd.f32 %v1704_v38, %v1129_v61  ;;  %v9768_v21 = vpop.f32.mrb[99].mxu1  ;;  %10179 = vmatmul.mubr.f32.gmra.mrb[204].mxu1 %v19687_v13  ;;  %9966 = vmatprep.mubr.msk.f32.mxu0 %vm13090_vm0, %v19497_v44  ;;  %v19689_v61 = vld [vmem:[#allocation92_spill] sm:$0xff] }
 0x277   : > { %10181 = vmatprep.mubr.msk.f32.mxu1 %vm13090_vm0, %v19497_v44  ;;  %v19690_v21 = vand.u32 4294901760, %v19683_v62 }
 0x278   : > { %19685 = vst [vmem:[#allocation51_spill] sm:$0xff] %v14951_v16  ;;  %v1159_v39 = vpop.f32.mrb[104].mxu0 }
 0x279   : > { %v1710_v49 = vpop.f32.mrb[100].mxu1  ;;  %9967 = vmatmul.mubr.f32.gmra.mrb[210].mxu0 %v19689_v61  ;;  %v9556_v38 = vpop.f32.mrb[105].mxu0 }
 0x27a   : > { %v14960_v12 = vadd.f32 %v1710_v49, %v1139_v14  ;;  %v9771_v18 = vpop.f32.mrb[101].mxu1  ;;  %10182 = vmatmul.mubr.f32.gmra.mrb[206].mxu1 %v19690_v21  ;;  %9969 = vmatprep.mubr.msk.f32.mxu0 %vm13090_vm0, %v19497_v44  ;;  %v19692_v14 = vld [vmem:[#allocation94_spill] sm:$0xff] }
 0x27b   : > { %10184 = vmatprep.mubr.msk.f32.mxu1 %vm13090_vm0, %v19497_v44  ;;  %v19693_v18 = vand.u32 4294901760, %v19686_v25 }
 0x27c   : > { %19688 = vst [vmem:[#allocation52_spill] sm:$0xff] %v14960_v12  ;;  %v1169_v13 = vpop.f32.mrb[106].mxu0 }
 0x27d   : > { %v1716_v46 = vpop.f32.mrb[102].mxu1  ;;  %9970 = vmatmul.mubr.f32.gmra.mrb[212].mxu0 %v19692_v14  ;;  %v9559_v49 = vpop.f32.mrb[107].mxu0 }
 0x27e   : > { %v14969_v50 = vadd.f32 %v1716_v46, %v1149_v4  ;;  %v9774_v16 = vpop.f32.mrb[103].mxu1  ;;  %10185 = vmatmul.mubr.f32.gmra.mrb[208].mxu1 %v19693_v18  ;;  %9972 = vmatprep.mubr.msk.f32.mxu0 %vm13090_vm0, %v19497_v44  ;;  %v19695_v4 = vld [vmem:[#allocation97_spill] sm:$0xff] }
 0x27f   : > { %10187 = vmatprep.mubr.msk.f32.mxu1 %vm13090_vm0, %v19497_v44  ;;  %v19696_v16 = vand.u32 4294901760, %v19689_v61 }
 0x280   : > { %19691 = vst [vmem:[#allocation54_spill] sm:$0xff] %v14969_v50  ;;  %v1179_v21 = vpop.f32.mrb[108].mxu0 }
 0x281   : > { %v1722_v62 = vpop.f32.mrb[104].mxu1  ;;  %9973 = vmatmul.mubr.f32.gmra.mrb[214].mxu0 %v19695_v4  ;;  %v9562_v46 = vpop.f32.mrb[109].mxu0 }
 0x282   : > { %v14978_v38 = vadd.f32 %v1722_v62, %v1159_v39  ;;  %v9777_v12 = vpop.f32.mrb[105].mxu1  ;;  %10188 = vmatmul.mubr.f32.gmra.mrb[210].mxu1 %v19696_v16  ;;  %9975 = vmatprep.mubr.msk.f32.mxu0 %vm13090_vm0, %v19497_v44  ;;  %v19698_v39 = vld [vmem:[#allocation98_spill] sm:$0xff] }
 0x283   : > { %10190 = vmatprep.mubr.msk.f32.mxu1 %vm13090_vm0, %v19497_v44  ;;  %v19699_v12 = vand.u32 4294901760, %v19692_v14 }
 0x284   : > { %19694 = vst [vmem:[#allocation56_spill] sm:$0xff] %v14978_v38  ;;  %v1189_v18 = vpop.f32.mrb[110].mxu0 }
 0x285   : > { %v1728_v25 = vpop.f32.mrb[106].mxu1  ;;  %9976 = vmatmul.mubr.f32.gmra.mrb[216].mxu0 %v19698_v39  ;;  %v9565_v62 = vpop.f32.mrb[111].mxu0 }
 0x286   : > { %v14987_v49 = vadd.f32 %v1728_v25, %v1169_v13  ;;  %v9780_v50 = vpop.f32.mrb[107].mxu1  ;;  %10191 = vmatmul.mubr.f32.gmra.mrb[212].mxu1 %v19699_v12  ;;  %9978 = vmatprep.mubr.msk.f32.mxu0 %vm13090_vm0, %v19497_v44  ;;  %v19701_v13 = vld [vmem:[#allocation100_spill] sm:$0xff] }
 0x287   : > { %10193 = vmatprep.mubr.msk.f32.mxu1 %vm13090_vm0, %v19497_v44  ;;  %v19702_v50 = vand.u32 4294901760, %v19695_v4 }
 0x288   : > { %19697 = vst [vmem:[#allocation58_spill] sm:$0xff] %v14987_v49  ;;  %v1199_v16 = vpop.f32.mrb[112].mxu0 }
 0x289   : > { %v1734_v61 = vpop.f32.mrb[108].mxu1  ;;  %9979 = vmatmul.mubr.f32.gmra.mrb[218].mxu0 %v19701_v13  ;;  %v9568_v25 = vpop.f32.mrb[113].mxu0 }
 0x28a   : > { %v14996_v46 = vadd.f32 %v1734_v61, %v1179_v21  ;;  %v9783_v38 = vpop.f32.mrb[109].mxu1  ;;  %10194 = vmatmul.mubr.f32.gmra.mrb[214].mxu1 %v19702_v50  ;;  %9981 = vmatprep.mubr.msk.f32.mxu0 %vm13090_vm0, %v19497_v44  ;;  %v19704_v21 = vld [vmem:[#allocation102_spill] sm:$0xff] }
 0x28b   : > { %10196 = vmatprep.mubr.msk.f32.mxu1 %vm13090_vm0, %v19497_v44  ;;  %v19705_v38 = vand.u32 4294901760, %v19698_v39 }
 0x28c   : > { %19700 = vst [vmem:[#allocation22_spill] sm:$0xff] %v14996_v46  ;;  %v1209_v12 = vpop.f32.mrb[114].mxu0 }
 0x28d   : > { %v1740_v14 = vpop.f32.mrb[110].mxu1  ;;  %9982 = vmatmul.mubr.f32.gmra.mrb[220].mxu0 %v19704_v21  ;;  %v9571_v61 = vpop.f32.mrb[115].mxu0 }
 0x28e   : > { %v15005_v62 = vadd.f32 %v1740_v14, %v1189_v18  ;;  %v9786_v49 = vpop.f32.mrb[111].mxu1  ;;  %10197 = vmatmul.mubr.f32.gmra.mrb[216].mxu1 %v19705_v38  ;;  %9984 = vmatprep.mubr.msk.f32.mxu0 %vm13090_vm0, %v19497_v44  ;;  %v19707_v18 = vld [vmem:[#allocation105_spill] sm:$0xff] }
 0x28f   : > { %10199 = vmatprep.mubr.msk.f32.mxu1 %vm13090_vm0, %v19497_v44  ;;  %v19708_v49 = vand.u32 4294901760, %v19701_v13 }
 0x290   : > { %19703 = vst [vmem:[#allocation23_spill] sm:$0xff] %v15005_v62  ;;  %v1219_v50 = vpop.f32.mrb[116].mxu0 }
 0x291   : > { %v1746_v4 = vpop.f32.mrb[112].mxu1  ;;  %9985 = vmatmul.mubr.f32.gmra.mrb[222].mxu0 %v19707_v18  ;;  %v9574_v14 = vpop.f32.mrb[117].mxu0 }
 0x292   : > { %v15014_v25 = vadd.f32 %v1746_v4, %v1199_v16  ;;  %v9789_v46 = vpop.f32.mrb[113].mxu1  ;;  %10200 = vmatmul.mubr.f32.gmra.mrb[218].mxu1 %v19708_v49  ;;  %9987 = vmatprep.mubr.msk.f32.mxu0 %vm13090_vm0, %v19497_v44  ;;  %v19710_v16 = vld [vmem:[#allocation106_spill] sm:$0xff] }
 0x293   : > { %10202 = vmatprep.mubr.msk.f32.mxu1 %vm13090_vm0, %v19497_v44  ;;  %v19711_v46 = vand.u32 4294901760, %v19704_v21 }
 0x294   : > { %19706 = vst [vmem:[#allocation61_spill] sm:$0xff] %v15014_v25  ;;  %v1229_v38 = vpop.f32.mrb[118].mxu0 }
 0x295   : > { %v1752_v39 = vpop.f32.mrb[114].mxu1  ;;  %9988 = vmatmul.mubr.f32.gmra.mrb[224].mxu0 %v19710_v16  ;;  %v9577_v4 = vpop.f32.mrb[119].mxu0 }
 0x296   : > { %v15023_v61 = vadd.f32 %v1752_v39, %v1209_v12  ;;  %v9792_v62 = vpop.f32.mrb[115].mxu1  ;;  %10203 = vmatmul.mubr.f32.gmra.mrb[220].mxu1 %v19711_v46  ;;  %9990 = vmatprep.mubr.msk.f32.mxu0 %vm13090_vm0, %v19497_v44  ;;  %v19713_v12 = vld [vmem:[#allocation108_spill] sm:$0xff] }
 0x297   : > { %10205 = vmatprep.mubr.msk.f32.mxu1 %vm13090_vm0, %v19497_v44  ;;  %v19714_v62 = vand.u32 4294901760, %v19707_v18 }
 0x298   : > { %19709 = vst [vmem:[#allocation62_spill] sm:$0xff] %v15023_v61  ;;  %v1239_v49 = vpop.f32.mrb[120].mxu0 }
 0x299   : > { %v1758_v13 = vpop.f32.mrb[116].mxu1  ;;  %9991 = vmatmul.mubr.f32.gmra.mrb[226].mxu0 %v19713_v12  ;;  %v9580_v39 = vpop.f32.mrb[121].mxu0 }
 0x29a   : > { %v15032_v14 = vadd.f32 %v1758_v13, %v1219_v50  ;;  %v9795_v25 = vpop.f32.mrb[117].mxu1  ;;  %10206 = vmatmul.mubr.f32.gmra.mrb[222].mxu1 %v19714_v62  ;;  %9993 = vmatprep.mubr.msk.f32.mxu0 %vm13090_vm0, %v19497_v44  ;;  %v19716_v50 = vld [vmem:[#allocation110_spill] sm:$0xff] }
 0x29b   : > { %10208 = vmatprep.mubr.msk.f32.mxu1 %vm13090_vm0, %v19497_v44  ;;  %v19717_v25 = vand.u32 4294901760, %v19710_v16 }
 0x29c   : > { %19712 = vst [vmem:[#allocation64_spill] sm:$0xff] %v15032_v14  ;;  %v1249_v46 = vpop.f32.mrb[122].mxu0 }
 0x29d   : > { %v1764_v21 = vpop.f32.mrb[118].mxu1  ;;  %9994 = vmatmul.mubr.f32.gmra.mrb[228].mxu0 %v19716_v50  ;;  %v9583_v13 = vpop.f32.mrb[123].mxu0 }
 0x29e   : > { %v15041_v4 = vadd.f32 %v1764_v21, %v1229_v38  ;;  %v9798_v61 = vpop.f32.mrb[119].mxu1  ;;  %10209 = vmatmul.mubr.f32.gmra.mrb[224].mxu1 %v19717_v25  ;;  %9996 = vmatprep.mubr.msk.f32.mxu0 %vm13090_vm0, %v19497_v44  ;;  %v19719_v38 = vld [vmem:[#allocation112_spill] sm:$0xff] }
 0x29f   : > { %10211 = vmatprep.mubr.msk.f32.mxu1 %vm13090_vm0, %v19497_v44  ;;  %v19720_v61 = vand.u32 4294901760, %v19713_v12 }
 0x2a0   : > { %19715 = vst [vmem:[#allocation67_spill] sm:$0xff] %v15041_v4  ;;  %v1259_v62 = vpop.f32.mrb[124].mxu0  ;;  %v19722_v4 = vld [vmem:[#allocation126_spill] sm:$0xff] }
 0x2a1   : > { %v1770_v18 = vpop.f32.mrb[120].mxu1  ;;  %9997 = vmatmul.mubr.f32.gmra.mrb[230].mxu0 %v19719_v38  ;;  %v9586_v21 = vpop.f32.mrb[125].mxu0 }
 0x2a2   : > { %v15050_v39 = vadd.f32 %v1770_v18, %v1239_v49  ;;  %v9801_v14 = vpop.f32.mrb[121].mxu1  ;;  %10212 = vmatmul.mubr.f32.gmra.mrb[226].mxu1 %v19720_v61  ;;  %9999 = vmatprep.mubr.msk.f32.mxu0 %vm13090_vm0, %v19497_v44 }
 0x2a3   : > { %10214 = vmatprep.mubr.msk.f32.mxu1 %vm13090_vm0, %v19497_v44  ;;  %v19723_v14 = vld [vmem:[#allocation115_spill] sm:$0xff] }
 0x2a4   : > { %19718 = vst [vmem:[#allocation69_spill] sm:$0xff] %v15050_v39  ;;  %v1886_v25 = vpop.f32.mrb[126].mxu0  ;;  %v19724_v39 = vand.u32 4294901760, %v19716_v50 }
 0x2a5   : > { %v1776_v16 = vpop.f32.mrb[122].mxu1  ;;  %v1887_v49 = vadd.f32 %v1886_v25, %v19722_v4  ;;  %10000 = vmatmul.mubr.f32.gmra.mrb[232].mxu0 %v19723_v14  ;;  %v9842_v12 = vpop.f32.mrb[127].mxu0  ;;  %v19727_v25 = vld [vmem:[#allocation117_spill] sm:$0xff] }
 0x2a6   : > { %v15059_v13 = vadd.f32 %v1776_v16, %v1249_v46  ;;  %v9804_v18 = vpop.f32.mrb[123].mxu1  ;;  %10215 = vmatmul.mubr.f32.gmra.mrb[228].mxu1 %v19724_v39  ;;  %10002 = vmatprep.mubr.msk.f32.mxu0 %vm13090_vm0, %v19497_v44  ;;  %v19726_v46 = vld [vmem:[#allocation128_spill] sm:$0xff] }
 0x2a7   : > { %10217 = vmatprep.mubr.msk.f32.mxu1 %vm13090_vm0, %v19497_v44  ;;  %v19728_v18 = vand.u32 4294901760, %v19719_v38 }
 0x2a8   : > { %19721 = vst [vmem:[#allocation70_spill] sm:$0xff] %v15059_v13  ;;  %v1893_v21 = vpop.f32.mrb[128].mxu0 }
 0x2a9   : > { %v1782_v61 = vpop.f32.mrb[124].mxu1  ;;  %v1894_v16 = vadd.f32 %v1893_v21, %v19726_v46  ;;  %10003 = vmatmul.mubr.f32.gmra.mrb[234].mxu0 %v19727_v25  ;;  %v9845_v50 = vpop.f32.mrb[129].mxu0  ;;  %v19730_v21 = vld [vmem:[#allocation118_spill] sm:$0xff] }
 0x2aa   : > { %v15069_v2 = vadd.f32 %v1782_v61, %v1259_v62  ;;  %v9807_v4 = vpop.f32.mrb[125].mxu1  ;;  %10218 = vmatmul.mubr.f32.gmra.mrb[230].mxu1 %v19728_v18  ;;  %10005 = vmatprep.mubr.msk.f32.mxu0 %vm13090_vm0, %v19497_v44 }
 0x2ab   : > { %10220 = vmatprep.mubr.msk.f32.mxu1 %vm13090_vm0, %v19497_v44  ;;  %v19731_v4 = vand.u32 4294901760, %v19723_v14 }
 0x2ac   : > { %19725 = vst [vmem:[#allocation72_spill] sm:$0xff] %v15069_v2  ;;  %v1900_v39 = vpop.f32.mrb[130].mxu0 }
 0x2ad   : > { %v2409_v12 = vpop.f32.mrb[126].mxu1  ;;  %v1901_v62 = vadd.f32 %v1900_v39, %v14466_v43  ;;  %10006 = vmatmul.mubr.f32.gmra.mrb[236].mxu0 %v19730_v21  ;;  %v9848_v38 = vpop.f32.mrb[131].mxu0 }
 0x2ae   : > { %v15080_v61 = vadd.f32 %v2409_v12, %v1887_v49  ;;  %v10063_v46 = vpop.f32.mrb[127].mxu1  ;;  %10221 = vmatmul.mubr.f32.gmra.mrb[232].mxu1 %v19731_v4  ;;  %10008 = vmatprep.mubr.msk.f32.mxu0 %vm13090_vm0, %v19497_v44  ;;  %v19733_v49 = vld [vmem:[#allocation120_spill] sm:$0xff]  ;;  %v19734_v12 = vand.u32 4294901760, %v19727_v25 }
 0x2af   : > { %10223 = vmatprep.mubr.msk.f32.mxu1 %vm13090_vm0, %v19497_v44 }
 0x2b0   : > { %19729 = vst [vmem:[#allocation74_spill] sm:$0xff] %v15080_v61  ;;  %v1907_v18 = vpop.f32.mrb[132].mxu0 }
 0x2b1   : > { %v2417_v50 = vpop.f32.mrb[128].mxu1  ;;  %v1908_v2 = vadd.f32 %v1907_v18, %v14479_v37  ;;  %10009 = vmatmul.mubr.f32.gmra.mrb[238].mxu0 %v19733_v49  ;;  %v9851_v14 = vpop.f32.mrb[133].mxu0 }
 0x2b2   : > { %v15090_v43 = vadd.f32 %v2417_v50, %v1894_v16  ;;  %v10066_v39 = vpop.f32.mrb[129].mxu1  ;;  %10224 = vmatmul.mubr.f32.gmra.mrb[234].mxu1 %v19734_v12  ;;  %10011 = vmatprep.mubr.msk.f32.mxu0 %vm13090_vm0, %v19497_v44  ;;  %v19736_v16 = vld [vmem:[#allocation123_spill] sm:$0xff]  ;;  %v19737_v50 = vand.u32 4294901760, %v19730_v21 }
 0x2b3   : > { %10226 = vmatprep.mubr.msk.f32.mxu1 %vm13090_vm0, %v19497_v44 }
 0x2b4   : > { %19732 = vst [vmem:[#allocation76_spill] sm:$0xff] %v15090_v43  ;;  %v1914_v46 = vpop.f32.mrb[134].mxu0 }
 0x2b5   : > { %v2425_v4 = vpop.f32.mrb[130].mxu1  ;;  %v1915_v38 = vadd.f32 %v1914_v46, %v14493_v20  ;;  %10012 = vmatmul.mubr.f32.gmra.mrb[240].mxu0 %v19736_v16  ;;  %v9854_v25 = vpop.f32.mrb[135].mxu0 }
 0x2b6   : > { %v15100_v37 = vadd.f32 %v2425_v4, %v1901_v62  ;;  %v10069_v18 = vpop.f32.mrb[131].mxu1  ;;  %10227 = vmatmul.mubr.f32.gmra.mrb[236].mxu1 %v19737_v50  ;;  %10014 = vmatprep.mubr.msk.f32.mxu0 %vm13090_vm0, %v19497_v44  ;;  %v19739_v62 = vld [vmem:[#allocation124_spill] sm:$0xff]  ;;  %v19740_v4 = vand.u32 4294901760, %v19733_v49  ;;  %v15117_v50 = vld [vmem:[#allocation8 + $0x8] sm:$0xff] }
 0x2b7   : > { %10229 = vmatprep.mubr.msk.f32.mxu1 %vm13090_vm0, %v19497_v44  ;;  %v15115_v18 = vld [vmem:[#allocation8] sm:$0xff] }
 0x2b8   : > { %19735 = vst [vmem:[#allocation79_spill] sm:$0xff] %v15100_v37  ;;  %v1921_v39 = vpop.f32.mrb[136].mxu0  ;;  %v3860_v25 = vand.u32 4294901760, %v15115_v18  ;;  %v15137_v37 = vld [vmem:[#allocation8 + $0x18] sm:$0xff] }
 0x2b9   : > { %v2433_v12 = vpop.f32.mrb[132].mxu1  ;;  %v1922_v14 = vadd.f32 %v1921_v39, %v14504_v63  ;;  %10015 = vmatmul.mubr.f32.gmra.mrb[242].mxu0 %v19739_v62  ;;  %v9857_v21 = vpop.f32.mrb[137].mxu0  ;;  %v3863_v39 = vand.u32 4294901760, %v15117_v50  ;;  %v3869_v61 = vand.u32 4294901760, %v15137_v37 }
 0x2ba   : > { %v15110_v20 = vadd.f32 %v2433_v12, %v1908_v2  ;;  %v10072_v46 = vpop.f32.mrb[133].mxu1  ;;  %10230 = vmatmul.mubr.f32.gmra.mrb[238].mxu1 %v19740_v4  ;;  %10017 = vmatprep.mubr.msk.f32.mxu0 %vm13090_vm0, %v19497_v44  ;;  %v19742_v4 = vand.u32 4294901760, %v19736_v16 }
 0x2bb   : > { %10232 = vmatprep.mubr.msk.f32.mxu1 %vm13090_vm0, %v19497_v44 }
 0x2bc   : > { %19738 = vst [vmem:[#allocation80_spill] sm:$0xff] %v15110_v20  ;;  %v1928_v63 = vpop.f32.mrb[138].mxu0  ;;  %v15131_v20 = vld [vmem:[#allocation8 + $0x10] sm:$0xff] }
 0x2bd   : > { %v2441_v2 = vpop.f32.mrb[134].mxu1  ;;  %v1929_v49 = vadd.f32 %v1928_v63, %v14514_v6  ;;  %10018 = vmatmul.mubr.f32.gmra.mrb[244].mxu0 %v14431_v29  ;;  %v9860_v21 = vpop.f32.mrb[139].mxu0  ;;  %v15140_v63 = vsub.f32 %v15115_v18, %v3860_v25  ;;  %v19155_v16 = vand.u32 4294901760, %v15131_v20  ;;  %v15157_v18 = vld [vmem:[#allocation8 + $0x20] sm:$0xff] }
 0x2be   : > { %v15126_v12 = vadd.f32 %v2441_v2, %v1915_v38  ;;  %v10075_v46 = vpop.f32.mrb[135].mxu1  ;;  %10233 = vmatmul.mubr.f32.gmra.mrb[240].mxu1 %v19742_v4  ;;  %10020 = vmatprep.mubr.msk.f32.mxu0 %vm13090_vm0, %v19497_v44  ;;  %v15143_v2 = vsub.f32 %v15117_v50, %v3863_v39 }
 0x2bf   : > { %10235 = vmatprep.mubr.msk.f32.mxu1 %vm13090_vm0, %v19497_v44  ;;  %19743 = vst [vmem:[#allocation85_spill] sm:$0xff] %v15140_v63 }
 0x2c0   : > { %19741 = vst [vmem:[#allocation82_spill] sm:$0xff] %v15126_v12  ;;  %v1935_v6 = vpop.f32.mrb[140].mxu0  ;;  %19744 = vst [vmem:[#allocation86_spill] sm:$0xff] %v15143_v2  ;;  %v19746_v12 = vand.u32 4294901760, %v19739_v62  ;;  %v19158_v62 = vand.u32 4294901760, %v15143_v2 }
 0x2c1   : > { %v2449_v38 = vpop.f32.mrb[136].mxu1  ;;  %v1936_v46 = vadd.f32 %v1935_v6, %v14521_v57  ;;  %10021 = vmatmul.mubr.f32.gmra.mrb[246].mxu0 %v14454_v8  ;;  %v9863_v43 = vpop.f32.mrb[141].mxu0  ;;  %v15159_v57 = vld [vmem:[#allocation8 + $0x28] sm:$0xff]  ;;  %v15175_v6 = vsub.f32 %v15137_v37, %v3869_v61  ;;  %v15215_v8 = vpack.c.bf16 %v3863_v39, %v3860_v25  ;;  %v19760_v25 = vand.u32 4294901760, %v14471_v51  ;;  %v19761_v39 = vld [vmem:[#allocation21_spill] sm:$0xff] }
 0x2c2   : > { %v15147_v4 = vadd.f32 %v2449_v38, %v1922_v14  ;;  %v10078_v21 = vpop.f32.mrb[137].mxu1  ;;  %10236 = vmatmul.mubr.f32.gmra.mrb[242].mxu1 %v19746_v12  ;;  %10023 = vmatprep.mubr.msk.f32.mxu0 %vm13090_vm0, %v19497_v44  ;;  %v15166_v43 = vsub.f32 %v15131_v20, %v19155_v16  ;;  %v15192_v16 = vld [vmem:[#allocation8 + $0x38] sm:$0xff] }
 0x2c3   : > { %10238 = vmatprep.mubr.msk.f32.mxu1 %vm13090_vm0, %v19497_v44  ;;  %19750 = vst [vmem:[#allocation94_spill] sm:$0xff] %v15175_v6  ;;  %19758 = vst [vmem:[#allocation102_spill] sm:$0xff] %v15215_v8 }
 0x2c4   : > { %19745 = vst [vmem:[#allocation89_spill] sm:$0xff] %v15147_v4  ;;  %v1942_v14 = vpop.f32.mrb[142].mxu0  ;;  %19747 = vst [vmem:[#allocation90_spill] sm:$0xff] %v15166_v43  ;;  %v19749_v4 = vand.u32 4294901760, %v14431_v29 }
 0x2c5   : > { %v2457_v50 = vpop.f32.mrb[138].mxu1  ;;  %v1943_v12 = vadd.f32 %v1942_v14, %v14532_v1  ;;  %10024 = vmatmul.mubr.f32.gmra.mrb[248].mxu0 %v14471_v51  ;;  %v9866_v13 = vpop.f32.mrb[143].mxu0  ;;  %v19763_v51 = vand.u32 4294901760, %v15131_v20 }
 0x2c6   : > { %v15169_v38 = vadd.f32 %v2457_v50, %v1929_v49  ;;  %v10081_v21 = vpop.f32.mrb[139].mxu1  ;;  %10239 = vmatmul.mubr.f32.gmra.mrb[244].mxu1 %v19749_v4  ;;  %10026 = vmatprep.mubr.msk.f32.mxu0 %vm13090_vm0, %v19497_v44  ;;  %v4581_v13 = vsub.f32 %v15143_v2, %v19158_v62  ;;  %v15190_v4 = vld [vmem:[#allocation8 + $0x30] sm:$0xff]  ;;  %v19754_v62 = vand.u32 4294901760, %v15157_v18  ;;  %v19759_v2 = vand.u32 4294901760, %v15166_v43 }
 0x2c7   : > { %10241 = vmatprep.mubr.msk.f32.mxu1 %vm13090_vm0, %v19497_v44  ;;  %v19751_v21 = vand.u32 4294901760, %v15140_v63 }
 0x2c8   : > { %19748 = vst [vmem:[#allocation92_spill] sm:$0xff] %v15169_v38  ;;  %v1949_v14 = vpop.f32.mrb[144].mxu0  ;;  %v4582_v37 = vand.u32 4294901760, %v4581_v13  ;;  %v19765_v13 = vand.u32 4294901760, %v15190_v4 }
 0x2c9   : > { %v2465_v50 = vpop.f32.mrb[140].mxu1  ;;  %v4574_v29 = vsub.f32 %v15140_v63, %v19751_v21  ;;  %v1950_v1 = vadd.f32 %v1949_v14, %v14545_v60  ;;  %10027 = vmatmul.mubr.f32.gmra.mrb[250].mxu0 %v14487_v48  ;;  %v9869_v21 = vpop.f32.mrb[145].mxu0  ;;  %v15208_v60 = vsub.f32 %v15157_v18, %v19754_v62  ;;  %v4588_v62 = vsub.f32 %v15166_v43, %v19759_v2  ;;  %v529_v43 = vld [vmem:[#allocation8 + $0x48] sm:$0xff] }
 0x2ca   : > { %v15195_v38 = vadd.f32 %v2465_v50, %v1936_v46  ;;  %v10084_v49 = vpop.f32.mrb[141].mxu1  ;;  %10242 = vmatmul.mubr.f32.gmra.mrb[246].mxu1 %v19753_v41  ;;  %10282 = vmatprep.mubr.msk.f32.mxu0 %vm13090_vm0, %v19497_v44  ;;  %v19756_v46 = vand.u32 4294901760, %v15159_v57  ;;  %v19762_v14 = vand.u32 4294901760, %v15175_v6 }
 0x2cb   : > { %10244 = vmatprep.mubr.msk.f32.mxu1 %vm13090_vm0, %v19497_v44  ;;  %19755 = vst [vmem:[#allocation98_spill] sm:$0xff] %v15208_v60  ;;  %v4575_v63 = vand.u32 4294901760, %v4574_v29 }
 0x2cc   : > { %19752 = vst [vmem:[#allocation97_spill] sm:$0xff] %v15195_v38  ;;  %v15213_v49 = vsub.f32 %v15159_v57, %v19756_v46  ;;  %v1956_v50 = vpop.f32.mrb[146].mxu0  ;;  %v4595_v29 = vsub.f32 %v15175_v6, %v19762_v14  ;;  %v19766_v14 = vand.u32 4294901760, %v15192_v16 }
 0x2cd   : > { %v2473_v21 = vpop.f32.mrb[142].mxu1  ;;  %v1957_v38 = vadd.f32 %v1956_v50, %v14558_v27  ;;  %10283 = vmatmul.mubr.f32.vlgmr.msra.gmra.mrb[252].mxu0 %v19761_v39  ;;  %v9872_v41 = vpop.f32.mrb[147].mxu0 }
 0x2ce   : > { %19757 = vst [vmem:[#allocation100_spill] sm:$0xff] %v15213_v49  ;;  %v15223_v40 = vadd.f32 %v2473_v21, %v1943_v12  ;;  %v10087_v46 = vpop.f32.mrb[143].mxu1  ;;  %10245 = vmatmul.mubr.f32.gmra.mrb[248].mxu1 %v19760_v25  ;;  %10285 = vmatprep.mubr.msk.f32.mxu0 %vm13090_vm0, %v19497_v44  ;;  %v15240_v12 = vpack.c.bf16 %v3869_v61, %v19763_v51  ;;  %v19769_v51 = vand.u32 4294901760, %v14487_v48  ;;  %v4596_v6 = vand.u32 4294901760, %v4595_v29  ;;  %v19776_v29 = vld [vmem:[#allocation25_spill] sm:$0xff] }
 0x2cf   : > { %10247 = vmatprep.mubr.msk.f32.mxu1 %vm13090_vm0, %v19497_v44  ;;  %12164 = vmatpush3.bf16.msra.mxu0 %v15215_v8  ;;  %v15245_v41 = vsub.f32 %v15190_v4, %v19765_v13  ;;  %v15250_v50 = vsub.f32 %v15192_v16, %v19766_v14  ;;  %v12187_v25 = vpack.c.bf16 %v4582_v37, %v4575_v63  ;;  %v19770_v13 = vld [vmem:[#allocation24_spill] sm:$0xff]  ;;  %v4589_v8 = vand.u32 4294901760, %v4588_v62  ;;  %v528_v14 = vld [vmem:[#allocation8 + $0x40] sm:$0xff] }
 0x2d0   : > { %19764 = vst [vmem:[#allocation105_spill] sm:$0xff] %v15240_v12  ;;  %v1963_v21 = vpop.f32.mrb[148].mxu0  ;;  %12165 = vmatprep.subr.bf16.mxu0 %v19502_v58  ;;  %v19772_v48 = vand.u32 4294901760, %v15213_v49  ;;  %v3884_v37 = vand.u32 4294901760, %v528_v14 }
 0x2d1   : > { %19767 = vst [vmem:[#allocation106_spill] sm:$0xff] %v15250_v50  ;;  %v2481_v46 = vpop.f32.mrb[144].mxu1  ;;  %v1964_v2 = vadd.f32 %v1963_v21, %v14573_v53  ;;  %10286 = vmatmul.mubr.f32.gmra.mrb[254].mxu0 %v19770_v13  ;;  %v9875_v27 = vpop.f32.mrb[149].mxu0  ;;  %v19771_v53 = vand.u32 4294901760, %v15208_v60 }
 0x2d2   : > { %v15254_v20 = vadd.f32 %v2481_v46, %v1950_v1  ;;  %v10090_v61 = vpop.f32.mrb[145].mxu1  ;;  %10248 = vmatmul.mubr.f32.gmra.mrb[250].mxu1 %v19769_v51  ;;  %10288 = vmatprep.mubr.msk.f32.mxu0 %vm13090_vm0, %v19497_v44  ;;  %v4609_v1 = vsub.f32 %v15213_v49, %v19772_v48  ;;  %v3887_v27 = vand.u32 4294901760, %v529_v43  ;;  %v19774_v51 = vand.u32 4294901760, %v15159_v57 }
 0x2d3   : > { %10503 = vmatprep.mubr.msk.f32.mxu1 %vm13090_vm0, %v19497_v44  ;;  %v4602_v63 = vsub.f32 %v15208_v60, %v19771_v53  ;;  %12167 = vmatpush3.bf16.msra.mxu0 %v15240_v12  ;;  %v19773_v61 = vand.u32 4294901760, %v15157_v18  ;;  %v15279_v60 = vsub.f32 %v528_v14, %v3884_v37  ;;  %v12190_v18 = vpack.c.bf16 %v4596_v6, %v4589_v8 }
 0x2d4   : > { %19768 = vst [vmem:[#allocation108_spill] sm:$0xff] %v15254_v20  ;;  %v1970_v21 = vpop.f32.mrb[150].mxu0  ;;  %12168 = vmatprep.subr.bf16.mxu0 %v19502_v58  ;;  %v15281_v48 = vsub.f32 %v529_v43, %v3887_v27  ;;  %v4610_v14 = vand.u32 4294901760, %v4609_v1  ;;  %v19780_v1 = vand.u32 4294901760, %v15192_v16 }
 0x2d5   : > { %v2489_v46 = vpop.f32.mrb[146].mxu1  ;;  %v15277_v53 = vpack.c.bf16 %v19774_v51, %v19773_v61  ;;  %v1971_v12 = vadd.f32 %v1970_v21, %v14589_v52  ;;  %10289 = vmatmul.mubr.f32.gmra.mrb[0].mxu0 %v19776_v29  ;;  %v9878_v20 = vpop.f32.mrb[151].mxu0  ;;  %v4603_v57 = vand.u32 4294901760, %v4602_v63  ;;  %v19777_v52 = vand.u32 4294901760, %v15245_v41  ;;  %v19781_v51 = vld [vmem:[#allocation26_spill] sm:$0xff] }
 0x2d6   : > { %v15284_v49 = vadd.f32 %v2489_v46, %v1957_v38  ;;  %v10093_v62 = vpop.f32.mrb[147].mxu1  ;;  %10504 = vmatmul.mubr.f32.vlgmr.msra.gmra.mrb[252].mxu1 %v19761_v39  ;;  %10291 = vmatprep.mubr.msk.f32.mxu0 %vm13090_vm0, %v19497_v44  ;;  %v19778_v38 = vand.u32 4294901760, %v15250_v50  ;;  %v19177_v20 = vand.u32 4294901760, %v15281_v48  ;;  %v19779_v63 = vand.u32 4294901760, %v15190_v4 }
 0x2d7   : > { %19775 = vst [vmem:[#allocation110_spill] sm:$0xff] %v15277_v53  ;;  %12188 = vmatpush3.bf16.msra.mxu1 %v12187_v25  ;;  %10506 = vmatprep.mubr.msk.f32.mxu1 %vm13090_vm0, %v19497_v44  ;;  %v4616_v43 = vsub.f32 %v15245_v41, %v19777_v52  ;;  %v19178_v25 = vand.u32 4294901760, %v15279_v60  ;;  %v12193_v4 = vpack.c.bf16 %v4610_v14, %v4603_v57 }
 0x2d8   : > { %12189 = vmatprep.subr.bf16.mxu1 %v19502_v58  ;;  %v4623_v39 = vsub.f32 %v15250_v50, %v19778_v38  ;;  %v1977_v6 = vpop.f32.mrb[152].mxu0  ;;  %12170 = vmatpush3.bf16.msra.mxu0 %v15277_v53  ;;  %v15306_v62 = vpack.c.bf16 %v19780_v1, %v19779_v63  ;;  %v15326_v57 = vpack.c.bf16 %v3887_v27, %v3884_v37 }
 0x2d9   : > { %v2497_v8 = vpop.f32.mrb[148].mxu1  ;;  %v1978_v21 = vadd.f32 %v1977_v6, %v14601_v22  ;;  %10292 = vmatmul.mubr.f32.gmra.mrb[2].mxu0 %v19781_v51  ;;  %v9881_v52 = vpop.f32.mrb[153].mxu0  ;;  %12171 = vmatprep.subr.bf16.mxu0 %v19502_v58  ;;  %v4617_v16 = vand.u32 4294901760, %v4616_v43 }
 0x2da   : > { %v15309_v46 = vadd.f32 %v2497_v8, %v1964_v2  ;;  %v10096_v61 = vpop.f32.mrb[149].mxu1  ;;  %10507 = vmatmul.mubr.f32.gmra.mrb[254].mxu1 %v19770_v13  ;;  %10294 = vmatprep.mubr.msk.f32.mxu0 %vm13090_vm0, %v19497_v44  ;;  %v4624_v22 = vand.u32 4294901760, %v4623_v39  ;;  %v4630_v2 = vsub.f32 %v15279_v60, %v19178_v25  ;;  %v4637_v13 = vsub.f32 %v15281_v48, %v19177_v20  ;;  %v19782_v39 = vld [vmem:[#allocation27_spill] sm:$0xff]  ;;  %v19783_v52 = vld [vmem:[#allocation28_spill] sm:$0xff] }
 0x2db   : > { %10509 = vmatprep.mubr.msk.f32.mxu1 %vm13090_vm0, %v19497_v44  ;;  %12191 = vmatpush3.bf16.msra.mxu1 %v12190_v18 }
 0x2dc   : > { %v1984_v38 = vpop.f32.mrb[154].mxu0  ;;  %12192 = vmatprep.subr.bf16.mxu1 %v19502_v58  ;;  %12173 = vmatpush3.bf16.msra.mxu0 %v15306_v62  ;;  %v12196_v63 = vpack.c.bf16 %v4624_v22, %v4617_v16  ;;  %v4631_v37 = vand.u32 4294901760, %v4630_v2 }
 0x2dd   : > { %v2505_v6 = vpop.f32.mrb[150].mxu1  ;;  %v1985_v18 = vadd.f32 %v1984_v38, %v14613_v32  ;;  %10295 = vmatmul.mubr.f32.gmra.mrb[4].mxu0 %v19782_v39  ;;  %v9884_v8 = vpop.f32.mrb[155].mxu0  ;;  %12174 = vmatprep.subr.bf16.mxu0 %v19502_v58  ;;  %v4638_v32 = vand.u32 4294901760, %v4637_v13  ;;  %v19784_v13 = vld [vmem:[#allocation29_spill] sm:$0xff] }
 0x2de   : > { %v15329_v14 = vadd.f32 %v2505_v6, %v1971_v12  ;;  %v10099_v43 = vpop.f32.mrb[151].mxu1  ;;  %10510 = vmatmul.mubr.f32.gmra.mrb[0].mxu1 %v19776_v29  ;;  %10297 = vmatprep.mubr.msk.f32.mxu0 %vm13090_vm0, %v19497_v44 }
 0x2df   : > { %10512 = vmatprep.mubr.msk.f32.mxu1 %vm13090_vm0, %v19497_v44  ;;  %12194 = vmatpush3.bf16.msra.mxu1 %v12193_v4  ;;  %v12199_v16 = vpack.c.bf16 %v4638_v32, %v4631_v37 }
 0x2e0   : > { %v1991_v12 = vpop.f32.mrb[156].mxu0  ;;  %12195 = vmatprep.subr.bf16.mxu1 %v19502_v58  ;;  %12176 = vmatpush3.bf16.msra.mxu0 %v15326_v57 }
 0x2e1   : > { %v2513_v27 = vpop.f32.mrb[152].mxu1  ;;  %v1992_v29 = vadd.f32 %v1991_v12, %v14624_v28  ;;  %10298 = vmatmul.mubr.f32.gmra.mrb[6].mxu0 %v19783_v52  ;;  %v9887_v4 = vpop.f32.mrb[157].mxu0  ;;  %12177 = vmatprep.subr.bf16.mxu0 %v19502_v58 }
 0x2e2   : > { %v15341_v1 = vadd.f32 %v2513_v27, %v1978_v21  ;;  %v10102_v61 = vpop.f32.mrb[153].mxu1  ;;  %10513 = vmatmul.mubr.f32.gmra.mrb[2].mxu1 %v19781_v51  ;;  %10300 = vmatprep.mubr.msk.f32.mxu0 %vm13090_vm0, %v19497_v44 }
 0x2e3   : > { %10515 = vmatprep.mubr.msk.f32.mxu1 %vm13090_vm0, %v19497_v44  ;;  %12197 = vmatpush3.bf16.msra.mxu1 %v12196_v63  ;;  %v19785_v63 = vld [vmem:[#allocation30_spill] sm:$0xff] }
 0x2e4   : > { %v1998_v22 = vpop.f32.mrb[158].mxu0  ;;  %12198 = vmatprep.subr.bf16.mxu1 %v19502_v58 }
 0x2e5   : > { %v2521_v28 = vpop.f32.mrb[154].mxu1  ;;  %v1999_v21 = vadd.f32 %v1998_v22, %v14635_v36  ;;  %10301 = vmatmul.mubr.f32.gmra.mrb[8].mxu0 %v19784_v13  ;;  %v9890_v38 = vpop.f32.mrb[159].mxu0 }
 0x2e6   : > { %v15352_v2 = vadd.f32 %v2521_v28, %v1985_v18  ;;  %v10105_v51 = vpop.f32.mrb[155].mxu1  ;;  %10516 = vmatmul.mubr.f32.gmra.mrb[4].mxu1 %v19782_v39  ;;  %10303 = vmatprep.mubr.msk.f32.mxu0 %vm13090_vm0, %v19497_v44  ;;  %v19787_v28 = vld [vmem:[#allocation32_spill] sm:$0xff] }
 0x2e7   : > { %10518 = vmatprep.mubr.msk.f32.mxu1 %vm13090_vm0, %v19497_v44  ;;  %12200 = vmatpush3.bf16.msra.mxu1 %v12199_v16  ;;  %v530_v51 = vld [vmem:[#allocation8 + $0x50] sm:$0xff] }
 0x2e8   : > { %v2005_v6 = vpop.f32.mrb[160].mxu0  ;;  %12201 = vmatprep.subr.bf16.mxu1 %v19502_v58  ;;  %v3890_v38 = vand.u32 4294901760, %v530_v51 }
 0x2e9   : > { %v2529_v43 = vpop.f32.mrb[156].mxu1  ;;  %v2006_v36 = vadd.f32 %v2005_v6, %v14646_v24  ;;  %10304 = vmatmul.mubr.f32.gmra.mrb[10].mxu0 %v19785_v63  ;;  %v9893_v39 = vpop.f32.mrb[161].mxu0 }
 0x2ea   : > { %v15362_v18 = vadd.f32 %v2529_v43, %v1992_v29  ;;  %v10108_v8 = vpop.f32.mrb[157].mxu1  ;;  %10519 = vmatmul.mubr.f32.gmra.mrb[6].mxu1 %v19783_v52  ;;  %10306 = vmatprep.mubr.msk.f32.mxu0 %vm13090_vm0, %v19497_v44  ;;  %v19786_v29 = vld [vmem:[#allocation31_spill] sm:$0xff] }
 0x2eb   : > { %10521 = vmatprep.mubr.msk.f32.mxu1 %vm13090_vm0, %v19497_v44  ;;  %v15390_v8 = vsub.f32 %v530_v51, %v3890_v38 }
 0x2ec   : > { %v2012_v37 = vpop.f32.mrb[162].mxu0 }
 0x2ed   : > { %v2537_v32 = vpop.f32.mrb[158].mxu1  ;;  %v2013_v12 = vadd.f32 %v2012_v37, %v14662_v19  ;;  %10307 = vmatmul.mubr.f32.gmra.mrb[12].mxu0 %v19786_v29  ;;  %v9896_v61 = vpop.f32.mrb[163].mxu0 }
 0x2ee   : > { %v15371_v27 = vadd.f32 %v2537_v32, %v1999_v21  ;;  %v10111_v24 = vpop.f32.mrb[159].mxu1  ;;  %10522 = vmatmul.mubr.f32.gmra.mrb[8].mxu1 %v19784_v13  ;;  %10309 = vmatprep.mubr.msk.f32.mxu0 %vm13090_vm0, %v19497_v44  ;;  %v531_v13 = vld [vmem:[#allocation8 + $0x58] sm:$0xff] }
 0x2ef   : > { %10524 = vmatprep.mubr.msk.f32.mxu1 %vm13090_vm0, %v19497_v44  ;;  %v3893_v6 = vand.u32 4294901760, %v531_v13  ;;  %v19788_v24 = vld [vmem:[#allocation33_spill] sm:$0xff] }
 0x2f0   : > { %v2019_v52 = vpop.f32.mrb[164].mxu0 }
 0x2f1   : > { %v2545_v4 = vpop.f32.mrb[160].mxu1  ;;  %v2020_v16 = vadd.f32 %v2019_v52, %v14671_v23  ;;  %10310 = vmatmul.mubr.f32.gmra.mrb[14].mxu0 %v19787_v28  ;;  %v9899_v21 = vpop.f32.mrb[165].mxu0  ;;  %v15392_v39 = vsub.f32 %v531_v13, %v3893_v6  ;;  %v19176_v52 = vand.u32 4294901760, %v15390_v8 }
 0x2f2   : > { %v15380_v22 = vadd.f32 %v2545_v4, %v2006_v36  ;;  %v10114_v19 = vpop.f32.mrb[161].mxu1  ;;  %10525 = vmatmul.mubr.f32.gmra.mrb[10].mxu1 %v19785_v63  ;;  %10312 = vmatprep.mubr.msk.f32.mxu0 %vm13090_vm0, %v19497_v44  ;;  %v15388_v36 = vpack.c.bf16 %v3893_v6, %v3890_v38  ;;  %v19789_v38 = vld [vmem:[#allocation34_spill] sm:$0xff] }
 0x2f3   : > { %10527 = vmatprep.mubr.msk.f32.mxu1 %vm13090_vm0, %v19497_v44  ;;  %v19173_v4 = vand.u32 4294901760, %v15392_v39  ;;  %v4644_v19 = vsub.f32 %v15390_v8, %v19176_v52 }
 0x2f4   : > { %v2026_v43 = vpop.f32.mrb[166].mxu0  ;;  %12179 = vmatpush3.bf16.msra.mxu0 %v15388_v36 }
 0x2f5   : > { %v2553_v23 = vpop.f32.mrb[162].mxu1  ;;  %v2027_v63 = vadd.f32 %v2026_v43, %v14680_v55  ;;  %10313 = vmatmul.mubr.f32.gmra.mrb[16].mxu0 %v19788_v24  ;;  %v9902_v61 = vpop.f32.mrb[167].mxu0  ;;  %12180 = vmatprep.subr.bf16.mxu0 %v19502_v58  ;;  %v4645_v43 = vand.u32 4294901760, %v4644_v19 }
 0x2f6   : > { %v15395_v37 = vadd.f32 %v2553_v23, %v2013_v12  ;;  %v10117_v32 = vpop.f32.mrb[163].mxu1  ;;  %10528 = vmatmul.mubr.f32.gmra.mrb[12].mxu1 %v19786_v29  ;;  %10315 = vmatprep.mubr.msk.f32.mxu0 %vm13090_vm0, %v19497_v44  ;;  %v4651_v29 = vsub.f32 %v15392_v39, %v19173_v4 }
 0x2f7   : > { %10530 = vmatprep.mubr.msk.f32.mxu1 %vm13090_vm0, %v19497_v44 }
 0x2f8   : > { %v2033_v55 = vpop.f32.mrb[168].mxu0  ;;  %v4652_v23 = vand.u32 4294901760, %v4651_v29 }
 0x2f9   : > { %v2561_v12 = vpop.f32.mrb[164].mxu1  ;;  %v2034_v21 = vadd.f32 %v2033_v55, %v14689_v35  ;;  %10316 = vmatmul.mubr.f32.gmra.mrb[18].mxu0 %v19789_v38  ;;  %v9905_v6 = vpop.f32.mrb[169].mxu0 }
 0x2fa   : > { %v15414_v51 = vadd.f32 %v2561_v12, %v2020_v16  ;;  %v10120_v13 = vpop.f32.mrb[165].mxu1  ;;  %10531 = vmatmul.mubr.f32.gmra.mrb[14].mxu1 %v19787_v28  ;;  %10318 = vmatprep.mubr.msk.f32.mxu0 %vm13090_vm0, %v19497_v44  ;;  %v12202_v4 = vpack.c.bf16 %v4652_v23, %v4645_v43  ;;  %v19790_v12 = vld [vmem:[#allocation35_spill] sm:$0xff]  ;;  %v19791_v6 = vld [vmem:[#allocation36_spill] sm:$0xff] }
 0x2fb   : > { %10533 = vmatprep.mubr.msk.f32.mxu1 %vm13090_vm0, %v19497_v44 }
 0x2fc   : > { %v2040_v32 = vpop.f32.mrb[170].mxu0  ;;  %12203 = vmatpush3.bf16.msra.mxu1 %v12202_v4 }
 0x2fd   : > { %v2569_v61 = vpop.f32.mrb[166].mxu1  ;;  %v2041_v35 = vadd.f32 %v2040_v32, %v14698_v26  ;;  %10319 = vmatmul.mubr.f32.gmra.mrb[20].mxu0 %v19790_v12  ;;  %v9908_v28 = vpop.f32.mrb[171].mxu0  ;;  %12204 = vmatprep.subr.bf16.mxu1 %v19502_v58 }
 0x2fe   : > { %v15423_v16 = vadd.f32 %v2569_v61, %v2027_v63  ;;  %v10123_v55 = vpop.f32.mrb[167].mxu1  ;;  %10534 = vmatmul.mubr.f32.gmra.mrb[16].mxu1 %v19788_v24  ;;  %10321 = vmatprep.mubr.msk.f32.mxu0 %vm13090_vm0, %v19497_v44 }
 0x2ff   : > { %10536 = vmatprep.mubr.msk.f32.mxu1 %vm13090_vm0, %v19497_v44 }
 0x300   : > { %v2047_v19 = vpop.f32.mrb[172].mxu0 }
 0x301   : > { %v2577_v29 = vpop.f32.mrb[168].mxu1  ;;  %v2048_v26 = vadd.f32 %v2047_v19, %v14707_v54  ;;  %10322 = vmatmul.mubr.f32.gmra.mrb[22].mxu0 %v19791_v6  ;;  %v9911_v24 = vpop.f32.mrb[173].mxu0 }
 0x302   : > { %v15433_v63 = vadd.f32 %v2577_v29, %v2034_v21  ;;  %v10126_v13 = vpop.f32.mrb[169].mxu1  ;;  %10537 = vmatmul.mubr.f32.gmra.mrb[18].mxu1 %v19789_v38  ;;  %10324 = vmatprep.mubr.msk.f32.mxu0 %vm13090_vm0, %v19497_v44  ;;  %v19792_v21 = vld [vmem:[#allocation37_spill] sm:$0xff] }
 0x303   : > { %10539 = vmatprep.mubr.msk.f32.mxu1 %vm13090_vm0, %v19497_v44 }
 0x304   : > { %v2054_v4 = vpop.f32.mrb[174].mxu0 }
 0x305   : > { %v2585_v43 = vpop.f32.mrb[170].mxu1  ;;  %v2055_v23 = vadd.f32 %v2054_v4, %v14716_v7  ;;  %10325 = vmatmul.mubr.f32.gmra.mrb[24].mxu0 %v19792_v21  ;;  %v9914_v61 = vpop.f32.mrb[175].mxu0 }
 0x306   : > { %v15442_v32 = vadd.f32 %v2585_v43, %v2041_v35  ;;  %v10129_v54 = vpop.f32.mrb[171].mxu1  ;;  %10540 = vmatmul.mubr.f32.gmra.mrb[20].mxu1 %v19790_v12  ;;  %10327 = vmatprep.mubr.msk.f32.mxu0 %vm13090_vm0, %v19497_v44  ;;  %v19793_v35 = vld [vmem:[#allocation38_spill] sm:$0xff] }
 0x307   : > { %10542 = vmatprep.mubr.msk.f32.mxu1 %vm13090_vm0, %v19497_v44 }
 0x308   : > { %v2061_v38 = vpop.f32.mrb[176].mxu0 }
 0x309   : > { %v2593_v55 = vpop.f32.mrb[172].mxu1  ;;  %v2062_v28 = vadd.f32 %v2061_v38, %v14725_v9  ;;  %10328 = vmatmul.mubr.f32.gmra.mrb[26].mxu0 %v19793_v35  ;;  %v9917_v29 = vpop.f32.mrb[177].mxu0 }
 0x30a   : > { %v15451_v19 = vadd.f32 %v2593_v55, %v2048_v26  ;;  %v10132_v7 = vpop.f32.mrb[173].mxu1  ;;  %10543 = vmatmul.mubr.f32.gmra.mrb[22].mxu1 %v19791_v6  ;;  %10330 = vmatprep.mubr.msk.f32.mxu0 %vm13090_vm0, %v19497_v44  ;;  %v19794_v26 = vld [vmem:[#allocation39_spill] sm:$0xff] }
 0x30b   : > { %10545 = vmatprep.mubr.msk.f32.mxu1 %vm13090_vm0, %v19497_v44  ;;  %v533_v7 = vld [vmem:[#allocation8 + $0x68] sm:$0xff] }
 0x30c   : > { %v2068_v12 = vpop.f32.mrb[178].mxu0 }
 0x30d   : > { %v2601_v13 = vpop.f32.mrb[174].mxu1  ;;  %v2069_v24 = vadd.f32 %v2068_v12, %v14739_v56  ;;  %10331 = vmatmul.mubr.f32.gmra.mrb[28].mxu0 %v19794_v26  ;;  %v9920_v43 = vpop.f32.mrb[179].mxu0  ;;  %v3899_v12 = vand.u32 4294901760, %v533_v7 }
 0x30e   : > { %v15460_v4 = vadd.f32 %v2601_v13, %v2055_v23  ;;  %v10135_v9 = vpop.f32.mrb[175].mxu1  ;;  %10546 = vmatmul.mubr.f32.gmra.mrb[24].mxu1 %v19792_v21  ;;  %10333 = vmatprep.mubr.msk.f32.mxu0 %vm13090_vm0, %v19497_v44  ;;  %v19795_v23 = vld [vmem:[#allocation40_spill] sm:$0xff]  ;;  %v532_v21 = vld [vmem:[#allocation8 + $0x60] sm:$0xff] }
 0x30f   : > { %10548 = vmatprep.mubr.msk.f32.mxu1 %vm13090_vm0, %v19497_v44  ;;  %v3896_v29 = vand.u32 4294901760, %v532_v21  ;;  %v15481_v43 = vsub.f32 %v533_v7, %v3899_v12 }
 0x310   : > { %v2075_v6 = vpop.f32.mrb[180].mxu0 }
 0x311   : > { %v2609_v54 = vpop.f32.mrb[176].mxu1  ;;  %v2076_v61 = vadd.f32 %v2075_v6, %v14748_v47  ;;  %10334 = vmatmul.mubr.f32.gmra.mrb[30].mxu0 %v19795_v23  ;;  %v9923_v55 = vpop.f32.mrb[181].mxu0  ;;  %v15479_v9 = vsub.f32 %v532_v21, %v3896_v29  ;;  %19798 = vst [vmem:[#allocation115_spill] sm:$0xff] %v15481_v43  ;;  %v19175_v7 = vand.u32 4294901760, %v15481_v43 }
 0x312   : > { %v15469_v38 = vadd.f32 %v2609_v54, %v2062_v28  ;;  %v10138_v56 = vpop.f32.mrb[177].mxu1  ;;  %10549 = vmatmul.mubr.f32.gmra.mrb[26].mxu1 %v19793_v35  ;;  %10336 = vmatprep.mubr.msk.f32.mxu0 %vm13090_vm0, %v19497_v44  ;;  %v15477_v28 = vpack.c.bf16 %v3899_v12, %v3896_v29 }
 0x313   : > { %10551 = vmatprep.mubr.msk.f32.mxu1 %vm13090_vm0, %v19497_v44  ;;  %19797 = vst [vmem:[#allocation126_spill] sm:$0xff] %v15479_v9  ;;  %v19799_v56 = vld [vmem:[#allocation43_spill] sm:$0xff]  ;;  %v19174_v21 = vand.u32 4294901760, %v15479_v9 }
 0x314   : > { %v2082_v13 = vpop.f32.mrb[182].mxu0  ;;  %19796 = vst [vmem:[#allocation112_spill] sm:$0xff] %v15477_v28  ;;  %12182 = vmatpush3.bf16.msra.mxu0 %v15477_v28 }
 0x315   : > { %v2617_v47 = vpop.f32.mrb[178].mxu1  ;;  %v2083_v35 = vadd.f32 %v2082_v13, %v14757_v33  ;;  %10337 = vmatmul.mubr.f32.gmra.mrb[32].mxu0 %v19799_v56  ;;  %v9926_v55 = vpop.f32.mrb[183].mxu0  ;;  %v4658_v29 = vsub.f32 %v15479_v9, %v19174_v21  ;;  %12183 = vmatprep.subr.bf16.mxu0 %v19502_v58 }
 0x316   : > { %v15484_v6 = vadd.f32 %v2617_v47, %v2069_v24  ;;  %v10141_v54 = vpop.f32.mrb[179].mxu1  ;;  %10552 = vmatmul.mubr.f32.gmra.mrb[28].mxu1 %v19794_v26  ;;  %10339 = vmatprep.mubr.msk.f32.mxu0 %vm13090_vm0, %v19497_v44  ;;  %v4665_v26 = vsub.f32 %v15481_v43, %v19175_v7 }
 0x317   : > { %10554 = vmatprep.mubr.msk.f32.mxu1 %vm13090_vm0, %v19497_v44  ;;  %v19800_v54 = vld [vmem:[#allocation45_spill] sm:$0xff]  ;;  %v4659_v21 = vand.u32 4294901760, %v4658_v29 }
 0x318   : > { %v2089_v33 = vpop.f32.mrb[184].mxu0  ;;  %v4666_v7 = vand.u32 4294901760, %v4665_v26 }
 0x319   : > { %v2625_v24 = vpop.f32.mrb[180].mxu1  ;;  %v2090_v12 = vadd.f32 %v2089_v33, %v14766_v15  ;;  %10340 = vmatmul.mubr.f32.gmra.mrb[34].mxu0 %v19800_v54  ;;  %v9929_v55 = vpop.f32.mrb[185].mxu0 }
 0x31a   : > { %v15503_v13 = vadd.f32 %v2625_v24, %v2076_v61  ;;  %v10144_v47 = vpop.f32.mrb[181].mxu1  ;;  %10555 = vmatmul.mubr.f32.gmra.mrb[30].mxu1 %v19795_v23  ;;  %10342 = vmatprep.mubr.msk.f32.mxu0 %vm13090_vm0, %v19497_v44  ;;  %v12205_v25 = vpack.c.bf16 %v4666_v7, %v4659_v21  ;;  %v19801_v24 = vld [vmem:[#allocation47_spill] sm:$0xff] }
 0x31b   : > { %10557 = vmatprep.mubr.msk.f32.mxu1 %vm13090_vm0, %v19497_v44 }
 0x31c   : > { %v2096_v52 = vpop.f32.mrb[186].mxu0  ;;  %12206 = vmatpush3.bf16.msra.mxu1 %v12205_v25 }
 0x31d   : > { %v2633_v20 = vpop.f32.mrb[182].mxu1  ;;  %v2097_v15 = vadd.f32 %v2096_v52, %v14775_v34  ;;  %10343 = vmatmul.mubr.f32.gmra.mrb[36].mxu0 %v19801_v24  ;;  %v9932_v23 = vpop.f32.mrb[187].mxu0  ;;  %12207 = vmatprep.subr.bf16.mxu1 %v19502_v58 }
 0x31e   : > { %v15512_v61 = vadd.f32 %v2633_v20, %v2083_v35  ;;  %v10147_v33 = vpop.f32.mrb[183].mxu1  ;;  %10558 = vmatmul.mubr.f32.gmra.mrb[32].mxu1 %v19799_v56  ;;  %10345 = vmatprep.mubr.msk.f32.mxu0 %vm13090_vm0, %v19497_v44  ;;  %v19803_v35 = vld [vmem:[#allocation49_spill] sm:$0xff] }
 0x31f   : > { %10560 = vmatprep.mubr.msk.f32.mxu1 %vm13090_vm0, %v19497_v44 }
 0x320   : > { %v2103_v29 = vpop.f32.mrb[188].mxu0 }
 0x321   : > { %v2641_v26 = vpop.f32.mrb[184].mxu1  ;;  %v2104_v34 = vadd.f32 %v2103_v29, %v14784_v3  ;;  %10346 = vmatmul.mubr.f32.gmra.mrb[38].mxu0 %v19803_v35  ;;  %v9935_v56 = vpop.f32.mrb[189].mxu0 }
 0x322   : > { %v15522_v20 = vadd.f32 %v2641_v26, %v2090_v12  ;;  %v10150_v52 = vpop.f32.mrb[185].mxu1  ;;  %10561 = vmatmul.mubr.f32.gmra.mrb[34].mxu1 %v19800_v54  ;;  %10348 = vmatprep.mubr.msk.f32.mxu0 %vm13090_vm0, %v19497_v44  ;;  %v19805_v12 = vld [vmem:[#allocation50_spill] sm:$0xff] }
 0x323   : > { %10563 = vmatprep.mubr.msk.f32.mxu1 %vm13090_vm0, %v19497_v44 }
 0x324   : > { %19802 = vst [vmem:[#allocation128_spill] sm:$0xff] %v15522_v20  ;;  %v2110_v25 = vpop.f32.mrb[190].mxu0 }
 0x325   : > { %v2649_v21 = vpop.f32.mrb[186].mxu1  ;;  %v2111_v7 = vadd.f32 %v2110_v25, %v14793_v42  ;;  %10349 = vmatmul.mubr.f32.gmra.mrb[40].mxu0 %v19805_v12  ;;  %v9938_v55 = vpop.f32.mrb[191].mxu0 }
 0x326   : > { %v15531_v47 = vadd.f32 %v2649_v21, %v2097_v15  ;;  %v10153_v3 = vpop.f32.mrb[187].mxu1  ;;  %10564 = vmatmul.mubr.f32.gmra.mrb[36].mxu1 %v19801_v24  ;;  %10351 = vmatprep.mubr.msk.f32.mxu0 %vm13090_vm0, %v19497_v44  ;;  %v19807_v15 = vld [vmem:[#allocation53_spill] sm:$0xff] }
 0x327   : > { %10566 = vmatprep.mubr.msk.f32.mxu1 %vm13090_vm0, %v19497_v44 }
 0x328   : > { %19804 = vst [vmem:[#allocation117_spill] sm:$0xff] %v15531_v47  ;;  %v2117_v54 = vpop.f32.mrb[192].mxu0 }
 0x329   : > { %v2657_v33 = vpop.f32.mrb[188].mxu1  ;;  %v2118_v23 = vadd.f32 %v2117_v54, %v14802_v5  ;;  %10352 = vmatmul.mubr.f32.gmra.mrb[42].mxu0 %v19807_v15  ;;  %v9941_v26 = vpop.f32.mrb[193].mxu0 }
 0x32a   : > { %v15540_v29 = vadd.f32 %v2657_v33, %v2104_v34  ;;  %v10156_v42 = vpop.f32.mrb[189].mxu1  ;;  %10567 = vmatmul.mubr.f32.gmra.mrb[38].mxu1 %v19803_v35  ;;  %10354 = vmatprep.mubr.msk.f32.mxu0 %vm13090_vm0, %v19497_v44  ;;  %v19809_v34 = vld [vmem:[#allocation55_spill] sm:$0xff] }
 0x32b   : > { %10569 = vmatprep.mubr.msk.f32.mxu1 %vm13090_vm0, %v19497_v44  ;;  %v535_v42 = vld [vmem:[#allocation8 + $0x78] sm:$0xff] }
 0x32c   : > { %19806 = vst [vmem:[#allocation118_spill] sm:$0xff] %v15540_v29  ;;  %v2124_v24 = vpop.f32.mrb[194].mxu0 }
 0x32d   : > { %v2665_v52 = vpop.f32.mrb[190].mxu1  ;;  %v2125_v56 = vadd.f32 %v2124_v24, %v14816_v17  ;;  %10355 = vmatmul.mubr.f32.gmra.mrb[44].mxu0 %v19809_v34  ;;  %v9944_v21 = vpop.f32.mrb[195].mxu0  ;;  %v3905_v24 = vand.u32 4294901760, %v535_v42 }
 0x32e   : > { %v15549_v25 = vadd.f32 %v2665_v52, %v2111_v7  ;;  %v10159_v5 = vpop.f32.mrb[191].mxu1  ;;  %10570 = vmatmul.mubr.f32.gmra.mrb[40].mxu1 %v19805_v12  ;;  %10357 = vmatprep.mubr.msk.f32.mxu0 %vm13090_vm0, %v19497_v44  ;;  %v19811_v7 = vld [vmem:[#allocation57_spill] sm:$0xff]  ;;  %v534_v12 = vld [vmem:[#allocation8 + $0x70] sm:$0xff] }
 0x32f   : > { %10572 = vmatprep.mubr.msk.f32.mxu1 %vm13090_vm0, %v19497_v44  ;;  %v3902_v26 = vand.u32 4294901760, %v534_v12  ;;  %v15570_v21 = vsub.f32 %v535_v42, %v3905_v24 }
 0x330   : > { %19808 = vst [vmem:[#allocation120_spill] sm:$0xff] %v15549_v25  ;;  %v2131_v35 = vpop.f32.mrb[196].mxu0 }
 0x331   : > { %v2673_v3 = vpop.f32.mrb[192].mxu1  ;;  %v2132_v55 = vadd.f32 %v2131_v35, %v14825_v59  ;;  %10358 = vmatmul.mubr.f32.gmra.mrb[46].mxu0 %v19811_v7  ;;  %v9947_v33 = vpop.f32.mrb[197].mxu0  ;;  %v15568_v5 = vsub.f32 %v534_v12, %v3902_v26  ;;  %19813 = vst [vmem:[#allocation21_spill] sm:$0xff] %v15570_v21  ;;  %v19180_v42 = vand.u32 4294901760, %v15570_v21 }
 0x332   : > { %v15558_v54 = vadd.f32 %v2673_v3, %v2118_v23  ;;  %v10162_v17 = vpop.f32.mrb[193].mxu1  ;;  %10573 = vmatmul.mubr.f32.gmra.mrb[42].mxu1 %v19807_v15  ;;  %10360 = vmatprep.mubr.msk.f32.mxu0 %vm13090_vm0, %v19497_v44  ;;  %v15566_v23 = vpack.c.bf16 %v3905_v24, %v3902_v26 }
 0x333   : > { %10575 = vmatprep.mubr.msk.f32.mxu1 %vm13090_vm0, %v19497_v44  ;;  %19812 = vst [vmem:[#allocation124_spill] sm:$0xff] %v15568_v5  ;;  %v19815_v17 = vld [vmem:[#allocation59_spill] sm:$0xff]  ;;  %v19179_v12 = vand.u32 4294901760, %v15568_v5 }
 0x334   : > { %19810 = vst [vmem:[#allocation123_spill] sm:$0xff] %v15558_v54  ;;  %v2138_v52 = vpop.f32.mrb[198].mxu0  ;;  %12185 = vmatpush3.bf16.msra.mxu0 %v15566_v23 }
 0x335   : > { %v2681_v59 = vpop.f32.mrb[194].mxu1  ;;  %v2139_v15 = vadd.f32 %v2138_v52, %v14834_v0  ;;  %10361 = vmatmul.mubr.f32.gmra.mrb[48].mxu0 %v19815_v17  ;;  %v9950_v33 = vpop.f32.mrb[199].mxu0  ;;  %v4672_v26 = vsub.f32 %v15568_v5, %v19179_v12  ;;  %12210 = vmatprep.subr.bf16.mxu0 %v19502_v58 }
 0x336   : > { %v15573_v35 = vadd.f32 %v2681_v59, %v2125_v56  ;;  %v10165_v3 = vpop.f32.mrb[195].mxu1  ;;  %10576 = vmatmul.mubr.f32.gmra.mrb[44].mxu1 %v19809_v34  ;;  %10363 = vmatprep.mubr.msk.f32.mxu0 %vm13090_vm0, %v19497_v44  ;;  %v4679_v34 = vsub.f32 %v15570_v21, %v19180_v42 }
 0x337   : > { %10578 = vmatprep.mubr.msk.f32.mxu1 %vm13090_vm0, %v19497_v44  ;;  %v19817_v3 = vld [vmem:[#allocation60_spill] sm:$0xff]  ;;  %v4673_v12 = vand.u32 4294901760, %v4672_v26 }
 0x338   : > { %19814 = vst [vmem:[#allocation24_spill] sm:$0xff] %v15573_v35  ;;  %v2145_v0 = vpop.f32.mrb[200].mxu0  ;;  %v4680_v42 = vand.u32 4294901760, %v4679_v34 }
 0x339   : > { %v2689_v56 = vpop.f32.mrb[196].mxu1  ;;  %v2146_v24 = vadd.f32 %v2145_v0, %v14843_v10  ;;  %10364 = vmatmul.mubr.f32.gmra.mrb[50].mxu0 %v19817_v3  ;;  %v9953_v33 = vpop.f32.mrb[201].mxu0 }
 0x33a   : > { %v15592_v52 = vadd.f32 %v2689_v56, %v2132_v55  ;;  %v10168_v59 = vpop.f32.mrb[197].mxu1  ;;  %10579 = vmatmul.mubr.f32.gmra.mrb[46].mxu1 %v19811_v7  ;;  %10366 = vmatprep.mubr.msk.f32.mxu0 %vm13090_vm0, %v19497_v44  ;;  %v12208_v35 = vpack.c.bf16 %v4680_v42, %v4673_v12  ;;  %v19819_v56 = vld [vmem:[#allocation63_spill] sm:$0xff] }
 0x33b   : > { %10581 = vmatprep.mubr.msk.f32.mxu1 %vm13090_vm0, %v19497_v44 }
 0x33c   : > { %19816 = vst [vmem:[#allocation25_spill] sm:$0xff] %v15592_v52  ;;  %v2152_v21 = vpop.f32.mrb[202].mxu0  ;;  %12209 = vmatpush3.bf16.msra.mxu1 %v12208_v35  ;;  %v19927_v52 = vld [vmem:[#allocation130_spill] sm:$0xff] }
 0x33d   : > { %v2697_v5 = vpop.f32.mrb[198].mxu1  ;;  %v2153_v10 = vadd.f32 %v2152_v21, %v14852_v11  ;;  %10367 = vmatmul.mubr.f32.gmra.mrb[52].mxu0 %v19819_v56  ;;  %v9956_v7 = vpop.f32.mrb[203].mxu0  ;;  %12234 = vmatprep.subr.bf16.mxu1 %v19502_v58 }
 0x33e   : > { %v15601_v55 = vadd.f32 %v2697_v5, %v2139_v15  ;;  %v10171_v0 = vpop.f32.mrb[199].mxu1  ;;  %10582 = vmatmul.mubr.f32.gmra.mrb[48].mxu1 %v19815_v17  ;;  %10369 = vmatprep.mubr.msk.f32.mxu0 %vm13090_vm0, %v19497_v44  ;;  %v19821_v15 = vld [vmem:[#allocation65_spill] sm:$0xff] }
 0x33f   : > { %10584 = vmatprep.mubr.msk.f32.mxu1 %vm13090_vm0, %v19497_v44 }
 0x340   : > { %19818 = vst [vmem:[#allocation26_spill] sm:$0xff] %v15601_v55  ;;  %v2159_v26 = vpop.f32.mrb[204].mxu0 }
 0x341   : > { %v2705_v34 = vpop.f32.mrb[200].mxu1  ;;  %v2160_v11 = vadd.f32 %v2159_v26, %v14861_v31  ;;  %10370 = vmatmul.mubr.f32.gmra.mrb[54].mxu0 %v19821_v15  ;;  %v9959_v17 = vpop.f32.mrb[205].mxu0 }
 0x342   : > { %v15611_v5 = vadd.f32 %v2705_v34, %v2146_v24  ;;  %v10174_v21 = vpop.f32.mrb[201].mxu1  ;;  %10585 = vmatmul.mubr.f32.gmra.mrb[50].mxu1 %v19817_v3  ;;  %10372 = vmatprep.mubr.msk.f32.mxu0 %vm13090_vm0, %v19497_v44  ;;  %v19823_v24 = vld [vmem:[#allocation66_spill] sm:$0xff]  ;;  %v19826_v17 = vld [vmem:[#allocation41_spill] sm:$0xff] }
 0x343   : > { %10587 = vmatprep.mubr.msk.f32.mxu1 %vm13090_vm0, %v19497_v44 }
 0x344   : > { %19820 = vst [vmem:[#allocation27_spill] sm:$0xff] %v15611_v5  ;;  %v2166_v35 = vpop.f32.mrb[206].mxu0 }
 0x345   : > { %v2713_v12 = vpop.f32.mrb[202].mxu1  ;;  %v2167_v42 = vadd.f32 %v2166_v35, %v14870_v30  ;;  %10373 = vmatmul.mubr.f32.gmra.mrb[56].mxu0 %v19823_v24  ;;  %v9962_v33 = vpop.f32.mrb[207].mxu0 }
 0x346   : > { %v15620_v59 = vadd.f32 %v2713_v12, %v2153_v10  ;;  %v10177_v31 = vpop.f32.mrb[203].mxu1  ;;  %10588 = vmatmul.mubr.f32.gmra.mrb[52].mxu1 %v19819_v56  ;;  %10375 = vmatprep.mubr.msk.f32.mxu0 %vm13090_vm0, %v19497_v44  ;;  %v19825_v10 = vld [vmem:[#allocation68_spill] sm:$0xff] }
 0x347   : > { %10590 = vmatprep.mubr.msk.f32.mxu1 %vm13090_vm0, %v19497_v44 }
 0x348   : > { %19822 = vst [vmem:[#allocation28_spill] sm:$0xff] %v15620_v59  ;;  %v2173_v3 = vpop.f32.mrb[208].mxu0 }
 0x349   : > { %v2721_v0 = vpop.f32.mrb[204].mxu1  ;;  %v2174_v7 = vadd.f32 %v2173_v3, %v14879_v45  ;;  %10376 = vmatmul.mubr.f32.gmra.mrb[58].mxu0 %v19825_v10  ;;  %v9965_v34 = vpop.f32.mrb[209].mxu0  ;;  %v19829_v3 = vld [vmem:[#allocation42_spill] sm:$0xff] }
 0x34a   : > { %v15629_v26 = vadd.f32 %v2721_v0, %v2160_v11  ;;  %v10180_v30 = vpop.f32.mrb[205].mxu1  ;;  %10591 = vmatmul.mubr.f32.gmra.mrb[54].mxu1 %v19821_v15  ;;  %10378 = vmatprep.mubr.msk.f32.mxu0 %vm13090_vm0, %v19497_v44  ;;  %v19828_v11 = vld [vmem:[#allocation71_spill] sm:$0xff]  ;;  %v19831_v34 = vld [vmem:[#allocation73_spill] sm:$0xff] }
 0x34b   : > { %10593 = vmatprep.mubr.msk.f32.mxu1 %vm13090_vm0, %v19497_v44 }
 0x34c   : > { %19824 = vst [vmem:[#allocation29_spill] sm:$0xff] %v15629_v26  ;;  %v2180_v56 = vpop.f32.mrb[210].mxu0 }
 0x34d   : > { %v2729_v21 = vpop.f32.mrb[206].mxu1  ;;  %v2181_v35 = vadd.f32 %v2180_v56, %v19826_v17  ;;  %10379 = vmatmul.mubr.f32.gmra.mrb[60].mxu0 %v19828_v11  ;;  %v9968_v31 = vpop.f32.mrb[211].mxu0  ;;  %v19832_v17 = vld [vmem:[#allocation19_spill] sm:$0xff] }
 0x34e   : > { %v15638_v12 = vadd.f32 %v2729_v21, %v2167_v42  ;;  %v10183_v45 = vpop.f32.mrb[207].mxu1  ;;  %10594 = vmatmul.mubr.f32.gmra.mrb[56].mxu1 %v19823_v24  ;;  %10381 = vmatprep.mubr.msk.f32.mxu0 %vm13090_vm0, %v19497_v44 }
 0x34f   : > { %10596 = vmatprep.mubr.msk.f32.mxu1 %vm13090_vm0, %v19497_v44 }
 0x350   : > { %19827 = vst [vmem:[#allocation30_spill] sm:$0xff] %v15638_v12  ;;  %v2187_v15 = vpop.f32.mrb[212].mxu0  ;;  %v396_v12 = vld [vmem:[%s13361_s21 + $0x10] sm:$0xff] }
 0x351   : > { %v2737_v33 = vpop.f32.mrb[208].mxu1  ;;  %v2188_v0 = vadd.f32 %v2187_v15, %v19829_v3  ;;  %10382 = vmatmul.mubr.f32.gmra.mrb[62].mxu0 %v19831_v34  ;;  %v9971_v56 = vpop.f32.mrb[213].mxu0  ;;  %v19834_v15 = vld [vmem:[#allocation75_spill] sm:$0xff] }
 0x352   : > { %v15647_v30 = vadd.f32 %v2737_v33, %v2174_v7  ;;  %v10186_v42 = vpop.f32.mrb[209].mxu1  ;;  %10597 = vmatmul.mubr.f32.gmra.mrb[58].mxu1 %v19825_v10  ;;  %10384 = vmatprep.mubr.msk.f32.mxu0 %vm13090_vm0, %v19497_v44 }
 0x353   : > { %10599 = vmatprep.mubr.msk.f32.mxu1 %vm13090_vm0, %v19497_v44  ;;  %v19835_v42 = vld [vmem:[#allocation20_spill] sm:$0xff] }
 0x354   : > { %19830 = vst [vmem:[#allocation31_spill] sm:$0xff] %v15647_v30  ;;  %v2194_v24 = vpop.f32.mrb[214].mxu0 }
 0x355   : > { %v2745_v21 = vpop.f32.mrb[210].mxu1  ;;  %v2195_v45 = vadd.f32 %v2194_v24, %v19832_v17  ;;  %10385 = vmatmul.mubr.f32.gmra.mrb[64].mxu0 %v19834_v15  ;;  %v9974_v33 = vpop.f32.mrb[215].mxu0  ;;  %v19837_v24 = vld [vmem:[#allocation77_spill] sm:$0xff] }
 0x356   : > { %v15656_v31 = vadd.f32 %v2745_v21, %v2181_v35  ;;  %v10189_v7 = vpop.f32.mrb[211].mxu1  ;;  %10600 = vmatmul.mubr.f32.gmra.mrb[60].mxu1 %v19828_v11  ;;  %10387 = vmatprep.mubr.msk.f32.mxu0 %vm13090_vm0, %v19497_v44 }
 0x357   : > { %10602 = vmatprep.mubr.msk.f32.mxu1 %vm13090_vm0, %v19497_v44  ;;  %v19838_v7 = vld [vmem:[#allocation44_spill] sm:$0xff] }
 0x358   : > { %19833 = vst [vmem:[#allocation32_spill] sm:$0xff] %v15656_v31  ;;  %v2201_v10 = vpop.f32.mrb[216].mxu0 }
 0x359   : > { %v2753_v3 = vpop.f32.mrb[212].mxu1  ;;  %v2202_v56 = vadd.f32 %v2201_v10, %v19835_v42  ;;  %10388 = vmatmul.mubr.f32.gmra.mrb[66].mxu0 %v19837_v24  ;;  %v9977_v21 = vpop.f32.mrb[217].mxu0  ;;  %v19840_v10 = vld [vmem:[#allocation78_spill] sm:$0xff] }
 0x35a   : > { %v15665_v30 = vadd.f32 %v2753_v3, %v2188_v0  ;;  %v10192_v35 = vpop.f32.mrb[213].mxu1  ;;  %10603 = vmatmul.mubr.f32.gmra.mrb[62].mxu1 %v19831_v34  ;;  %10390 = vmatprep.mubr.msk.f32.mxu0 %vm13090_vm0, %v19497_v44 }
 0x35b   : > { %10605 = vmatprep.mubr.msk.f32.mxu1 %vm13090_vm0, %v19497_v44  ;;  %v19841_v35 = vld [vmem:[#allocation46_spill] sm:$0xff] }
 0x35c   : > { %19836 = vst [vmem:[#allocation33_spill] sm:$0xff] %v15665_v30  ;;  %v2208_v11 = vpop.f32.mrb[218].mxu0 }
 0x35d   : > { %v2761_v17 = vpop.f32.mrb[214].mxu1  ;;  %v2209_v33 = vadd.f32 %v2208_v11, %v19838_v7  ;;  %10391 = vmatmul.mubr.f32.gmra.mrb[68].mxu0 %v19840_v10  ;;  %v9980_v3 = vpop.f32.mrb[219].mxu0  ;;  %v19843_v11 = vld [vmem:[#allocation81_spill] sm:$0xff] }
 0x35e   : > { %v15674_v31 = vadd.f32 %v2761_v17, %v2195_v45  ;;  %v10195_v0 = vpop.f32.mrb[215].mxu1  ;;  %10606 = vmatmul.mubr.f32.gmra.mrb[64].mxu1 %v19834_v15  ;;  %10393 = vmatprep.mubr.msk.f32.mxu0 %vm13090_vm0, %v19497_v44 }
 0x35f   : > { %10608 = vmatprep.mubr.msk.f32.mxu1 %vm13090_vm0, %v19497_v44  ;;  %v19844_v0 = vld [vmem:[#allocation48_spill] sm:$0xff] }
 0x360   : > { %19839 = vst [vmem:[#allocation34_spill] sm:$0xff] %v15674_v31  ;;  %v2215_v34 = vpop.f32.mrb[220].mxu0 }
 0x361   : > { %v2769_v42 = vpop.f32.mrb[216].mxu1  ;;  %v2216_v21 = vadd.f32 %v2215_v34, %v19841_v35  ;;  %10394 = vmatmul.mubr.f32.gmra.mrb[70].mxu0 %v19843_v11  ;;  %v9983_v17 = vpop.f32.mrb[221].mxu0  ;;  %v19846_v34 = vld [vmem:[#allocation83_spill] sm:$0xff] }
 0x362   : > { %v15683_v30 = vadd.f32 %v2769_v42, %v2202_v56  ;;  %v10198_v45 = vpop.f32.mrb[217].mxu1  ;;  %10609 = vmatmul.mubr.f32.gmra.mrb[66].mxu1 %v19837_v24  ;;  %10396 = vmatprep.mubr.msk.f32.mxu0 %vm13090_vm0, %v19497_v44 }
 0x363   : > { %10611 = vmatprep.mubr.msk.f32.mxu1 %vm13090_vm0, %v19497_v44  ;;  %v19847_v45 = vld [vmem:[#allocation51_spill] sm:$0xff] }
 0x364   : > { %19842 = vst [vmem:[#allocation35_spill] sm:$0xff] %v15683_v30  ;;  %v2222_v15 = vpop.f32.mrb[222].mxu0 }
 0x365   : > { %v2777_v7 = vpop.f32.mrb[218].mxu1  ;;  %v2223_v3 = vadd.f32 %v2222_v15, %v19844_v0  ;;  %10397 = vmatmul.mubr.f32.gmra.mrb[72].mxu0 %v19846_v34  ;;  %v9986_v42 = vpop.f32.mrb[223].mxu0  ;;  %v19849_v15 = vld [vmem:[#allocation84_spill] sm:$0xff] }
 0x366   : > { %v15692_v31 = vadd.f32 %v2777_v7, %v2209_v33  ;;  %v10201_v56 = vpop.f32.mrb[219].mxu1  ;;  %10612 = vmatmul.mubr.f32.gmra.mrb[68].mxu1 %v19840_v10  ;;  %10399 = vmatprep.mubr.msk.f32.mxu0 %vm13090_vm0, %v19497_v44 }
 0x367   : > { %10614 = vmatprep.mubr.msk.f32.mxu1 %vm13090_vm0, %v19497_v44  ;;  %v19850_v56 = vld [vmem:[#allocation52_spill] sm:$0xff] }
 0x368   : > { %19845 = vst [vmem:[#allocation36_spill] sm:$0xff] %v15692_v31  ;;  %v2229_v24 = vpop.f32.mrb[224].mxu0 }
 0x369   : > { %v2785_v35 = vpop.f32.mrb[220].mxu1  ;;  %v2230_v17 = vadd.f32 %v2229_v24, %v19847_v45  ;;  %10400 = vmatmul.mubr.f32.gmra.mrb[74].mxu0 %v19849_v15  ;;  %v9989_v7 = vpop.f32.mrb[225].mxu0  ;;  %v19852_v24 = vld [vmem:[#allocation87_spill] sm:$0xff] }
 0x36a   : > { %v15701_v30 = vadd.f32 %v2785_v35, %v2216_v21  ;;  %v10204_v33 = vpop.f32.mrb[221].mxu1  ;;  %10615 = vmatmul.mubr.f32.gmra.mrb[70].mxu1 %v19843_v11  ;;  %10402 = vmatprep.mubr.msk.f32.mxu0 %vm13090_vm0, %v19497_v44 }
 0x36b   : > { %10617 = vmatprep.mubr.msk.f32.mxu1 %vm13090_vm0, %v19497_v44  ;;  %v19853_v33 = vld [vmem:[#allocation54_spill] sm:$0xff] }
 0x36c   : > { %19848 = vst [vmem:[#allocation37_spill] sm:$0xff] %v15701_v30  ;;  %v2236_v10 = vpop.f32.mrb[226].mxu0 }
 0x36d   : > { %v2793_v0 = vpop.f32.mrb[222].mxu1  ;;  %v2237_v42 = vadd.f32 %v2236_v10, %v19850_v56  ;;  %10403 = vmatmul.mubr.f32.gmra.mrb[76].mxu0 %v19852_v24  ;;  %v9992_v35 = vpop.f32.mrb[227].mxu0  ;;  %v19855_v10 = vld [vmem:[#allocation88_spill] sm:$0xff] }
 0x36e   : > { %v15710_v31 = vadd.f32 %v2793_v0, %v2223_v3  ;;  %v10207_v21 = vpop.f32.mrb[223].mxu1  ;;  %10618 = vmatmul.mubr.f32.gmra.mrb[72].mxu1 %v19846_v34  ;;  %10405 = vmatprep.mubr.msk.f32.mxu0 %vm13090_vm0, %v19497_v44 }
 0x36f   : > { %10620 = vmatprep.mubr.msk.f32.mxu1 %vm13090_vm0, %v19497_v44  ;;  %v19856_v21 = vld [vmem:[#allocation56_spill] sm:$0xff] }
 0x370   : > { %19851 = vst [vmem:[#allocation38_spill] sm:$0xff] %v15710_v31  ;;  %v2243_v11 = vpop.f32.mrb[228].mxu0 }
 0x371   : > { %v2801_v45 = vpop.f32.mrb[224].mxu1  ;;  %v2244_v7 = vadd.f32 %v2243_v11, %v19853_v33  ;;  %10406 = vmatmul.mubr.f32.gmra.mrb[78].mxu0 %v19855_v10  ;;  %v9995_v0 = vpop.f32.mrb[229].mxu0  ;;  %v19858_v11 = vld [vmem:[#allocation91_spill] sm:$0xff] }
 0x372   : > { %v15719_v30 = vadd.f32 %v2801_v45, %v2230_v17  ;;  %v10210_v3 = vpop.f32.mrb[225].mxu1  ;;  %10621 = vmatmul.mubr.f32.gmra.mrb[74].mxu1 %v19849_v15  ;;  %10408 = vmatprep.mubr.msk.f32.mxu0 %vm13090_vm0, %v19497_v44 }
 0x373   : > { %10623 = vmatprep.mubr.msk.f32.mxu1 %vm13090_vm0, %v19497_v44  ;;  %v19859_v3 = vld [vmem:[#allocation58_spill] sm:$0xff] }
 0x374   : > { %19854 = vst [vmem:[#allocation39_spill] sm:$0xff] %v15719_v30  ;;  %v2250_v34 = vpop.f32.mrb[230].mxu0 }
 0x375   : > { %v2809_v56 = vpop.f32.mrb[226].mxu1  ;;  %v2251_v35 = vadd.f32 %v2250_v34, %v19856_v21  ;;  %10409 = vmatmul.mubr.f32.gmra.mrb[80].mxu0 %v19858_v11  ;;  %v9998_v45 = vpop.f32.mrb[231].mxu0  ;;  %v19861_v34 = vld [vmem:[#allocation93_spill] sm:$0xff] }
 0x376   : > { %v15728_v31 = vadd.f32 %v2809_v56, %v2237_v42  ;;  %v10213_v17 = vpop.f32.mrb[227].mxu1  ;;  %10624 = vmatmul.mubr.f32.gmra.mrb[76].mxu1 %v19852_v24  ;;  %10411 = vmatprep.mubr.msk.f32.mxu0 %vm13090_vm0, %v19497_v44 }
 0x377   : > { %10626 = vmatprep.mubr.msk.f32.mxu1 %vm13090_vm0, %v19497_v44  ;;  %v19862_v17 = vld [vmem:[#allocation22_spill] sm:$0xff] }
 0x378   : > { %19857 = vst [vmem:[#allocation40_spill] sm:$0xff] %v15728_v31  ;;  %v2257_v15 = vpop.f32.mrb[232].mxu0 }
 0x379   : > { %v2817_v33 = vpop.f32.mrb[228].mxu1  ;;  %v2258_v0 = vadd.f32 %v2257_v15, %v19859_v3  ;;  %10412 = vmatmul.mubr.f32.gmra.mrb[82].mxu0 %v19861_v34  ;;  %v10001_v56 = vpop.f32.mrb[233].mxu0  ;;  %v19864_v15 = vld [vmem:[#allocation95_spill] sm:$0xff] }
 0x37a   : > { %v15737_v30 = vadd.f32 %v2817_v33, %v2244_v7  ;;  %v10216_v42 = vpop.f32.mrb[229].mxu1  ;;  %10627 = vmatmul.mubr.f32.gmra.mrb[78].mxu1 %v19855_v10  ;;  %10414 = vmatprep.mubr.msk.f32.mxu0 %vm13090_vm0, %v19497_v44 }
 0x37b   : > { %10629 = vmatprep.mubr.msk.f32.mxu1 %vm13090_vm0, %v19497_v44  ;;  %v19865_v42 = vld [vmem:[#allocation23_spill] sm:$0xff] }
 0x37c   : > { %19860 = vst [vmem:[#allocation43_spill] sm:$0xff] %v15737_v30  ;;  %v2264_v24 = vpop.f32.mrb[234].mxu0 }
 0x37d   : > { %v2825_v21 = vpop.f32.mrb[230].mxu1  ;;  %v2265_v45 = vadd.f32 %v2264_v24, %v19862_v17  ;;  %10415 = vmatmul.mubr.f32.gmra.mrb[84].mxu0 %v19864_v15  ;;  %v10004_v33 = vpop.f32.mrb[235].mxu0  ;;  %v19867_v24 = vld [vmem:[#allocation96_spill] sm:$0xff] }
 0x37e   : > { %v15746_v31 = vadd.f32 %v2825_v21, %v2251_v35  ;;  %v10219_v7 = vpop.f32.mrb[231].mxu1  ;;  %10630 = vmatmul.mubr.f32.gmra.mrb[80].mxu1 %v19858_v11  ;;  %10417 = vmatprep.mubr.msk.f32.mxu0 %vm13090_vm0, %v19497_v44 }
 0x37f   : > { %10632 = vmatprep.mubr.msk.f32.mxu1 %vm13090_vm0, %v19497_v44  ;;  %v19868_v7 = vld [vmem:[#allocation61_spill] sm:$0xff] }
 0x380   : > { %19863 = vst [vmem:[#allocation45_spill] sm:$0xff] %v15746_v31  ;;  %v2271_v10 = vpop.f32.mrb[236].mxu0 }
 0x381   : > { %v2833_v3 = vpop.f32.mrb[232].mxu1  ;;  %v2272_v56 = vadd.f32 %v2271_v10, %v19865_v42  ;;  %10418 = vmatmul.mubr.f32.gmra.mrb[86].mxu0 %v19867_v24  ;;  %v10007_v21 = vpop.f32.mrb[237].mxu0  ;;  %v19870_v10 = vld [vmem:[#allocation99_spill] sm:$0xff] }
 0x382   : > { %v15755_v30 = vadd.f32 %v2833_v3, %v2258_v0  ;;  %v10222_v35 = vpop.f32.mrb[233].mxu1  ;;  %10633 = vmatmul.mubr.f32.gmra.mrb[82].mxu1 %v19861_v34  ;;  %10420 = vmatprep.mubr.msk.f32.mxu0 %vm13090_vm0, %v19497_v44 }
 0x383   : > { %10635 = vmatprep.mubr.msk.f32.mxu1 %vm13090_vm0, %v19497_v44  ;;  %v19871_v35 = vld [vmem:[#allocation62_spill] sm:$0xff] }
 0x384   : > { %19866 = vst [vmem:[#allocation47_spill] sm:$0xff] %v15755_v30  ;;  %v2278_v11 = vpop.f32.mrb[238].mxu0 }
 0x385   : > { %v2841_v17 = vpop.f32.mrb[234].mxu1  ;;  %v2279_v33 = vadd.f32 %v2278_v11, %v19868_v7  ;;  %10421 = vmatmul.mubr.f32.gmra.mrb[88].mxu0 %v19870_v10  ;;  %v10010_v3 = vpop.f32.mrb[239].mxu0  ;;  %v19873_v11 = vld [vmem:[#allocation101_spill] sm:$0xff] }
 0x386   : > { %v15764_v31 = vadd.f32 %v2841_v17, %v2265_v45  ;;  %v10225_v0 = vpop.f32.mrb[235].mxu1  ;;  %10636 = vmatmul.mubr.f32.gmra.mrb[84].mxu1 %v19864_v15  ;;  %10423 = vmatprep.mubr.msk.f32.mxu0 %vm13090_vm0, %v19497_v44 }
 0x387   : > { %10638 = vmatprep.mubr.msk.f32.mxu1 %vm13090_vm0, %v19497_v44  ;;  %v19874_v0 = vld [vmem:[#allocation64_spill] sm:$0xff] }
 0x388   : > { %19869 = vst [vmem:[#allocation49_spill] sm:$0xff] %v15764_v31  ;;  %v2285_v34 = vpop.f32.mrb[240].mxu0 }
 0x389   : > { %v2849_v42 = vpop.f32.mrb[236].mxu1  ;;  %v2286_v21 = vadd.f32 %v2285_v34, %v19871_v35  ;;  %10424 = vmatmul.mubr.f32.gmra.mrb[90].mxu0 %v19873_v11  ;;  %v10013_v17 = vpop.f32.mrb[241].mxu0  ;;  %v19876_v34 = vld [vmem:[#allocation103_spill] sm:$0xff] }
 0x38a   : > { %v15773_v30 = vadd.f32 %v2849_v42, %v2272_v56  ;;  %v10228_v45 = vpop.f32.mrb[237].mxu1  ;;  %10639 = vmatmul.mubr.f32.gmra.mrb[86].mxu1 %v19867_v24  ;;  %10426 = vmatprep.mubr.msk.f32.mxu0 %vm13090_vm0, %v19497_v44 }
 0x38b   : > { %10641 = vmatprep.mubr.msk.f32.mxu1 %vm13090_vm0, %v19497_v44  ;;  %v19877_v45 = vld [vmem:[#allocation67_spill] sm:$0xff] }
 0x38c   : > { %19872 = vst [vmem:[#allocation50_spill] sm:$0xff] %v15773_v30  ;;  %v2292_v15 = vpop.f32.mrb[242].mxu0 }
 0x38d   : > { %v2857_v7 = vpop.f32.mrb[238].mxu1  ;;  %v2293_v3 = vadd.f32 %v2292_v15, %v19874_v0  ;;  %10427 = vmatmul.mubr.f32.gmra.mrb[92].mxu0 %v19876_v34  ;;  %v10016_v42 = vpop.f32.mrb[243].mxu0  ;;  %v19879_v15 = vld [vmem:[#allocation104_spill] sm:$0xff] }
 0x38e   : > { %v15782_v31 = vadd.f32 %v2857_v7, %v2279_v33  ;;  %v10231_v56 = vpop.f32.mrb[239].mxu1  ;;  %10642 = vmatmul.mubr.f32.gmra.mrb[88].mxu1 %v19870_v10  ;;  %10429 = vmatprep.mubr.msk.f32.mxu0 %vm13090_vm0, %v19497_v44 }
 0x38f   : > { %10644 = vmatprep.mubr.msk.f32.mxu1 %vm13090_vm0, %v19497_v44  ;;  %v19880_v56 = vld [vmem:[#allocation69_spill] sm:$0xff] }
 0x390   : > { %19875 = vst [vmem:[#allocation53_spill] sm:$0xff] %v15782_v31  ;;  %v2299_v24 = vpop.f32.mrb[244].mxu0 }
 0x391   : > { %v2865_v35 = vpop.f32.mrb[240].mxu1  ;;  %v2300_v17 = vadd.f32 %v2299_v24, %v19877_v45  ;;  %10430 = vmatmul.mubr.f32.gmra.mrb[94].mxu0 %v19879_v15  ;;  %v10019_v7 = vpop.f32.mrb[245].mxu0  ;;  %v19882_v24 = vld [vmem:[#allocation107_spill] sm:$0xff] }
 0x392   : > { %v15791_v30 = vadd.f32 %v2865_v35, %v2286_v21  ;;  %v10234_v33 = vpop.f32.mrb[241].mxu1  ;;  %10645 = vmatmul.mubr.f32.gmra.mrb[90].mxu1 %v19873_v11  ;;  %10432 = vmatprep.mubr.msk.f32.mxu0 %vm13090_vm0, %v19497_v44 }
 0x393   : > { %10647 = vmatprep.mubr.msk.f32.mxu1 %vm13090_vm0, %v19497_v44  ;;  %v19883_v33 = vld [vmem:[#allocation70_spill] sm:$0xff] }
 0x394   : > { %19878 = vst [vmem:[#allocation55_spill] sm:$0xff] %v15791_v30  ;;  %v2306_v10 = vpop.f32.mrb[246].mxu0 }
 0x395   : > { %v2873_v0 = vpop.f32.mrb[242].mxu1  ;;  %v2307_v42 = vadd.f32 %v2306_v10, %v19880_v56  ;;  %10433 = vmatmul.mubr.f32.gmra.mrb[96].mxu0 %v19882_v24  ;;  %v10022_v35 = vpop.f32.mrb[247].mxu0  ;;  %v19885_v10 = vld [vmem:[#allocation109_spill] sm:$0xff] }
 0x396   : > { %v15800_v31 = vadd.f32 %v2873_v0, %v2293_v3  ;;  %v10237_v21 = vpop.f32.mrb[243].mxu1  ;;  %10648 = vmatmul.mubr.f32.gmra.mrb[92].mxu1 %v19876_v34  ;;  %10435 = vmatprep.mubr.msk.f32.mxu0 %vm13090_vm0, %v19497_v44 }
 0x397   : > { %10650 = vmatprep.mubr.msk.f32.mxu1 %vm13090_vm0, %v19497_v44  ;;  %v19886_v21 = vld [vmem:[#allocation72_spill] sm:$0xff] }
 0x398   : > { %19881 = vst [vmem:[#allocation57_spill] sm:$0xff] %v15800_v31  ;;  %v2313_v11 = vpop.f32.mrb[248].mxu0 }
 0x399   : > { %v2881_v45 = vpop.f32.mrb[244].mxu1  ;;  %v2314_v7 = vadd.f32 %v2313_v11, %v19883_v33  ;;  %10436 = vmatmul.mubr.f32.gmra.mrb[98].mxu0 %v19885_v10  ;;  %v10025_v0 = vpop.f32.mrb[249].mxu0  ;;  %v19888_v11 = vld [vmem:[#allocation111_spill] sm:$0xff] }
 0x39a   : > { %v15809_v30 = vadd.f32 %v2881_v45, %v2300_v17  ;;  %v10240_v3 = vpop.f32.mrb[245].mxu1  ;;  %10651 = vmatmul.mubr.f32.gmra.mrb[94].mxu1 %v19879_v15  ;;  %10438 = vmatprep.mubr.msk.f32.mxu0 %vm13090_vm0, %v19497_v44  ;;  %v19890_v0 = vld [vmem:[#allocation74_spill] sm:$0xff] }
 0x39b   : > { %10653 = vmatprep.mubr.msk.f32.mxu1 %vm13090_vm0, %v19497_v44 }
 0x39c   : > { %19884 = vst [vmem:[#allocation59_spill] sm:$0xff] %v15809_v30  ;;  %v2320_v34 = vpop.f32.mrb[250].mxu0 }
 0x39d   : > { %v2889_v56 = vpop.f32.mrb[246].mxu1  ;;  %v2321_v35 = vadd.f32 %v2320_v34, %v19886_v21  ;;  %10439 = vmatmul.mubr.f32.gmra.mrb[100].mxu0 %v19888_v11  ;;  %v10028_v45 = vpop.f32.mrb[251].mxu0 }
 0x39e   : > { %v15818_v31 = vadd.f32 %v2889_v56, %v2307_v42  ;;  %v10243_v17 = vpop.f32.mrb[247].mxu1  ;;  %10654 = vmatmul.mubr.f32.gmra.mrb[96].mxu1 %v19882_v24  ;;  %10441 = vmatprep.mubr.msk.f32.mxu0 %vm13090_vm0, %v19497_v44  ;;  %v19891_v56 = vld [vmem:[#allocation113_spill] sm:$0xff] }
 0x39f   : > { %10656 = vmatprep.mubr.msk.f32.mxu1 %vm13090_vm0, %v19497_v44 }
 0x3a0   : > { %19887 = vst [vmem:[#allocation60_spill] sm:$0xff] %v15818_v31  ;;  %v3024_v33 = vpop.f32.mrb[252].mxu0 }
 0x3a1   : > { %v2897_v15 = vpop.f32.mrb[248].mxu1  ;;  %v3025_v34 = vadd.f32 %v3024_v33, %v19890_v0  ;;  %10442 = vmatmul.mubr.f32.gmra.mrb[102].mxu0 %v19891_v56  ;;  %v10284_v21 = vpop.f32.mrb[253].mxu0  ;;  %v19894_v33 = vld [vmem:[#allocation114_spill] sm:$0xff] }
 0x3a2   : > { %v15826_v3 = vadd.f32 %v2897_v15, %v2314_v7  ;;  %v10246_v42 = vpop.f32.mrb[249].mxu1  ;;  %10657 = vmatmul.mubr.f32.gmra.mrb[98].mxu1 %v19885_v10  ;;  %10444 = vmatprep.mubr.msk.f32.mxu0 %vm13090_vm0, %v19497_v44  ;;  %v19893_v7 = vld [vmem:[#allocation76_spill] sm:$0xff]  ;;  %v19895_v21 = vld [vmem:[#allocation79_spill] sm:$0xff] }
 0x3a3   : > { %10659 = vmatprep.mubr.msk.f32.mxu1 %vm13090_vm0, %v19497_v44 }
 0x3a4   : > { %19889 = vst [vmem:[#allocation63_spill] sm:$0xff] %v15826_v3  ;;  %v3030_v17 = vpop.f32.mrb[254].mxu0 }
 0x3a5   : > { %v2905_v24 = vpop.f32.mrb[250].mxu1  ;;  %v3031_v15 = vadd.f32 %v3030_v17, %v19893_v7  ;;  %10445 = vmatmul.mubr.f32.gmra.mrb[104].mxu0 %v19894_v33  ;;  %v10287_v0 = vpop.f32.mrb[255].mxu0 }
 0x3a6   : > { %v15835_v45 = vadd.f32 %v2905_v24, %v2321_v35  ;;  %v10249_v3 = vpop.f32.mrb[251].mxu1  ;;  %10660 = vmatmul.mubr.f32.gmra.mrb[100].mxu1 %v19888_v11  ;;  %10447 = vmatprep.mubr.msk.f32.mxu0 %vm13090_vm0, %v19497_v44  ;;  %v19897_v24 = vld [vmem:[#allocation116_spill] sm:$0xff] }
 0x3a7   : > { %10662 = vmatprep.mubr.msk.f32.mxu1 %vm13090_vm0, %v19497_v44  ;;  %v19898_v0 = vld [vmem:[#allocation80_spill] sm:$0xff] }
 0x3a8   : > { %19892 = vst [vmem:[#allocation65_spill] sm:$0xff] %v15835_v45  ;;  %v3036_v10 = vpop.f32.mrb[0].mxu0 }
 0x3a9   : > { %v3483_v42 = vpop.f32.mrb[252].mxu1  ;;  %v3037_v31 = vadd.f32 %v3036_v10, %v19895_v21  ;;  %10448 = vmatmul.mubr.f32.gmra.mrb[106].mxu0 %v19897_v24  ;;  %v10290_v11 = vpop.f32.mrb[1].mxu0 }
 0x3aa   : > { %v15845_v35 = vadd.f32 %v3483_v42, %v3025_v34  ;;  %v10505_v3 = vpop.f32.mrb[253].mxu1  ;;  %10663 = vmatmul.mubr.f32.gmra.mrb[102].mxu1 %v19891_v56  ;;  %10450 = vmatprep.mubr.msk.f32.mxu0 %vm13090_vm0, %v19497_v44  ;;  %v19900_v34 = vld [vmem:[#allocation119_spill] sm:$0xff]  ;;  %v394_v11 = vld [vmem:[%s13361_s21] sm:$0xff] }
 0x3ab   : > { %10665 = vmatprep.mubr.msk.f32.mxu1 %vm13090_vm0, %v19497_v44 }
 0x3ac   : > { %19896 = vst [vmem:[#allocation66_spill] sm:$0xff] %v15845_v35  ;;  %v3042_v17 = vpop.f32.mrb[2].mxu0  ;;  %v19901_v35 = vld [vmem:[#allocation82_spill] sm:$0xff] }
 0x3ad   : > { %v3489_v7 = vpop.f32.mrb[254].mxu1  ;;  %v3043_v45 = vadd.f32 %v3042_v17, %v19898_v0  ;;  %10451 = vmatmul.mubr.f32.gmra.mrb[108].mxu0 %v19900_v34  ;;  %v10293_v56 = vpop.f32.mrb[3].mxu0  ;;  %v15872_v0 = vand.u32 4294901760, %v394_v11 }
 0x3ae   : > { %v15854_v10 = vadd.f32 %v3489_v7, %v3031_v15  ;;  %v10508_v42 = vpop.f32.mrb[255].mxu1  ;;  %10666 = vmatmul.mubr.f32.gmra.mrb[104].mxu1 %v19894_v33  ;;  %10453 = vmatprep.mubr.msk.f32.mxu0 %vm13090_vm0, %v19497_v44  ;;  %v19903_v15 = vld [vmem:[#allocation121_spill] sm:$0xff] }
 0x3af   : > { %10668 = vmatprep.mubr.msk.f32.mxu1 %vm13090_vm0, %v19497_v44  ;;  %19904 = vst [vmem:[#allocation71_spill] sm:$0xff] %v15872_v0 }
 0x3b0   : > { %19899 = vst [vmem:[#allocation68_spill] sm:$0xff] %v15854_v10  ;;  %v3048_v21 = vpop.f32.mrb[4].mxu0 }
 0x3b1   : > { %v3495_v3 = vpop.f32.mrb[0].mxu1  ;;  %v3049_v30 = vadd.f32 %v3048_v21, %v19901_v35  ;;  %10454 = vmatmul.mubr.f32.gmra.mrb[110].mxu0 %v19903_v15  ;;  %v10296_v33 = vpop.f32.mrb[5].mxu0  ;;  %v19905_v35 = vld [vmem:[#allocation89_spill] sm:$0xff] }
 0x3b2   : > { %v15864_v17 = vadd.f32 %v3495_v3, %v3037_v31  ;;  %v10511_v7 = vpop.f32.mrb[1].mxu1  ;;  %10669 = vmatmul.mubr.f32.gmra.mrb[106].mxu1 %v19897_v24  ;;  %10456 = vmatprep.mubr.msk.f32.mxu0 %vm13090_vm0, %v19497_v44  ;;  %v19907_v3 = vld [vmem:[#allocation122_spill] sm:$0xff] }
 0x3b3   : > { %10671 = vmatprep.mubr.msk.f32.mxu1 %vm13090_vm0, %v19497_v44  ;;  %v395_v33 = vld [vmem:[%s13361_s21 + $0x8] sm:$0xff] }
 0x3b4   : > { %19902 = vst [vmem:[#allocation41_spill] sm:$0xff] %v15864_v17  ;;  %v3054_v42 = vpop.f32.mrb[6].mxu0  ;;  %v15885_v17 = vsub.f32 %v394_v11, %v15872_v0 }
 0x3b5   : > { %v3501_v56 = vpop.f32.mrb[2].mxu1  ;;  %v3055_v31 = vadd.f32 %v3054_v42, %v19905_v35  ;;  %10457 = vmatmul.mubr.f32.gmra.mrb[112].mxu0 %v19907_v3  ;;  %v10299_v24 = vpop.f32.mrb[7].mxu0  ;;  %v19910_v35 = vld [vmem:[#allocation92_spill] sm:$0xff] }
 0x3b6   : > { %v15875_v21 = vadd.f32 %v3501_v56, %v3043_v45  ;;  %v10514_v7 = vpop.f32.mrb[3].mxu1  ;;  %10672 = vmatmul.mubr.f32.gmra.mrb[108].mxu1 %v19900_v34  ;;  %10459 = vmatprep.mubr.msk.f32.mxu0 %vm13090_vm0, %v19497_v44  ;;  %19908 = vst [vmem:[#allocation73_spill] sm:$0xff] %v15885_v17  ;;  %v15887_v56 = vand.u32 4294901760, %v395_v33  ;;  %v19912_v34 = vld [vmem:[#allocation125_spill] sm:$0xff] }
 0x3b7   : > { %10674 = vmatprep.mubr.msk.f32.mxu1 %vm13090_vm0, %v19497_v44 }
 0x3b8   : > { %19906 = vst [vmem:[#allocation42_spill] sm:$0xff] %v15875_v21  ;;  %v3060_v42 = vpop.f32.mrb[8].mxu0  ;;  %19909 = vst [vmem:[#allocation19_spill] sm:$0xff] %v15887_v56  ;;  %v15909_v5 = vsub.f32 %v395_v33, %v15887_v56  ;;  %v19921_v33 = vld [vmem:[#allocation129_spill] sm:$0xff] }
 0x3b9   : > { %v3507_v45 = vpop.f32.mrb[4].mxu1  ;;  %v3061_v7 = vadd.f32 %v3060_v42, %v19910_v35  ;;  %10460 = vmatmul.mubr.f32.gmra.mrb[114].mxu0 %v19912_v34  ;;  %v10302_v10 = vpop.f32.mrb[9].mxu0  ;;  %v397_v42 = vld [vmem:[%s13361_s21 + $0x18] sm:$0xff] }
 0x3ba   : > { %v15890_v21 = vadd.f32 %v3507_v45, %v3049_v30  ;;  %v10517_v24 = vpop.f32.mrb[5].mxu1  ;;  %10675 = vmatmul.mubr.f32.gmra.mrb[110].mxu1 %v19903_v15  ;;  %10462 = vmatprep.mubr.msk.f32.mxu0 %vm13090_vm0, %v19497_v44  ;;  %v15900_v30 = vand.u32 4294901760, %v396_v12  ;;  %v19914_v45 = vld [vmem:[#allocation97_spill] sm:$0xff]  ;;  %v19916_v10 = vld [vmem:[#allocation127_spill] sm:$0xff]  ;;  %19917 = vst [vmem:[#allocation44_spill] sm:$0xff] %v15909_v5  ;;  %v15915_v11 = vand.u32 4294901760, %v397_v42 }
 0x3bb   : > { %10677 = vmatprep.mubr.msk.f32.mxu1 %vm13090_vm0, %v19497_v44  ;;  %v19928_v25 = vand.u32 4294901760, %v15909_v5 }
 0x3bc   : > { %19911 = vst [vmem:[#allocation75_spill] sm:$0xff] %v15890_v21  ;;  %v3066_v26 = vpop.f32.mrb[10].mxu0  ;;  %19913 = vst [vmem:[#allocation20_spill] sm:$0xff] %v15900_v30  ;;  %v15928_v54 = vsub.f32 %v396_v12, %v15900_v30 }
 0x3bd   : > { %v3513_v59 = vpop.f32.mrb[6].mxu1  ;;  %v3067_v35 = vadd.f32 %v3066_v26, %v19914_v45  ;;  %10463 = vmatmul.mubr.f32.gmra.mrb[116].mxu0 %v19916_v10  ;;  %v10305_v21 = vpop.f32.mrb[11].mxu0  ;;  %19918 = vst [vmem:[#allocation78_spill] sm:$0xff] %v15915_v11  ;;  %v3953_v29 = vsub.f32 %v15909_v5, %v19928_v25  ;;  %v400_v25 = vld [vmem:[%s13361_s21 + $0x30] sm:$0xff] }
 0x3be   : > { %v15904_v24 = vadd.f32 %v3513_v59, %v3055_v31  ;;  %v10520_v15 = vpop.f32.mrb[7].mxu1  ;;  %10678 = vmatmul.mubr.f32.gmra.mrb[112].mxu1 %v19907_v3  ;;  %10465 = vmatprep.mubr.msk.f32.mxu0 %vm13090_vm0, %v19497_v44  ;;  %v19919_v31 = vand.u32 4294901760, %v15885_v17  ;;  %19922 = vst [vmem:[#allocation81_spill] sm:$0xff] %v15928_v54  ;;  %v19933_v47 = vand.u32 4294901760, %v15928_v54 }
 0x3bf   : > { %10680 = vmatprep.mubr.msk.f32.mxu1 %vm13090_vm0, %v19497_v44  ;;  %v398_v15 = vld [vmem:[%s13361_s21 + $0x20] sm:$0xff] }
 0x3c0   : > { %19915 = vst [vmem:[#allocation77_spill] sm:$0xff] %v15904_v24  ;;  %v3072_v26 = vpop.f32.mrb[12].mxu0  ;;  %v3943_v45 = vsub.f32 %v15885_v17, %v19919_v31  ;;  %v3963_v20 = vsub.f32 %v15928_v54, %v19933_v47 }
 0x3c1   : > { %v3519_v59 = vpop.f32.mrb[8].mxu1  ;;  %v3073_v21 = vadd.f32 %v3072_v26, %v15223_v40  ;;  %10466 = vmatmul.mubr.f32.gmra.mrb[118].mxu0 %v19921_v33  ;;  %v10308_v55 = vpop.f32.mrb[13].mxu0  ;;  %v15934_v40 = vand.u32 4294901760, %v398_v15 }
 0x3c2   : > { %v15922_v3 = vadd.f32 %v3519_v59, %v3061_v7  ;;  %v10523_v24 = vpop.f32.mrb[9].mxu1  ;;  %10681 = vmatmul.mubr.f32.gmra.mrb[114].mxu1 %v19912_v34  ;;  %10468 = vmatprep.mubr.msk.f32.mxu0 %vm13090_vm0, %v19497_v44  ;;  %v3944_v59 = vand.u32 4294901760, %v3943_v45  ;;  %v399_v55 = vld [vmem:[%s13361_s21 + $0x28] sm:$0xff]  ;;  %v19925_v34 = vld [vmem:[#allocation108_spill] sm:$0xff] }
 0x3c3   : > { %10683 = vmatprep.mubr.msk.f32.mxu1 %vm13090_vm0, %v19497_v44  ;;  %19923 = vst [vmem:[#allocation48_spill] sm:$0xff] %v15934_v40  ;;  %v15937_v24 = vsub.f32 %v397_v42, %v15915_v11  ;;  %v19929_v42 = vld [vmem:[#allocation85_spill] sm:$0xff] }
 0x3c4   : > { %19920 = vst [vmem:[#allocation46_spill] sm:$0xff] %v15922_v3  ;;  %v3078_v7 = vpop.f32.mrb[14].mxu0 }
 0x3c5   : > { %v3525_v26 = vpop.f32.mrb[10].mxu1  ;;  %19924 = vst [vmem:[#allocation83_spill] sm:$0xff] %v15937_v24  ;;  %v3079_v31 = vadd.f32 %v3078_v7, %v19925_v34  ;;  %10469 = vmatmul.mubr.f32.gmra.mrb[120].mxu0 %v19927_v52  ;;  %v10311_v3 = vpop.f32.mrb[15].mxu0  ;;  %v15959_v34 = vsub.f32 %v398_v15, %v15934_v40  ;;  %v19935_v15 = vld [vmem:[#allocation94_spill] sm:$0xff] }
 0x3c6   : > { %v15941_v12 = vadd.f32 %v3525_v26, %v3067_v35  ;;  %v10526_v17 = vpop.f32.mrb[11].mxu1  ;;  %10684 = vmatmul.mubr.f32.gmra.mrb[116].mxu1 %v19916_v10  ;;  %10724 = vmatprep.mubr.msk.f32.mxu0 %vm13090_vm0, %v19497_v44  ;;  %v19930_v35 = vld [vmem:[#allocation86_spill] sm:$0xff]  ;;  %v15955_v26 = vand.u32 4294901760, %v399_v55  ;;  %v19191_v3 = vand.u32 4294901760, %v15937_v24 }
 0x3c7   : > { %10686 = vmatprep.mubr.msk.f32.mxu1 %vm13090_vm0, %v19497_v44  ;;  %v12211_v7 = vpack.c.bf16 %v19930_v35, %v19929_v42  ;;  %19932 = vst [vmem:[#allocation52_spill] sm:$0xff] %v15959_v34  ;;  %v3954_v42 = vand.u32 4294901760, %v3953_v29  ;;  %v19194_v47 = vand.u32 4294901760, %v15959_v34 }
 0x3c8   : > { %19926 = vst [vmem:[#allocation51_spill] sm:$0xff] %v15941_v12  ;;  %19931 = vst [vmem:[#allocation84_spill] sm:$0xff] %v15955_v26  ;;  %v3084_v17 = vpop.f32.mrb[16].mxu0  ;;  %v3973_v29 = vsub.f32 %v15937_v24, %v19191_v3 }
 0x3c9   : > { %v3531_v10 = vpop.f32.mrb[12].mxu1  ;;  %v3085_v45 = vadd.f32 %v3084_v17, %v15284_v49  ;;  %10725 = vmatmul.mubr.f32.vlgmr.msra.gmra.mrb[122].mxu0 %v3944_v59  ;;  %v10314_v35 = vpop.f32.mrb[17].mxu0  ;;  %v19934_v49 = vld [vmem:[#allocation90_spill] sm:$0xff] }
 0x3ca   : > { %v15963_v5 = vadd.f32 %v3531_v10, %v3073_v21  ;;  %v10529_v12 = vpop.f32.mrb[13].mxu1  ;;  %10687 = vmatmul.mubr.f32.gmra.mrb[118].mxu1 %v19921_v33  ;;  %10727 = vmatprep.mubr.msk.f32.mxu0 %vm13090_vm0, %v19497_v44  ;;  %v12214_v21 = vpack.c.bf16 %v19935_v15, %v19934_v49  ;;  %v401_v35 = vld [vmem:[%s13361_s21 + $0x38] sm:$0xff]  ;;  %v3964_v15 = vand.u32 4294901760, %v3963_v20  ;;  %v15988_v49 = vsub.f32 %v399_v55, %v15955_v26  ;;  %v19939_v20 = vld [vmem:[#allocation98_spill] sm:$0xff] }
 0x3cb   : > { %10689 = vmatprep.mubr.msk.f32.mxu1 %vm13090_vm0, %v19497_v44  ;;  %12212 = vmatpush3.bf16.msra.mxu0 %v12211_v7  ;;  %v15975_v12 = vand.u32 4294901760, %v400_v25 }
 0x3cc   : > { %v3090_v33 = vpop.f32.mrb[18].mxu0  ;;  %12213 = vmatprep.subr.bf16.mxu0 %v19502_v58  ;;  %19937 = vst [vmem:[#allocation54_spill] sm:$0xff] %v15988_v49 }
 0x3cd   : > { %19936 = vst [vmem:[#allocation87_spill] sm:$0xff] %v15975_v12  ;;  %v3537_v59 = vpop.f32.mrb[14].mxu1  ;;  %v3091_v17 = vadd.f32 %v3090_v33, %v15309_v46  ;;  %10728 = vmatmul.mubr.f32.gmra.mrb[124].mxu0 %v3954_v42  ;;  %v10317_v54 = vpop.f32.mrb[19].mxu0  ;;  %v15994_v46 = vand.u32 4294901760, %v401_v35  ;;  %v402_v42 = vld [vmem:[%s13361_s21 + $0x40] sm:$0xff] }
 0x3ce   : > { %v15984_v10 = vadd.f32 %v3537_v59, %v3079_v31  ;;  %v10532_v7 = vpop.f32.mrb[15].mxu1  ;;  %10690 = vmatmul.mubr.f32.gmra.mrb[120].mxu1 %v19927_v52  ;;  %10730 = vmatprep.mubr.msk.f32.mxu0 %vm13090_vm0, %v19497_v44  ;;  %v3974_v59 = vand.u32 4294901760, %v3973_v29  ;;  %v3983_v54 = vsub.f32 %v15959_v34, %v19194_v47  ;;  %v19940_v52 = vld [vmem:[#allocation100_spill] sm:$0xff]  ;;  %v16009_v47 = vsub.f32 %v400_v25, %v15975_v12  ;;  %v19942_v34 = vld [vmem:[#allocation102_spill] sm:$0xff] }
 0x3cf   : > { %10945 = vmatprep.mubr.msk.f32.mxu1 %vm13090_vm0, %v19497_v44  ;;  %12215 = vmatpush3.bf16.msra.mxu0 %v12214_v21  ;;  %19938 = vst [vmem:[#allocation88_spill] sm:$0xff] %v15994_v46  ;;  %v12217_v55 = vpack.c.bf16 %v19940_v52, %v19939_v20  ;;  %v12220_v25 = vpack.c.bf16 %v15250_v50, %v15245_v41 }
 0x3d0   : > { %v3096_v31 = vpop.f32.mrb[20].mxu0  ;;  %12216 = vmatprep.subr.bf16.mxu0 %v19502_v58  ;;  %19941 = vst [vmem:[#allocation56_spill] sm:$0xff] %v16009_v47 }
 0x3d1   : > { %v3543_v33 = vpop.f32.mrb[16].mxu1  ;;  %v3097_v7 = vadd.f32 %v3096_v31, %v15329_v14  ;;  %10731 = vmatmul.mubr.f32.gmra.mrb[126].mxu0 %v3964_v15  ;;  %v10320_v29 = vpop.f32.mrb[21].mxu0  ;;  %v16017_v14 = vand.u32 4294901760, %v402_v42  ;;  %v3984_v31 = vand.u32 4294901760, %v3983_v54  ;;  %v19944_v54 = vand.u32 4294901760, %v15988_v49 }
 0x3d2   : > { %v16004_v3 = vadd.f32 %v3543_v33, %v3085_v45  ;;  %v10535_v21 = vpop.f32.mrb[17].mxu1  ;;  %10946 = vmatmul.mubr.f32.vlgmr.msra.gmra.mrb[122].mxu1 %v15872_v0  ;;  %10733 = vmatprep.mubr.msk.f32.mxu0 %vm13090_vm0, %v19497_v44  ;;  %v16020_v33 = vsub.f32 %v401_v35, %v15994_v46 }
 0x3d3   : > { %12236 = vmatpush3.bf16.msra.mxu1 %v19942_v34  ;;  %10948 = vmatprep.mubr.msk.f32.mxu1 %vm13090_vm0, %v19497_v44  ;;  %19943 = vst [vmem:[#allocation91_spill] sm:$0xff] %v16017_v14  ;;  %v403_v21 = vld [vmem:[%s13361_s21 + $0x48] sm:$0xff]  ;;  %v3993_v35 = vsub.f32 %v15988_v49, %v19944_v54  ;;  %v404_v54 = vld [vmem:[%s13361_s21 + $0x50] sm:$0xff] }
 0x3d4   : > { %12237 = vmatprep.subr.bf16.mxu1 %v19502_v58  ;;  %v3102_v45 = vpop.f32.mrb[22].mxu0  ;;  %12218 = vmatpush3.bf16.msra.mxu0 %v12217_v55 }
 0x3d5   : > { %v3549_v15 = vpop.f32.mrb[18].mxu1  ;;  %v3103_v29 = vadd.f32 %v3102_v45, %v15341_v1  ;;  %10734 = vmatmul.mubr.f32.gmra.mrb[128].mxu0 %v3974_v59  ;;  %v10323_v34 = vpop.f32.mrb[23].mxu0  ;;  %v19945_v1 = vld [vmem:[#allocation105_spill] sm:$0xff]  ;;  %12219 = vmatprep.subr.bf16.mxu0 %v19502_v58  ;;  %v16043_v45 = vsub.f32 %v402_v42, %v16017_v14  ;;  %v19947_v42 = vand.u32 4294901760, %v16009_v47 }
 0x3d6   : > { %v16026_v24 = vadd.f32 %v3549_v15, %v3091_v17  ;;  %v10538_v0 = vpop.f32.mrb[19].mxu1  ;;  %10949 = vmatmul.mubr.f32.gmra.mrb[124].mxu1 %v15887_v56  ;;  %10736 = vmatprep.mubr.msk.f32.mxu0 %vm13090_vm0, %v19497_v44  ;;  %v12223_v15 = vpack.c.bf16 %v15281_v48, %v15279_v60 }
 0x3d7   : > { %10951 = vmatprep.mubr.msk.f32.mxu1 %vm13090_vm0, %v19497_v44  ;;  %12239 = vmatpush3.bf16.msra.mxu1 %v19945_v1  ;;  %v16039_v0 = vand.u32 4294901760, %v403_v21  ;;  %v3994_v1 = vand.u32 4294901760, %v3993_v35  ;;  %v4003_v50 = vsub.f32 %v16009_v47, %v19947_v42  ;;  %v19209_v35 = vand.u32 4294901760, %v16043_v45 }
 0x3d8   : > { %v3108_v17 = vpop.f32.mrb[24].mxu0  ;;  %12240 = vmatprep.subr.bf16.mxu1 %v19502_v58  ;;  %12221 = vmatpush3.bf16.msra.mxu0 %v12220_v25 }
 0x3d9   : > { %19946 = vst [vmem:[#allocation58_spill] sm:$0xff] %v16039_v0  ;;  %v3555_v34 = vpop.f32.mrb[20].mxu1  ;;  %v3109_v55 = vadd.f32 %v3108_v17, %v15352_v2  ;;  %10737 = vmatmul.mubr.f32.gmra.mrb[130].mxu0 %v3984_v31  ;;  %v10326_v59 = vpop.f32.mrb[25].mxu0  ;;  %12222 = vmatprep.subr.bf16.mxu0 %v19502_v58  ;;  %v16062_v2 = vand.u32 4294901760, %v404_v54  ;;  %v19949_v31 = vand.u32 4294901760, %v16020_v33  ;;  %v405_v17 = vld [vmem:[%s13361_s21 + $0x58] sm:$0xff] }
 0x3da   : > { %v16050_v56 = vadd.f32 %v3555_v34, %v3097_v7  ;;  %v10541_v49 = vpop.f32.mrb[21].mxu1  ;;  %10952 = vmatmul.mubr.f32.gmra.mrb[126].mxu1 %v15900_v30  ;;  %10739 = vmatprep.mubr.msk.f32.mxu0 %vm13090_vm0, %v19497_v44  ;;  %v4004_v47 = vand.u32 4294901760, %v4003_v50  ;;  %v4023_v50 = vsub.f32 %v16043_v45, %v19209_v35 }
 0x3db   : > { %10954 = vmatprep.mubr.msk.f32.mxu1 %vm13090_vm0, %v19497_v44  ;;  %12242 = vmatpush3.bf16.msra.mxu1 %v15277_v53  ;;  %19948 = vst [vmem:[#allocation93_spill] sm:$0xff] %v16062_v2  ;;  %v4013_v25 = vsub.f32 %v16020_v33, %v19949_v31  ;;  %v16075_v53 = vsub.f32 %v403_v21, %v16039_v0 }
 0x3dc   : > { %v3114_v49 = vpop.f32.mrb[26].mxu0  ;;  %12243 = vmatprep.subr.bf16.mxu1 %v19502_v58  ;;  %12224 = vmatpush3.bf16.msra.mxu0 %v12223_v15 }
 0x3dd   : > { %v3561_v7 = vpop.f32.mrb[22].mxu1  ;;  %v3115_v34 = vadd.f32 %v3114_v49, %v15362_v18  ;;  %10740 = vmatmul.mubr.f32.gmra.mrb[132].mxu0 %v3994_v1  ;;  %v10329_v30 = vpop.f32.mrb[27].mxu0  ;;  %19950 = vst [vmem:[#allocation22_spill] sm:$0xff] %v16075_v53  ;;  %12225 = vmatprep.subr.bf16.mxu0 %v19502_v58  ;;  %v16083_v18 = vand.u32 4294901760, %v405_v17  ;;  %v4014_v15 = vand.u32 4294901760, %v4013_v25  ;;  %v16096_v25 = vsub.f32 %v404_v54, %v16062_v2  ;;  %v407_v54 = vld [vmem:[%s13361_s21 + $0x68] sm:$0xff] }
 0x3de   : > { %v16071_v59 = vadd.f32 %v3561_v7, %v3103_v29  ;;  %v10544_v42 = vpop.f32.mrb[23].mxu1  ;;  %10955 = vmatmul.mubr.f32.gmra.mrb[128].mxu1 %v15915_v11  ;;  %10742 = vmatprep.mubr.msk.f32.mxu0 %vm13090_vm0, %v19497_v44  ;;  %v406_v30 = vld [vmem:[%s13361_s21 + $0x60] sm:$0xff] }
 0x3df   : > { %10957 = vmatprep.mubr.msk.f32.mxu1 %vm13090_vm0, %v19497_v44  ;;  %12245 = vmatpush3.bf16.msra.mxu1 %v15306_v62  ;;  %19951 = vst [vmem:[#allocation95_spill] sm:$0xff] %v16083_v18  ;;  %19952 = vst [vmem:[#allocation23_spill] sm:$0xff] %v16096_v25 }
 0x3e0   : > { %v3120_v29 = vpop.f32.mrb[28].mxu0  ;;  %12246 = vmatprep.subr.bf16.mxu1 %v19502_v58 }
 0x3e1   : > { %v3567_v1 = vpop.f32.mrb[24].mxu1  ;;  %v3121_v21 = vadd.f32 %v3120_v29, %v15371_v27  ;;  %10743 = vmatmul.mubr.f32.gmra.mrb[134].mxu0 %v4004_v47  ;;  %v10332_v31 = vpop.f32.mrb[29].mxu0  ;;  %v16103_v27 = vand.u32 4294901760, %v406_v30  ;;  %v4024_v29 = vand.u32 4294901760, %v4023_v50 }
 0x3e2   : > { %v16091_v49 = vadd.f32 %v3567_v1, %v3109_v55  ;;  %v10547_v7 = vpop.f32.mrb[25].mxu1  ;;  %10958 = vmatmul.mubr.f32.gmra.mrb[130].mxu1 %v15934_v40  ;;  %10745 = vmatprep.mubr.msk.f32.mxu0 %vm13090_vm0, %v19497_v44  ;;  %v16106_v1 = vsub.f32 %v405_v17, %v16083_v18  ;;  %v19955_v40 = vand.u32 4294901760, %v16075_v53 }
 0x3e3   : > { %10960 = vmatprep.mubr.msk.f32.mxu1 %vm13090_vm0, %v19497_v44  ;;  %12248 = vmatpush3.bf16.msra.mxu1 %v15326_v57  ;;  %19953 = vst [vmem:[#allocation96_spill] sm:$0xff] %v16103_v27 }
 0x3e4   : > { %v3126_v55 = vpop.f32.mrb[30].mxu0  ;;  %19954 = vst [vmem:[#allocation61_spill] sm:$0xff] %v16106_v1  ;;  %12249 = vmatprep.subr.bf16.mxu1 %v19502_v58  ;;  %v4033_v50 = vsub.f32 %v16075_v53, %v19955_v40  ;;  %v408_v40 = vld [vmem:[%s13361_s21 + $0x70] sm:$0xff]  ;;  %v19958_v53 = vand.u32 4294901760, %v16096_v25 }
 0x3e5   : > { %v3573_v47 = vpop.f32.mrb[26].mxu1  ;;  %v3127_v7 = vadd.f32 %v3126_v55, %v15380_v22  ;;  %10746 = vmatmul.mubr.f32.gmra.mrb[136].mxu0 %v4014_v15  ;;  %v10335_v42 = vpop.f32.mrb[31].mxu0  ;;  %v16123_v22 = vand.u32 4294901760, %v407_v54 }
 0x3e6   : > { %v16111_v31 = vadd.f32 %v3573_v47, %v3115_v34  ;;  %v10550_v35 = vpop.f32.mrb[27].mxu1  ;;  %10961 = vmatmul.mubr.f32.gmra.mrb[132].mxu1 %v15955_v26  ;;  %10748 = vmatprep.mubr.msk.f32.mxu0 %vm13090_vm0, %v19497_v44  ;;  %v16127_v42 = vsub.f32 %v406_v30, %v16103_v27  ;;  %v4034_v11 = vand.u32 4294901760, %v4033_v50  ;;  %v4043_v15 = vsub.f32 %v16096_v25, %v19958_v53 }
 0x3e7   : > { %10963 = vmatprep.mubr.msk.f32.mxu1 %vm13090_vm0, %v19497_v44  ;;  %12251 = vmatpush3.bf16.msra.mxu1 %v15388_v36  ;;  %19956 = vst [vmem:[#allocation99_spill] sm:$0xff] %v16123_v22  ;;  %v16150_v53 = vsub.f32 %v407_v54, %v16123_v22 }
 0x3e8   : > { %v3132_v35 = vpop.f32.mrb[32].mxu0  ;;  %19957 = vst [vmem:[#allocation62_spill] sm:$0xff] %v16127_v42  ;;  %12252 = vmatprep.subr.bf16.mxu1 %v19502_v58  ;;  %v19225_v50 = vand.u32 4294901760, %v16127_v42 }
 0x3e9   : > { %v3579_v34 = vpop.f32.mrb[28].mxu1  ;;  %v3133_v55 = vadd.f32 %v3132_v35, %v15395_v37  ;;  %10749 = vmatmul.mubr.f32.gmra.mrb[138].mxu0 %v4024_v29  ;;  %v10338_v26 = vpop.f32.mrb[33].mxu0  ;;  %v16143_v37 = vand.u32 4294901760, %v408_v40  ;;  %v19960_v29 = vand.u32 4294901760, %v16106_v1  ;;  %19961 = vst [vmem:[#allocation64_spill] sm:$0xff] %v16150_v53 }
 0x3ea   : > { %v16132_v47 = vadd.f32 %v3579_v34, %v3121_v21  ;;  %v10553_v17 = vpop.f32.mrb[29].mxu1  ;;  %10964 = vmatmul.mubr.f32.gmra.mrb[134].mxu1 %v15975_v12  ;;  %10751 = vmatprep.mubr.msk.f32.mxu0 %vm13090_vm0, %v19497_v44 }
 0x3eb   : > { %10966 = vmatprep.mubr.msk.f32.mxu1 %vm13090_vm0, %v19497_v44  ;;  %12254 = vmatpush3.bf16.msra.mxu1 %v15477_v28  ;;  %19959 = vst [vmem:[#allocation101_spill] sm:$0xff] %v16143_v37  ;;  %v4053_v26 = vsub.f32 %v16106_v1, %v19960_v29  ;;  %v409_v17 = vld [vmem:[%s13361_s21 + $0x78] sm:$0xff]  ;;  %v4044_v28 = vand.u32 4294901760, %v4043_v15  ;;  %v12226_v29 = vpack.c.bf16 %v15392_v39, %v15390_v8 }
 0x3ec   : > { %v3138_v30 = vpop.f32.mrb[34].mxu0  ;;  %12255 = vmatprep.subr.bf16.mxu1 %v19502_v58 }
 0x3ed   : > { %v3585_v21 = vpop.f32.mrb[30].mxu1  ;;  %v3139_v35 = vadd.f32 %v3138_v30, %v15414_v51  ;;  %10752 = vmatmul.mubr.f32.gmra.mrb[140].mxu0 %v4034_v11  ;;  %v10341_v25 = vpop.f32.mrb[35].mxu0  ;;  %v16165_v51 = vand.u32 4294901760, %v409_v17  ;;  %v4054_v54 = vand.u32 4294901760, %v4053_v26 }
 0x3ee   : > { %v16155_v34 = vadd.f32 %v3585_v21, %v3127_v7  ;;  %v10556_v12 = vpop.f32.mrb[31].mxu1  ;;  %10967 = vmatmul.mubr.f32.gmra.mrb[136].mxu1 %v15994_v46  ;;  %10754 = vmatprep.mubr.msk.f32.mxu0 %vm13090_vm0, %v19497_v44  ;;  %v4063_v25 = vsub.f32 %v16127_v42, %v19225_v50  ;;  %v410_v7 = vld [vmem:[%s13361_s21 + $0x80] sm:$0xff]  ;;  %v16179_v46 = vsub.f32 %v408_v40, %v16143_v37 }
 0x3ef   : > { %10969 = vmatprep.mubr.msk.f32.mxu1 %vm13090_vm0, %v19497_v44  ;;  %12227 = vmatpush3.bf16.msra.mxu0 %v12226_v29  ;;  %19962 = vst [vmem:[#allocation103_spill] sm:$0xff] %v16165_v51  ;;  %v16185_v50 = vand.u32 4294901760, %v410_v7 }
 0x3f0   : > { %12257 = vmatpush3.bf16.msra.mxu1 %v15566_v23  ;;  %v3144_v11 = vpop.f32.mrb[36].mxu0  ;;  %12228 = vmatprep.subr.bf16.mxu0 %v19502_v58  ;;  %19963 = vst [vmem:[#allocation67_spill] sm:$0xff] %v16179_v46 }
 0x3f1   : > { %v3591_v12 = vpop.f32.mrb[32].mxu1  ;;  %12282 = vmatprep.subr.bf16.mxu1 %v19502_v58  ;;  %v3145_v15 = vadd.f32 %v3144_v11, %v15423_v16  ;;  %10755 = vmatmul.mubr.f32.gmra.mrb[142].mxu0 %v4044_v28  ;;  %v10344_v29 = vpop.f32.mrb[37].mxu0  ;;  %19964 = vst [vmem:[#allocation104_spill] sm:$0xff] %v16185_v50  ;;  %v4064_v11 = vand.u32 4294901760, %v4063_v25  ;;  %v16188_v28 = vsub.f32 %v409_v17, %v16165_v51 }
 0x3f2   : > { %v16174_v30 = vadd.f32 %v3591_v12, %v3133_v55  ;;  %v10559_v21 = vpop.f32.mrb[33].mxu1  ;;  %10970 = vmatmul.mubr.f32.gmra.mrb[138].mxu1 %v16017_v14  ;;  %10757 = vmatprep.mubr.msk.f32.mxu0 %vm13090_vm0, %v19497_v44  ;;  %v411_v12 = vld [vmem:[%s13361_s21 + $0x88] sm:$0xff]  ;;  %v19966_v14 = vand.u32 4294901760, %v16150_v53 }
 0x3f3   : > { %10972 = vmatprep.mubr.msk.f32.mxu1 %vm13090_vm0, %v19497_v44  ;;  %19965 = vst [vmem:[#allocation69_spill] sm:$0xff] %v16188_v28 }
 0x3f4   : > { %v3150_v16 = vpop.f32.mrb[38].mxu0  ;;  %v4073_v42 = vsub.f32 %v16150_v53, %v19966_v14  ;;  %v19969_v53 = vand.u32 4294901760, %v16179_v46 }
 0x3f5   : > { %v3597_v55 = vpop.f32.mrb[34].mxu1  ;;  %v3151_v21 = vadd.f32 %v3150_v16, %v15433_v63  ;;  %10758 = vmatmul.mubr.f32.gmra.mrb[144].mxu0 %v4054_v54  ;;  %v10347_v26 = vpop.f32.mrb[39].mxu0  ;;  %v16203_v63 = vand.u32 4294901760, %v411_v12  ;;  %v19240_v54 = vand.u32 4294901760, %v16188_v28  ;;  %v412_v16 = vld [vmem:[%s13361_s21 + $0x90] sm:$0xff] }
 0x3f6   : > { %v16192_v40 = vadd.f32 %v3597_v55, %v3139_v35  ;;  %v10562_v29 = vpop.f32.mrb[35].mxu1  ;;  %10973 = vmatmul.mubr.f32.gmra.mrb[140].mxu1 %v16039_v0  ;;  %10760 = vmatprep.mubr.msk.f32.mxu0 %vm13090_vm0, %v19497_v44  ;;  %v16207_v26 = vsub.f32 %v410_v7, %v16185_v50  ;;  %v4074_v0 = vand.u32 4294901760, %v4073_v42  ;;  %v4083_v1 = vsub.f32 %v16179_v46, %v19969_v53 }
 0x3f7   : > { %10975 = vmatprep.mubr.msk.f32.mxu1 %vm13090_vm0, %v19497_v44  ;;  %19967 = vst [vmem:[#allocation107_spill] sm:$0xff] %v16203_v63  ;;  %v16221_v7 = vand.u32 4294901760, %v412_v16  ;;  %v16233_v46 = vsub.f32 %v411_v12, %v16203_v63 }
 0x3f8   : > { %v3156_v17 = vpop.f32.mrb[40].mxu0  ;;  %19968 = vst [vmem:[#allocation70_spill] sm:$0xff] %v16207_v26  ;;  %v19245_v42 = vand.u32 4294901760, %v16207_v26 }
 0x3f9   : > { %v3603_v35 = vpop.f32.mrb[36].mxu1  ;;  %v3157_v14 = vadd.f32 %v3156_v17, %v15442_v32  ;;  %10761 = vmatmul.mubr.f32.gmra.mrb[146].mxu0 %v4064_v11  ;;  %v10350_v25 = vpop.f32.mrb[41].mxu0  ;;  %19970 = vst [vmem:[#allocation109_spill] sm:$0xff] %v16221_v7  ;;  %v4093_v11 = vsub.f32 %v16188_v28, %v19240_v54  ;;  %19971 = vst [vmem:[#allocation72_spill] sm:$0xff] %v16233_v46  ;;  %v16251_v28 = vsub.f32 %v412_v16, %v16221_v7 }
 0x3fa   : > { %v16211_v55 = vadd.f32 %v3603_v35, %v3145_v15  ;;  %v10565_v29 = vpop.f32.mrb[37].mxu1  ;;  %10976 = vmatmul.mubr.f32.gmra.mrb[142].mxu1 %v16062_v2  ;;  %10763 = vmatprep.mubr.msk.f32.mxu0 %vm13090_vm0, %v19497_v44  ;;  %v413_v25 = vld [vmem:[%s13361_s21 + $0x98] sm:$0xff]  ;;  %v4084_v2 = vand.u32 4294901760, %v4083_v1 }
 0x3fb   : > { %10978 = vmatprep.mubr.msk.f32.mxu1 %vm13090_vm0, %v19497_v44  ;;  %v16239_v54 = vand.u32 4294901760, %v413_v25  ;;  %19973 = vst [vmem:[#allocation74_spill] sm:$0xff] %v16251_v28 }
 0x3fc   : > { %v3162_v32 = vpop.f32.mrb[42].mxu0 }
 0x3fd   : > { %v3609_v15 = vpop.f32.mrb[38].mxu1  ;;  %v3163_v53 = vadd.f32 %v3162_v32, %v15451_v19  ;;  %10764 = vmatmul.mubr.f32.gmra.mrb[148].mxu0 %v4074_v0  ;;  %v10353_v29 = vpop.f32.mrb[43].mxu0  ;;  %19972 = vst [vmem:[#allocation111_spill] sm:$0xff] %v16239_v54  ;;  %v4094_v32 = vand.u32 4294901760, %v4093_v11  ;;  %v4103_v0 = vsub.f32 %v16207_v26, %v19245_v42 }
 0x3fe   : > { %v16229_v17 = vadd.f32 %v3609_v15, %v3151_v21  ;;  %v10568_v35 = vpop.f32.mrb[39].mxu1  ;;  %10979 = vmatmul.mubr.f32.gmra.mrb[144].mxu1 %v16083_v18  ;;  %10766 = vmatprep.mubr.msk.f32.mxu0 %vm13090_vm0, %v19497_v44  ;;  %v414_v15 = vld [vmem:[%s13361_s21 + $0xa0] sm:$0xff]  ;;  %v19248_v18 = vand.u32 4294901760, %v16233_v46 }
 0x3ff   : > { %10981 = vmatprep.mubr.msk.f32.mxu1 %vm13090_vm0, %v19497_v44  ;;  %v16257_v11 = vand.u32 4294901760, %v414_v15 }
 0x400   : > { %v3168_v19 = vpop.f32.mrb[44].mxu0 }
 0x401   : > { %v3615_v21 = vpop.f32.mrb[40].mxu1  ;;  %v3169_v1 = vadd.f32 %v3168_v19, %v15460_v4  ;;  %10767 = vmatmul.mubr.f32.gmra.mrb[150].mxu0 %v4084_v2  ;;  %v10356_v29 = vpop.f32.mrb[45].mxu0  ;;  %19974 = vst [vmem:[#allocation113_spill] sm:$0xff] %v16257_v11  ;;  %v4104_v19 = vand.u32 4294901760, %v4103_v0  ;;  %v16260_v2 = vsub.f32 %v413_v25, %v16239_v54 }
 0x402   : > { %v16246_v12 = vadd.f32 %v3615_v21, %v3157_v14  ;;  %v10571_v35 = vpop.f32.mrb[41].mxu1  ;;  %10982 = vmatmul.mubr.f32.gmra.mrb[146].mxu1 %v16103_v27  ;;  %10769 = vmatprep.mubr.msk.f32.mxu0 %vm13090_vm0, %v19497_v44  ;;  %v415_v21 = vld [vmem:[%s13361_s21 + $0xa8] sm:$0xff]  ;;  %v4113_v27 = vsub.f32 %v16233_v46, %v19248_v18  ;;  %v19978_v46 = vand.u32 4294901760, %v16251_v28 }
 0x403   : > { %10984 = vmatprep.mubr.msk.f32.mxu1 %vm13090_vm0, %v19497_v44  ;;  %19975 = vst [vmem:[#allocation76_spill] sm:$0xff] %v16260_v2 }
 0x404   : > { %v3174_v4 = vpop.f32.mrb[46].mxu0  ;;  %v4123_v26 = vsub.f32 %v16251_v28, %v19978_v46  ;;  %v417_v46 = vld [vmem:[%s13361_s21 + $0xb8] sm:$0xff] }
 0x405   : > { %v3621_v14 = vpop.f32.mrb[42].mxu1  ;;  %v3175_v35 = vadd.f32 %v3174_v4, %v15469_v38  ;;  %10770 = vmatmul.mubr.f32.gmra.mrb[152].mxu0 %v4094_v32  ;;  %v10359_v42 = vpop.f32.mrb[47].mxu0  ;;  %v16275_v38 = vand.u32 4294901760, %v415_v21  ;;  %v19259_v32 = vand.u32 4294901760, %v16260_v2  ;;  %v416_v4 = vld [vmem:[%s13361_s21 + $0xb0] sm:$0xff] }
 0x406   : > { %v16264_v16 = vadd.f32 %v3621_v14, %v3163_v53  ;;  %v10574_v29 = vpop.f32.mrb[43].mxu1  ;;  %10985 = vmatmul.mubr.f32.gmra.mrb[148].mxu1 %v16123_v22  ;;  %10772 = vmatprep.mubr.msk.f32.mxu0 %vm13090_vm0, %v19497_v44  ;;  %v16279_v42 = vsub.f32 %v414_v15, %v16257_v11  ;;  %v4114_v22 = vand.u32 4294901760, %v4113_v27  ;;  %v4124_v28 = vand.u32 4294901760, %v4123_v26 }
 0x407   : > { %10987 = vmatprep.mubr.msk.f32.mxu1 %vm13090_vm0, %v19497_v44  ;;  %19976 = vst [vmem:[#allocation114_spill] sm:$0xff] %v16275_v38 }
 0x408   : > { %v3180_v25 = vpop.f32.mrb[48].mxu0  ;;  %19977 = vst [vmem:[#allocation79_spill] sm:$0xff] %v16279_v42  ;;  %v19262_v27 = vand.u32 4294901760, %v16279_v42 }
 0x409   : > { %v3627_v53 = vpop.f32.mrb[44].mxu1  ;;  %v3181_v14 = vadd.f32 %v3180_v25, %v15484_v6  ;;  %10773 = vmatmul.mubr.f32.gmra.mrb[154].mxu0 %v4104_v19  ;;  %v10362_v0 = vpop.f32.mrb[49].mxu0  ;;  %v16293_v6 = vand.u32 4294901760, %v416_v4  ;;  %v16300_v19 = vsub.f32 %v415_v21, %v16275_v38 }
 0x40a   : > { %v16283_v29 = vadd.f32 %v3627_v53, %v3169_v1  ;;  %v10577_v18 = vpop.f32.mrb[45].mxu1  ;;  %10988 = vmatmul.mubr.f32.gmra.mrb[150].mxu1 %v16143_v37  ;;  %10775 = vmatprep.mubr.msk.f32.mxu0 %vm13090_vm0, %v19497_v44 }
 0x40b   : > { %10990 = vmatprep.mubr.msk.f32.mxu1 %vm13090_vm0, %v19497_v44  ;;  %19979 = vst [vmem:[#allocation116_spill] sm:$0xff] %v16293_v6  ;;  %v4133_v18 = vsub.f32 %v16260_v2, %v19259_v32  ;;  %19980 = vst [vmem:[#allocation80_spill] sm:$0xff] %v16300_v19  ;;  %v12229_v32 = vpack.c.bf16 %v15481_v43, %v15479_v9 }
 0x40c   : > { %v3186_v15 = vpop.f32.mrb[50].mxu0 }
 0x40d   : > { %v3633_v1 = vpop.f32.mrb[46].mxu1  ;;  %v3187_v0 = vadd.f32 %v3186_v15, %v15503_v13  ;;  %10776 = vmatmul.mubr.f32.gmra.mrb[156].mxu0 %v4114_v22  ;;  %v10365_v37 = vpop.f32.mrb[51].mxu0  ;;  %v16313_v13 = vand.u32 4294901760, %v417_v46  ;;  %v4134_v15 = vand.u32 4294901760, %v4133_v18  ;;  %v4143_v22 = vsub.f32 %v16279_v42, %v19262_v27 }
 0x40e   : > { %v16304_v25 = vadd.f32 %v3633_v1, %v3175_v35  ;;  %v10580_v53 = vpop.f32.mrb[47].mxu1  ;;  %10991 = vmatmul.mubr.f32.gmra.mrb[152].mxu1 %v16165_v51  ;;  %10778 = vmatprep.mubr.msk.f32.mxu0 %vm13090_vm0, %v19497_v44  ;;  %v418_v37 = vld [vmem:[%s13361_s21 + $0xc0] sm:$0xff]  ;;  %v16326_v18 = vsub.f32 %v416_v4, %v16293_v6  ;;  %v19988_v42 = vand.u32 4294901760, %v16300_v19 }
 0x40f   : > { %10993 = vmatprep.mubr.msk.f32.mxu1 %vm13090_vm0, %v19497_v44  ;;  %12230 = vmatpush3.bf16.msra.mxu0 %v12229_v32  ;;  %19981 = vst [vmem:[#allocation119_spill] sm:$0xff] %v16313_v13  ;;  %v16332_v27 = vand.u32 4294901760, %v418_v37 }
 0x410   : > { %v3192_v21 = vpop.f32.mrb[52].mxu0  ;;  %12231 = vmatprep.subr.bf16.mxu0 %v19502_v58  ;;  %19983 = vst [vmem:[#allocation121_spill] sm:$0xff] %v16326_v18  ;;  %v4153_v2 = vsub.f32 %v16300_v19, %v19988_v42  ;;  %v19993_v43 = vand.u32 4294901760, %v16326_v18 }
 0x411   : > { %v3639_v35 = vpop.f32.mrb[48].mxu1  ;;  %v3193_v26 = vadd.f32 %v3192_v21, %v15512_v61  ;;  %10779 = vmatmul.mubr.f32.gmra.mrb[158].mxu0 %v4124_v28  ;;  %v10368_v32 = vpop.f32.mrb[53].mxu0  ;;  %19984 = vst [vmem:[#allocation89_spill] sm:$0xff] %v16332_v27  ;;  %v4144_v21 = vand.u32 4294901760, %v4143_v22  ;;  %v16335_v28 = vsub.f32 %v417_v46, %v16313_v13 }
 0x412   : > { %v16321_v1 = vadd.f32 %v3639_v35, %v3181_v14  ;;  %v10583_v53 = vpop.f32.mrb[49].mxu1  ;;  %10994 = vmatmul.mubr.f32.gmra.mrb[154].mxu1 %v16185_v50  ;;  %10781 = vmatprep.mubr.msk.f32.mxu0 %vm13090_vm0, %v19497_v44  ;;  %v419_v35 = vld [vmem:[%s13361_s21 + $0xc8] sm:$0xff]  ;;  %v4154_v19 = vand.u32 4294901760, %v4153_v2  ;;  %v4163_v9 = vsub.f32 %v16326_v18, %v19993_v43  ;;  %v421_v2 = vld [vmem:[%s13361_s21 + $0xd8] sm:$0xff] }
 0x413   : > { %10996 = vmatprep.mubr.msk.f32.mxu1 %vm13090_vm0, %v19497_v44  ;;  %19985 = vst [vmem:[#allocation122_spill] sm:$0xff] %v16335_v28  ;;  %v19986_v53 = vld [vmem:[#allocation128_spill] sm:$0xff]  ;;  %v16350_v46 = vand.u32 4294901760, %v419_v35 }
 0x414   : > { %19982 = vst [vmem:[#allocation82_spill] sm:$0xff] %v16321_v1  ;;  %v3198_v61 = vpop.f32.mrb[54].mxu0  ;;  %v4164_v18 = vand.u32 4294901760, %v4163_v9  ;;  %v19999_v9 = vld [vmem:[#allocation120_spill] sm:$0xff]  ;;  %v20016_v1 = vld [vmem:[#allocation21_spill] sm:$0xff] }
 0x415   : > { %v3645_v14 = vpop.f32.mrb[50].mxu1  ;;  %v3199_v32 = vadd.f32 %v3198_v61, %v19986_v53  ;;  %10782 = vmatmul.mubr.f32.gmra.mrb[160].mxu0 %v4134_v15  ;;  %v10371_v50 = vpop.f32.mrb[55].mxu0  ;;  %19989 = vst [vmem:[#allocation125_spill] sm:$0xff] %v16350_v46  ;;  %v19279_v15 = vand.u32 4294901760, %v16335_v28  ;;  %v420_v61 = vld [vmem:[%s13361_s21 + $0xd0] sm:$0xff] }
 0x416   : > { %v16339_v4 = vadd.f32 %v3645_v14, %v3187_v0  ;;  %v10586_v51 = vpop.f32.mrb[51].mxu1  ;;  %10997 = vmatmul.mubr.f32.gmra.mrb[156].mxu1 %v16203_v63  ;;  %10784 = vmatprep.mubr.msk.f32.mxu0 %vm13090_vm0, %v19497_v44  ;;  %v16354_v50 = vsub.f32 %v418_v37, %v16332_v27  ;;  %v19991_v14 = vld [vmem:[#allocation117_spill] sm:$0xff]  ;;  %v16368_v37 = vand.u32 4294901760, %v420_v61 }
 0x417   : > { %10999 = vmatprep.mubr.msk.f32.mxu1 %vm13090_vm0, %v19497_v44 }
 0x418   : > { %19987 = vst [vmem:[#allocation92_spill] sm:$0xff] %v16339_v4  ;;  %v3204_v0 = vpop.f32.mrb[56].mxu0  ;;  %19990 = vst [vmem:[#allocation97_spill] sm:$0xff] %v16354_v50  ;;  %v20015_v4 = vld [vmem:[#allocation124_spill] sm:$0xff] }
 0x419   : > { %v3651_v51 = vpop.f32.mrb[52].mxu1  ;;  %v3205_v42 = vadd.f32 %v3204_v0, %v19991_v14  ;;  %10785 = vmatmul.mubr.f32.gmra.mrb[162].mxu0 %v4144_v21  ;;  %v10374_v63 = vpop.f32.mrb[57].mxu0  ;;  %19994 = vst [vmem:[#allocation129_spill] sm:$0xff] %v16368_v37  ;;  %v4173_v21 = vsub.f32 %v16335_v28, %v19279_v15  ;;  %v16386_v15 = vand.u32 4294901760, %v421_v2 }
 0x41a   : > { %v16358_v53 = vadd.f32 %v3651_v51, %v3193_v26  ;;  %v10589_v22 = vpop.f32.mrb[53].mxu1  ;;  %11000 = vmatmul.mubr.f32.gmra.mrb[158].mxu1 %v16221_v7  ;;  %10787 = vmatprep.mubr.msk.f32.mxu0 %vm13090_vm0, %v19497_v44  ;;  %v19284_v63 = vand.u32 4294901760, %v16354_v50 }
 0x41b   : > { %11002 = vmatprep.mubr.msk.f32.mxu1 %vm13090_vm0, %v19497_v44  ;;  %v19995_v22 = vld [vmem:[#allocation118_spill] sm:$0xff]  ;;  %19998 = vst [vmem:[#allocation98_spill] sm:$0xff] %v16386_v15 }
 0x41c   : > { %19992 = vst [vmem:[#allocation127_spill] sm:$0xff] %v16358_v53  ;;  %v3210_v26 = vpop.f32.mrb[58].mxu0  ;;  %v16380_v53 = vsub.f32 %v419_v35, %v16350_v46 }
 0x41d   : > { %v3657_v0 = vpop.f32.mrb[54].mxu1  ;;  %v3211_v43 = vadd.f32 %v3210_v26, %v19995_v22  ;;  %10788 = vmatmul.mubr.f32.gmra.mrb[164].mxu0 %v4154_v19  ;;  %v10377_v7 = vpop.f32.mrb[59].mxu0  ;;  %v4183_v19 = vsub.f32 %v16354_v50, %v19284_v63 }
 0x41e   : > { %v16376_v51 = vadd.f32 %v3657_v0, %v3199_v32  ;;  %v10592_v14 = vpop.f32.mrb[55].mxu1  ;;  %11003 = vmatmul.mubr.f32.gmra.mrb[160].mxu1 %v16239_v54  ;;  %19997 = vst [vmem:[#allocation130_spill] sm:$0xff] %v16380_v53  ;;  %10790 = vmatprep.mubr.msk.f32.mxu0 %vm13090_vm0, %v19497_v44  ;;  %v4174_v0 = vand.u32 4294901760, %v4173_v21  ;;  %v422_v7 = vld [vmem:[%s13361_s21 + $0xe0] sm:$0xff] }
 0x41f   : > { %11005 = vmatprep.mubr.msk.f32.mxu1 %vm13090_vm0, %v19497_v44  ;;  %v16404_v21 = vand.u32 4294901760, %v422_v7 }
 0x420   : > { %19996 = vst [vmem:[#allocation108_spill] sm:$0xff] %v16376_v51  ;;  %v3216_v26 = vpop.f32.mrb[60].mxu0  ;;  %v16398_v51 = vsub.f32 %v420_v61, %v16368_v37 }
 0x421   : > { %v3663_v32 = vpop.f32.mrb[56].mxu1  ;;  %v3217_v35 = vadd.f32 %v3216_v26, %v19999_v9  ;;  %10791 = vmatmul.mubr.f32.gmra.mrb[166].mxu0 %v4164_v18  ;;  %v10380_v54 = vpop.f32.mrb[61].mxu0  ;;  %20002 = vst [vmem:[#allocation117_spill] sm:$0xff] %v16404_v21  ;;  %v16407_v18 = vsub.f32 %v421_v2, %v16386_v15  ;;  %v20004_v9 = vld [vmem:[#allocation123_spill] sm:$0xff] }
 0x422   : > { %v16393_v22 = vadd.f32 %v3663_v32, %v3205_v42  ;;  %v10595_v14 = vpop.f32.mrb[57].mxu1  ;;  %11006 = vmatmul.mubr.f32.gmra.mrb[162].mxu1 %v16257_v11  ;;  %20001 = vst [vmem:[#allocation128_spill] sm:$0xff] %v16398_v51  ;;  %10793 = vmatprep.mubr.msk.f32.mxu0 %vm13090_vm0, %v19497_v44  ;;  %v4184_v32 = vand.u32 4294901760, %v4183_v19  ;;  %v423_v54 = vld [vmem:[%s13361_s21 + $0xe8] sm:$0xff]  ;;  %v20006_v11 = vand.u32 4294901760, %v16380_v53 }
 0x423   : > { %11008 = vmatprep.mubr.msk.f32.mxu1 %vm13090_vm0, %v19497_v44  ;;  %20003 = vst [vmem:[#allocation118_spill] sm:$0xff] %v16407_v18  ;;  %v16422_v2 = vand.u32 4294901760, %v423_v54 }
 0x424   : > { %20000 = vst [vmem:[#allocation100_spill] sm:$0xff] %v16393_v22  ;;  %v3222_v42 = vpop.f32.mrb[62].mxu0  ;;  %v4193_v50 = vsub.f32 %v16380_v53, %v20006_v11 }
 0x425   : > { %v3669_v26 = vpop.f32.mrb[58].mxu1  ;;  %v3223_v14 = vadd.f32 %v3222_v42, %v20004_v9  ;;  %10794 = vmatmul.mubr.f32.gmra.mrb[168].mxu0 %v4174_v0  ;;  %v10383_v28 = vpop.f32.mrb[63].mxu0  ;;  %20007 = vst [vmem:[#allocation123_spill] sm:$0xff] %v16422_v2  ;;  %v19297_v0 = vand.u32 4294901760, %v16407_v18  ;;  %v424_v42 = vld [vmem:[%s13361_s21 + $0xf0] sm:$0xff] }
 0x426   : > { %v16411_v61 = vadd.f32 %v3669_v26, %v3211_v43  ;;  %v10598_v63 = vpop.f32.mrb[59].mxu1  ;;  %11009 = vmatmul.mubr.f32.gmra.mrb[164].mxu1 %v16275_v38  ;;  %10796 = vmatprep.mubr.msk.f32.mxu0 %vm13090_vm0, %v19497_v44  ;;  %v16426_v28 = vsub.f32 %v422_v7, %v16404_v21  ;;  %v20009_v26 = vld [vmem:[#allocation24_spill] sm:$0xff]  ;;  %v4194_v53 = vand.u32 4294901760, %v4193_v50  ;;  %v16440_v7 = vand.u32 4294901760, %v424_v42 }
 0x427   : > { %11011 = vmatprep.mubr.msk.f32.mxu1 %vm13090_vm0, %v19497_v44  ;;  %v16447_v50 = vsub.f32 %v423_v54, %v16422_v2 }
 0x428   : > { %20005 = vst [vmem:[#allocation120_spill] sm:$0xff] %v16411_v61  ;;  %v3228_v43 = vpop.f32.mrb[64].mxu0  ;;  %20008 = vst [vmem:[#allocation131_spill] sm:$0xff] %v16426_v28  ;;  %v20011_v61 = vand.u32 4294901760, %v16398_v51 }
 0x429   : > { %v3675_v63 = vpop.f32.mrb[60].mxu1  ;;  %v3229_v11 = vadd.f32 %v3228_v43, %v20009_v26  ;;  %10797 = vmatmul.mubr.f32.gmra.mrb[170].mxu0 %v4184_v32  ;;  %v10386_v38 = vpop.f32.mrb[65].mxu0  ;;  %20012 = vst [vmem:[#allocation132_spill] sm:$0xff] %v16440_v7  ;;  %v4213_v32 = vsub.f32 %v16407_v18, %v19297_v0  ;;  %20013 = vst [vmem:[#allocation133_spill] sm:$0xff] %v16447_v50  ;;  %v12232_v0 = vpack.c.bf16 %v20016_v1, %v20015_v4 }
 0x42a   : > { %v16430_v9 = vadd.f32 %v3675_v63, %v3217_v35  ;;  %v10601_v19 = vpop.f32.mrb[61].mxu1  ;;  %11012 = vmatmul.mubr.f32.gmra.mrb[166].mxu1 %v16293_v6  ;;  %v4203_v22 = vsub.f32 %v16398_v51, %v20011_v61  ;;  %10799 = vmatprep.mubr.msk.f32.mxu0 %vm13090_vm0, %v19497_v44  ;;  %v19302_v38 = vand.u32 4294901760, %v16426_v28  ;;  %v425_v61 = vld [vmem:[%s13361_s21 + $0xf8] sm:$0xff] }
 0x42b   : > { %11014 = vmatprep.mubr.msk.f32.mxu1 %vm13090_vm0, %v19497_v44  ;;  %v20014_v19 = vld [vmem:[#allocation25_spill] sm:$0xff]  ;;  %12233 = vmatpush3.bf16.msra.mxu0 %v12232_v0  ;;  %v16460_v54 = vand.u32 4294901760, %v425_v61 }
 0x42c   : > { %20010 = vst [vmem:[#allocation24_spill] sm:$0xff] %v16430_v9  ;;  %v3234_v35 = vpop.f32.mrb[66].mxu0  ;;  %v4204_v9 = vand.u32 4294901760, %v4203_v22  ;;  %12258 = vmatprep.subr.bf16.mxu0 %v19502_v58  ;;  %v20018_v22 = vld [vmem:[#allocation26_spill] sm:$0xff] }
 0x42d   : > { %v3681_v43 = vpop.f32.mrb[62].mxu1  ;;  %v3235_v63 = vadd.f32 %v3234_v35, %v20014_v19  ;;  %10800 = vmatmul.mubr.f32.gmra.mrb[172].mxu0 %v4194_v53  ;;  %v10389_v51 = vpop.f32.mrb[67].mxu0  ;;  %20017 = vst [vmem:[#allocation25_spill] sm:$0xff] %v16460_v54  ;;  %v4223_v53 = vsub.f32 %v16426_v28, %v19302_v38  ;;  %v20024_v28 = vand.u32 4294901760, %v16447_v50 }
 0x42e   : > { %v16451_v26 = vadd.f32 %v3681_v43, %v3223_v14  ;;  %v10604_v6 = vpop.f32.mrb[63].mxu1  ;;  %11015 = vmatmul.mubr.f32.gmra.mrb[168].mxu1 %v16313_v13  ;;  %10802 = vmatprep.mubr.msk.f32.mxu0 %vm13090_vm0, %v19497_v44  ;;  %v426_v51 = vld [vmem:[%s13361_s21 + $0x100] sm:$0xff] }
 0x42f   : > { %11017 = vmatprep.mubr.msk.f32.mxu1 %vm13090_vm0, %v19497_v44  ;;  %v4214_v6 = vand.u32 4294901760, %v4213_v32  ;;  %v16473_v32 = vsub.f32 %v424_v42, %v16440_v7  ;;  %v16479_v38 = vand.u32 4294901760, %v426_v51  ;;  %v4233_v1 = vsub.f32 %v16447_v50, %v20024_v28 }
 0x430   : > { %v3240_v14 = vpop.f32.mrb[68].mxu0 }
 0x431   : > { %v3687_v35 = vpop.f32.mrb[64].mxu1  ;;  %v3241_v43 = vadd.f32 %v3240_v14, %v20018_v22  ;;  %10803 = vmatmul.mubr.f32.gmra.mrb[174].mxu0 %v4204_v9  ;;  %v10392_v0 = vpop.f32.mrb[69].mxu0  ;;  %20019 = vst [vmem:[#allocation26_spill] sm:$0xff] %v16473_v32  ;;  %20020 = vst [vmem:[#allocation134_spill] sm:$0xff] %v16479_v38  ;;  %v16482_v9 = vsub.f32 %v425_v61, %v16460_v54  ;;  %v20022_v22 = vld [vmem:[#allocation27_spill] sm:$0xff]  ;;  %v4234_v50 = vand.u32 4294901760, %v4233_v1 }
 0x432   : > { %v16468_v19 = vadd.f32 %v3687_v35, %v3229_v11  ;;  %v10607_v13 = vpop.f32.mrb[65].mxu1  ;;  %11018 = vmatmul.mubr.f32.gmra.mrb[170].mxu1 %v16332_v27  ;;  %10805 = vmatprep.mubr.msk.f32.mxu0 %vm13090_vm0, %v19497_v44  ;;  %v427_v35 = vld [vmem:[%s13361_s21 + $0x108] sm:$0xff]  ;;  %v20029_v4 = vand.u32 4294901760, %v16473_v32 }
 0x433   : > { %11020 = vmatprep.mubr.msk.f32.mxu1 %vm13090_vm0, %v19497_v44  ;;  %v4224_v13 = vand.u32 4294901760, %v4223_v53  ;;  %20021 = vst [vmem:[#allocation135_spill] sm:$0xff] %v16482_v9  ;;  %v16497_v61 = vand.u32 4294901760, %v427_v35 }
 0x434   : > { %v3246_v11 = vpop.f32.mrb[70].mxu0 }
 0x435   : > { %v3693_v14 = vpop.f32.mrb[66].mxu1  ;;  %v3247_v0 = vadd.f32 %v3246_v11, %v20022_v22  ;;  %10806 = vmatmul.mubr.f32.gmra.mrb[176].mxu0 %v4214_v6  ;;  %v10395_v27 = vpop.f32.mrb[71].mxu0  ;;  %20025 = vst [vmem:[#allocation136_spill] sm:$0xff] %v16497_v61  ;;  %v19315_v6 = vand.u32 4294901760, %v16482_v9  ;;  %v428_v11 = vld [vmem:[%s13361_s21 + $0x110] sm:$0xff] }
 0x436   : > { %v16486_v42 = vadd.f32 %v3693_v14, %v3235_v63  ;;  %v10610_v18 = vpop.f32.mrb[67].mxu1  ;;  %11021 = vmatmul.mubr.f32.gmra.mrb[172].mxu1 %v16350_v46  ;;  %10808 = vmatprep.mubr.msk.f32.mxu0 %vm13090_vm0, %v19497_v44  ;;  %v16501_v27 = vsub.f32 %v426_v51, %v16479_v38  ;;  %v20027_v14 = vld [vmem:[#allocation28_spill] sm:$0xff]  ;;  %v16515_v51 = vand.u32 4294901760, %v428_v11 }
 0x437   : > { %11023 = vmatprep.mubr.msk.f32.mxu1 %vm13090_vm0, %v19497_v44 }
 0x438   : > { %20023 = vst [vmem:[#allocation27_spill] sm:$0xff] %v16486_v42  ;;  %v3252_v63 = vpop.f32.mrb[72].mxu0  ;;  %20026 = vst [vmem:[#allocation137_spill] sm:$0xff] %v16501_v27  ;;  %v4243_v42 = vsub.f32 %v16473_v32, %v20029_v4  ;;  %v19320_v1 = vand.u32 4294901760, %v16501_v27 }
 0x439   : > { %v3699_v18 = vpop.f32.mrb[68].mxu1  ;;  %v3253_v28 = vadd.f32 %v3252_v63, %v20027_v14  ;;  %10809 = vmatmul.mubr.f32.gmra.mrb[178].mxu0 %v4224_v13  ;;  %v10398_v46 = vpop.f32.mrb[73].mxu0  ;;  %20030 = vst [vmem:[#allocation138_spill] sm:$0xff] %v16515_v51  ;;  %v4253_v13 = vsub.f32 %v16482_v9, %v19315_v6 }
 0x43a   : > { %v16505_v22 = vadd.f32 %v3699_v18, %v3241_v43  ;;  %v10613_v53 = vpop.f32.mrb[69].mxu1  ;;  %11024 = vmatmul.mubr.f32.gmra.mrb[174].mxu1 %v16368_v37  ;;  %10811 = vmatprep.mubr.msk.f32.mxu0 %vm13090_vm0, %v19497_v44  ;;  %v429_v46 = vld [vmem:[%s13361_s21 + $0x118] sm:$0xff]  ;;  %v4244_v32 = vand.u32 4294901760, %v4243_v42  ;;  %v20035_v42 = vld [vmem:[#allocation30_spill] sm:$0xff] }
 0x43b   : > { %11026 = vmatprep.mubr.msk.f32.mxu1 %vm13090_vm0, %v19497_v44  ;;  %v20031_v53 = vld [vmem:[#allocation29_spill] sm:$0xff]  ;;  %v16533_v6 = vand.u32 4294901760, %v429_v46 }
 0x43c   : > { %20028 = vst [vmem:[#allocation28_spill] sm:$0xff] %v16505_v22  ;;  %v3258_v43 = vpop.f32.mrb[74].mxu0  ;;  %v16527_v22 = vsub.f32 %v427_v35, %v16497_v61 }
 0x43d   : > { %v3705_v63 = vpop.f32.mrb[70].mxu1  ;;  %v3259_v4 = vadd.f32 %v3258_v43, %v20031_v53  ;;  %10812 = vmatmul.mubr.f32.gmra.mrb[180].mxu0 %v4234_v50  ;;  %v10401_v37 = vpop.f32.mrb[75].mxu0  ;;  %20034 = vst [vmem:[#allocation140_spill] sm:$0xff] %v16533_v6  ;;  %v4263_v50 = vsub.f32 %v16501_v27, %v19320_v1 }
 0x43e   : > { %v16523_v18 = vadd.f32 %v3705_v63, %v3247_v0  ;;  %v10616_v14 = vpop.f32.mrb[71].mxu1  ;;  %11027 = vmatmul.mubr.f32.gmra.mrb[176].mxu1 %v16386_v15  ;;  %20033 = vst [vmem:[#allocation139_spill] sm:$0xff] %v16527_v22  ;;  %10814 = vmatprep.mubr.msk.f32.mxu0 %vm13090_vm0, %v19497_v44  ;;  %v4254_v63 = vand.u32 4294901760, %v4253_v13  ;;  %v430_v37 = vld [vmem:[%s13361_s21 + $0x120] sm:$0xff] }
 0x43f   : > { %11029 = vmatprep.mubr.msk.f32.mxu1 %vm13090_vm0, %v19497_v44  ;;  %v16551_v13 = vand.u32 4294901760, %v430_v37 }
 0x440   : > { %20032 = vst [vmem:[#allocation29_spill] sm:$0xff] %v16523_v18  ;;  %v3264_v43 = vpop.f32.mrb[76].mxu0  ;;  %v16545_v18 = vsub.f32 %v428_v11, %v16515_v51 }
 0x441   : > { %v3711_v0 = vpop.f32.mrb[72].mxu1  ;;  %v3265_v35 = vadd.f32 %v3264_v43, %v20035_v42  ;;  %10815 = vmatmul.mubr.f32.gmra.mrb[182].mxu0 %v4244_v32  ;;  %v10404_v15 = vpop.f32.mrb[77].mxu0  ;;  %20038 = vst [vmem:[#allocation142_spill] sm:$0xff] %v16551_v13  ;;  %v16554_v32 = vsub.f32 %v429_v46, %v16533_v6  ;;  %v20040_v42 = vld [vmem:[#allocation31_spill] sm:$0xff] }
 0x442   : > { %v16540_v53 = vadd.f32 %v3711_v0, %v3253_v28  ;;  %v10619_v14 = vpop.f32.mrb[73].mxu1  ;;  %11030 = vmatmul.mubr.f32.gmra.mrb[178].mxu1 %v16404_v21  ;;  %20037 = vst [vmem:[#allocation141_spill] sm:$0xff] %v16545_v18  ;;  %10817 = vmatprep.mubr.msk.f32.mxu0 %vm13090_vm0, %v19497_v44  ;;  %v4264_v0 = vand.u32 4294901760, %v4263_v50  ;;  %v431_v15 = vld [vmem:[%s13361_s21 + $0x128] sm:$0xff]  ;;  %v20042_v21 = vand.u32 4294901760, %v16527_v22 }
 0x443   : > { %11032 = vmatprep.mubr.msk.f32.mxu1 %vm13090_vm0, %v19497_v44  ;;  %20039 = vst [vmem:[#allocation143_spill] sm:$0xff] %v16554_v32  ;;  %v16569_v46 = vand.u32 4294901760, %v431_v15 }
 0x444   : > { %20036 = vst [vmem:[#allocation30_spill] sm:$0xff] %v16540_v53  ;;  %v3270_v28 = vpop.f32.mrb[78].mxu0  ;;  %v4273_v27 = vsub.f32 %v16527_v22, %v20042_v21 }
 0x445   : > { %v3717_v43 = vpop.f32.mrb[74].mxu1  ;;  %v3271_v14 = vadd.f32 %v3270_v28, %v20040_v42  ;;  %10818 = vmatmul.mubr.f32.gmra.mrb[184].mxu0 %v4254_v63  ;;  %v10407_v9 = vpop.f32.mrb[79].mxu0  ;;  %20043 = vst [vmem:[#allocation144_spill] sm:$0xff] %v16569_v46  ;;  %v19333_v63 = vand.u32 4294901760, %v16554_v32  ;;  %v432_v28 = vld [vmem:[%s13361_s21 + $0x130] sm:$0xff] }
 0x446   : > { %v16558_v11 = vadd.f32 %v3717_v43, %v3259_v4  ;;  %v10622_v1 = vpop.f32.mrb[75].mxu1  ;;  %11033 = vmatmul.mubr.f32.gmra.mrb[180].mxu1 %v16422_v2  ;;  %10820 = vmatprep.mubr.msk.f32.mxu0 %vm13090_vm0, %v19497_v44  ;;  %v16573_v9 = vsub.f32 %v430_v37, %v16551_v13  ;;  %v20045_v43 = vld [vmem:[#allocation32_spill] sm:$0xff]  ;;  %v4274_v22 = vand.u32 4294901760, %v4273_v27  ;;  %v16587_v37 = vand.u32 4294901760, %v432_v28 }
 0x447   : > { %11035 = vmatprep.mubr.msk.f32.mxu1 %vm13090_vm0, %v19497_v44  ;;  %v433_v27 = vld [vmem:[%s13361_s21 + $0x138] sm:$0xff] }
 0x448   : > { %20041 = vst [vmem:[#allocation31_spill] sm:$0xff] %v16558_v11  ;;  %v3276_v4 = vpop.f32.mrb[80].mxu0  ;;  %20044 = vst [vmem:[#allocation145_spill] sm:$0xff] %v16573_v9  ;;  %v20047_v11 = vand.u32 4294901760, %v16545_v18 }
 0x449   : > { %v3723_v1 = vpop.f32.mrb[76].mxu1  ;;  %v3277_v21 = vadd.f32 %v3276_v4, %v20045_v43  ;;  %10821 = vmatmul.mubr.f32.gmra.mrb[186].mxu0 %v4264_v0  ;;  %v10410_v2 = vpop.f32.mrb[81].mxu0  ;;  %20048 = vst [vmem:[#allocation146_spill] sm:$0xff] %v16587_v37  ;;  %v4293_v0 = vsub.f32 %v16554_v32, %v19333_v63  ;;  %v16605_v63 = vand.u32 4294901760, %v433_v27 }
 0x44a   : > { %v16577_v42 = vadd.f32 %v3723_v1, %v3265_v35  ;;  %v10625_v50 = vpop.f32.mrb[77].mxu1  ;;  %11036 = vmatmul.mubr.f32.gmra.mrb[182].mxu1 %v16440_v7  ;;  %v4283_v53 = vsub.f32 %v16545_v18, %v20047_v11  ;;  %10823 = vmatprep.mubr.msk.f32.mxu0 %vm13090_vm0, %v19497_v44  ;;  %v19338_v2 = vand.u32 4294901760, %v16573_v9 }
 0x44b   : > { %11038 = vmatprep.mubr.msk.f32.mxu1 %vm13090_vm0, %v19497_v44  ;;  %v20049_v50 = vld [vmem:[#allocation33_spill] sm:$0xff]  ;;  %20052 = vst [vmem:[#allocation148_spill] sm:$0xff] %v16605_v63 }
 0x44c   : > { %20046 = vst [vmem:[#allocation32_spill] sm:$0xff] %v16577_v42  ;;  %v3282_v35 = vpop.f32.mrb[82].mxu0  ;;  %v4284_v18 = vand.u32 4294901760, %v4283_v53  ;;  %v16599_v42 = vsub.f32 %v431_v15, %v16569_v46  ;;  %v20053_v53 = vld [vmem:[#allocation34_spill] sm:$0xff] }
 0x44d   : > { %v3729_v4 = vpop.f32.mrb[78].mxu1  ;;  %v3283_v11 = vadd.f32 %v3282_v35, %v20049_v50  ;;  %10824 = vmatmul.mubr.f32.gmra.mrb[188].mxu0 %v4274_v22  ;;  %v10413_v7 = vpop.f32.mrb[83].mxu0  ;;  %v4303_v22 = vsub.f32 %v16573_v9, %v19338_v2 }
 0x44e   : > { %v16595_v1 = vadd.f32 %v3729_v4, %v3271_v14  ;;  %v10628_v43 = vpop.f32.mrb[79].mxu1  ;;  %11039 = vmatmul.mubr.f32.gmra.mrb[184].mxu1 %v16460_v54  ;;  %20051 = vst [vmem:[#allocation147_spill] sm:$0xff] %v16599_v42  ;;  %10826 = vmatprep.mubr.msk.f32.mxu0 %vm13090_vm0, %v19497_v44  ;;  %v4294_v4 = vand.u32 4294901760, %v4293_v0  ;;  %v434_v7 = vld [vmem:[%s13361_s21 + $0x140] sm:$0xff] }
 0x44f   : > { %11041 = vmatprep.mubr.msk.f32.mxu1 %vm13090_vm0, %v19497_v44  ;;  %v16623_v0 = vand.u32 4294901760, %v434_v7 }
 0x450   : > { %20050 = vst [vmem:[#allocation33_spill] sm:$0xff] %v16595_v1  ;;  %v3288_v35 = vpop.f32.mrb[84].mxu0  ;;  %v16617_v1 = vsub.f32 %v432_v28, %v16587_v37 }
 0x451   : > { %v3735_v14 = vpop.f32.mrb[80].mxu1  ;;  %v3289_v15 = vadd.f32 %v3288_v35, %v20053_v53  ;;  %10827 = vmatmul.mubr.f32.gmra.mrb[190].mxu0 %v4284_v18  ;;  %v10416_v54 = vpop.f32.mrb[85].mxu0  ;;  %20056 = vst [vmem:[#allocation150_spill] sm:$0xff] %v16623_v0  ;;  %v16626_v18 = vsub.f32 %v433_v27, %v16605_v63  ;;  %v20058_v53 = vld [vmem:[#allocation35_spill] sm:$0xff] }
 0x452   : > { %v16612_v50 = vadd.f32 %v3735_v14, %v3277_v21  ;;  %v10631_v43 = vpop.f32.mrb[81].mxu1  ;;  %11042 = vmatmul.mubr.f32.gmra.mrb[186].mxu1 %v16479_v38  ;;  %20055 = vst [vmem:[#allocation149_spill] sm:$0xff] %v16617_v1  ;;  %10829 = vmatprep.mubr.msk.f32.mxu0 %vm13090_vm0, %v19497_v44  ;;  %v4304_v14 = vand.u32 4294901760, %v4303_v22  ;;  %v435_v54 = vld [vmem:[%s13361_s21 + $0x148] sm:$0xff]  ;;  %v20060_v38 = vand.u32 4294901760, %v16599_v42 }
 0x453   : > { %11044 = vmatprep.mubr.msk.f32.mxu1 %vm13090_vm0, %v19497_v44  ;;  %20057 = vst [vmem:[#allocation151_spill] sm:$0xff] %v16626_v18  ;;  %v16641_v27 = vand.u32 4294901760, %v435_v54 }
 0x454   : > { %20054 = vst [vmem:[#allocation34_spill] sm:$0xff] %v16612_v50  ;;  %v3294_v21 = vpop.f32.mrb[86].mxu0  ;;  %v4313_v9 = vsub.f32 %v16599_v42, %v20060_v38 }
 0x455   : > { %v3741_v35 = vpop.f32.mrb[82].mxu1  ;;  %v3295_v43 = vadd.f32 %v3294_v21, %v20058_v53  ;;  %10830 = vmatmul.mubr.f32.gmra.mrb[192].mxu0 %v4294_v4  ;;  %v10419_v32 = vpop.f32.mrb[87].mxu0  ;;  %20061 = vst [vmem:[#allocation152_spill] sm:$0xff] %v16641_v27  ;;  %v19351_v4 = vand.u32 4294901760, %v16626_v18  ;;  %v436_v21 = vld [vmem:[%s13361_s21 + $0x150] sm:$0xff] }
 0x456   : > { %v16630_v28 = vadd.f32 %v3741_v35, %v3283_v11  ;;  %v10634_v2 = vpop.f32.mrb[83].mxu1  ;;  %11045 = vmatmul.mubr.f32.gmra.mrb[188].mxu1 %v16497_v61  ;;  %10832 = vmatprep.mubr.msk.f32.mxu0 %vm13090_vm0, %v19497_v44  ;;  %v16645_v32 = vsub.f32 %v434_v7, %v16623_v0  ;;  %v20063_v35 = vld [vmem:[#allocation36_spill] sm:$0xff]  ;;  %v4314_v42 = vand.u32 4294901760, %v4313_v9  ;;  %v16659_v7 = vand.u32 4294901760, %v436_v21 }
 0x457   : > { %11047 = vmatprep.mubr.msk.f32.mxu1 %vm13090_vm0, %v19497_v44  ;;  %v437_v9 = vld [vmem:[%s13361_s21 + $0x158] sm:$0xff] }
 0x458   : > { %20059 = vst [vmem:[#allocation35_spill] sm:$0xff] %v16630_v28  ;;  %v3300_v11 = vpop.f32.mrb[88].mxu0  ;;  %20062 = vst [vmem:[#allocation153_spill] sm:$0xff] %v16645_v32  ;;  %v20065_v28 = vand.u32 4294901760, %v16617_v1 }
 0x459   : > { %v3747_v2 = vpop.f32.mrb[84].mxu1  ;;  %v3301_v38 = vadd.f32 %v3300_v11, %v20063_v35  ;;  %10833 = vmatmul.mubr.f32.gmra.mrb[194].mxu0 %v4304_v14  ;;  %v10422_v61 = vpop.f32.mrb[89].mxu0  ;;  %20066 = vst [vmem:[#allocation154_spill] sm:$0xff] %v16659_v7  ;;  %v4333_v14 = vsub.f32 %v16626_v18, %v19351_v4  ;;  %v16677_v4 = vand.u32 4294901760, %v437_v9 }
 0x45a   : > { %v16649_v53 = vadd.f32 %v3747_v2, %v3289_v15  ;;  %v10637_v22 = vpop.f32.mrb[85].mxu1  ;;  %11048 = vmatmul.mubr.f32.gmra.mrb[190].mxu1 %v16515_v51  ;;  %v4323_v50 = vsub.f32 %v16617_v1, %v20065_v28  ;;  %10835 = vmatprep.mubr.msk.f32.mxu0 %vm13090_vm0, %v19497_v44  ;;  %v19356_v61 = vand.u32 4294901760, %v16645_v32 }
 0x45b   : > { %11050 = vmatprep.mubr.msk.f32.mxu1 %vm13090_vm0, %v19497_v44  ;;  %v20067_v22 = vld [vmem:[#allocation37_spill] sm:$0xff]  ;;  %20070 = vst [vmem:[#allocation156_spill] sm:$0xff] %v16677_v4 }
 0x45c   : > { %20064 = vst [vmem:[#allocation36_spill] sm:$0xff] %v16649_v53  ;;  %v3306_v15 = vpop.f32.mrb[90].mxu0  ;;  %v4324_v1 = vand.u32 4294901760, %v4323_v50  ;;  %v16671_v53 = vsub.f32 %v435_v54, %v16641_v27  ;;  %v20071_v50 = vld [vmem:[#allocation38_spill] sm:$0xff] }
 0x45d   : > { %v3753_v11 = vpop.f32.mrb[86].mxu1  ;;  %v3307_v28 = vadd.f32 %v3306_v15, %v20067_v22  ;;  %10836 = vmatmul.mubr.f32.gmra.mrb[196].mxu0 %v4314_v42  ;;  %v10425_v51 = vpop.f32.mrb[91].mxu0  ;;  %v4343_v42 = vsub.f32 %v16645_v32, %v19356_v61 }
 0x45e   : > { %v16667_v2 = vadd.f32 %v3753_v11, %v3295_v43  ;;  %v10640_v35 = vpop.f32.mrb[87].mxu1  ;;  %11051 = vmatmul.mubr.f32.gmra.mrb[192].mxu1 %v16533_v6  ;;  %20069 = vst [vmem:[#allocation155_spill] sm:$0xff] %v16671_v53  ;;  %10838 = vmatprep.mubr.msk.f32.mxu0 %vm13090_vm0, %v19497_v44  ;;  %v4334_v11 = vand.u32 4294901760, %v4333_v14  ;;  %v438_v51 = vld [vmem:[%s13361_s21 + $0x160] sm:$0xff] }
 0x45f   : > { %11053 = vmatprep.mubr.msk.f32.mxu1 %vm13090_vm0, %v19497_v44  ;;  %v16695_v14 = vand.u32 4294901760, %v438_v51 }
 0x460   : > { %20068 = vst [vmem:[#allocation37_spill] sm:$0xff] %v16667_v2  ;;  %v3312_v15 = vpop.f32.mrb[92].mxu0  ;;  %v16689_v2 = vsub.f32 %v436_v21, %v16659_v7 }
 0x461   : > { %v3759_v43 = vpop.f32.mrb[88].mxu1  ;;  %v3313_v54 = vadd.f32 %v3312_v15, %v20071_v50  ;;  %10839 = vmatmul.mubr.f32.gmra.mrb[198].mxu0 %v4324_v1  ;;  %v10428_v6 = vpop.f32.mrb[93].mxu0  ;;  %20074 = vst [vmem:[#allocation158_spill] sm:$0xff] %v16695_v14  ;;  %v16698_v1 = vsub.f32 %v437_v9, %v16677_v4  ;;  %v20076_v50 = vld [vmem:[#allocation39_spill] sm:$0xff] }
 0x462   : > { %v16684_v22 = vadd.f32 %v3759_v43, %v3301_v38  ;;  %v10643_v35 = vpop.f32.mrb[89].mxu1  ;;  %11054 = vmatmul.mubr.f32.gmra.mrb[194].mxu1 %v16551_v13  ;;  %20073 = vst [vmem:[#allocation157_spill] sm:$0xff] %v16689_v2  ;;  %10841 = vmatprep.mubr.msk.f32.mxu0 %vm13090_vm0, %v19497_v44  ;;  %v4344_v43 = vand.u32 4294901760, %v4343_v42  ;;  %v439_v6 = vld [vmem:[%s13361_s21 + $0x168] sm:$0xff]  ;;  %v20078_v13 = vand.u32 4294901760, %v16671_v53 }
 0x463   : > { %11056 = vmatprep.mubr.msk.f32.mxu1 %vm13090_vm0, %v19497_v44  ;;  %20075 = vst [vmem:[#allocation159_spill] sm:$0xff] %v16698_v1  ;;  %v16713_v9 = vand.u32 4294901760, %v439_v6 }
 0x464   : > { %20072 = vst [vmem:[#allocation38_spill] sm:$0xff] %v16684_v22  ;;  %v3318_v38 = vpop.f32.mrb[94].mxu0  ;;  %v4353_v32 = vsub.f32 %v16671_v53, %v20078_v13 }
 0x465   : > { %v3765_v15 = vpop.f32.mrb[90].mxu1  ;;  %v3319_v35 = vadd.f32 %v3318_v38, %v20076_v50  ;;  %10842 = vmatmul.mubr.f32.gmra.mrb[200].mxu0 %v4334_v11  ;;  %v10431_v18 = vpop.f32.mrb[95].mxu0  ;;  %20079 = vst [vmem:[#allocation160_spill] sm:$0xff] %v16713_v9  ;;  %v19369_v11 = vand.u32 4294901760, %v16698_v1  ;;  %v440_v38 = vld [vmem:[%s13361_s21 + $0x170] sm:$0xff] }
 0x466   : > { %v16702_v21 = vadd.f32 %v3765_v15, %v3307_v28  ;;  %v10646_v61 = vpop.f32.mrb[91].mxu1  ;;  %11057 = vmatmul.mubr.f32.gmra.mrb[196].mxu1 %v16569_v46  ;;  %10844 = vmatprep.mubr.msk.f32.mxu0 %vm13090_vm0, %v19497_v44  ;;  %v16717_v18 = vsub.f32 %v438_v51, %v16695_v14  ;;  %v20081_v15 = vld [vmem:[#allocation40_spill] sm:$0xff]  ;;  %v4354_v53 = vand.u32 4294901760, %v4353_v32  ;;  %v16731_v51 = vand.u32 4294901760, %v440_v38 }
 0x467   : > { %11059 = vmatprep.mubr.msk.f32.mxu1 %vm13090_vm0, %v19497_v44  ;;  %v441_v32 = vld [vmem:[%s13361_s21 + $0x178] sm:$0xff] }
 0x468   : > { %20077 = vst [vmem:[#allocation39_spill] sm:$0xff] %v16702_v21  ;;  %v3324_v28 = vpop.f32.mrb[96].mxu0  ;;  %20080 = vst [vmem:[#allocation161_spill] sm:$0xff] %v16717_v18  ;;  %v20083_v21 = vand.u32 4294901760, %v16689_v2 }
 0x469   : > { %v3771_v61 = vpop.f32.mrb[92].mxu1  ;;  %v3325_v13 = vadd.f32 %v3324_v28, %v20081_v15  ;;  %10845 = vmatmul.mubr.f32.gmra.mrb[202].mxu0 %v4344_v43  ;;  %v10434_v46 = vpop.f32.mrb[97].mxu0  ;;  %20084 = vst [vmem:[#allocation162_spill] sm:$0xff] %v16731_v51  ;;  %v4373_v43 = vsub.f32 %v16698_v1, %v19369_v11  ;;  %v16749_v11 = vand.u32 4294901760, %v441_v32 }
 0x46a   : > { %v16721_v50 = vadd.f32 %v3771_v61, %v3313_v54  ;;  %v10649_v42 = vpop.f32.mrb[93].mxu1  ;;  %11060 = vmatmul.mubr.f32.gmra.mrb[198].mxu1 %v16587_v37  ;;  %v4363_v22 = vsub.f32 %v16689_v2, %v20083_v21  ;;  %10847 = vmatprep.mubr.msk.f32.mxu0 %vm13090_vm0, %v19497_v44  ;;  %v19374_v46 = vand.u32 4294901760, %v16717_v18 }
 0x46b   : > { %11062 = vmatprep.mubr.msk.f32.mxu1 %vm13090_vm0, %v19497_v44  ;;  %v20085_v42 = vld [vmem:[#allocation43_spill] sm:$0xff]  ;;  %20088 = vst [vmem:[#allocation164_spill] sm:$0xff] %v16749_v11 }
 0x46c   : > { %20082 = vst [vmem:[#allocation40_spill] sm:$0xff] %v16721_v50  ;;  %v3330_v54 = vpop.f32.mrb[98].mxu0  ;;  %v4364_v2 = vand.u32 4294901760, %v4363_v22  ;;  %v16743_v50 = vsub.f32 %v439_v6, %v16713_v9  ;;  %v20089_v22 = vld [vmem:[#allocation45_spill] sm:$0xff] }
 0x46d   : > { %v3777_v28 = vpop.f32.mrb[94].mxu1  ;;  %v3331_v21 = vadd.f32 %v3330_v54, %v20085_v42  ;;  %10848 = vmatmul.mubr.f32.gmra.mrb[204].mxu0 %v4354_v53  ;;  %v10437_v37 = vpop.f32.mrb[99].mxu0  ;;  %v4383_v53 = vsub.f32 %v16717_v18, %v19374_v46 }
 0x46e   : > { %v16739_v61 = vadd.f32 %v3777_v28, %v3319_v35  ;;  %v10652_v15 = vpop.f32.mrb[95].mxu1  ;;  %11063 = vmatmul.mubr.f32.gmra.mrb[200].mxu1 %v16605_v63  ;;  %20087 = vst [vmem:[#allocation163_spill] sm:$0xff] %v16743_v50  ;;  %10850 = vmatprep.mubr.msk.f32.mxu0 %vm13090_vm0, %v19497_v44  ;;  %v4374_v28 = vand.u32 4294901760, %v4373_v43  ;;  %v442_v37 = vld [vmem:[%s13361_s21 + $0x180] sm:$0xff] }
 0x46f   : > { %11065 = vmatprep.mubr.msk.f32.mxu1 %vm13090_vm0, %v19497_v44  ;;  %v16767_v43 = vand.u32 4294901760, %v442_v37 }
 0x470   : > { %20086 = vst [vmem:[#allocation43_spill] sm:$0xff] %v16739_v61  ;;  %v3336_v54 = vpop.f32.mrb[100].mxu0  ;;  %v16761_v61 = vsub.f32 %v440_v38, %v16731_v51 }
 0x471   : > { %v3783_v35 = vpop.f32.mrb[96].mxu1  ;;  %v3337_v6 = vadd.f32 %v3336_v54, %v20089_v22  ;;  %10851 = vmatmul.mubr.f32.gmra.mrb[206].mxu0 %v4364_v2  ;;  %v10440_v63 = vpop.f32.mrb[101].mxu0  ;;  %20092 = vst [vmem:[#allocation166_spill] sm:$0xff] %v16767_v43  ;;  %v16770_v2 = vsub.f32 %v441_v32, %v16749_v11  ;;  %v20094_v22 = vld [vmem:[#allocation47_spill] sm:$0xff] }
 0x472   : > { %v16756_v42 = vadd.f32 %v3783_v35, %v3325_v13  ;;  %v10655_v15 = vpop.f32.mrb[97].mxu1  ;;  %11066 = vmatmul.mubr.f32.gmra.mrb[202].mxu1 %v16623_v0  ;;  %20091 = vst [vmem:[#allocation165_spill] sm:$0xff] %v16761_v61  ;;  %10853 = vmatprep.mubr.msk.f32.mxu0 %vm13090_vm0, %v19497_v44  ;;  %v4384_v35 = vand.u32 4294901760, %v4383_v53  ;;  %v443_v63 = vld [vmem:[%s13361_s21 + $0x188] sm:$0xff]  ;;  %v20096_v0 = vand.u32 4294901760, %v16743_v50 }
 0x473   : > { %11068 = vmatprep.mubr.msk.f32.mxu1 %vm13090_vm0, %v19497_v44  ;;  %20093 = vst [vmem:[#allocation167_spill] sm:$0xff] %v16770_v2  ;;  %v16785_v32 = vand.u32 4294901760, %v443_v63 }
 0x474   : > { %20090 = vst [vmem:[#allocation45_spill] sm:$0xff] %v16756_v42  ;;  %v3342_v13 = vpop.f32.mrb[102].mxu0  ;;  %v4393_v18 = vsub.f32 %v16743_v50, %v20096_v0 }
 0x475   : > { %v3789_v54 = vpop.f32.mrb[98].mxu1  ;;  %v3343_v15 = vadd.f32 %v3342_v13, %v20094_v22  ;;  %10854 = vmatmul.mubr.f32.gmra.mrb[208].mxu0 %v4374_v28  ;;  %v10443_v1 = vpop.f32.mrb[103].mxu0  ;;  %20097 = vst [vmem:[#allocation168_spill] sm:$0xff] %v16785_v32  ;;  %v19387_v28 = vand.u32 4294901760, %v16770_v2  ;;  %v444_v13 = vld [vmem:[%s13361_s21 + $0x190] sm:$0xff] }
 0x476   : > { %v16774_v38 = vadd.f32 %v3789_v54, %v3331_v21  ;;  %v10658_v46 = vpop.f32.mrb[99].mxu1  ;;  %11069 = vmatmul.mubr.f32.gmra.mrb[204].mxu1 %v16641_v27  ;;  %10856 = vmatprep.mubr.msk.f32.mxu0 %vm13090_vm0, %v19497_v44  ;;  %v16789_v1 = vsub.f32 %v442_v37, %v16767_v43  ;;  %v20099_v54 = vld [vmem:[#allocation49_spill] sm:$0xff]  ;;  %v4394_v50 = vand.u32 4294901760, %v4393_v18  ;;  %v16803_v37 = vand.u32 4294901760, %v444_v13  ;;  %v445_v18 = vld [vmem:[%s13361_s21 + $0x198] sm:$0xff] }
 0x477   : > { %11071 = vmatprep.mubr.msk.f32.mxu1 %vm13090_vm0, %v19497_v44 }
 0x478   : > { %20095 = vst [vmem:[#allocation47_spill] sm:$0xff] %v16774_v38  ;;  %v3348_v21 = vpop.f32.mrb[104].mxu0  ;;  %20098 = vst [vmem:[#allocation169_spill] sm:$0xff] %v16789_v1  ;;  %v20101_v38 = vand.u32 4294901760, %v16761_v61 }
 0x479   : > { %v3795_v46 = vpop.f32.mrb[100].mxu1  ;;  %v3349_v0 = vadd.f32 %v3348_v21, %v20099_v54  ;;  %10857 = vmatmul.mubr.f32.gmra.mrb[210].mxu0 %v4384_v35  ;;  %v10446_v27 = vpop.f32.mrb[105].mxu0  ;;  %20102 = vst [vmem:[#allocation170_spill] sm:$0xff] %v16803_v37  ;;  %v4413_v35 = vsub.f32 %v16770_v2, %v19387_v28  ;;  %v16821_v28 = vand.u32 4294901760, %v445_v18 }
 0x47a   : > { %v16793_v22 = vadd.f32 %v3795_v46, %v3337_v6  ;;  %v10661_v53 = vpop.f32.mrb[101].mxu1  ;;  %11072 = vmatmul.mubr.f32.gmra.mrb[206].mxu1 %v16659_v7  ;;  %v4403_v42 = vsub.f32 %v16761_v61, %v20101_v38  ;;  %10859 = vmatprep.mubr.msk.f32.mxu0 %vm13090_vm0, %v19497_v44  ;;  %v19392_v27 = vand.u32 4294901760, %v16789_v1 }
 0x47b   : > { %11074 = vmatprep.mubr.msk.f32.mxu1 %vm13090_vm0, %v19497_v44  ;;  %v20103_v53 = vld [vmem:[#allocation50_spill] sm:$0xff]  ;;  %20106 = vst [vmem:[#allocation172_spill] sm:$0xff] %v16821_v28 }
 0x47c   : > { %20100 = vst [vmem:[#allocation49_spill] sm:$0xff] %v16793_v22  ;;  %v3354_v6 = vpop.f32.mrb[106].mxu0  ;;  %v4404_v61 = vand.u32 4294901760, %v4403_v42  ;;  %v16815_v22 = vsub.f32 %v443_v63, %v16785_v32  ;;  %v20107_v42 = vld [vmem:[#allocation53_spill] sm:$0xff] }
 0x47d   : > { %v3801_v21 = vpop.f32.mrb[102].mxu1  ;;  %v3355_v38 = vadd.f32 %v3354_v6, %v20103_v53  ;;  %10860 = vmatmul.mubr.f32.gmra.mrb[212].mxu0 %v4394_v50  ;;  %v10449_v7 = vpop.f32.mrb[107].mxu0  ;;  %v4423_v50 = vsub.f32 %v16789_v1, %v19392_v27 }
 0x47e   : > { %v16811_v46 = vadd.f32 %v3801_v21, %v3343_v15  ;;  %v10664_v54 = vpop.f32.mrb[103].mxu1  ;;  %11075 = vmatmul.mubr.f32.gmra.mrb[208].mxu1 %v16677_v4  ;;  %20105 = vst [vmem:[#allocation171_spill] sm:$0xff] %v16815_v22  ;;  %10862 = vmatprep.mubr.msk.f32.mxu0 %vm13090_vm0, %v19497_v44  ;;  %v4414_v21 = vand.u32 4294901760, %v4413_v35  ;;  %v446_v7 = vld [vmem:[%s13361_s21 + $0x1a0] sm:$0xff] }
 0x47f   : > { %11077 = vmatprep.mubr.msk.f32.mxu1 %vm13090_vm0, %v19497_v44  ;;  %v16839_v35 = vand.u32 4294901760, %v446_v7 }
 0x480   : > { %20104 = vst [vmem:[#allocation50_spill] sm:$0xff] %v16811_v46  ;;  %v3360_v6 = vpop.f32.mrb[108].mxu0  ;;  %v16833_v46 = vsub.f32 %v444_v13, %v16803_v37 }
 0x481   : > { %v3807_v15 = vpop.f32.mrb[104].mxu1  ;;  %v3361_v63 = vadd.f32 %v3360_v6, %v20107_v42  ;;  %10863 = vmatmul.mubr.f32.gmra.mrb[214].mxu0 %v4404_v61  ;;  %v10452_v4 = vpop.f32.mrb[109].mxu0  ;;  %20110 = vst [vmem:[#allocation174_spill] sm:$0xff] %v16839_v35  ;;  %v16842_v61 = vsub.f32 %v445_v18, %v16821_v28  ;;  %v20112_v42 = vld [vmem:[#allocation55_spill] sm:$0xff] }
 0x482   : > { %v16828_v53 = vadd.f32 %v3807_v15, %v3349_v0  ;;  %v10667_v54 = vpop.f32.mrb[105].mxu1  ;;  %11078 = vmatmul.mubr.f32.gmra.mrb[210].mxu1 %v16695_v14  ;;  %20109 = vst [vmem:[#allocation173_spill] sm:$0xff] %v16833_v46  ;;  %10865 = vmatprep.mubr.msk.f32.mxu0 %vm13090_vm0, %v19497_v44  ;;  %v4424_v15 = vand.u32 4294901760, %v4423_v50  ;;  %v447_v4 = vld [vmem:[%s13361_s21 + $0x1a8] sm:$0xff]  ;;  %v20114_v14 = vand.u32 4294901760, %v16815_v22 }
 0x483   : > { %11080 = vmatprep.mubr.msk.f32.mxu1 %vm13090_vm0, %v19497_v44  ;;  %20111 = vst [vmem:[#allocation175_spill] sm:$0xff] %v16842_v61  ;;  %v16857_v18 = vand.u32 4294901760, %v447_v4 }
 0x484   : > { %20108 = vst [vmem:[#allocation53_spill] sm:$0xff] %v16828_v53  ;;  %v3366_v0 = vpop.f32.mrb[110].mxu0  ;;  %v4433_v1 = vsub.f32 %v16815_v22, %v20114_v14 }
 0x485   : > { %v3813_v6 = vpop.f32.mrb[106].mxu1  ;;  %v3367_v54 = vadd.f32 %v3366_v0, %v20112_v42  ;;  %10866 = vmatmul.mubr.f32.gmra.mrb[216].mxu0 %v4414_v21  ;;  %v10455_v2 = vpop.f32.mrb[111].mxu0  ;;  %20115 = vst [vmem:[#allocation176_spill] sm:$0xff] %v16857_v18  ;;  %v19405_v21 = vand.u32 4294901760, %v16842_v61  ;;  %v448_v0 = vld [vmem:[%s13361_s21 + $0x1b0] sm:$0xff] }
 0x486   : > { %v16846_v13 = vadd.f32 %v3813_v6, %v3355_v38  ;;  %v10670_v27 = vpop.f32.mrb[107].mxu1  ;;  %11081 = vmatmul.mubr.f32.gmra.mrb[212].mxu1 %v16713_v9  ;;  %10868 = vmatprep.mubr.msk.f32.mxu0 %vm13090_vm0, %v19497_v44  ;;  %v16861_v2 = vsub.f32 %v446_v7, %v16839_v35  ;;  %v20117_v6 = vld [vmem:[#allocation57_spill] sm:$0xff]  ;;  %v4434_v22 = vand.u32 4294901760, %v4433_v1  ;;  %v16875_v7 = vand.u32 4294901760, %v448_v0  ;;  %v449_v1 = vld [vmem:[%s13361_s21 + $0x1b8] sm:$0xff] }
 0x487   : > { %11083 = vmatprep.mubr.msk.f32.mxu1 %vm13090_vm0, %v19497_v44 }
 0x488   : > { %20113 = vst [vmem:[#allocation55_spill] sm:$0xff] %v16846_v13  ;;  %v3372_v38 = vpop.f32.mrb[112].mxu0  ;;  %20116 = vst [vmem:[#allocation177_spill] sm:$0xff] %v16861_v2  ;;  %v20119_v13 = vand.u32 4294901760, %v16833_v46 }
 0x489   : > { %v3819_v27 = vpop.f32.mrb[108].mxu1  ;;  %v3373_v14 = vadd.f32 %v3372_v38, %v20117_v6  ;;  %10869 = vmatmul.mubr.f32.gmra.mrb[218].mxu0 %v4424_v15  ;;  %v10458_v9 = vpop.f32.mrb[113].mxu0  ;;  %20120 = vst [vmem:[#allocation178_spill] sm:$0xff] %v16875_v7  ;;  %v4453_v15 = vsub.f32 %v16842_v61, %v19405_v21  ;;  %v16893_v21 = vand.u32 4294901760, %v449_v1 }
 0x48a   : > { %v16865_v42 = vadd.f32 %v3819_v27, %v3361_v63  ;;  %v10673_v50 = vpop.f32.mrb[109].mxu1  ;;  %11084 = vmatmul.mubr.f32.gmra.mrb[214].mxu1 %v16731_v51  ;;  %v4443_v53 = vsub.f32 %v16833_v46, %v20119_v13  ;;  %10871 = vmatprep.mubr.msk.f32.mxu0 %vm13090_vm0, %v19497_v44  ;;  %v19410_v9 = vand.u32 4294901760, %v16861_v2 }
 0x48b   : > { %11086 = vmatprep.mubr.msk.f32.mxu1 %vm13090_vm0, %v19497_v44  ;;  %v20121_v50 = vld [vmem:[#allocation59_spill] sm:$0xff]  ;;  %20124 = vst [vmem:[#allocation180_spill] sm:$0xff] %v16893_v21 }
 0x48c   : > { %20118 = vst [vmem:[#allocation57_spill] sm:$0xff] %v16865_v42  ;;  %v3378_v63 = vpop.f32.mrb[114].mxu0  ;;  %v4444_v46 = vand.u32 4294901760, %v4443_v53  ;;  %v16887_v42 = vsub.f32 %v447_v4, %v16857_v18  ;;  %v20125_v53 = vld [vmem:[#allocation60_spill] sm:$0xff] }
 0x48d   : > { %v3825_v38 = vpop.f32.mrb[110].mxu1  ;;  %v3379_v13 = vadd.f32 %v3378_v63, %v20121_v50  ;;  %10872 = vmatmul.mubr.f32.gmra.mrb[220].mxu0 %v4434_v22  ;;  %v10461_v51 = vpop.f32.mrb[115].mxu0  ;;  %v4463_v22 = vsub.f32 %v16861_v2, %v19410_v9 }
 0x48e   : > { %v16883_v27 = vadd.f32 %v3825_v38, %v3367_v54  ;;  %v10676_v6 = vpop.f32.mrb[111].mxu1  ;;  %11087 = vmatmul.mubr.f32.gmra.mrb[216].mxu1 %v16749_v11  ;;  %20123 = vst [vmem:[#allocation179_spill] sm:$0xff] %v16887_v42  ;;  %10874 = vmatprep.mubr.msk.f32.mxu0 %vm13090_vm0, %v19497_v44  ;;  %v4454_v38 = vand.u32 4294901760, %v4453_v15  ;;  %v450_v51 = vld [vmem:[%s13361_s21 + $0x1c0] sm:$0xff] }
 0x48f   : > { %11089 = vmatprep.mubr.msk.f32.mxu1 %vm13090_vm0, %v19497_v44  ;;  %v16911_v15 = vand.u32 4294901760, %v450_v51 }
 0x490   : > { %20122 = vst [vmem:[#allocation59_spill] sm:$0xff] %v16883_v27  ;;  %v3384_v63 = vpop.f32.mrb[116].mxu0  ;;  %v16905_v27 = vsub.f32 %v448_v0, %v16875_v7 }
 0x491   : > { %v3831_v54 = vpop.f32.mrb[112].mxu1  ;;  %v3385_v4 = vadd.f32 %v3384_v63, %v20125_v53  ;;  %10875 = vmatmul.mubr.f32.gmra.mrb[222].mxu0 %v4444_v46  ;;  %v10464_v11 = vpop.f32.mrb[117].mxu0  ;;  %20128 = vst [vmem:[#allocation182_spill] sm:$0xff] %v16911_v15  ;;  %v16914_v46 = vsub.f32 %v449_v1, %v16893_v21  ;;  %v20130_v53 = vld [vmem:[#allocation63_spill] sm:$0xff] }
 0x492   : > { %v16900_v50 = vadd.f32 %v3831_v54, %v3373_v14  ;;  %v10679_v6 = vpop.f32.mrb[113].mxu1  ;;  %11090 = vmatmul.mubr.f32.gmra.mrb[218].mxu1 %v16767_v43  ;;  %20127 = vst [vmem:[#allocation181_spill] sm:$0xff] %v16905_v27  ;;  %10877 = vmatprep.mubr.msk.f32.mxu0 %vm13090_vm0, %v19497_v44  ;;  %v4464_v54 = vand.u32 4294901760, %v4463_v22  ;;  %v451_v11 = vld [vmem:[%s13361_s21 + $0x1c8] sm:$0xff]  ;;  %v20132_v43 = vand.u32 4294901760, %v16887_v42 }
 0x493   : > { %11092 = vmatprep.mubr.msk.f32.mxu1 %vm13090_vm0, %v19497_v44  ;;  %20129 = vst [vmem:[#allocation183_spill] sm:$0xff] %v16914_v46  ;;  %v16929_v1 = vand.u32 4294901760, %v451_v11 }
 0x494   : > { %20126 = vst [vmem:[#allocation60_spill] sm:$0xff] %v16900_v50  ;;  %v3390_v14 = vpop.f32.mrb[118].mxu0  ;;  %v4473_v2 = vsub.f32 %v16887_v42, %v20132_v43 }
 0x495   : > { %v3837_v63 = vpop.f32.mrb[114].mxu1  ;;  %v3391_v6 = vadd.f32 %v3390_v14, %v20130_v53  ;;  %10878 = vmatmul.mubr.f32.gmra.mrb[224].mxu0 %v4454_v38  ;;  %v10467_v61 = vpop.f32.mrb[119].mxu0  ;;  %20133 = vst [vmem:[#allocation184_spill] sm:$0xff] %v16929_v1  ;;  %v19423_v38 = vand.u32 4294901760, %v16914_v46  ;;  %v452_v14 = vld [vmem:[%s13361_s21 + $0x1d0] sm:$0xff] }
 0x496   : > { %v16918_v0 = vadd.f32 %v3837_v63, %v3379_v13  ;;  %v10682_v9 = vpop.f32.mrb[115].mxu1  ;;  %11093 = vmatmul.mubr.f32.gmra.mrb[220].mxu1 %v16785_v32  ;;  %10880 = vmatprep.mubr.msk.f32.mxu0 %vm13090_vm0, %v19497_v44  ;;  %v16933_v61 = vsub.f32 %v450_v51, %v16911_v15  ;;  %v20135_v63 = vld [vmem:[#allocation65_spill] sm:$0xff]  ;;  %v4474_v42 = vand.u32 4294901760, %v4473_v2  ;;  %v16947_v51 = vand.u32 4294901760, %v452_v14  ;;  %v453_v2 = vld [vmem:[%s13361_s21 + $0x1d8] sm:$0xff] }
 0x497   : > { %11095 = vmatprep.mubr.msk.f32.mxu1 %vm13090_vm0, %v19497_v44 }
 0x498   : > { %20131 = vst [vmem:[#allocation63_spill] sm:$0xff] %v16918_v0  ;;  %v3396_v13 = vpop.f32.mrb[120].mxu0  ;;  %20134 = vst [vmem:[#allocation185_spill] sm:$0xff] %v16933_v61  ;;  %v20137_v0 = vand.u32 4294901760, %v16905_v27 }
 0x499   : > { %v3843_v9 = vpop.f32.mrb[116].mxu1  ;;  %v3397_v43 = vadd.f32 %v3396_v13, %v20135_v63  ;;  %10881 = vmatmul.mubr.f32.gmra.mrb[226].mxu0 %v4464_v54  ;;  %v10470_v32 = vpop.f32.mrb[121].mxu0  ;;  %20138 = vst [vmem:[#allocation186_spill] sm:$0xff] %v16947_v51  ;;  %v4493_v54 = vsub.f32 %v16914_v46, %v19423_v38  ;;  %v16965_v38 = vand.u32 4294901760, %v453_v2  ;;  %v16975_v46 = vsub.f32 %v452_v14, %v16947_v51 }
 0x49a   : > { %v16937_v53 = vadd.f32 %v3843_v9, %v3385_v4  ;;  %v10685_v22 = vpop.f32.mrb[117].mxu1  ;;  %11096 = vmatmul.mubr.f32.gmra.mrb[222].mxu1 %v16803_v37  ;;  %v4483_v50 = vsub.f32 %v16905_v27, %v20137_v0  ;;  %10883 = vmatprep.mubr.msk.f32.mxu0 %vm13090_vm0, %v19497_v44  ;;  %v19428_v32 = vand.u32 4294901760, %v16933_v61  ;;  %v16957_v27 = vsub.f32 %v451_v11, %v16929_v1  ;;  %v20143_v11 = vld [vmem:[#allocation68_spill] sm:$0xff] }
 0x49b   : > { %11098 = vmatprep.mubr.msk.f32.mxu1 %vm13090_vm0, %v19497_v44  ;;  %v20139_v22 = vld [vmem:[#allocation66_spill] sm:$0xff]  ;;  %20142 = vst [vmem:[#allocation188_spill] sm:$0xff] %v16965_v38  ;;  %20144 = vst [vmem:[#allocation68_spill] sm:$0xff] %v16975_v46 }
 0x49c   : > { %20136 = vst [vmem:[#allocation65_spill] sm:$0xff] %v16937_v53  ;;  %v3946_v13 = vpop.f32.mrb[122].mxu0  ;;  %v4484_v37 = vand.u32 4294901760, %v4483_v50  ;;  %20140 = vst [vmem:[#allocation66_spill] sm:$0xff] %v16957_v27  ;;  %v4503_v50 = vsub.f32 %v16933_v61, %v19428_v32  ;;  %v20147_v32 = vld [vmem:[#allocation41_spill] sm:$0xff] }
 0x49d   : > { %v3849_v4 = vpop.f32.mrb[118].mxu1  ;;  %v3947_v0 = vadd.f32 %v3946_v13, %v20139_v22  ;;  %10884 = vmatmul.mubr.f32.gmra.mrb[228].mxu0 %v4474_v42  ;;  %v10726_v63 = vpop.f32.mrb[123].mxu0  ;;  %v4494_v42 = vand.u32 4294901760, %v4493_v54 }
 0x49e   : > { %v10688_v9 = vpop.f32.mrb[119].mxu1  ;;  %11099 = vmatmul.mubr.f32.gmra.mrb[224].mxu1 %v16821_v28  ;;  %v16959_v53 = vadd.f32 %v3849_v4, %v3391_v6  ;;  %10886 = vmatprep.mubr.msk.f32.mxu0 %vm13090_vm0, %v19497_v44  ;;  %v19433_v28 = vand.u32 4294901760, %v16957_v27 }
 0x49f   : > { %11101 = vmatprep.mubr.msk.f32.mxu1 %vm13090_vm0, %v19497_v44  ;;  %v454_v9 = vld [vmem:[%s13361_s21 + $0x1e0] sm:$0xff] }
 0x4a0   : > { %20141 = vst [vmem:[#allocation187_spill] sm:$0xff] %v16959_v53  ;;  %v3956_v22 = vpop.f32.mrb[124].mxu0  ;;  %v16983_v54 = vand.u32 4294901760, %v454_v9 }
 0x4a1   : > { %v3855_v13 = vpop.f32.mrb[120].mxu1  ;;  %v3957_v6 = vadd.f32 %v3956_v22, %v20143_v11  ;;  %10887 = vmatmul.mubr.f32.gmra.mrb[230].mxu0 %v4484_v37  ;;  %v10729_v63 = vpop.f32.mrb[125].mxu0  ;;  %v4504_v11 = vand.u32 4294901760, %v4503_v50 }
 0x4a2   : > { %v10691_v4 = vpop.f32.mrb[121].mxu1  ;;  %11102 = vmatmul.mubr.f32.gmra.mrb[226].mxu1 %v16839_v35  ;;  %v16977_v53 = vadd.f32 %v3855_v13, %v3397_v43  ;;  %10889 = vmatprep.mubr.msk.f32.mxu0 %vm13090_vm0, %v19497_v44  ;;  %20146 = vst [vmem:[#allocation190_spill] sm:$0xff] %v16983_v54  ;;  %v455_v63 = vld [vmem:[%s13361_s21 + $0x1e8] sm:$0xff]  ;;  %v4513_v35 = vsub.f32 %v16957_v27, %v19433_v28 }
 0x4a3   : > { %11104 = vmatprep.mubr.msk.f32.mxu1 %vm13090_vm0, %v19497_v44  ;;  %v16986_v4 = vsub.f32 %v453_v2, %v16965_v38 }
 0x4a4   : > { %20145 = vst [vmem:[#allocation189_spill] sm:$0xff] %v16977_v53  ;;  %v3966_v22 = vpop.f32.mrb[126].mxu0  ;;  %v4514_v61 = vand.u32 4294901760, %v4513_v35 }
 0x4a5   : > { %v4717_v37 = vpop.f32.mrb[122].mxu1  ;;  %v3967_v14 = vadd.f32 %v3966_v22, %v20147_v32  ;;  %10890 = vmatmul.mubr.f32.gmra.mrb[232].mxu0 %v4494_v42  ;;  %v10732_v13 = vpop.f32.mrb[127].mxu0  ;;  %v17001_v32 = vand.u32 4294901760, %v455_v63  ;;  %v19442_v50 = vand.u32 4294901760, %v16986_v4  ;;  %v17005_v22 = vsub.f32 %v454_v9, %v16983_v54 }
 0x4a6   : > { %v10947_v43 = vpop.f32.mrb[123].mxu1  ;;  %11105 = vmatmul.mubr.f32.gmra.mrb[228].mxu1 %v16857_v18  ;;  %v16995_v53 = vadd.f32 %v4717_v37, %v3947_v0  ;;  %10892 = vmatprep.mubr.msk.f32.mxu0 %vm13090_vm0, %v19497_v44  ;;  %v20150_v13 = vld [vmem:[#allocation42_spill] sm:$0xff]  ;;  %v20151_v18 = vand.u32 4294901760, %v16975_v46 }
 0x4a7   : > { %11107 = vmatprep.mubr.msk.f32.mxu1 %vm13090_vm0, %v19497_v44  ;;  %20149 = vst [vmem:[#allocation191_spill] sm:$0xff] %v17001_v32  ;;  %v456_v43 = vld [vmem:[%s13361_s21 + $0x1f0] sm:$0xff]  ;;  %v4533_v35 = vsub.f32 %v16986_v4, %v19442_v50 }
 0x4a8   : > { %20148 = vst [vmem:[#allocation41_spill] sm:$0xff] %v16995_v53  ;;  %v3976_v2 = vpop.f32.mrb[128].mxu0  ;;  %v4523_v27 = vsub.f32 %v16975_v46, %v20151_v18  ;;  %v17019_v9 = vand.u32 4294901760, %v456_v43 }
 0x4a9   : > { %v4723_v42 = vpop.f32.mrb[124].mxu1  ;;  %v3977_v28 = vadd.f32 %v3976_v2, %v20150_v13  ;;  %10893 = vmatmul.mubr.f32.gmra.mrb[234].mxu0 %v4504_v11  ;;  %v10735_v37 = vpop.f32.mrb[129].mxu0 }
 0x4aa   : > { %v10950_v0 = vpop.f32.mrb[125].mxu1  ;;  %11108 = vmatmul.mubr.f32.gmra.mrb[230].mxu1 %v16875_v7  ;;  %v17013_v53 = vadd.f32 %v4723_v42, %v3957_v6  ;;  %10895 = vmatprep.mubr.msk.f32.mxu0 %vm13090_vm0, %v19497_v44  ;;  %20152 = vst [vmem:[#allocation42_spill] sm:$0xff] %v17019_v9  ;;  %v4524_v37 = vand.u32 4294901760, %v4523_v27  ;;  %v17028_v7 = vsub.f32 %v455_v63, %v17001_v32 }
 0x4ab   : > { %11110 = vmatprep.mubr.msk.f32.mxu1 %vm13090_vm0, %v19497_v44  ;;  %v20153_v0 = vld [vmem:[#allocation75_spill] sm:$0xff] }
 0x4ac   : > { %v3986_v11 = vpop.f32.mrb[130].mxu0 }
 0x4ad   : > { %v4729_v2 = vpop.f32.mrb[126].mxu1  ;;  %v3987_v18 = vadd.f32 %v3986_v11, %v20153_v0  ;;  %10896 = vmatmul.mubr.f32.gmra.mrb[236].mxu0 %v4514_v61  ;;  %v10738_v42 = vpop.f32.mrb[131].mxu0  ;;  %v4534_v11 = vand.u32 4294901760, %v4533_v35  ;;  %v20154_v61 = vand.u32 4294901760, %v17005_v22 }
 0x4ae   : > { %v10953_v6 = vpop.f32.mrb[127].mxu1  ;;  %11111 = vmatmul.mubr.f32.gmra.mrb[232].mxu1 %v16893_v21  ;;  %v17030_v46 = vadd.f32 %v4729_v2, %v3967_v14  ;;  %10898 = vmatprep.mubr.msk.f32.mxu0 %vm13090_vm0, %v19497_v44  ;;  %v19445_v2 = vand.u32 4294901760, %v17028_v7  ;;  %v17043_v42 = vsub.f32 %v456_v43, %v17019_v9 }
 0x4af   : > { %11113 = vmatprep.mubr.msk.f32.mxu1 %vm13090_vm0, %v19497_v44  ;;  %v4543_v0 = vsub.f32 %v17005_v22, %v20154_v61  ;;  %v20155_v6 = vld [vmem:[#allocation77_spill] sm:$0xff]  ;;  %v20156_v61 = vld [vmem:[#allocation46_spill] sm:$0xff] }
 0x4b0   : > { %v3996_v50 = vpop.f32.mrb[132].mxu0  ;;  %v19448_v43 = vand.u32 4294901760, %v17043_v42 }
 0x4b1   : > { %v4735_v13 = vpop.f32.mrb[128].mxu1  ;;  %v3997_v27 = vadd.f32 %v3996_v50, %v20155_v6  ;;  %10899 = vmatmul.mubr.f32.gmra.mrb[238].mxu0 %v4524_v37  ;;  %v10741_v14 = vpop.f32.mrb[133].mxu0  ;;  %v4544_v37 = vand.u32 4294901760, %v4543_v0 }
 0x4b2   : > { %v10956_v63 = vpop.f32.mrb[129].mxu1  ;;  %11114 = vmatmul.mubr.f32.gmra.mrb[234].mxu1 %v16911_v15  ;;  %v17045_v21 = vadd.f32 %v4735_v13, %v3977_v28  ;;  %10901 = vmatprep.mubr.msk.f32.mxu0 %vm13090_vm0, %v19497_v44  ;;  %v4553_v28 = vsub.f32 %v17028_v7, %v19445_v2 }
 0x4b3   : > { %11116 = vmatprep.mubr.msk.f32.mxu1 %vm13090_vm0, %v19497_v44 }
 0x4b4   : > { %v4006_v35 = vpop.f32.mrb[134].mxu0  ;;  %v4554_v2 = vand.u32 4294901760, %v4553_v28 }
 0x4b5   : > { %v4741_v50 = vpop.f32.mrb[130].mxu1  ;;  %v4007_v6 = vadd.f32 %v4006_v35, %v20156_v61  ;;  %10902 = vmatmul.mubr.f32.gmra.mrb[240].mxu0 %v4534_v11  ;;  %v10744_v14 = vpop.f32.mrb[135].mxu0  ;;  %v20157_v35 = vld [vmem:[#allocation51_spill] sm:$0xff] }
 0x4b6   : > { %v10959_v63 = vpop.f32.mrb[131].mxu1  ;;  %11117 = vmatmul.mubr.f32.gmra.mrb[236].mxu1 %v16929_v1  ;;  %v17057_v13 = vadd.f32 %v4741_v50, %v3987_v18  ;;  %10904 = vmatprep.mubr.msk.f32.mxu0 %vm13090_vm0, %v19497_v44  ;;  %v4563_v18 = vsub.f32 %v17043_v42, %v19448_v43 }
 0x4b7   : > { %11119 = vmatprep.mubr.msk.f32.mxu1 %vm13090_vm0, %v19497_v44 }
 0x4b8   : > { %v4016_v0 = vpop.f32.mrb[136].mxu0 }
 0x4b9   : > { %v4747_v11 = vpop.f32.mrb[132].mxu1  ;;  %v4017_v61 = vadd.f32 %v4016_v0, %v20157_v35  ;;  %10905 = vmatmul.mubr.f32.gmra.mrb[242].mxu0 %v4544_v37  ;;  %v10747_v14 = vpop.f32.mrb[137].mxu0 }
 0x4ba   : > { %v10962_v63 = vpop.f32.mrb[133].mxu1  ;;  %11120 = vmatmul.mubr.f32.gmra.mrb[238].mxu1 %v16947_v51  ;;  %v17068_v50 = vadd.f32 %v4747_v11, %v3997_v27  ;;  %10907 = vmatprep.mubr.msk.f32.mxu0 %vm13090_vm0, %v19497_v44 }
 0x4bb   : > { %11122 = vmatprep.mubr.msk.f32.mxu1 %vm13090_vm0, %v19497_v44  ;;  %v4564_v63 = vand.u32 4294901760, %v4563_v18 }
 0x4bc   : > { %v4026_v1 = vpop.f32.mrb[138].mxu0 }
 0x4bd   : > { %v4753_v0 = vpop.f32.mrb[134].mxu1  ;;  %v4027_v37 = vadd.f32 %v4026_v1, %v15963_v5  ;;  %10908 = vmatmul.mubr.f32.gmra.mrb[244].mxu0 %v4554_v2  ;;  %v10750_v28 = vpop.f32.mrb[139].mxu0 }
 0x4be   : > { %v10965_v35 = vpop.f32.mrb[135].mxu1  ;;  %11123 = vmatmul.mubr.f32.gmra.mrb[240].mxu1 %v16965_v38  ;;  %v17076_v14 = vadd.f32 %v4753_v0, %v4007_v6  ;;  %10910 = vmatprep.mubr.msk.f32.mxu0 %vm13090_vm0, %v19497_v44  ;;  %v20158_v6 = vld [vmem:[#allocation85_spill] sm:$0xff]  ;;  %v20160_v0 = vld [vmem:[#allocation86_spill] sm:$0xff] }
 0x4bf   : > { %11125 = vmatprep.mubr.msk.f32.mxu1 %vm13090_vm0, %v19497_v44  ;;  %v20159_v18 = vand.u32 4294901760, %v20158_v6  ;;  %v20161_v35 = vand.u32 4294901760, %v20160_v0 }
 0x4c0   : > { %v4036_v27 = vpop.f32.mrb[140].mxu0 }
 0x4c1   : > { %v4759_v11 = vpop.f32.mrb[136].mxu1  ;;  %v4037_v43 = vadd.f32 %v4036_v27, %v15984_v10  ;;  %10911 = vmatmul.mubr.f32.gmra.mrb[246].mxu0 %v4564_v63  ;;  %v10753_v1 = vpop.f32.mrb[141].mxu0  ;;  %v12259_v28 = vpack.c.bf16 %v20161_v35, %v20159_v18  ;;  %v20165_v18 = vld [vmem:[#allocation94_spill] sm:$0xff] }
 0x4c2   : > { %v10968_v5 = vpop.f32.mrb[137].mxu1  ;;  %11126 = vmatmul.mubr.f32.gmra.mrb[242].mxu1 %v16983_v54  ;;  %v17084_v2 = vadd.f32 %v4759_v11, %v4017_v61  ;;  %11166 = vmatprep.mubr.msk.f32.mxu0 %vm13090_vm0, %v19497_v44  ;;  %v20162_v61 = vld [vmem:[#allocation73_spill] sm:$0xff]  ;;  %v20163_v1 = vld [vmem:[#allocation90_spill] sm:$0xff]  ;;  %v20166_v0 = vand.u32 4294901760, %v20165_v18 }
 0x4c3   : > { %11128 = vmatprep.mubr.msk.f32.mxu1 %vm13090_vm0, %v19497_v44  ;;  %v20164_v6 = vand.u32 4294901760, %v20163_v1 }
 0x4c4   : > { %v4046_v38 = vpop.f32.mrb[142].mxu0 }
 0x4c5   : > { %v4765_v10 = vpop.f32.mrb[138].mxu1  ;;  %v4047_v63 = vadd.f32 %v4046_v38, %v16004_v3  ;;  %11167 = vmatmul.mubr.f32.vlgmr.msra.gmra.mrb[248].mxu0 %v20162_v61  ;;  %v10756_v11 = vpop.f32.mrb[143].mxu0  ;;  %v12262_v3 = vpack.c.bf16 %v20166_v0, %v20164_v6  ;;  %v20169_v6 = vand.u32 4294901760, %v19940_v52  ;;  %v20173_v52 = vand.u32 4294901760, %v15245_v41  ;;  %v20178_v41 = vld [vmem:[#allocation105_spill] sm:$0xff] }
 0x4c6   : > { %v10971_v27 = vpop.f32.mrb[139].mxu1  ;;  %11129 = vmatmul.mubr.f32.gmra.mrb[244].mxu1 %v17001_v32  ;;  %v17097_v5 = vadd.f32 %v4765_v10, %v4027_v37  ;;  %11169 = vmatprep.mubr.msk.f32.mxu0 %vm13090_vm0, %v19497_v44  ;;  %v20167_v10 = vld [vmem:[#allocation44_spill] sm:$0xff] }
 0x4c7   : > { %11131 = vmatprep.mubr.msk.f32.mxu1 %vm13090_vm0, %v19497_v44  ;;  %12260 = vmatpush3.bf16.msra.mxu0 %v12259_v28 }
 0x4c8   : > { %v4056_v38 = vpop.f32.mrb[144].mxu0  ;;  %12261 = vmatprep.subr.bf16.mxu0 %v19502_v58 }
 0x4c9   : > { %v4771_v35 = vpop.f32.mrb[140].mxu1  ;;  %v4057_v27 = vadd.f32 %v4056_v38, %v16026_v24  ;;  %11170 = vmatmul.mubr.f32.gmra.mrb[250].mxu0 %v20167_v10  ;;  %v10759_v11 = vpop.f32.mrb[145].mxu0  ;;  %v20168_v24 = vand.u32 4294901760, %v19939_v20  ;;  %v20170_v38 = vld [vmem:[#allocation81_spill] sm:$0xff] }
 0x4ca   : > { %v10974_v37 = vpop.f32.mrb[141].mxu1  ;;  %11132 = vmatmul.mubr.f32.gmra.mrb[246].mxu1 %v17019_v9  ;;  %v17111_v32 = vadd.f32 %v4771_v35, %v4037_v43  ;;  %11172 = vmatprep.mubr.msk.f32.mxu0 %vm13090_vm0, %v19497_v44  ;;  %v20171_v35 = vand.u32 4294901760, %v20162_v61  ;;  %v20174_v61 = vld [vmem:[#allocation106_spill] sm:$0xff] }
 0x4cb   : > { %11387 = vmatprep.mubr.msk.f32.mxu1 %vm13090_vm0, %v19497_v44  ;;  %12263 = vmatpush3.bf16.msra.mxu0 %v12262_v3  ;;  %v12265_v18 = vpack.c.bf16 %v20169_v6, %v20168_v24  ;;  %v20172_v3 = vld [vmem:[#allocation102_spill] sm:$0xff]  ;;  %v20176_v6 = vld [vmem:[#allocation83_spill] sm:$0xff] }
 0x4cc   : > { %v4066_v28 = vpop.f32.mrb[146].mxu0  ;;  %12264 = vmatprep.subr.bf16.mxu0 %v19502_v58 }
 0x4cd   : > { %v4777_v1 = vpop.f32.mrb[142].mxu1  ;;  %v4067_v0 = vadd.f32 %v4066_v28, %v16050_v56  ;;  %11173 = vmatmul.mubr.f32.gmra.mrb[252].mxu0 %v20170_v38  ;;  %v10762_v37 = vpop.f32.mrb[147].mxu0  ;;  %v20175_v28 = vand.u32 4294901760, %v20174_v61  ;;  %v20182_v61 = vand.u32 4294901760, %v20170_v38 }
 0x4ce   : > { %v10977_v43 = vpop.f32.mrb[143].mxu1  ;;  %11388 = vmatmul.mubr.f32.vlgmr.msra.gmra.mrb[248].mxu1 %v20171_v35  ;;  %v17126_v11 = vadd.f32 %v4777_v1, %v4047_v63  ;;  %11175 = vmatprep.mubr.msk.f32.mxu0 %vm13090_vm0, %v19497_v44 }
 0x4cf   : > { %12284 = vmatpush3.bf16.msra.mxu1 %v20172_v3  ;;  %11390 = vmatprep.mubr.msk.f32.mxu1 %vm13090_vm0, %v19497_v44  ;;  %v12268_v24 = vpack.c.bf16 %v20175_v28, %v20173_v52  ;;  %v20177_v43 = vand.u32 4294901760, %v20167_v10  ;;  %v20179_v10 = vand.u32 4294901760, %v15279_v60  ;;  %v20181_v52 = vld [vmem:[#allocation52_spill] sm:$0xff]  ;;  %v20183_v60 = vld [vmem:[#allocation110_spill] sm:$0xff] }
 0x4d0   : > { %12285 = vmatprep.subr.bf16.mxu1 %v19502_v58  ;;  %v4076_v56 = vpop.f32.mrb[148].mxu0  ;;  %12266 = vmatpush3.bf16.msra.mxu0 %v12265_v18 }
 0x4d1   : > { %v4783_v20 = vpop.f32.mrb[144].mxu1  ;;  %v4077_v63 = vadd.f32 %v4076_v56, %v16071_v59  ;;  %11176 = vmatmul.mubr.f32.gmra.mrb[254].mxu0 %v20176_v6  ;;  %v10765_v35 = vpop.f32.mrb[149].mxu0  ;;  %12267 = vmatprep.subr.bf16.mxu0 %v19502_v58 }
 0x4d2   : > { %v10980_v1 = vpop.f32.mrb[145].mxu1  ;;  %11391 = vmatmul.mubr.f32.gmra.mrb[250].mxu1 %v20177_v43  ;;  %v17142_v37 = vadd.f32 %v4783_v20, %v4057_v27  ;;  %11178 = vmatprep.mubr.msk.f32.mxu0 %vm13090_vm0, %v19497_v44  ;;  %v20180_v27 = vand.u32 4294901760, %v15281_v48  ;;  %v20185_v43 = vand.u32 4294901760, %v20176_v6 }
 0x4d3   : > { %11393 = vmatprep.mubr.msk.f32.mxu1 %vm13090_vm0, %v19497_v44  ;;  %12287 = vmatpush3.bf16.msra.mxu1 %v20178_v41 }
 0x4d4   : > { %v4086_v59 = vpop.f32.mrb[150].mxu0  ;;  %12288 = vmatprep.subr.bf16.mxu1 %v19502_v58  ;;  %12269 = vmatpush3.bf16.msra.mxu0 %v12268_v24  ;;  %v12271_v3 = vpack.c.bf16 %v20180_v27, %v20179_v10  ;;  %v20186_v10 = vld [vmem:[#allocation56_spill] sm:$0xff] }
 0x4d5   : > { %v4789_v18 = vpop.f32.mrb[146].mxu1  ;;  %v4087_v56 = vadd.f32 %v4086_v59, %v16091_v49  ;;  %11179 = vmatmul.mubr.f32.gmra.mrb[0].mxu0 %v20181_v52  ;;  %v10768_v28 = vpop.f32.mrb[151].mxu0  ;;  %12270 = vmatprep.subr.bf16.mxu0 %v19502_v58 }
 0x4d6   : > { %v10983_v20 = vpop.f32.mrb[147].mxu1  ;;  %11394 = vmatmul.mubr.f32.gmra.mrb[252].mxu1 %v20182_v61  ;;  %v17159_v1 = vadd.f32 %v4789_v18, %v4067_v0  ;;  %11181 = vmatprep.mubr.msk.f32.mxu0 %vm13090_vm0, %v19497_v44  ;;  %v20184_v0 = vld [vmem:[#allocation54_spill] sm:$0xff] }
 0x4d7   : > { %11396 = vmatprep.mubr.msk.f32.mxu1 %vm13090_vm0, %v19497_v44  ;;  %12290 = vmatpush3.bf16.msra.mxu1 %v20183_v60 }
 0x4d8   : > { %v4096_v48 = vpop.f32.mrb[152].mxu0  ;;  %12291 = vmatprep.subr.bf16.mxu1 %v19502_v58  ;;  %12272 = vmatpush3.bf16.msra.mxu0 %v12271_v3 }
 0x4d9   : > { %v4795_v49 = vpop.f32.mrb[148].mxu1  ;;  %v4097_v38 = vadd.f32 %v4096_v48, %v16111_v31  ;;  %11182 = vmatmul.mubr.f32.gmra.mrb[2].mxu0 %v20184_v0  ;;  %v10771_v35 = vpop.f32.mrb[153].mxu0  ;;  %12273 = vmatprep.subr.bf16.mxu0 %v19502_v58 }
 0x4da   : > { %v10986_v24 = vpop.f32.mrb[149].mxu1  ;;  %11397 = vmatmul.mubr.f32.gmra.mrb[254].mxu1 %v20185_v43  ;;  %v17172_v41 = vadd.f32 %v4795_v49, %v4077_v63  ;;  %11184 = vmatprep.mubr.msk.f32.mxu0 %vm13090_vm0, %v19497_v44  ;;  %v20187_v63 = vand.u32 4294901760, %v20181_v52  ;;  %v20189_v49 = vand.u32 4294901760, %v20186_v10 }
 0x4db   : > { %11399 = vmatprep.mubr.msk.f32.mxu1 %vm13090_vm0, %v19497_v44  ;;  %12293 = vmatpush3.bf16.msra.mxu1 %v15306_v62 }
 0x4dc   : > { %v4106_v31 = vpop.f32.mrb[154].mxu0  ;;  %12294 = vmatprep.subr.bf16.mxu1 %v19502_v58 }
 0x4dd   : > { %v4801_v59 = vpop.f32.mrb[150].mxu1  ;;  %v4107_v6 = vadd.f32 %v4106_v31, %v16132_v47  ;;  %11185 = vmatmul.mubr.f32.gmra.mrb[4].mxu0 %v20186_v10  ;;  %v10774_v27 = vpop.f32.mrb[155].mxu0  ;;  %v20191_v31 = vld [vmem:[#allocation22_spill] sm:$0xff]  ;;  %v20194_v10 = vand.u32 4294901760, %v15392_v39  ;;  %v20195_v39 = vld [vmem:[#allocation23_spill] sm:$0xff] }
 0x4de   : > { %v10989_v18 = vpop.f32.mrb[151].mxu1  ;;  %11400 = vmatmul.mubr.f32.gmra.mrb[0].mxu1 %v20187_v63  ;;  %v17185_v3 = vadd.f32 %v4801_v59, %v4087_v56  ;;  %11187 = vmatprep.mubr.msk.f32.mxu0 %vm13090_vm0, %v19497_v44  ;;  %v20188_v56 = vand.u32 4294901760, %v20184_v0  ;;  %v20192_v59 = vand.u32 4294901760, %v16020_v33 }
 0x4df   : > { %11402 = vmatprep.mubr.msk.f32.mxu1 %vm13090_vm0, %v19497_v44  ;;  %12296 = vmatpush3.bf16.msra.mxu1 %v15326_v57  ;;  %v20193_v18 = vand.u32 4294901760, %v15390_v8 }
 0x4e0   : > { %v4116_v62 = vpop.f32.mrb[156].mxu0  ;;  %12297 = vmatprep.subr.bf16.mxu1 %v19502_v58 }
 0x4e1   : > { %v4807_v20 = vpop.f32.mrb[152].mxu1  ;;  %v4117_v47 = vadd.f32 %v4116_v62, %v16155_v34  ;;  %11188 = vmatmul.mubr.f32.gmra.mrb[6].mxu0 %v16020_v33  ;;  %v10777_v52 = vpop.f32.mrb[157].mxu0  ;;  %v12274_v63 = vpack.c.bf16 %v20194_v10, %v20193_v18 }
 0x4e2   : > { %v10992_v61 = vpop.f32.mrb[153].mxu1  ;;  %11403 = vmatmul.mubr.f32.gmra.mrb[2].mxu1 %v20188_v56  ;;  %v17197_v28 = vadd.f32 %v4807_v20, %v4097_v38  ;;  %11190 = vmatprep.mubr.msk.f32.mxu0 %vm13090_vm0, %v19497_v44  ;;  %v20196_v20 = vand.u32 4294901760, %v16043_v45 }
 0x4e3   : > { %11405 = vmatprep.mubr.msk.f32.mxu1 %vm13090_vm0, %v19497_v44  ;;  %12299 = vmatpush3.bf16.msra.mxu1 %v15388_v36  ;;  %v20190_v36 = vld [vmem:[#allocation112_spill] sm:$0xff] }
 0x4e4   : > { %v4126_v57 = vpop.f32.mrb[158].mxu0  ;;  %12300 = vmatprep.subr.bf16.mxu1 %v19502_v58  ;;  %12275 = vmatpush3.bf16.msra.mxu0 %v12274_v63 }
 0x4e5   : > { %v4813_v60 = vpop.f32.mrb[154].mxu1  ;;  %v4127_v34 = vadd.f32 %v4126_v57, %v16174_v30  ;;  %11191 = vmatmul.mubr.f32.gmra.mrb[8].mxu0 %v16043_v45  ;;  %v10780_v38 = vpop.f32.mrb[159].mxu0  ;;  %12276 = vmatprep.subr.bf16.mxu0 %v19502_v58  ;;  %v20197_v57 = vld [vmem:[#allocation61_spill] sm:$0xff] }
 0x4e6   : > { %v10995_v48 = vpop.f32.mrb[155].mxu1  ;;  %11406 = vmatmul.mubr.f32.gmra.mrb[4].mxu1 %v20189_v49  ;;  %v17209_v24 = vadd.f32 %v4813_v60, %v4107_v6  ;;  %11193 = vmatprep.mubr.msk.f32.mxu0 %vm13090_vm0, %v19497_v44  ;;  %v20198_v60 = vand.u32 4294901760, %v20191_v31  ;;  %v20202_v18 = vand.u32 4294901760, %v20197_v57 }
 0x4e7   : > { %11408 = vmatprep.mubr.msk.f32.mxu1 %vm13090_vm0, %v19497_v44  ;;  %12302 = vmatpush3.bf16.msra.mxu1 %v20190_v36  ;;  %v20199_v36 = vld [vmem:[#allocation62_spill] sm:$0xff] }
 0x4e8   : > { %v4136_v0 = vpop.f32.mrb[160].mxu0  ;;  %12303 = vmatprep.subr.bf16.mxu1 %v19502_v58 }
 0x4e9   : > { %v4819_v43 = vpop.f32.mrb[156].mxu1  ;;  %v4137_v30 = vadd.f32 %v4136_v0, %v16192_v40  ;;  %11194 = vmatmul.mubr.f32.gmra.mrb[10].mxu0 %v20191_v31  ;;  %v10783_v6 = vpop.f32.mrb[161].mxu0  ;;  %v20200_v0 = vand.u32 4294901760, %v20195_v39 }
 0x4ea   : > { %v10998_v35 = vpop.f32.mrb[157].mxu1  ;;  %11409 = vmatmul.mubr.f32.gmra.mrb[6].mxu1 %v20192_v59  ;;  %v17225_v27 = vadd.f32 %v4819_v43, %v4117_v47  ;;  %11196 = vmatprep.mubr.msk.f32.mxu0 %vm13090_vm0, %v19497_v44  ;;  %v20201_v6 = vld [vmem:[#allocation64_spill] sm:$0xff] }
 0x4eb   : > { %11411 = vmatprep.mubr.msk.f32.mxu1 %vm13090_vm0, %v19497_v44  ;;  %12305 = vmatpush3.bf16.msra.mxu1 %v15566_v23 }
 0x4ec   : > { %v4146_v40 = vpop.f32.mrb[162].mxu0 }
 0x4ed   : > { %v4825_v33 = vpop.f32.mrb[158].mxu1  ;;  %v4147_v8 = vadd.f32 %v4146_v40, %v16211_v55  ;;  %11197 = vmatmul.mubr.f32.gmra.mrb[12].mxu0 %v20195_v39  ;;  %v10786_v47 = vpop.f32.mrb[163].mxu0  ;;  %v20204_v39 = vand.u32 4294901760, %v20199_v36 }
 0x4ee   : > { %v11001_v62 = vpop.f32.mrb[159].mxu1  ;;  %11412 = vmatmul.mubr.f32.gmra.mrb[8].mxu1 %v20196_v20  ;;  %v17237_v61 = vadd.f32 %v4825_v33, %v4127_v34  ;;  %11199 = vmatprep.mubr.msk.f32.mxu0 %vm13090_vm0, %v19497_v44 }
 0x4ef   : > { %11414 = vmatprep.mubr.msk.f32.mxu1 %vm13090_vm0, %v19497_v44  ;;  %v20203_v62 = vld [vmem:[#allocation67_spill] sm:$0xff] }
 0x4f0   : > { %v4156_v23 = vpop.f32.mrb[164].mxu0 }
 0x4f1   : > { %v4831_v56 = vpop.f32.mrb[160].mxu1  ;;  %v4157_v52 = vadd.f32 %v4156_v23, %v16229_v17  ;;  %11200 = vmatmul.mubr.f32.gmra.mrb[14].mxu0 %v20197_v57  ;;  %v10789_v45 = vpop.f32.mrb[165].mxu0  ;;  %v20206_v57 = vand.u32 4294901760, %v20201_v6 }
 0x4f2   : > { %v11004_v55 = vpop.f32.mrb[161].mxu1  ;;  %11415 = vmatmul.mubr.f32.gmra.mrb[10].mxu1 %v20198_v60  ;;  %v17247_v48 = vadd.f32 %v4831_v56, %v4137_v30  ;;  %11202 = vmatprep.mubr.msk.f32.mxu0 %vm13090_vm0, %v19497_v44 }
 0x4f3   : > { %11417 = vmatprep.mubr.msk.f32.mxu1 %vm13090_vm0, %v19497_v44  ;;  %v20205_v55 = vld [vmem:[#allocation69_spill] sm:$0xff] }
 0x4f4   : > { %v4166_v34 = vpop.f32.mrb[166].mxu0 }
 0x4f5   : > { %v4837_v49 = vpop.f32.mrb[162].mxu1  ;;  %v4167_v38 = vadd.f32 %v4166_v34, %v16246_v12  ;;  %11203 = vmatmul.mubr.f32.gmra.mrb[16].mxu0 %v20199_v36  ;;  %v10792_v43 = vpop.f32.mrb[167].mxu0  ;;  %v20208_v36 = vld [vmem:[#allocation70_spill] sm:$0xff] }
 0x4f6   : > { %v11007_v17 = vpop.f32.mrb[163].mxu1  ;;  %11418 = vmatmul.mubr.f32.gmra.mrb[12].mxu1 %v20200_v0  ;;  %v17257_v35 = vadd.f32 %v4837_v49, %v4147_v8  ;;  %11205 = vmatprep.mubr.msk.f32.mxu0 %vm13090_vm0, %v19497_v44  ;;  %v20209_v0 = vand.u32 4294901760, %v20203_v62 }
 0x4f7   : > { %11420 = vmatprep.mubr.msk.f32.mxu1 %vm13090_vm0, %v19497_v44 }
 0x4f8   : > { %v4176_v30 = vpop.f32.mrb[168].mxu0 }
 0x4f9   : > { %v4843_v31 = vpop.f32.mrb[164].mxu1  ;;  %v4177_v59 = vadd.f32 %v4176_v30, %v16264_v16  ;;  %11206 = vmatmul.mubr.f32.gmra.mrb[18].mxu0 %v20201_v6  ;;  %v10795_v10 = vpop.f32.mrb[169].mxu0 }
 0x4fa   : > { %v11010_v12 = vpop.f32.mrb[165].mxu1  ;;  %11421 = vmatmul.mubr.f32.gmra.mrb[14].mxu1 %v20202_v18  ;;  %v17267_v63 = vadd.f32 %v4843_v31, %v4157_v52  ;;  %11208 = vmatprep.mubr.msk.f32.mxu0 %vm13090_vm0, %v19497_v44  ;;  %v20211_v10 = vld [vmem:[#allocation72_spill] sm:$0xff] }
 0x4fb   : > { %11423 = vmatprep.mubr.msk.f32.mxu1 %vm13090_vm0, %v19497_v44  ;;  %v20210_v12 = vld [vmem:[#allocation92_spill] sm:$0xff] }
 0x4fc   : > { %v4186_v40 = vpop.f32.mrb[170].mxu0 }
 0x4fd   : > { %v4849_v33 = vpop.f32.mrb[166].mxu1  ;;  %v4187_v8 = vadd.f32 %v4186_v40, %v16283_v29  ;;  %11209 = vmatmul.mubr.f32.gmra.mrb[20].mxu0 %v20203_v62  ;;  %v10798_v20 = vpop.f32.mrb[171].mxu0  ;;  %v20212_v40 = vand.u32 4294901760, %v20205_v55  ;;  %v20215_v62 = vld [vmem:[#allocation115_spill] sm:$0xff] }
 0x4fe   : > { %v11013_v16 = vpop.f32.mrb[167].mxu1  ;;  %11424 = vmatmul.mubr.f32.gmra.mrb[16].mxu1 %v20204_v39  ;;  %v17277_v47 = vadd.f32 %v4849_v33, %v4167_v38  ;;  %11211 = vmatprep.mubr.msk.f32.mxu0 %vm13090_vm0, %v19497_v44  ;;  %v20207_v38 = vld [vmem:[#allocation82_spill] sm:$0xff]  ;;  %v20216_v39 = vand.u32 4294901760, %v20215_v62  ;;  %v20224_v62 = vld [vmem:[#allocation79_spill] sm:$0xff] }
 0x4ff   : > { %11426 = vmatprep.mubr.msk.f32.mxu1 %vm13090_vm0, %v19497_v44  ;;  %v20213_v16 = vld [vmem:[#allocation126_spill] sm:$0xff] }
 0x500   : > { %v4196_v23 = vpop.f32.mrb[172].mxu0 }
 0x501   : > { %v4855_v56 = vpop.f32.mrb[168].mxu1  ;;  %v4197_v52 = vadd.f32 %v4196_v23, %v16304_v25  ;;  %11212 = vmatmul.mubr.f32.gmra.mrb[22].mxu0 %v20205_v55  ;;  %v10801_v60 = vpop.f32.mrb[173].mxu0  ;;  %v20217_v55 = vld [vmem:[#allocation127_spill] sm:$0xff] }
 0x502   : > { %v11016_v29 = vpop.f32.mrb[169].mxu1  ;;  %11427 = vmatmul.mubr.f32.gmra.mrb[18].mxu1 %v20206_v57  ;;  %v17287_v45 = vadd.f32 %v4855_v56, %v4177_v59  ;;  %11214 = vmatprep.mubr.msk.f32.mxu0 %vm13090_vm0, %v19497_v44 }
 0x503   : > { %11429 = vmatprep.mubr.msk.f32.mxu1 %vm13090_vm0, %v19497_v44 }
 0x504   : > { %v4206_v34 = vpop.f32.mrb[174].mxu0 }
 0x505   : > { %v4861_v49 = vpop.f32.mrb[170].mxu1  ;;  %v4207_v17 = vadd.f32 %v4206_v34, %v20207_v38  ;;  %11215 = vmatmul.mubr.f32.gmra.mrb[24].mxu0 %v20208_v36  ;;  %v10804_v43 = vpop.f32.mrb[175].mxu0  ;;  %v20218_v34 = vld [vmem:[#allocation74_spill] sm:$0xff] }
 0x506   : > { %v11019_v25 = vpop.f32.mrb[171].mxu1  ;;  %11430 = vmatmul.mubr.f32.gmra.mrb[20].mxu1 %v20209_v0  ;;  %v17297_v30 = vadd.f32 %v4861_v49, %v4187_v8  ;;  %11217 = vmatprep.mubr.msk.f32.mxu0 %vm13090_vm0, %v19497_v44  ;;  %v20214_v8 = vand.u32 4294901760, %v20213_v16  ;;  %v20219_v49 = vand.u32 4294901760, %v20208_v36 }
 0x507   : > { %11432 = vmatprep.mubr.msk.f32.mxu1 %vm13090_vm0, %v19497_v44 }
 0x508   : > { %v4216_v31 = vpop.f32.mrb[176].mxu0  ;;  %v12277_v20 = vpack.c.bf16 %v20216_v39, %v20214_v8  ;;  %v20225_v39 = vand.u32 4294901760, %v20218_v34 }
 0x509   : > { %v4867_v59 = vpop.f32.mrb[172].mxu1  ;;  %v4217_v6 = vadd.f32 %v4216_v31, %v20210_v12  ;;  %11218 = vmatmul.mubr.f32.gmra.mrb[26].mxu0 %v20211_v10  ;;  %v10807_v33 = vpop.f32.mrb[177].mxu0  ;;  %v20222_v12 = vand.u32 4294901760, %v20211_v10 }
 0x50a   : > { %v11022_v18 = vpop.f32.mrb[173].mxu1  ;;  %11433 = vmatmul.mubr.f32.gmra.mrb[22].mxu1 %v20212_v40  ;;  %v17311_v23 = vadd.f32 %v4867_v59, %v4197_v52  ;;  %11220 = vmatprep.mubr.msk.f32.mxu0 %vm13090_vm0, %v19497_v44  ;;  %v20221_v59 = vld [vmem:[#allocation76_spill] sm:$0xff] }
 0x50b   : > { %11435 = vmatprep.mubr.msk.f32.mxu1 %vm13090_vm0, %v19497_v44  ;;  %12278 = vmatpush3.bf16.msra.mxu0 %v12277_v20  ;;  %v20223_v33 = vld [vmem:[#allocation100_spill] sm:$0xff] }
 0x50c   : > { %v4226_v56 = vpop.f32.mrb[178].mxu0  ;;  %12279 = vmatprep.subr.bf16.mxu0 %v19502_v58  ;;  %v20220_v58 = vld [vmem:[#allocation108_spill] sm:$0xff] }
 0x50d   : > { %v4873_v29 = vpop.f32.mrb[174].mxu1  ;;  %v4227_v57 = vadd.f32 %v4226_v56, %v20217_v55  ;;  %11221 = vmatmul.mubr.f32.gmra.mrb[28].mxu0 %v20218_v34  ;;  %v10810_v52 = vpop.f32.mrb[179].mxu0 }
 0x50e   : > { %v11025_v60 = vpop.f32.mrb[175].mxu1  ;;  %11436 = vmatmul.mubr.f32.gmra.mrb[24].mxu1 %v20219_v49  ;;  %v17322_v38 = vadd.f32 %v4873_v29, %v4207_v17  ;;  %11223 = vmatprep.mubr.msk.f32.mxu0 %vm13090_vm0, %v19497_v44  ;;  %v20226_v29 = vld [vmem:[#allocation120_spill] sm:$0xff]  ;;  %v20228_v52 = vand.u32 4294901760, %v20221_v59 }
 0x50f   : > { %11438 = vmatprep.mubr.msk.f32.mxu1 %vm13090_vm0, %v19497_v44  ;;  %v20227_v49 = vld [vmem:[#allocation80_spill] sm:$0xff] }
 0x510   : > { %v4236_v25 = vpop.f32.mrb[180].mxu0 }
 0x511   : > { %v4879_v0 = vpop.f32.mrb[176].mxu1  ;;  %v4237_v43 = vadd.f32 %v4236_v25, %v20220_v58  ;;  %11224 = vmatmul.mubr.f32.gmra.mrb[30].mxu0 %v20221_v59  ;;  %v10813_v36 = vpop.f32.mrb[181].mxu0  ;;  %v20229_v58 = vld [vmem:[#allocation24_spill] sm:$0xff] }
 0x512   : > { %v11028_v31 = vpop.f32.mrb[177].mxu1  ;;  %11439 = vmatmul.mubr.f32.gmra.mrb[26].mxu1 %v20222_v12  ;;  %v17332_v18 = vadd.f32 %v4879_v0, %v4217_v6  ;;  %11226 = vmatprep.mubr.msk.f32.mxu0 %vm13090_vm0, %v19497_v44  ;;  %v20230_v36 = vld [vmem:[#allocation121_spill] sm:$0xff] }
 0x513   : > { %11441 = vmatprep.mubr.msk.f32.mxu1 %vm13090_vm0, %v19497_v44 }
 0x514   : > { %v4246_v17 = vpop.f32.mrb[182].mxu0 }
 0x515   : > { %v4885_v40 = vpop.f32.mrb[178].mxu1  ;;  %v4247_v16 = vadd.f32 %v4246_v17, %v20223_v33  ;;  %11227 = vmatmul.mubr.f32.gmra.mrb[32].mxu0 %v20224_v62  ;;  %v10816_v10 = vpop.f32.mrb[183].mxu0  ;;  %v20231_v17 = vand.u32 4294901760, %v20224_v62 }
 0x516   : > { %v11031_v8 = vpop.f32.mrb[179].mxu1  ;;  %11442 = vmatmul.mubr.f32.gmra.mrb[28].mxu1 %v20225_v39  ;;  %v17342_v20 = vadd.f32 %v4885_v40, %v4227_v57  ;;  %11229 = vmatprep.mubr.msk.f32.mxu0 %vm13090_vm0, %v19497_v44  ;;  %v20232_v10 = vld [vmem:[#allocation122_spill] sm:$0xff] }
 0x517   : > { %11444 = vmatprep.mubr.msk.f32.mxu1 %vm13090_vm0, %v19497_v44 }
 0x518   : > { %v4256_v6 = vpop.f32.mrb[184].mxu0 }
 0x519   : > { %v4891_v56 = vpop.f32.mrb[180].mxu1  ;;  %v4257_v55 = vadd.f32 %v4256_v6, %v20226_v29  ;;  %11230 = vmatmul.mubr.f32.gmra.mrb[34].mxu0 %v20227_v49  ;;  %v10819_v34 = vpop.f32.mrb[185].mxu0  ;;  %v20233_v6 = vand.u32 4294901760, %v20227_v49 }
 0x51a   : > { %v11034_v60 = vpop.f32.mrb[181].mxu1  ;;  %11445 = vmatmul.mubr.f32.gmra.mrb[30].mxu1 %v20228_v52  ;;  %v17352_v25 = vadd.f32 %v4891_v56, %v4237_v43  ;;  %11232 = vmatprep.mubr.msk.f32.mxu0 %vm13090_vm0, %v19497_v44  ;;  %v20234_v52 = vld [vmem:[#allocation97_spill] sm:$0xff]  ;;  %v20235_v34 = vand.u32 4294901760, %v20230_v36 }
 0x51b   : > { %11447 = vmatprep.mubr.msk.f32.mxu1 %vm13090_vm0, %v19497_v44 }
 0x51c   : > { %v4266_v57 = vpop.f32.mrb[186].mxu0 }
 0x51d   : > { %v4897_v0 = vpop.f32.mrb[182].mxu1  ;;  %v4267_v31 = vadd.f32 %v4266_v57, %v20229_v58  ;;  %11233 = vmatmul.mubr.f32.gmra.mrb[36].mxu0 %v20230_v36  ;;  %v10822_v59 = vpop.f32.mrb[187].mxu0  ;;  %v20236_v58 = vld [vmem:[#allocation27_spill] sm:$0xff] }
 0x51e   : > { %v11037_v12 = vpop.f32.mrb[183].mxu1  ;;  %11448 = vmatmul.mubr.f32.gmra.mrb[32].mxu1 %v20231_v17  ;;  %v17362_v40 = vadd.f32 %v4897_v0, %v4247_v16  ;;  %11235 = vmatprep.mubr.msk.f32.mxu0 %vm13090_vm0, %v19497_v44  ;;  %v20237_v17 = vld [vmem:[#allocation130_spill] sm:$0xff]  ;;  %v20238_v59 = vand.u32 4294901760, %v20232_v10 }
 0x51f   : > { %11450 = vmatprep.mubr.msk.f32.mxu1 %vm13090_vm0, %v19497_v44 }
 0x520   : > { %v4276_v43 = vpop.f32.mrb[188].mxu0 }
 0x521   : > { %v4903_v33 = vpop.f32.mrb[184].mxu1  ;;  %v4277_v8 = vadd.f32 %v4276_v43, %v16451_v26  ;;  %11236 = vmatmul.mubr.f32.gmra.mrb[38].mxu0 %v20232_v10  ;;  %v10825_v62 = vpop.f32.mrb[189].mxu0  ;;  %v20239_v43 = vld [vmem:[#allocation124_spill] sm:$0xff] }
 0x522   : > { %v11040_v39 = vpop.f32.mrb[185].mxu1  ;;  %11451 = vmatmul.mubr.f32.gmra.mrb[34].mxu1 %v20233_v6  ;;  %v17372_v56 = vadd.f32 %v4903_v33, %v4257_v55  ;;  %11238 = vmatprep.mubr.msk.f32.mxu0 %vm13090_vm0, %v19497_v44  ;;  %v20241_v33 = vld [vmem:[#allocation21_spill] sm:$0xff] }
 0x523   : > { %11453 = vmatprep.mubr.msk.f32.mxu1 %vm13090_vm0, %v19497_v44  ;;  %v20242_v39 = vand.u32 4294901760, %v20241_v33  ;;  %v20248_v33 = vand.u32 4294901760, %v20237_v17 }
 0x524   : > { %v4286_v16 = vpop.f32.mrb[190].mxu0 }
 0x525   : > { %v4909_v29 = vpop.f32.mrb[186].mxu1  ;;  %v4287_v60 = vadd.f32 %v4286_v16, %v16468_v19  ;;  %11239 = vmatmul.mubr.f32.gmra.mrb[40].mxu0 %v20234_v52  ;;  %v10828_v49 = vpop.f32.mrb[191].mxu0 }
 0x526   : > { %v11043_v26 = vpop.f32.mrb[187].mxu1  ;;  %11454 = vmatmul.mubr.f32.gmra.mrb[36].mxu1 %v20235_v34  ;;  %v17382_v57 = vadd.f32 %v4909_v29, %v4267_v31  ;;  %11241 = vmatprep.mubr.msk.f32.mxu0 %vm13090_vm0, %v19497_v44  ;;  %v20240_v31 = vand.u32 4294901760, %v20239_v43  ;;  %v20244_v49 = vld [vmem:[#allocation128_spill] sm:$0xff] }
 0x527   : > { %11456 = vmatprep.mubr.msk.f32.mxu1 %vm13090_vm0, %v19497_v44  ;;  %v20243_v26 = vld [vmem:[#allocation28_spill] sm:$0xff] }
 0x528   : > { %v4296_v55 = vpop.f32.mrb[192].mxu0  ;;  %v12280_v6 = vpack.c.bf16 %v20242_v39, %v20240_v31  ;;  %v20247_v31 = vld [vmem:[#allocation118_spill] sm:$0xff] }
 0x529   : > { %v4915_v0 = vpop.f32.mrb[188].mxu1  ;;  %v4297_v12 = vadd.f32 %v4296_v55, %v20236_v58  ;;  %11242 = vmatmul.mubr.f32.gmra.mrb[42].mxu0 %v20237_v17  ;;  %v10831_v36 = vpop.f32.mrb[193].mxu0  ;;  %v20245_v55 = vand.u32 4294901760, %v20234_v52 }
 0x52a   : > { %v11046_v19 = vpop.f32.mrb[189].mxu1  ;;  %11457 = vmatmul.mubr.f32.gmra.mrb[38].mxu1 %v20238_v59  ;;  %v17396_v62 = vadd.f32 %v4915_v0, %v4277_v8  ;;  %11244 = vmatprep.mubr.msk.f32.mxu0 %vm13090_vm0, %v19497_v44  ;;  %v20246_v59 = vld [vmem:[#allocation29_spill] sm:$0xff] }
 0x52b   : > { %11459 = vmatprep.mubr.msk.f32.mxu1 %vm13090_vm0, %v19497_v44  ;;  %12281 = vmatpush3.bf16.msra.mxu0 %v12280_v6 }
 0x52c   : > { %v4306_v16 = vpop.f32.mrb[194].mxu0 }
 0x52d   : > { %v4921_v29 = vpop.f32.mrb[190].mxu1  ;;  %v4307_v10 = vadd.f32 %v4306_v16, %v20243_v26  ;;  %11245 = vmatmul.mubr.f32.gmra.mrb[44].mxu0 %v20244_v49  ;;  %v10834_v58 = vpop.f32.mrb[195].mxu0  ;;  %v20249_v16 = vld [vmem:[#allocation30_spill] sm:$0xff] }
 0x52e   : > { %v11049_v34 = vpop.f32.mrb[191].mxu1  ;;  %11460 = vmatmul.mubr.f32.gmra.mrb[40].mxu1 %v20245_v55  ;;  %v17406_v8 = vadd.f32 %v4921_v29, %v4287_v60  ;;  %11247 = vmatprep.mubr.msk.f32.mxu0 %vm13090_vm0, %v19497_v44  ;;  %v20251_v55 = vand.u32 4294901760, %v20244_v49 }
 0x52f   : > { %11462 = vmatprep.mubr.msk.f32.mxu1 %vm13090_vm0, %v19497_v44  ;;  %v20250_v34 = vld [vmem:[#allocation131_spill] sm:$0xff] }
 0x530   : > { %v4316_v0 = vpop.f32.mrb[196].mxu0 }
 0x531   : > { %v4927_v19 = vpop.f32.mrb[192].mxu1  ;;  %v4317_v36 = vadd.f32 %v4316_v0, %v20246_v59  ;;  %11248 = vmatmul.mubr.f32.gmra.mrb[46].mxu0 %v20247_v31  ;;  %v10837_v52 = vpop.f32.mrb[197].mxu0 }
 0x532   : > { %v11052_v43 = vpop.f32.mrb[193].mxu1  ;;  %11463 = vmatmul.mubr.f32.gmra.mrb[42].mxu1 %v20248_v33  ;;  %v17416_v39 = vadd.f32 %v4927_v19, %v4297_v12  ;;  %11250 = vmatprep.mubr.msk.f32.mxu0 %vm13090_vm0, %v19497_v44  ;;  %v20252_v19 = vld [vmem:[#allocation31_spill] sm:$0xff]  ;;  %v20253_v33 = vld [vmem:[#allocation133_spill] sm:$0xff]  ;;  %v20254_v52 = vand.u32 4294901760, %v20247_v31 }
 0x533   : > { %11465 = vmatprep.mubr.msk.f32.mxu1 %vm13090_vm0, %v19497_v44 }
 0x534   : > { %v4326_v60 = vpop.f32.mrb[198].mxu0 }
 0x535   : > { %v4933_v6 = vpop.f32.mrb[194].mxu1  ;;  %v4327_v29 = vadd.f32 %v4326_v60, %v20249_v16  ;;  %11251 = vmatmul.mubr.f32.gmra.mrb[48].mxu0 %v20250_v34  ;;  %v10840_v17 = vpop.f32.mrb[199].mxu0  ;;  %v20255_v16 = vld [vmem:[#allocation32_spill] sm:$0xff] }
 0x536   : > { %v11055_v26 = vpop.f32.mrb[195].mxu1  ;;  %11466 = vmatmul.mubr.f32.gmra.mrb[44].mxu1 %v20251_v55  ;;  %v17426_v58 = vadd.f32 %v4933_v6, %v4307_v10  ;;  %11253 = vmatprep.mubr.msk.f32.mxu0 %vm13090_vm0, %v19497_v44  ;;  %v20256_v17 = vld [vmem:[#allocation26_spill] sm:$0xff] }
 0x537   : > { %11468 = vmatprep.mubr.msk.f32.mxu1 %vm13090_vm0, %v19497_v44 }
 0x538   : > { %v4336_v12 = vpop.f32.mrb[200].mxu0 }
 0x539   : > { %v4939_v0 = vpop.f32.mrb[196].mxu1  ;;  %v4337_v59 = vadd.f32 %v4336_v12, %v20252_v19  ;;  %11254 = vmatmul.mubr.f32.gmra.mrb[50].mxu0 %v20253_v33  ;;  %v10843_v49 = vpop.f32.mrb[201].mxu0  ;;  %v20257_v12 = vand.u32 4294901760, %v20250_v34 }
 0x53a   : > { %v11058_v43 = vpop.f32.mrb[197].mxu1  ;;  %11469 = vmatmul.mubr.f32.gmra.mrb[46].mxu1 %v20254_v52  ;;  %v17436_v60 = vadd.f32 %v4939_v0, %v4317_v36  ;;  %11256 = vmatprep.mubr.msk.f32.mxu0 %vm13090_vm0, %v19497_v44 }
 0x53b   : > { %11471 = vmatprep.mubr.msk.f32.mxu1 %vm13090_vm0, %v19497_v44  ;;  %v20258_v43 = vld [vmem:[#allocation33_spill] sm:$0xff] }
 0x53c   : > { %v4346_v10 = vpop.f32.mrb[202].mxu0 }
 0x53d   : > { %v4945_v6 = vpop.f32.mrb[198].mxu1  ;;  %v4347_v26 = vadd.f32 %v4346_v10, %v20255_v16  ;;  %11257 = vmatmul.mubr.f32.gmra.mrb[52].mxu0 %v20256_v17  ;;  %v10846_v31 = vpop.f32.mrb[203].mxu0  ;;  %v20259_v10 = vld [vmem:[#allocation135_spill] sm:$0xff]  ;;  %v20260_v16 = vand.u32 4294901760, %v20253_v33 }
 0x53e   : > { %v11061_v55 = vpop.f32.mrb[199].mxu1  ;;  %11472 = vmatmul.mubr.f32.gmra.mrb[48].mxu1 %v20257_v12  ;;  %v17446_v19 = vadd.f32 %v4945_v6, %v4327_v29  ;;  %11259 = vmatprep.mubr.msk.f32.mxu0 %vm13090_vm0, %v19497_v44  ;;  %v20261_v12 = vld [vmem:[#allocation34_spill] sm:$0xff] }
 0x53f   : > { %11474 = vmatprep.mubr.msk.f32.mxu1 %vm13090_vm0, %v19497_v44 }
 0x540   : > { %v4356_v36 = vpop.f32.mrb[204].mxu0 }
 0x541   : > { %v4951_v0 = vpop.f32.mrb[200].mxu1  ;;  %v4357_v52 = vadd.f32 %v4356_v36, %v20258_v43  ;;  %11260 = vmatmul.mubr.f32.gmra.mrb[54].mxu0 %v20259_v10  ;;  %v10849_v34 = vpop.f32.mrb[205].mxu0  ;;  %v20262_v43 = vld [vmem:[#allocation137_spill] sm:$0xff] }
 0x542   : > { %v11064_v49 = vpop.f32.mrb[201].mxu1  ;;  %11475 = vmatmul.mubr.f32.gmra.mrb[50].mxu1 %v20260_v16  ;;  %v17456_v55 = vadd.f32 %v4951_v0, %v4337_v59  ;;  %11262 = vmatprep.mubr.msk.f32.mxu0 %vm13090_vm0, %v19497_v44  ;;  %v20264_v34 = vld [vmem:[#allocation35_spill] sm:$0xff] }
 0x543   : > { %11477 = vmatprep.mubr.msk.f32.mxu1 %vm13090_vm0, %v19497_v44  ;;  %v20263_v49 = vand.u32 4294901760, %v20256_v17 }
 0x544   : > { %v4366_v29 = vpop.f32.mrb[206].mxu0 }
 0x545   : > { %v4957_v6 = vpop.f32.mrb[202].mxu1  ;;  %v4367_v31 = vadd.f32 %v4366_v29, %v20261_v12  ;;  %11263 = vmatmul.mubr.f32.gmra.mrb[56].mxu0 %v20262_v43  ;;  %v10852_v33 = vpop.f32.mrb[207].mxu0  ;;  %v20265_v12 = vld [vmem:[#allocation139_spill] sm:$0xff] }
 0x546   : > { %v11067_v36 = vpop.f32.mrb[203].mxu1  ;;  %11478 = vmatmul.mubr.f32.gmra.mrb[52].mxu1 %v20263_v49  ;;  %v17466_v16 = vadd.f32 %v4957_v6, %v4347_v26  ;;  %11265 = vmatprep.mubr.msk.f32.mxu0 %vm13090_vm0, %v19497_v44  ;;  %v20267_v33 = vld [vmem:[#allocation36_spill] sm:$0xff] }
 0x547   : > { %11480 = vmatprep.mubr.msk.f32.mxu1 %vm13090_vm0, %v19497_v44  ;;  %v20266_v36 = vand.u32 4294901760, %v20259_v10 }
 0x548   : > { %v4376_v59 = vpop.f32.mrb[208].mxu0 }
 0x549   : > { %v4963_v0 = vpop.f32.mrb[204].mxu1  ;;  %v4377_v9 = vadd.f32 %v4376_v59, %v20264_v34  ;;  %11266 = vmatmul.mubr.f32.gmra.mrb[58].mxu0 %v20265_v12  ;;  %v10855_v17 = vpop.f32.mrb[209].mxu0  ;;  %v20268_v34 = vld [vmem:[#allocation141_spill] sm:$0xff] }
 0x54a   : > { %v11070_v29 = vpop.f32.mrb[205].mxu1  ;;  %11481 = vmatmul.mubr.f32.gmra.mrb[54].mxu1 %v20266_v36  ;;  %v17476_v49 = vadd.f32 %v4963_v0, %v4357_v52  ;;  %11268 = vmatprep.mubr.msk.f32.mxu0 %vm13090_vm0, %v19497_v44  ;;  %v20270_v17 = vld [vmem:[#allocation37_spill] sm:$0xff] }
 0x54b   : > { %11483 = vmatprep.mubr.msk.f32.mxu1 %vm13090_vm0, %v19497_v44  ;;  %v20269_v29 = vand.u32 4294901760, %v20262_v43 }
 0x54c   : > { %v4386_v26 = vpop.f32.mrb[210].mxu0 }
 0x54d   : > { %v4969_v6 = vpop.f32.mrb[206].mxu1  ;;  %v4387_v54 = vadd.f32 %v4386_v26, %v20267_v33  ;;  %11269 = vmatmul.mubr.f32.gmra.mrb[60].mxu0 %v20268_v34  ;;  %v10858_v10 = vpop.f32.mrb[211].mxu0  ;;  %v20271_v33 = vld [vmem:[#allocation143_spill] sm:$0xff] }
 0x54e   : > { %v11073_v59 = vpop.f32.mrb[207].mxu1  ;;  %11484 = vmatmul.mubr.f32.gmra.mrb[56].mxu1 %v20269_v29  ;;  %v17486_v36 = vadd.f32 %v4969_v6, %v4367_v31  ;;  %11271 = vmatprep.mubr.msk.f32.mxu0 %vm13090_vm0, %v19497_v44  ;;  %v20274_v10 = vld [vmem:[#allocation38_spill] sm:$0xff] }
 0x54f   : > { %11486 = vmatprep.mubr.msk.f32.mxu1 %vm13090_vm0, %v19497_v44  ;;  %v20272_v59 = vand.u32 4294901760, %v20265_v12 }
 0x550   : > { %v4396_v52 = vpop.f32.mrb[212].mxu0 }
 0x551   : > { %v4975_v0 = vpop.f32.mrb[208].mxu1  ;;  %v4397_v51 = vadd.f32 %v4396_v52, %v20270_v17  ;;  %11272 = vmatmul.mubr.f32.gmra.mrb[62].mxu0 %v20271_v33  ;;  %v10861_v43 = vpop.f32.mrb[213].mxu0  ;;  %v20275_v17 = vld [vmem:[#allocation145_spill] sm:$0xff] }
 0x552   : > { %v11076_v26 = vpop.f32.mrb[209].mxu1  ;;  %11487 = vmatmul.mubr.f32.gmra.mrb[58].mxu1 %v20272_v59  ;;  %v17496_v29 = vadd.f32 %v4975_v0, %v4377_v9  ;;  %11274 = vmatprep.mubr.msk.f32.mxu0 %vm13090_vm0, %v19497_v44  ;;  %v20278_v43 = vld [vmem:[#allocation39_spill] sm:$0xff] }
 0x553   : > { %11489 = vmatprep.mubr.msk.f32.mxu1 %vm13090_vm0, %v19497_v44  ;;  %v20276_v26 = vand.u32 4294901760, %v20268_v34 }
 0x554   : > { %20273 = vst [vmem:[#allocation75_spill] sm:$0xff] %v17496_v29  ;;  %v4406_v31 = vpop.f32.mrb[214].mxu0 }
 0x555   : > { %v4981_v6 = vpop.f32.mrb[210].mxu1  ;;  %v4407_v15 = vadd.f32 %v4406_v31, %v20274_v10  ;;  %11275 = vmatmul.mubr.f32.gmra.mrb[64].mxu0 %v20275_v17  ;;  %v10864_v12 = vpop.f32.mrb[215].mxu0  ;;  %v20279_v10 = vld [vmem:[#allocation147_spill] sm:$0xff] }
 0x556   : > { %v11079_v52 = vpop.f32.mrb[211].mxu1  ;;  %11490 = vmatmul.mubr.f32.gmra.mrb[60].mxu1 %v20276_v26  ;;  %v17506_v59 = vadd.f32 %v4981_v6, %v4387_v54  ;;  %11277 = vmatprep.mubr.msk.f32.mxu0 %vm13090_vm0, %v19497_v44  ;;  %v20282_v12 = vld [vmem:[#allocation40_spill] sm:$0xff] }
 0x557   : > { %11492 = vmatprep.mubr.msk.f32.mxu1 %vm13090_vm0, %v19497_v44  ;;  %v20280_v52 = vand.u32 4294901760, %v20271_v33 }
 0x558   : > { %20277 = vst [vmem:[#allocation77_spill] sm:$0xff] %v17506_v59  ;;  %v4416_v9 = vpop.f32.mrb[216].mxu0 }
 0x559   : > { %v4987_v0 = vpop.f32.mrb[212].mxu1  ;;  %v4417_v29 = vadd.f32 %v4416_v9, %v20278_v43  ;;  %11278 = vmatmul.mubr.f32.gmra.mrb[66].mxu0 %v20279_v10  ;;  %v10867_v34 = vpop.f32.mrb[217].mxu0  ;;  %v20283_v43 = vld [vmem:[#allocation149_spill] sm:$0xff] }
 0x55a   : > { %v11082_v31 = vpop.f32.mrb[213].mxu1  ;;  %11493 = vmatmul.mubr.f32.gmra.mrb[62].mxu1 %v20280_v52  ;;  %v17516_v26 = vadd.f32 %v4987_v0, %v4397_v51  ;;  %11280 = vmatprep.mubr.msk.f32.mxu0 %vm13090_vm0, %v19497_v44  ;;  %v20286_v34 = vld [vmem:[#allocation43_spill] sm:$0xff] }
 0x55b   : > { %11495 = vmatprep.mubr.msk.f32.mxu1 %vm13090_vm0, %v19497_v44  ;;  %v20284_v31 = vand.u32 4294901760, %v20275_v17 }
 0x55c   : > { %20281 = vst [vmem:[#allocation46_spill] sm:$0xff] %v17516_v26  ;;  %v4426_v54 = vpop.f32.mrb[218].mxu0 }
 0x55d   : > { %v4993_v6 = vpop.f32.mrb[214].mxu1  ;;  %v4427_v59 = vadd.f32 %v4426_v54, %v20282_v12  ;;  %11281 = vmatmul.mubr.f32.gmra.mrb[68].mxu0 %v20283_v43  ;;  %v10870_v33 = vpop.f32.mrb[219].mxu0  ;;  %v20287_v12 = vld [vmem:[#allocation151_spill] sm:$0xff] }
 0x55e   : > { %v11085_v9 = vpop.f32.mrb[215].mxu1  ;;  %11496 = vmatmul.mubr.f32.gmra.mrb[64].mxu1 %v20284_v31  ;;  %v17526_v52 = vadd.f32 %v4993_v6, %v4407_v15  ;;  %11283 = vmatprep.mubr.msk.f32.mxu0 %vm13090_vm0, %v19497_v44  ;;  %v20290_v33 = vld [vmem:[#allocation45_spill] sm:$0xff] }
 0x55f   : > { %11498 = vmatprep.mubr.msk.f32.mxu1 %vm13090_vm0, %v19497_v44  ;;  %v20288_v9 = vand.u32 4294901760, %v20279_v10 }
 0x560   : > { %20285 = vst [vmem:[#allocation51_spill] sm:$0xff] %v17526_v52  ;;  %v4436_v51 = vpop.f32.mrb[220].mxu0 }
 0x561   : > { %v4999_v0 = vpop.f32.mrb[216].mxu1  ;;  %v4437_v26 = vadd.f32 %v4436_v51, %v20286_v34  ;;  %11284 = vmatmul.mubr.f32.gmra.mrb[70].mxu0 %v20287_v12  ;;  %v10873_v17 = vpop.f32.mrb[221].mxu0  ;;  %v20291_v34 = vld [vmem:[#allocation153_spill] sm:$0xff] }
 0x562   : > { %v11088_v54 = vpop.f32.mrb[217].mxu1  ;;  %11499 = vmatmul.mubr.f32.gmra.mrb[66].mxu1 %v20288_v9  ;;  %v17536_v31 = vadd.f32 %v4999_v0, %v4417_v29  ;;  %11286 = vmatprep.mubr.msk.f32.mxu0 %vm13090_vm0, %v19497_v44  ;;  %v20294_v17 = vld [vmem:[#allocation47_spill] sm:$0xff] }
 0x563   : > { %11501 = vmatprep.mubr.msk.f32.mxu1 %vm13090_vm0, %v19497_v44  ;;  %v20292_v54 = vand.u32 4294901760, %v20283_v43 }
 0x564   : > { %20289 = vst [vmem:[#allocation85_spill] sm:$0xff] %v17536_v31  ;;  %v4446_v15 = vpop.f32.mrb[222].mxu0 }
 0x565   : > { %v5005_v6 = vpop.f32.mrb[218].mxu1  ;;  %v4447_v52 = vadd.f32 %v4446_v15, %v20290_v33  ;;  %11287 = vmatmul.mubr.f32.gmra.mrb[72].mxu0 %v20291_v34  ;;  %v10876_v10 = vpop.f32.mrb[223].mxu0  ;;  %v20295_v33 = vld [vmem:[#allocation155_spill] sm:$0xff] }
 0x566   : > { %v11091_v51 = vpop.f32.mrb[219].mxu1  ;;  %11502 = vmatmul.mubr.f32.gmra.mrb[68].mxu1 %v20292_v54  ;;  %v17546_v9 = vadd.f32 %v5005_v6, %v4427_v59  ;;  %11289 = vmatprep.mubr.msk.f32.mxu0 %vm13090_vm0, %v19497_v44  ;;  %v20298_v10 = vld [vmem:[#allocation49_spill] sm:$0xff] }
 0x567   : > { %11504 = vmatprep.mubr.msk.f32.mxu1 %vm13090_vm0, %v19497_v44  ;;  %v20296_v51 = vand.u32 4294901760, %v20287_v12 }
 0x568   : > { %20293 = vst [vmem:[#allocation86_spill] sm:$0xff] %v17546_v9  ;;  %v4456_v29 = vpop.f32.mrb[224].mxu0 }
 0x569   : > { %v5011_v0 = vpop.f32.mrb[220].mxu1  ;;  %v4457_v31 = vadd.f32 %v4456_v29, %v20294_v17  ;;  %11290 = vmatmul.mubr.f32.gmra.mrb[74].mxu0 %v20295_v33  ;;  %v10879_v43 = vpop.f32.mrb[225].mxu0  ;;  %v20299_v17 = vld [vmem:[#allocation157_spill] sm:$0xff] }
 0x56a   : > { %v11094_v15 = vpop.f32.mrb[221].mxu1  ;;  %11505 = vmatmul.mubr.f32.gmra.mrb[70].mxu1 %v20296_v51  ;;  %v17556_v54 = vadd.f32 %v5011_v0, %v4437_v26  ;;  %11292 = vmatprep.mubr.msk.f32.mxu0 %vm13090_vm0, %v19497_v44  ;;  %v20302_v43 = vld [vmem:[#allocation50_spill] sm:$0xff] }
 0x56b   : > { %11507 = vmatprep.mubr.msk.f32.mxu1 %vm13090_vm0, %v19497_v44  ;;  %v20300_v15 = vand.u32 4294901760, %v20291_v34 }
 0x56c   : > { %20297 = vst [vmem:[#allocation73_spill] sm:$0xff] %v17556_v54  ;;  %v4466_v59 = vpop.f32.mrb[226].mxu0 }
 0x56d   : > { %v5017_v6 = vpop.f32.mrb[222].mxu1  ;;  %v4467_v9 = vadd.f32 %v4466_v59, %v20298_v10  ;;  %11293 = vmatmul.mubr.f32.gmra.mrb[76].mxu0 %v20299_v17  ;;  %v10882_v12 = vpop.f32.mrb[227].mxu0  ;;  %v20303_v10 = vld [vmem:[#allocation159_spill] sm:$0xff] }
 0x56e   : > { %v11097_v29 = vpop.f32.mrb[223].mxu1  ;;  %11508 = vmatmul.mubr.f32.gmra.mrb[72].mxu1 %v20300_v15  ;;  %v17566_v51 = vadd.f32 %v5017_v6, %v4447_v52  ;;  %11295 = vmatprep.mubr.msk.f32.mxu0 %vm13090_vm0, %v19497_v44  ;;  %v20306_v12 = vld [vmem:[#allocation53_spill] sm:$0xff] }
 0x56f   : > { %11510 = vmatprep.mubr.msk.f32.mxu1 %vm13090_vm0, %v19497_v44  ;;  %v20304_v29 = vand.u32 4294901760, %v20295_v33 }
 0x570   : > { %20301 = vst [vmem:[#allocation90_spill] sm:$0xff] %v17566_v51  ;;  %v4476_v26 = vpop.f32.mrb[228].mxu0 }
 0x571   : > { %v5023_v0 = vpop.f32.mrb[224].mxu1  ;;  %v4477_v54 = vadd.f32 %v4476_v26, %v20302_v43  ;;  %11296 = vmatmul.mubr.f32.gmra.mrb[78].mxu0 %v20303_v10  ;;  %v10885_v34 = vpop.f32.mrb[229].mxu0  ;;  %v20307_v43 = vld [vmem:[#allocation161_spill] sm:$0xff] }
 0x572   : > { %v11100_v59 = vpop.f32.mrb[225].mxu1  ;;  %11511 = vmatmul.mubr.f32.gmra.mrb[74].mxu1 %v20304_v29  ;;  %v17576_v15 = vadd.f32 %v5023_v0, %v4457_v31  ;;  %11298 = vmatprep.mubr.msk.f32.mxu0 %vm13090_vm0, %v19497_v44  ;;  %v20310_v34 = vld [vmem:[#allocation55_spill] sm:$0xff] }
 0x573   : > { %11513 = vmatprep.mubr.msk.f32.mxu1 %vm13090_vm0, %v19497_v44  ;;  %v20308_v59 = vand.u32 4294901760, %v20299_v17 }
 0x574   : > { %20305 = vst [vmem:[#allocation94_spill] sm:$0xff] %v17576_v15  ;;  %v4486_v52 = vpop.f32.mrb[230].mxu0 }
 0x575   : > { %v5029_v6 = vpop.f32.mrb[226].mxu1  ;;  %v4487_v51 = vadd.f32 %v4486_v52, %v20306_v12  ;;  %11299 = vmatmul.mubr.f32.gmra.mrb[80].mxu0 %v20307_v43  ;;  %v10888_v33 = vpop.f32.mrb[231].mxu0  ;;  %v20311_v12 = vld [vmem:[#allocation163_spill] sm:$0xff] }
 0x576   : > { %v11103_v26 = vpop.f32.mrb[227].mxu1  ;;  %11514 = vmatmul.mubr.f32.gmra.mrb[76].mxu1 %v20308_v59  ;;  %v17586_v29 = vadd.f32 %v5029_v6, %v4467_v9  ;;  %11301 = vmatprep.mubr.msk.f32.mxu0 %vm13090_vm0, %v19497_v44  ;;  %v20314_v33 = vld [vmem:[#allocation57_spill] sm:$0xff] }
 0x577   : > { %11516 = vmatprep.mubr.msk.f32.mxu1 %vm13090_vm0, %v19497_v44  ;;  %v20312_v26 = vand.u32 4294901760, %v20303_v10 }
 0x578   : > { %20309 = vst [vmem:[#allocation44_spill] sm:$0xff] %v17586_v29  ;;  %v4496_v31 = vpop.f32.mrb[232].mxu0 }
 0x579   : > { %v5035_v0 = vpop.f32.mrb[228].mxu1  ;;  %v4497_v15 = vadd.f32 %v4496_v31, %v20310_v34  ;;  %11302 = vmatmul.mubr.f32.gmra.mrb[82].mxu0 %v20311_v12  ;;  %v10891_v17 = vpop.f32.mrb[233].mxu0  ;;  %v20315_v34 = vld [vmem:[#allocation165_spill] sm:$0xff] }
 0x57a   : > { %v11106_v52 = vpop.f32.mrb[229].mxu1  ;;  %11517 = vmatmul.mubr.f32.gmra.mrb[78].mxu1 %v20312_v26  ;;  %v17596_v59 = vadd.f32 %v5035_v0, %v4477_v54  ;;  %11304 = vmatprep.mubr.msk.f32.mxu0 %vm13090_vm0, %v19497_v44  ;;  %v20318_v17 = vld [vmem:[#allocation59_spill] sm:$0xff] }
 0x57b   : > { %11519 = vmatprep.mubr.msk.f32.mxu1 %vm13090_vm0, %v19497_v44  ;;  %v20316_v52 = vand.u32 4294901760, %v20307_v43 }
 0x57c   : > { %20313 = vst [vmem:[#allocation81_spill] sm:$0xff] %v17596_v59  ;;  %v4506_v9 = vpop.f32.mrb[234].mxu0 }
 0x57d   : > { %v5041_v6 = vpop.f32.mrb[230].mxu1  ;;  %v4507_v29 = vadd.f32 %v4506_v9, %v20314_v33  ;;  %11305 = vmatmul.mubr.f32.gmra.mrb[84].mxu0 %v20315_v34  ;;  %v10894_v10 = vpop.f32.mrb[235].mxu0  ;;  %v20319_v33 = vld [vmem:[#allocation167_spill] sm:$0xff] }
 0x57e   : > { %v11109_v31 = vpop.f32.mrb[231].mxu1  ;;  %11520 = vmatmul.mubr.f32.gmra.mrb[80].mxu1 %v20316_v52  ;;  %v17606_v26 = vadd.f32 %v5041_v6, %v4487_v51  ;;  %11307 = vmatprep.mubr.msk.f32.mxu0 %vm13090_vm0, %v19497_v44  ;;  %v20322_v10 = vld [vmem:[#allocation60_spill] sm:$0xff] }
 0x57f   : > { %11522 = vmatprep.mubr.msk.f32.mxu1 %vm13090_vm0, %v19497_v44  ;;  %v20320_v31 = vand.u32 4294901760, %v20311_v12 }
 0x580   : > { %20317 = vst [vmem:[#allocation102_spill] sm:$0xff] %v17606_v26  ;;  %v4516_v54 = vpop.f32.mrb[236].mxu0 }
 0x581   : > { %v5047_v0 = vpop.f32.mrb[232].mxu1  ;;  %v4517_v59 = vadd.f32 %v4516_v54, %v20318_v17  ;;  %11308 = vmatmul.mubr.f32.gmra.mrb[86].mxu0 %v20319_v33  ;;  %v10897_v43 = vpop.f32.mrb[237].mxu0  ;;  %v20323_v17 = vld [vmem:[#allocation169_spill] sm:$0xff] }
 0x582   : > { %v11112_v9 = vpop.f32.mrb[233].mxu1  ;;  %11523 = vmatmul.mubr.f32.gmra.mrb[82].mxu1 %v20320_v31  ;;  %v17616_v52 = vadd.f32 %v5047_v0, %v4497_v15  ;;  %11310 = vmatprep.mubr.msk.f32.mxu0 %vm13090_vm0, %v19497_v44  ;;  %v20326_v43 = vld [vmem:[#allocation63_spill] sm:$0xff] }
 0x583   : > { %11525 = vmatprep.mubr.msk.f32.mxu1 %vm13090_vm0, %v19497_v44  ;;  %v20324_v9 = vand.u32 4294901760, %v20315_v34 }
 0x584   : > { %20321 = vst [vmem:[#allocation106_spill] sm:$0xff] %v17616_v52  ;;  %v4526_v51 = vpop.f32.mrb[238].mxu0 }
 0x585   : > { %v5053_v6 = vpop.f32.mrb[234].mxu1  ;;  %v4527_v26 = vadd.f32 %v4526_v51, %v20322_v10  ;;  %11311 = vmatmul.mubr.f32.gmra.mrb[88].mxu0 %v20323_v17  ;;  %v10900_v12 = vpop.f32.mrb[239].mxu0  ;;  %v20327_v10 = vld [vmem:[#allocation171_spill] sm:$0xff] }
 0x586   : > { %v11115_v54 = vpop.f32.mrb[235].mxu1  ;;  %11526 = vmatmul.mubr.f32.gmra.mrb[84].mxu1 %v20324_v9  ;;  %v17626_v31 = vadd.f32 %v5053_v6, %v4507_v29  ;;  %11313 = vmatprep.mubr.msk.f32.mxu0 %vm13090_vm0, %v19497_v44  ;;  %v20330_v12 = vld [vmem:[#allocation65_spill] sm:$0xff] }
 0x587   : > { %11528 = vmatprep.mubr.msk.f32.mxu1 %vm13090_vm0, %v19497_v44  ;;  %v20328_v54 = vand.u32 4294901760, %v20319_v33 }
 0x588   : > { %20325 = vst [vmem:[#allocation83_spill] sm:$0xff] %v17626_v31  ;;  %v4536_v15 = vpop.f32.mrb[240].mxu0 }
 0x589   : > { %v5059_v0 = vpop.f32.mrb[236].mxu1  ;;  %v4537_v52 = vadd.f32 %v4536_v15, %v20326_v43  ;;  %11314 = vmatmul.mubr.f32.gmra.mrb[90].mxu0 %v20327_v10  ;;  %v10903_v34 = vpop.f32.mrb[241].mxu0  ;;  %v20331_v43 = vld [vmem:[#allocation173_spill] sm:$0xff] }
 0x58a   : > { %v11118_v51 = vpop.f32.mrb[237].mxu1  ;;  %11529 = vmatmul.mubr.f32.gmra.mrb[86].mxu1 %v20328_v54  ;;  %v17636_v9 = vadd.f32 %v5059_v0, %v4517_v59  ;;  %11316 = vmatprep.mubr.msk.f32.mxu0 %vm13090_vm0, %v19497_v44  ;;  %v20334_v34 = vld [vmem:[#allocation187_spill] sm:$0xff] }
 0x58b   : > { %11531 = vmatprep.mubr.msk.f32.mxu1 %vm13090_vm0, %v19497_v44  ;;  %v20332_v51 = vand.u32 4294901760, %v20323_v17 }
 0x58c   : > { %20329 = vst [vmem:[#allocation105_spill] sm:$0xff] %v17636_v9  ;;  %v4546_v29 = vpop.f32.mrb[242].mxu0 }
 0x58d   : > { %v5065_v6 = vpop.f32.mrb[238].mxu1  ;;  %v4547_v31 = vadd.f32 %v4546_v29, %v20330_v12  ;;  %11317 = vmatmul.mubr.f32.gmra.mrb[92].mxu0 %v20331_v43  ;;  %v10906_v33 = vpop.f32.mrb[243].mxu0  ;;  %v20335_v12 = vld [vmem:[#allocation175_spill] sm:$0xff] }
 0x58e   : > { %v11121_v15 = vpop.f32.mrb[239].mxu1  ;;  %11532 = vmatmul.mubr.f32.gmra.mrb[88].mxu1 %v20332_v51  ;;  %v17646_v54 = vadd.f32 %v5065_v6, %v4527_v26  ;;  %11319 = vmatprep.mubr.msk.f32.mxu0 %vm13090_vm0, %v19497_v44  ;;  %v20338_v33 = vld [vmem:[#allocation189_spill] sm:$0xff] }
 0x58f   : > { %11534 = vmatprep.mubr.msk.f32.mxu1 %vm13090_vm0, %v19497_v44  ;;  %v20336_v15 = vand.u32 4294901760, %v20327_v10 }
 0x590   : > { %20333 = vst [vmem:[#allocation52_spill] sm:$0xff] %v17646_v54  ;;  %v4556_v59 = vpop.f32.mrb[244].mxu0 }
 0x591   : > { %v5071_v0 = vpop.f32.mrb[240].mxu1  ;;  %v4557_v9 = vadd.f32 %v4556_v59, %v20334_v34  ;;  %11320 = vmatmul.mubr.f32.gmra.mrb[94].mxu0 %v20335_v12  ;;  %v10909_v17 = vpop.f32.mrb[245].mxu0  ;;  %v20339_v34 = vld [vmem:[#allocation177_spill] sm:$0xff] }
 0x592   : > { %v11124_v29 = vpop.f32.mrb[241].mxu1  ;;  %11535 = vmatmul.mubr.f32.gmra.mrb[90].mxu1 %v20336_v15  ;;  %v17656_v51 = vadd.f32 %v5071_v0, %v4537_v52  ;;  %11322 = vmatprep.mubr.msk.f32.mxu0 %vm13090_vm0, %v19497_v44 }
 0x593   : > { %11537 = vmatprep.mubr.msk.f32.mxu1 %vm13090_vm0, %v19497_v44  ;;  %v20340_v29 = vand.u32 4294901760, %v20331_v43  ;;  %v20343_v43 = vand.u32 4294901760, %v20335_v12 }
 0x594   : > { %20337 = vst [vmem:[#allocation110_spill] sm:$0xff] %v17656_v51  ;;  %v4566_v26 = vpop.f32.mrb[246].mxu0  ;;  %v20342_v51 = vld [vmem:[#allocation179_spill] sm:$0xff] }
 0x595   : > { %v5077_v6 = vpop.f32.mrb[242].mxu1  ;;  %v4567_v54 = vadd.f32 %v4566_v26, %v20338_v33  ;;  %11323 = vmatmul.mubr.f32.gmra.mrb[96].mxu0 %v20339_v34  ;;  %v10912_v10 = vpop.f32.mrb[247].mxu0  ;;  %v20341_v26 = vld [vmem:[#allocation41_spill] sm:$0xff] }
 0x596   : > { %v11127_v59 = vpop.f32.mrb[243].mxu1  ;;  %11538 = vmatmul.mubr.f32.gmra.mrb[92].mxu1 %v20340_v29  ;;  %v17666_v15 = vadd.f32 %v5077_v6, %v4547_v31  ;;  %11325 = vmatprep.mubr.msk.f32.mxu0 %vm13090_vm0, %v19497_v44 }
 0x597   : > { %11540 = vmatprep.mubr.msk.f32.mxu1 %vm13090_vm0, %v19497_v44 }
 0x598   : > { %v5193_v0 = vpop.f32.mrb[248].mxu0 }
 0x599   : > { %v5083_v52 = vpop.f32.mrb[244].mxu1  ;;  %v5194_v33 = vadd.f32 %v5193_v0, %v20341_v26  ;;  %11326 = vmatmul.mubr.f32.gmra.mrb[98].mxu0 %v20342_v51  ;;  %v11168_v31 = vpop.f32.mrb[249].mxu0  ;;  %v20344_v0 = vld [vmem:[#allocation181_spill] sm:$0xff]  ;;  %v20345_v26 = vand.u32 4294901760, %v20339_v34 }
 0x59a   : > { %v17672_v17 = vadd.f32 %v5083_v52, %v4557_v9  ;;  %v11130_v59 = vpop.f32.mrb[245].mxu1  ;;  %11541 = vmatmul.mubr.f32.gmra.mrb[94].mxu1 %v20343_v43  ;;  %11328 = vmatprep.mubr.msk.f32.mxu0 %vm13090_vm0, %v19497_v44 }
 0x59b   : > { %11543 = vmatprep.mubr.msk.f32.mxu1 %vm13090_vm0, %v19497_v44 }
 0x59c   : > { %v5200_v29 = vpop.f32.mrb[250].mxu0 }
 0x59d   : > { %v5089_v6 = vpop.f32.mrb[246].mxu1  ;;  %v5201_v9 = vadd.f32 %v5200_v29, %v17013_v53  ;;  %11329 = vmatmul.mubr.f32.gmra.mrb[100].mxu0 %v20344_v0  ;;  %v11171_v12 = vpop.f32.mrb[251].mxu0  ;;  %v20346_v53 = vld [vmem:[#allocation183_spill] sm:$0xff]  ;;  %v20347_v29 = vand.u32 4294901760, %v20342_v51 }
 0x59e   : > { %v17682_v10 = vadd.f32 %v5089_v6, %v4567_v54  ;;  %v11133_v52 = vpop.f32.mrb[247].mxu1  ;;  %11544 = vmatmul.mubr.f32.gmra.mrb[96].mxu1 %v20345_v26  ;;  %11331 = vmatprep.mubr.msk.f32.mxu0 %vm13090_vm0, %v19497_v44 }
 0x59f   : > { %11546 = vmatprep.mubr.msk.f32.mxu1 %vm13090_vm0, %v19497_v44 }
 0x5a0   : > { %v5207_v59 = vpop.f32.mrb[252].mxu0 }
 0x5a1   : > { %v5716_v43 = vpop.f32.mrb[248].mxu1  ;;  %v5208_v54 = vadd.f32 %v5207_v59, %v17030_v46  ;;  %11332 = vmatmul.mubr.f32.gmra.mrb[102].mxu0 %v20346_v53  ;;  %v11174_v34 = vpop.f32.mrb[253].mxu0 }
 0x5a2   : > { %v17693_v31 = vadd.f32 %v5716_v43, %v5194_v33  ;;  %v11389_v6 = vpop.f32.mrb[249].mxu1  ;;  %11547 = vmatmul.mubr.f32.gmra.mrb[98].mxu1 %v20347_v29  ;;  %11334 = vmatprep.mubr.msk.f32.mxu0 %vm13090_vm0, %v19497_v44  ;;  %v20348_v33 = vld [vmem:[#allocation185_spill] sm:$0xff]  ;;  %v20349_v43 = vand.u32 4294901760, %v20344_v0 }
 0x5a3   : > { %11549 = vmatprep.mubr.msk.f32.mxu1 %vm13090_vm0, %v19497_v44 }
 0x5a4   : > { %v5214_v52 = vpop.f32.mrb[254].mxu0 }
 0x5a5   : > { %v5724_v26 = vpop.f32.mrb[250].mxu1  ;;  %v5215_v12 = vadd.f32 %v5214_v52, %v17045_v21  ;;  %11335 = vmatmul.mubr.f32.gmra.mrb[104].mxu0 %v20348_v33  ;;  %v11177_v51 = vpop.f32.mrb[255].mxu0 }
 0x5a6   : > { %v17703_v46 = vadd.f32 %v5724_v26, %v5201_v9  ;;  %v11392_v59 = vpop.f32.mrb[251].mxu1  ;;  %11550 = vmatmul.mubr.f32.gmra.mrb[100].mxu1 %v20349_v43  ;;  %11337 = vmatprep.mubr.msk.f32.mxu0 %vm13090_vm0, %v19497_v44  ;;  %v20350_v9 = vld [vmem:[#allocation66_spill] sm:$0xff]  ;;  %v20351_v26 = vand.u32 4294901760, %v20346_v53 }
 0x5a7   : > { %11552 = vmatprep.mubr.msk.f32.mxu1 %vm13090_vm0, %v19497_v44 }
 0x5a8   : > { %v5221_v6 = vpop.f32.mrb[0].mxu0 }
 0x5a9   : > { %v5732_v29 = vpop.f32.mrb[252].mxu1  ;;  %v5222_v34 = vadd.f32 %v5221_v6, %v17057_v13  ;;  %11338 = vmatmul.mubr.f32.gmra.mrb[106].mxu0 %v20350_v9  ;;  %v11180_v0 = vpop.f32.mrb[1].mxu0 }
 0x5aa   : > { %v17713_v21 = vadd.f32 %v5732_v29, %v5208_v54  ;;  %v11395_v52 = vpop.f32.mrb[253].mxu1  ;;  %11553 = vmatmul.mubr.f32.gmra.mrb[102].mxu1 %v20351_v26  ;;  %11340 = vmatprep.mubr.msk.f32.mxu0 %vm13090_vm0, %v19497_v44  ;;  %v20352_v54 = vld [vmem:[#allocation68_spill] sm:$0xff]  ;;  %v20353_v29 = vand.u32 4294901760, %v20348_v33 }
 0x5ab   : > { %11555 = vmatprep.mubr.msk.f32.mxu1 %vm13090_vm0, %v19497_v44 }
 0x5ac   : > { %v5228_v59 = vpop.f32.mrb[2].mxu0 }
 0x5ad   : > { %v5740_v43 = vpop.f32.mrb[254].mxu1  ;;  %v5229_v51 = vadd.f32 %v5228_v59, %v17068_v50  ;;  %11341 = vmatmul.mubr.f32.gmra.mrb[108].mxu0 %v20352_v54  ;;  %v11183_v53 = vpop.f32.mrb[3].mxu0  ;;  %v20354_v59 = vand.u32 4294901760, %v20350_v9 }
 0x5ae   : > { %v17723_v13 = vadd.f32 %v5740_v43, %v5215_v12  ;;  %v11398_v6 = vpop.f32.mrb[255].mxu1  ;;  %11556 = vmatmul.mubr.f32.gmra.mrb[104].mxu1 %v20353_v29  ;;  %11343 = vmatprep.mubr.msk.f32.mxu0 %vm13090_vm0, %v19497_v44  ;;  %v20355_v53 = vand.u32 4294901760, %v20352_v54 }
 0x5af   : > { %11558 = vmatprep.mubr.msk.f32.mxu1 %vm13090_vm0, %v19497_v44 }
 0x5b0   : > { %v5235_v52 = vpop.f32.mrb[4].mxu0 }
 0x5b1   : > { %v5748_v26 = vpop.f32.mrb[0].mxu1  ;;  %v5236_v0 = vadd.f32 %v5235_v52, %v17076_v14  ;;  %11344 = vmatmul.mubr.f32.gmra.mrb[110].mxu0 %v16986_v4  ;;  %v11186_v33 = vpop.f32.mrb[5].mxu0 }
 0x5b2   : > { %v17733_v50 = vadd.f32 %v5748_v26, %v5222_v34  ;;  %v11401_v12 = vpop.f32.mrb[1].mxu1  ;;  %11559 = vmatmul.mubr.f32.gmra.mrb[106].mxu1 %v20354_v59  ;;  %11346 = vmatprep.mubr.msk.f32.mxu0 %vm13090_vm0, %v19497_v44  ;;  %v20356_v59 = vand.u32 4294901760, %v16986_v4 }
 0x5b3   : > { %11561 = vmatprep.mubr.msk.f32.mxu1 %vm13090_vm0, %v19497_v44 }
 0x5b4   : > { %v5242_v43 = vpop.f32.mrb[6].mxu0 }
 0x5b5   : > { %v5756_v6 = vpop.f32.mrb[2].mxu1  ;;  %v5243_v29 = vadd.f32 %v5242_v43, %v17084_v2  ;;  %11347 = vmatmul.mubr.f32.gmra.mrb[112].mxu0 %v17005_v22  ;;  %v11189_v9 = vpop.f32.mrb[7].mxu0 }
 0x5b6   : > { %v17743_v14 = vadd.f32 %v5756_v6, %v5229_v51  ;;  %v11404_v34 = vpop.f32.mrb[3].mxu1  ;;  %11562 = vmatmul.mubr.f32.gmra.mrb[108].mxu1 %v20355_v53  ;;  %11349 = vmatprep.mubr.msk.f32.mxu0 %vm13090_vm0, %v19497_v44 }
 0x5b7   : > { %11564 = vmatprep.mubr.msk.f32.mxu1 %vm13090_vm0, %v19497_v44  ;;  %v20357_v34 = vand.u32 4294901760, %v17005_v22 }
 0x5b8   : > { %v5249_v52 = vpop.f32.mrb[8].mxu0 }
 0x5b9   : > { %v5764_v26 = vpop.f32.mrb[4].mxu1  ;;  %v5250_v12 = vadd.f32 %v5249_v52, %v17097_v5  ;;  %11350 = vmatmul.mubr.f32.gmra.mrb[114].mxu0 %v17028_v7  ;;  %v11192_v54 = vpop.f32.mrb[9].mxu0 }
 0x5ba   : > { %v17753_v2 = vadd.f32 %v5764_v26, %v5236_v0  ;;  %v11407_v51 = vpop.f32.mrb[5].mxu1  ;;  %11565 = vmatmul.mubr.f32.gmra.mrb[110].mxu1 %v20356_v59  ;;  %11352 = vmatprep.mubr.msk.f32.mxu0 %vm13090_vm0, %v19497_v44  ;;  %v20358_v26 = vand.u32 4294901760, %v17028_v7  ;;  %v20361_v7 = vld [vmem:[#allocation19_spill] sm:$0xff] }
 0x5bb   : > { %11567 = vmatprep.mubr.msk.f32.mxu1 %vm13090_vm0, %v19497_v44  ;;  %v20359_v51 = vld [vmem:[#allocation71_spill] sm:$0xff] }
 0x5bc   : > { %v5256_v33 = vpop.f32.mrb[10].mxu0 }
 0x5bd   : > { %v5772_v43 = vpop.f32.mrb[6].mxu1  ;;  %v5257_v6 = vadd.f32 %v5256_v33, %v17111_v32  ;;  %11353 = vmatmul.mubr.f32.gmra.mrb[116].mxu0 %v17043_v42  ;;  %v11195_v4 = vpop.f32.mrb[11].mxu0 }
 0x5be   : > { %v17763_v5 = vadd.f32 %v5772_v43, %v5243_v29  ;;  %v11410_v0 = vpop.f32.mrb[7].mxu1  ;;  %11568 = vmatmul.mubr.f32.gmra.mrb[112].mxu1 %v20357_v34  ;;  %11608 = vmatprep.mubr.msk.f32.mxu0 %vm13090_vm0, %v19497_v44  ;;  %v20360_v43 = vand.u32 4294901760, %v17043_v42 }
 0x5bf   : > { %11570 = vmatprep.mubr.msk.f32.mxu1 %vm13090_vm0, %v19497_v44 }
 0x5c0   : > { %v5263_v53 = vpop.f32.mrb[12].mxu0 }
 0x5c1   : > { %v5780_v9 = vpop.f32.mrb[8].mxu1  ;;  %v5264_v52 = vadd.f32 %v5263_v53, %v17126_v11  ;;  %11609 = vmatmul.mubr.f32.vlgmr.msra.gmra.mrb[118].mxu0 %v20359_v51  ;;  %v11198_v22 = vpop.f32.mrb[13].mxu0 }
 0x5c2   : > { %v17773_v32 = vadd.f32 %v5780_v9, %v5250_v12  ;;  %v11413_v29 = vpop.f32.mrb[9].mxu1  ;;  %11571 = vmatmul.mubr.f32.gmra.mrb[114].mxu1 %v20358_v26  ;;  %11611 = vmatprep.mubr.msk.f32.mxu0 %vm13090_vm0, %v19497_v44  ;;  %v20362_v9 = vld [vmem:[#allocation20_spill] sm:$0xff] }
 0x5c3   : > { %11573 = vmatprep.mubr.msk.f32.mxu1 %vm13090_vm0, %v19497_v44 }
 0x5c4   : > { %v5270_v59 = vpop.f32.mrb[14].mxu0 }
 0x5c5   : > { %v5788_v54 = vpop.f32.mrb[10].mxu1  ;;  %v5271_v33 = vadd.f32 %v5270_v59, %v17142_v37  ;;  %11612 = vmatmul.mubr.f32.gmra.mrb[120].mxu0 %v20361_v7  ;;  %v11201_v0 = vpop.f32.mrb[15].mxu0 }
 0x5c6   : > { %v17783_v11 = vadd.f32 %v5788_v54, %v5257_v6  ;;  %v11416_v12 = vpop.f32.mrb[11].mxu1  ;;  %11574 = vmatmul.mubr.f32.gmra.mrb[116].mxu1 %v20360_v43  ;;  %11614 = vmatprep.mubr.msk.f32.mxu0 %vm13090_vm0, %v19497_v44 }
 0x5c7   : > { %11829 = vmatprep.mubr.msk.f32.mxu1 %vm13090_vm0, %v19497_v44 }
 0x5c8   : > { %v5277_v34 = vpop.f32.mrb[16].mxu0 }
 0x5c9   : > { %v5796_v4 = vpop.f32.mrb[12].mxu1  ;;  %v5278_v53 = vadd.f32 %v5277_v34, %v17159_v1  ;;  %11615 = vmatmul.mubr.f32.gmra.mrb[122].mxu0 %v20362_v9  ;;  %v11204_v42 = vpop.f32.mrb[17].mxu0 }
 0x5ca   : > { %v17793_v37 = vadd.f32 %v5796_v4, %v5264_v52  ;;  %v11419_v6 = vpop.f32.mrb[13].mxu1  ;;  %11830 = vmatmul.mubr.f32.vlgmr.msra.gmra.mrb[118].mxu1 %v20359_v51  ;;  %11617 = vmatprep.mubr.msk.f32.mxu0 %vm13090_vm0, %v19497_v44  ;;  %v20363_v52 = vld [vmem:[#allocation78_spill] sm:$0xff] }
 0x5cb   : > { %11832 = vmatprep.mubr.msk.f32.mxu1 %vm13090_vm0, %v19497_v44 }
 0x5cc   : > { %v5284_v29 = vpop.f32.mrb[18].mxu0 }
 0x5cd   : > { %v5804_v26 = vpop.f32.mrb[14].mxu1  ;;  %v5285_v22 = vadd.f32 %v5284_v29, %v17172_v41  ;;  %11618 = vmatmul.mubr.f32.gmra.mrb[124].mxu0 %v20363_v52  ;;  %v11207_v54 = vpop.f32.mrb[19].mxu0 }
 0x5ce   : > { %v17802_v59 = vadd.f32 %v5804_v26, %v5271_v33  ;;  %v11422_v1 = vpop.f32.mrb[15].mxu1  ;;  %11833 = vmatmul.mubr.f32.gmra.mrb[120].mxu1 %v20361_v7  ;;  %11620 = vmatprep.mubr.msk.f32.mxu0 %vm13090_vm0, %v19497_v44  ;;  %v20364_v33 = vld [vmem:[#allocation48_spill] sm:$0xff] }
 0x5cf   : > { %11835 = vmatprep.mubr.msk.f32.mxu1 %vm13090_vm0, %v19497_v44 }
 0x5d0   : > { %v5291_v51 = vpop.f32.mrb[20].mxu0 }
 0x5d1   : > { %v5812_v12 = vpop.f32.mrb[16].mxu1  ;;  %v5292_v43 = vadd.f32 %v5291_v51, %v17185_v3  ;;  %11621 = vmatmul.mubr.f32.gmra.mrb[126].mxu0 %v20364_v33  ;;  %v11210_v34 = vpop.f32.mrb[21].mxu0 }
 0x5d2   : > { %v17811_v0 = vadd.f32 %v5812_v12, %v5278_v53  ;;  %v11425_v41 = vpop.f32.mrb[17].mxu1  ;;  %11836 = vmatmul.mubr.f32.gmra.mrb[122].mxu1 %v20362_v9  ;;  %11623 = vmatprep.mubr.msk.f32.mxu0 %vm13090_vm0, %v19497_v44  ;;  %v20365_v53 = vld [vmem:[#allocation84_spill] sm:$0xff] }
 0x5d3   : > { %11838 = vmatprep.mubr.msk.f32.mxu1 %vm13090_vm0, %v19497_v44 }
 0x5d4   : > { %v5298_v7 = vpop.f32.mrb[22].mxu0 }
 0x5d5   : > { %v5820_v4 = vpop.f32.mrb[18].mxu1  ;;  %v5299_v6 = vadd.f32 %v5298_v7, %v17197_v28  ;;  %11624 = vmatmul.mubr.f32.gmra.mrb[128].mxu0 %v20365_v53  ;;  %v11213_v29 = vpop.f32.mrb[23].mxu0 }
 0x5d6   : > { %v17820_v42 = vadd.f32 %v5820_v4, %v5285_v22  ;;  %v11428_v3 = vpop.f32.mrb[19].mxu1  ;;  %11839 = vmatmul.mubr.f32.gmra.mrb[124].mxu1 %v20363_v52  ;;  %11626 = vmatprep.mubr.msk.f32.mxu0 %vm13090_vm0, %v19497_v44  ;;  %v20366_v22 = vld [vmem:[#allocation87_spill] sm:$0xff] }
 0x5d7   : > { %11841 = vmatprep.mubr.msk.f32.mxu1 %vm13090_vm0, %v19497_v44 }
 0x5d8   : > { %v5305_v9 = vpop.f32.mrb[24].mxu0 }
 0x5d9   : > { %v5828_v26 = vpop.f32.mrb[20].mxu1  ;;  %v5306_v1 = vadd.f32 %v5305_v9, %v17209_v24  ;;  %11627 = vmatmul.mubr.f32.gmra.mrb[130].mxu0 %v20366_v22  ;;  %v11216_v51 = vpop.f32.mrb[25].mxu0 }
 0x5da   : > { %v17829_v54 = vadd.f32 %v5828_v26, %v5292_v43  ;;  %v11431_v28 = vpop.f32.mrb[21].mxu1  ;;  %11842 = vmatmul.mubr.f32.gmra.mrb[126].mxu1 %v20364_v33  ;;  %11629 = vmatprep.mubr.msk.f32.mxu0 %vm13090_vm0, %v19497_v44  ;;  %v20367_v43 = vld [vmem:[#allocation88_spill] sm:$0xff] }
 0x5db   : > { %11844 = vmatprep.mubr.msk.f32.mxu1 %vm13090_vm0, %v19497_v44 }
 0x5dc   : > { %v5312_v52 = vpop.f32.mrb[26].mxu0 }
 0x5dd   : > { %v5836_v12 = vpop.f32.mrb[22].mxu1  ;;  %v5313_v41 = vadd.f32 %v5312_v52, %v17225_v27  ;;  %11630 = vmatmul.mubr.f32.gmra.mrb[132].mxu0 %v20367_v43  ;;  %v11219_v7 = vpop.f32.mrb[27].mxu0 }
 0x5de   : > { %v17838_v34 = vadd.f32 %v5836_v12, %v5299_v6  ;;  %v11434_v24 = vpop.f32.mrb[23].mxu1  ;;  %11845 = vmatmul.mubr.f32.gmra.mrb[128].mxu1 %v20365_v53  ;;  %11632 = vmatprep.mubr.msk.f32.mxu0 %vm13090_vm0, %v19497_v44  ;;  %v20368_v6 = vld [vmem:[#allocation91_spill] sm:$0xff] }
 0x5df   : > { %11847 = vmatprep.mubr.msk.f32.mxu1 %vm13090_vm0, %v19497_v44 }
 0x5e0   : > { %v5319_v33 = vpop.f32.mrb[28].mxu0 }
 0x5e1   : > { %v5844_v4 = vpop.f32.mrb[24].mxu1  ;;  %v5320_v3 = vadd.f32 %v5319_v33, %v17237_v61  ;;  %11633 = vmatmul.mubr.f32.gmra.mrb[134].mxu0 %v20368_v6  ;;  %v11222_v9 = vpop.f32.mrb[29].mxu0 }
 0x5e2   : > { %v17847_v29 = vadd.f32 %v5844_v4, %v5306_v1  ;;  %v11437_v27 = vpop.f32.mrb[25].mxu1  ;;  %11848 = vmatmul.mubr.f32.gmra.mrb[130].mxu1 %v20366_v22  ;;  %11635 = vmatprep.mubr.msk.f32.mxu0 %vm13090_vm0, %v19497_v44  ;;  %v20369_v1 = vld [vmem:[#allocation58_spill] sm:$0xff] }
 0x5e3   : > { %11850 = vmatprep.mubr.msk.f32.mxu1 %vm13090_vm0, %v19497_v44 }
 0x5e4   : > { %v5326_v53 = vpop.f32.mrb[30].mxu0 }
 0x5e5   : > { %v5852_v26 = vpop.f32.mrb[26].mxu1  ;;  %v5327_v28 = vadd.f32 %v5326_v53, %v17247_v48  ;;  %11636 = vmatmul.mubr.f32.gmra.mrb[136].mxu0 %v20369_v1  ;;  %v11225_v52 = vpop.f32.mrb[31].mxu0 }
 0x5e6   : > { %v17856_v51 = vadd.f32 %v5852_v26, %v5313_v41  ;;  %v11440_v61 = vpop.f32.mrb[27].mxu1  ;;  %11851 = vmatmul.mubr.f32.gmra.mrb[132].mxu1 %v20367_v43  ;;  %11638 = vmatprep.mubr.msk.f32.mxu0 %vm13090_vm0, %v19497_v44  ;;  %v20370_v41 = vld [vmem:[#allocation93_spill] sm:$0xff] }
 0x5e7   : > { %11853 = vmatprep.mubr.msk.f32.mxu1 %vm13090_vm0, %v19497_v44 }
 0x5e8   : > { %v5333_v22 = vpop.f32.mrb[32].mxu0 }
 0x5e9   : > { %v5860_v12 = vpop.f32.mrb[28].mxu1  ;;  %v5334_v24 = vadd.f32 %v5333_v22, %v17257_v35  ;;  %11639 = vmatmul.mubr.f32.gmra.mrb[138].mxu0 %v20370_v41  ;;  %v11228_v33 = vpop.f32.mrb[33].mxu0 }
 0x5ea   : > { %v17865_v7 = vadd.f32 %v5860_v12, %v5320_v3  ;;  %v11443_v48 = vpop.f32.mrb[29].mxu1  ;;  %11854 = vmatmul.mubr.f32.gmra.mrb[134].mxu1 %v20368_v6  ;;  %11641 = vmatprep.mubr.msk.f32.mxu0 %vm13090_vm0, %v19497_v44  ;;  %v20371_v3 = vld [vmem:[#allocation95_spill] sm:$0xff] }
 0x5eb   : > { %11856 = vmatprep.mubr.msk.f32.mxu1 %vm13090_vm0, %v19497_v44 }
 0x5ec   : > { %v5340_v43 = vpop.f32.mrb[34].mxu0 }
 0x5ed   : > { %v5868_v4 = vpop.f32.mrb[30].mxu1  ;;  %v5341_v27 = vadd.f32 %v5340_v43, %v17267_v63  ;;  %11642 = vmatmul.mubr.f32.gmra.mrb[140].mxu0 %v20371_v3  ;;  %v11231_v53 = vpop.f32.mrb[35].mxu0 }
 0x5ee   : > { %v17874_v9 = vadd.f32 %v5868_v4, %v5327_v28  ;;  %v11446_v35 = vpop.f32.mrb[31].mxu1  ;;  %11857 = vmatmul.mubr.f32.gmra.mrb[136].mxu1 %v20369_v1  ;;  %11644 = vmatprep.mubr.msk.f32.mxu0 %vm13090_vm0, %v19497_v44  ;;  %v20372_v28 = vld [vmem:[#allocation96_spill] sm:$0xff] }
 0x5ef   : > { %11859 = vmatprep.mubr.msk.f32.mxu1 %vm13090_vm0, %v19497_v44 }
 0x5f0   : > { %v5347_v6 = vpop.f32.mrb[36].mxu0 }
 0x5f1   : > { %v5876_v26 = vpop.f32.mrb[32].mxu1  ;;  %v5348_v61 = vadd.f32 %v5347_v6, %v17277_v47  ;;  %11645 = vmatmul.mubr.f32.gmra.mrb[142].mxu0 %v20372_v28  ;;  %v11234_v22 = vpop.f32.mrb[37].mxu0 }
 0x5f2   : > { %v17883_v52 = vadd.f32 %v5876_v26, %v5334_v24  ;;  %v11449_v63 = vpop.f32.mrb[33].mxu1  ;;  %11860 = vmatmul.mubr.f32.gmra.mrb[138].mxu1 %v20370_v41  ;;  %11647 = vmatprep.mubr.msk.f32.mxu0 %vm13090_vm0, %v19497_v44  ;;  %v20373_v24 = vld [vmem:[#allocation99_spill] sm:$0xff] }
 0x5f3   : > { %11862 = vmatprep.mubr.msk.f32.mxu1 %vm13090_vm0, %v19497_v44 }
 0x5f4   : > { %v5354_v1 = vpop.f32.mrb[38].mxu0 }
 0x5f5   : > { %v5884_v12 = vpop.f32.mrb[34].mxu1  ;;  %v5355_v48 = vadd.f32 %v5354_v1, %v17287_v45  ;;  %11648 = vmatmul.mubr.f32.gmra.mrb[144].mxu0 %v20373_v24  ;;  %v11237_v43 = vpop.f32.mrb[39].mxu0 }
 0x5f6   : > { %v17892_v33 = vadd.f32 %v5884_v12, %v5341_v27  ;;  %v11452_v47 = vpop.f32.mrb[35].mxu1  ;;  %11863 = vmatmul.mubr.f32.gmra.mrb[140].mxu1 %v20371_v3  ;;  %11650 = vmatprep.mubr.msk.f32.mxu0 %vm13090_vm0, %v19497_v44  ;;  %v20374_v27 = vld [vmem:[#allocation101_spill] sm:$0xff] }
 0x5f7   : > { %11865 = vmatprep.mubr.msk.f32.mxu1 %vm13090_vm0, %v19497_v44 }
 0x5f8   : > { %v5361_v41 = vpop.f32.mrb[40].mxu0 }
 0x5f9   : > { %v5892_v4 = vpop.f32.mrb[36].mxu1  ;;  %v5362_v35 = vadd.f32 %v5361_v41, %v17297_v30  ;;  %11651 = vmatmul.mubr.f32.gmra.mrb[146].mxu0 %v20374_v27  ;;  %v11240_v6 = vpop.f32.mrb[41].mxu0 }
 0x5fa   : > { %v17901_v53 = vadd.f32 %v5892_v4, %v5348_v61  ;;  %v11455_v45 = vpop.f32.mrb[37].mxu1  ;;  %11866 = vmatmul.mubr.f32.gmra.mrb[142].mxu1 %v20372_v28  ;;  %11653 = vmatprep.mubr.msk.f32.mxu0 %vm13090_vm0, %v19497_v44  ;;  %v20375_v61 = vld [vmem:[#allocation103_spill] sm:$0xff] }
 0x5fb   : > { %11868 = vmatprep.mubr.msk.f32.mxu1 %vm13090_vm0, %v19497_v44 }
 0x5fc   : > { %v5368_v3 = vpop.f32.mrb[42].mxu0 }
 0x5fd   : > { %v5900_v26 = vpop.f32.mrb[38].mxu1  ;;  %v5369_v63 = vadd.f32 %v5368_v3, %v17311_v23  ;;  %11654 = vmatmul.mubr.f32.gmra.mrb[148].mxu0 %v20375_v61  ;;  %v11243_v1 = vpop.f32.mrb[43].mxu0 }
 0x5fe   : > { %v17910_v22 = vadd.f32 %v5900_v26, %v5355_v48  ;;  %v11458_v30 = vpop.f32.mrb[39].mxu1  ;;  %11869 = vmatmul.mubr.f32.gmra.mrb[144].mxu1 %v20373_v24  ;;  %11656 = vmatprep.mubr.msk.f32.mxu0 %vm13090_vm0, %v19497_v44  ;;  %v20376_v48 = vld [vmem:[#allocation104_spill] sm:$0xff] }
 0x5ff   : > { %11871 = vmatprep.mubr.msk.f32.mxu1 %vm13090_vm0, %v19497_v44 }
 0x600   : > { %v5375_v28 = vpop.f32.mrb[44].mxu0 }
 0x601   : > { %v5908_v12 = vpop.f32.mrb[40].mxu1  ;;  %v5376_v47 = vadd.f32 %v5375_v28, %v17322_v38  ;;  %11657 = vmatmul.mubr.f32.gmra.mrb[150].mxu0 %v20376_v48  ;;  %v11246_v41 = vpop.f32.mrb[45].mxu0 }
 0x602   : > { %v17919_v43 = vadd.f32 %v5908_v12, %v5362_v35  ;;  %v11461_v23 = vpop.f32.mrb[41].mxu1  ;;  %11872 = vmatmul.mubr.f32.gmra.mrb[146].mxu1 %v20374_v27  ;;  %11659 = vmatprep.mubr.msk.f32.mxu0 %vm13090_vm0, %v19497_v44  ;;  %v20377_v35 = vld [vmem:[#allocation107_spill] sm:$0xff] }
 0x603   : > { %11874 = vmatprep.mubr.msk.f32.mxu1 %vm13090_vm0, %v19497_v44 }
 0x604   : > { %v5382_v24 = vpop.f32.mrb[46].mxu0 }
 0x605   : > { %v5916_v4 = vpop.f32.mrb[42].mxu1  ;;  %v5383_v45 = vadd.f32 %v5382_v24, %v17332_v18  ;;  %11660 = vmatmul.mubr.f32.gmra.mrb[152].mxu0 %v20377_v35  ;;  %v11249_v3 = vpop.f32.mrb[47].mxu0 }
 0x606   : > { %v17928_v6 = vadd.f32 %v5916_v4, %v5369_v63  ;;  %v11464_v38 = vpop.f32.mrb[43].mxu1  ;;  %11875 = vmatmul.mubr.f32.gmra.mrb[148].mxu1 %v20375_v61  ;;  %11662 = vmatprep.mubr.msk.f32.mxu0 %vm13090_vm0, %v19497_v44  ;;  %v20378_v63 = vld [vmem:[#allocation109_spill] sm:$0xff] }
 0x607   : > { %11877 = vmatprep.mubr.msk.f32.mxu1 %vm13090_vm0, %v19497_v44 }
 0x608   : > { %v5389_v27 = vpop.f32.mrb[48].mxu0 }
 0x609   : > { %v5924_v26 = vpop.f32.mrb[44].mxu1  ;;  %v5390_v30 = vadd.f32 %v5389_v27, %v17342_v20  ;;  %11663 = vmatmul.mubr.f32.gmra.mrb[154].mxu0 %v20378_v63  ;;  %v11252_v28 = vpop.f32.mrb[49].mxu0 }
 0x60a   : > { %v17937_v1 = vadd.f32 %v5924_v26, %v5376_v47  ;;  %v11467_v18 = vpop.f32.mrb[45].mxu1  ;;  %11878 = vmatmul.mubr.f32.gmra.mrb[150].mxu1 %v20376_v48  ;;  %11665 = vmatprep.mubr.msk.f32.mxu0 %vm13090_vm0, %v19497_v44  ;;  %v20379_v47 = vld [vmem:[#allocation111_spill] sm:$0xff] }
 0x60b   : > { %11880 = vmatprep.mubr.msk.f32.mxu1 %vm13090_vm0, %v19497_v44 }
 0x60c   : > { %v5396_v61 = vpop.f32.mrb[50].mxu0 }
 0x60d   : > { %v5932_v12 = vpop.f32.mrb[46].mxu1  ;;  %v5397_v23 = vadd.f32 %v5396_v61, %v17352_v25  ;;  %11666 = vmatmul.mubr.f32.gmra.mrb[156].mxu0 %v20379_v47  ;;  %v11255_v24 = vpop.f32.mrb[51].mxu0 }
 0x60e   : > { %v17946_v41 = vadd.f32 %v5932_v12, %v5383_v45  ;;  %v11470_v20 = vpop.f32.mrb[47].mxu1  ;;  %11881 = vmatmul.mubr.f32.gmra.mrb[152].mxu1 %v20377_v35  ;;  %11668 = vmatprep.mubr.msk.f32.mxu0 %vm13090_vm0, %v19497_v44  ;;  %v20380_v45 = vld [vmem:[#allocation113_spill] sm:$0xff] }
 0x60f   : > { %11883 = vmatprep.mubr.msk.f32.mxu1 %vm13090_vm0, %v19497_v44 }
 0x610   : > { %v5403_v48 = vpop.f32.mrb[52].mxu0 }
 0x611   : > { %v5940_v4 = vpop.f32.mrb[48].mxu1  ;;  %v5404_v38 = vadd.f32 %v5403_v48, %v17362_v40  ;;  %11669 = vmatmul.mubr.f32.gmra.mrb[158].mxu0 %v20380_v45  ;;  %v11258_v27 = vpop.f32.mrb[53].mxu0 }
 0x612   : > { %v17955_v3 = vadd.f32 %v5940_v4, %v5390_v30  ;;  %v11473_v25 = vpop.f32.mrb[49].mxu1  ;;  %11884 = vmatmul.mubr.f32.gmra.mrb[154].mxu1 %v20378_v63  ;;  %11671 = vmatprep.mubr.msk.f32.mxu0 %vm13090_vm0, %v19497_v44  ;;  %v20381_v30 = vld [vmem:[#allocation114_spill] sm:$0xff] }
 0x613   : > { %11886 = vmatprep.mubr.msk.f32.mxu1 %vm13090_vm0, %v19497_v44 }
 0x614   : > { %v5410_v35 = vpop.f32.mrb[54].mxu0 }
 0x615   : > { %v5948_v26 = vpop.f32.mrb[50].mxu1  ;;  %v5411_v18 = vadd.f32 %v5410_v35, %v17372_v56  ;;  %11672 = vmatmul.mubr.f32.gmra.mrb[160].mxu0 %v20381_v30  ;;  %v11261_v61 = vpop.f32.mrb[55].mxu0 }
 0x616   : > { %v17964_v28 = vadd.f32 %v5948_v26, %v5397_v23  ;;  %v11476_v40 = vpop.f32.mrb[51].mxu1  ;;  %11887 = vmatmul.mubr.f32.gmra.mrb[156].mxu1 %v20379_v47  ;;  %11674 = vmatprep.mubr.msk.f32.mxu0 %vm13090_vm0, %v19497_v44  ;;  %v20382_v23 = vld [vmem:[#allocation116_spill] sm:$0xff] }
 0x617   : > { %11889 = vmatprep.mubr.msk.f32.mxu1 %vm13090_vm0, %v19497_v44 }
 0x618   : > { %v5417_v63 = vpop.f32.mrb[56].mxu0 }
 0x619   : > { %v5956_v12 = vpop.f32.mrb[52].mxu1  ;;  %v5418_v20 = vadd.f32 %v5417_v63, %v17382_v57  ;;  %11675 = vmatmul.mubr.f32.gmra.mrb[162].mxu0 %v20382_v23  ;;  %v11264_v48 = vpop.f32.mrb[57].mxu0 }
 0x61a   : > { %v17973_v24 = vadd.f32 %v5956_v12, %v5404_v38  ;;  %v11479_v56 = vpop.f32.mrb[53].mxu1  ;;  %11890 = vmatmul.mubr.f32.gmra.mrb[158].mxu1 %v20380_v45  ;;  %11677 = vmatprep.mubr.msk.f32.mxu0 %vm13090_vm0, %v19497_v44  ;;  %v20383_v38 = vld [vmem:[#allocation119_spill] sm:$0xff] }
 0x61b   : > { %11892 = vmatprep.mubr.msk.f32.mxu1 %vm13090_vm0, %v19497_v44 }
 0x61c   : > { %v5424_v47 = vpop.f32.mrb[58].mxu0 }
 0x61d   : > { %v5964_v4 = vpop.f32.mrb[54].mxu1  ;;  %v5425_v25 = vadd.f32 %v5424_v47, %v17396_v62  ;;  %11678 = vmatmul.mubr.f32.gmra.mrb[164].mxu0 %v20383_v38  ;;  %v11267_v35 = vpop.f32.mrb[59].mxu0 }
 0x61e   : > { %v17982_v27 = vadd.f32 %v5964_v4, %v5411_v18  ;;  %v11482_v57 = vpop.f32.mrb[55].mxu1  ;;  %11893 = vmatmul.mubr.f32.gmra.mrb[160].mxu1 %v20381_v30  ;;  %11680 = vmatprep.mubr.msk.f32.mxu0 %vm13090_vm0, %v19497_v44  ;;  %v20384_v18 = vld [vmem:[#allocation89_spill] sm:$0xff] }
 0x61f   : > { %11895 = vmatprep.mubr.msk.f32.mxu1 %vm13090_vm0, %v19497_v44 }
 0x620   : > { %v5431_v45 = vpop.f32.mrb[60].mxu0 }
 0x621   : > { %v5972_v26 = vpop.f32.mrb[56].mxu1  ;;  %v5432_v40 = vadd.f32 %v5431_v45, %v17406_v8  ;;  %11681 = vmatmul.mubr.f32.gmra.mrb[166].mxu0 %v20384_v18  ;;  %v11270_v63 = vpop.f32.mrb[61].mxu0 }
 0x622   : > { %v17991_v61 = vadd.f32 %v5972_v26, %v5418_v20  ;;  %v11485_v62 = vpop.f32.mrb[57].mxu1  ;;  %11896 = vmatmul.mubr.f32.gmra.mrb[162].mxu1 %v20382_v23  ;;  %11683 = vmatprep.mubr.msk.f32.mxu0 %vm13090_vm0, %v19497_v44  ;;  %v20385_v20 = vld [vmem:[#allocation125_spill] sm:$0xff] }
 0x623   : > { %11898 = vmatprep.mubr.msk.f32.mxu1 %vm13090_vm0, %v19497_v44 }
 0x624   : > { %v5438_v30 = vpop.f32.mrb[62].mxu0 }
 0x625   : > { %v5980_v12 = vpop.f32.mrb[58].mxu1  ;;  %v5439_v56 = vadd.f32 %v5438_v30, %v17416_v39  ;;  %11684 = vmatmul.mubr.f32.gmra.mrb[168].mxu0 %v20385_v20  ;;  %v11273_v47 = vpop.f32.mrb[63].mxu0 }
 0x626   : > { %v18000_v48 = vadd.f32 %v5980_v12, %v5425_v25  ;;  %v11488_v8 = vpop.f32.mrb[59].mxu1  ;;  %11899 = vmatmul.mubr.f32.gmra.mrb[164].mxu1 %v20383_v38  ;;  %11686 = vmatprep.mubr.msk.f32.mxu0 %vm13090_vm0, %v19497_v44  ;;  %v20386_v25 = vld [vmem:[#allocation129_spill] sm:$0xff] }
 0x627   : > { %11901 = vmatprep.mubr.msk.f32.mxu1 %vm13090_vm0, %v19497_v44 }
 0x628   : > { %v5445_v23 = vpop.f32.mrb[64].mxu0 }
 0x629   : > { %v5988_v4 = vpop.f32.mrb[60].mxu1  ;;  %v5446_v57 = vadd.f32 %v5445_v23, %v17426_v58  ;;  %11687 = vmatmul.mubr.f32.gmra.mrb[170].mxu0 %v20386_v25  ;;  %v11276_v45 = vpop.f32.mrb[65].mxu0 }
 0x62a   : > { %v18009_v35 = vadd.f32 %v5988_v4, %v5432_v40  ;;  %v11491_v39 = vpop.f32.mrb[61].mxu1  ;;  %11902 = vmatmul.mubr.f32.gmra.mrb[166].mxu1 %v20384_v18  ;;  %11689 = vmatprep.mubr.msk.f32.mxu0 %vm13090_vm0, %v19497_v44  ;;  %v20387_v40 = vld [vmem:[#allocation98_spill] sm:$0xff] }
 0x62b   : > { %11904 = vmatprep.mubr.msk.f32.mxu1 %vm13090_vm0, %v19497_v44 }
 0x62c   : > { %v5452_v38 = vpop.f32.mrb[66].mxu0 }
 0x62d   : > { %v5996_v26 = vpop.f32.mrb[62].mxu1  ;;  %v5453_v62 = vadd.f32 %v5452_v38, %v17436_v60  ;;  %11690 = vmatmul.mubr.f32.gmra.mrb[172].mxu0 %v20387_v40  ;;  %v11279_v30 = vpop.f32.mrb[67].mxu0 }
 0x62e   : > { %v18018_v63 = vadd.f32 %v5996_v26, %v5439_v56  ;;  %v11494_v58 = vpop.f32.mrb[63].mxu1  ;;  %11905 = vmatmul.mubr.f32.gmra.mrb[168].mxu1 %v20385_v20  ;;  %11692 = vmatprep.mubr.msk.f32.mxu0 %vm13090_vm0, %v19497_v44  ;;  %v20388_v56 = vld [vmem:[#allocation117_spill] sm:$0xff] }
 0x62f   : > { %11907 = vmatprep.mubr.msk.f32.mxu1 %vm13090_vm0, %v19497_v44 }
 0x630   : > { %v5459_v18 = vpop.f32.mrb[68].mxu0 }
 0x631   : > { %v6004_v12 = vpop.f32.mrb[64].mxu1  ;;  %v5460_v8 = vadd.f32 %v5459_v18, %v17446_v19  ;;  %11693 = vmatmul.mubr.f32.gmra.mrb[174].mxu0 %v20388_v56  ;;  %v11282_v23 = vpop.f32.mrb[69].mxu0 }
 0x632   : > { %v18027_v47 = vadd.f32 %v6004_v12, %v5446_v57  ;;  %v11497_v60 = vpop.f32.mrb[65].mxu1  ;;  %11908 = vmatmul.mubr.f32.gmra.mrb[170].mxu1 %v20386_v25  ;;  %11695 = vmatprep.mubr.msk.f32.mxu0 %vm13090_vm0, %v19497_v44  ;;  %v20389_v57 = vld [vmem:[#allocation123_spill] sm:$0xff] }
 0x633   : > { %11910 = vmatprep.mubr.msk.f32.mxu1 %vm13090_vm0, %v19497_v44 }
 0x634   : > { %v5466_v20 = vpop.f32.mrb[70].mxu0 }
 0x635   : > { %v6012_v4 = vpop.f32.mrb[66].mxu1  ;;  %v5467_v39 = vadd.f32 %v5466_v20, %v17456_v55  ;;  %11696 = vmatmul.mubr.f32.gmra.mrb[176].mxu0 %v20389_v57  ;;  %v11285_v38 = vpop.f32.mrb[71].mxu0 }
 0x636   : > { %v18036_v45 = vadd.f32 %v6012_v4, %v5453_v62  ;;  %v11500_v19 = vpop.f32.mrb[67].mxu1  ;;  %11911 = vmatmul.mubr.f32.gmra.mrb[172].mxu1 %v20387_v40  ;;  %11698 = vmatprep.mubr.msk.f32.mxu0 %vm13090_vm0, %v19497_v44  ;;  %v20390_v62 = vld [vmem:[#allocation132_spill] sm:$0xff] }
 0x637   : > { %11913 = vmatprep.mubr.msk.f32.mxu1 %vm13090_vm0, %v19497_v44 }
 0x638   : > { %v5473_v25 = vpop.f32.mrb[72].mxu0 }
 0x639   : > { %v6020_v26 = vpop.f32.mrb[68].mxu1  ;;  %v5474_v58 = vadd.f32 %v5473_v25, %v17466_v16  ;;  %11699 = vmatmul.mubr.f32.gmra.mrb[178].mxu0 %v20390_v62  ;;  %v11288_v18 = vpop.f32.mrb[73].mxu0 }
 0x63a   : > { %v18045_v30 = vadd.f32 %v6020_v26, %v5460_v8  ;;  %v11503_v55 = vpop.f32.mrb[69].mxu1  ;;  %11914 = vmatmul.mubr.f32.gmra.mrb[174].mxu1 %v20388_v56  ;;  %11701 = vmatprep.mubr.msk.f32.mxu0 %vm13090_vm0, %v19497_v44  ;;  %v20391_v8 = vld [vmem:[#allocation25_spill] sm:$0xff] }
 0x63b   : > { %11916 = vmatprep.mubr.msk.f32.mxu1 %vm13090_vm0, %v19497_v44  ;;  %v20393_v55 = vld [vmem:[#allocation75_spill] sm:$0xff] }
 0x63c   : > { %v5480_v40 = vpop.f32.mrb[74].mxu0 }
 0x63d   : > { %v6028_v12 = vpop.f32.mrb[70].mxu1  ;;  %v5481_v60 = vadd.f32 %v5480_v40, %v17476_v49  ;;  %11702 = vmatmul.mubr.f32.gmra.mrb[180].mxu0 %v20391_v8  ;;  %v11291_v20 = vpop.f32.mrb[75].mxu0 }
 0x63e   : > { %v18054_v23 = vadd.f32 %v6028_v12, %v5467_v39  ;;  %v11506_v16 = vpop.f32.mrb[71].mxu1  ;;  %11917 = vmatmul.mubr.f32.gmra.mrb[176].mxu1 %v20389_v57  ;;  %11704 = vmatprep.mubr.msk.f32.mxu0 %vm13090_vm0, %v19497_v44  ;;  %v20392_v39 = vld [vmem:[#allocation134_spill] sm:$0xff]  ;;  %v20395_v20 = vld [vmem:[#allocation77_spill] sm:$0xff] }
 0x63f   : > { %11919 = vmatprep.mubr.msk.f32.mxu1 %vm13090_vm0, %v19497_v44 }
 0x640   : > { %v5487_v56 = vpop.f32.mrb[76].mxu0 }
 0x641   : > { %v6036_v4 = vpop.f32.mrb[72].mxu1  ;;  %v5488_v19 = vadd.f32 %v5487_v56, %v17486_v36  ;;  %11705 = vmatmul.mubr.f32.gmra.mrb[182].mxu0 %v20392_v39  ;;  %v11294_v25 = vpop.f32.mrb[77].mxu0 }
 0x642   : > { %v18063_v38 = vadd.f32 %v6036_v4, %v5474_v58  ;;  %v11509_v49 = vpop.f32.mrb[73].mxu1  ;;  %11920 = vmatmul.mubr.f32.gmra.mrb[178].mxu1 %v20390_v62  ;;  %11707 = vmatprep.mubr.msk.f32.mxu0 %vm13090_vm0, %v19497_v44  ;;  %v20394_v58 = vld [vmem:[#allocation136_spill] sm:$0xff] }
 0x643   : > { %11922 = vmatprep.mubr.msk.f32.mxu1 %vm13090_vm0, %v19497_v44  ;;  %v20396_v49 = vld [vmem:[#allocation138_spill] sm:$0xff] }
 0x644   : > { %v5494_v57 = vpop.f32.mrb[78].mxu0 }
 0x645   : > { %v6044_v26 = vpop.f32.mrb[74].mxu1  ;;  %v5495_v18 = vadd.f32 %v5494_v57, %v20393_v55  ;;  %11708 = vmatmul.mubr.f32.gmra.mrb[184].mxu0 %v20394_v58  ;;  %v11297_v12 = vpop.f32.mrb[79].mxu0 }
 0x646   : > { %v18072_v40 = vadd.f32 %v6044_v26, %v5481_v60  ;;  %v11512_v36 = vpop.f32.mrb[75].mxu1  ;;  %11923 = vmatmul.mubr.f32.gmra.mrb[180].mxu1 %v20391_v8  ;;  %11710 = vmatprep.mubr.msk.f32.mxu0 %vm13090_vm0, %v19497_v44  ;;  %v20397_v26 = vld [vmem:[#allocation46_spill] sm:$0xff]  ;;  %v20399_v12 = vld [vmem:[#allocation140_spill] sm:$0xff] }
 0x647   : > { %11925 = vmatprep.mubr.msk.f32.mxu1 %vm13090_vm0, %v19497_v44 }
 0x648   : > { %v5501_v62 = vpop.f32.mrb[80].mxu0 }
 0x649   : > { %v6052_v16 = vpop.f32.mrb[76].mxu1  ;;  %v5502_v56 = vadd.f32 %v5501_v62, %v20395_v20  ;;  %11711 = vmatmul.mubr.f32.gmra.mrb[186].mxu0 %v20396_v49  ;;  %v11300_v25 = vpop.f32.mrb[81].mxu0  ;;  %v20400_v20 = vld [vmem:[#allocation51_spill] sm:$0xff] }
 0x64a   : > { %v18081_v4 = vadd.f32 %v6052_v16, %v5488_v19  ;;  %v11515_v60 = vpop.f32.mrb[77].mxu1  ;;  %11926 = vmatmul.mubr.f32.gmra.mrb[182].mxu1 %v20392_v39  ;;  %11713 = vmatprep.mubr.msk.f32.mxu0 %vm13090_vm0, %v19497_v44 }
 0x64b   : > { %11928 = vmatprep.mubr.msk.f32.mxu1 %vm13090_vm0, %v19497_v44 }
 0x64c   : > { %v5508_v8 = vpop.f32.mrb[82].mxu0 }
 0x64d   : > { %v6060_v57 = vpop.f32.mrb[78].mxu1  ;;  %v5509_v55 = vadd.f32 %v5508_v8, %v20397_v26  ;;  %11714 = vmatmul.mubr.f32.gmra.mrb[188].mxu0 %v20399_v12  ;;  %v11303_v62 = vpop.f32.mrb[83].mxu0  ;;  %v20402_v8 = vld [vmem:[#allocation142_spill] sm:$0xff] }
 0x64e   : > { %v18090_v36 = vadd.f32 %v6060_v57, %v5495_v18  ;;  %v11518_v19 = vpop.f32.mrb[79].mxu1  ;;  %11929 = vmatmul.mubr.f32.gmra.mrb[184].mxu1 %v20394_v58  ;;  %11716 = vmatprep.mubr.msk.f32.mxu0 %vm13090_vm0, %v19497_v44 }
 0x64f   : > { %11931 = vmatprep.mubr.msk.f32.mxu1 %vm13090_vm0, %v19497_v44  ;;  %v20403_v19 = vld [vmem:[#allocation85_spill] sm:$0xff] }
 0x650   : > { %20398 = vst [vmem:[#allocation54_spill] sm:$0xff] %v18090_v36  ;;  %v5515_v39 = vpop.f32.mrb[84].mxu0 }
 0x651   : > { %v6068_v16 = vpop.f32.mrb[80].mxu1  ;;  %v5516_v60 = vadd.f32 %v5515_v39, %v20400_v20  ;;  %11717 = vmatmul.mubr.f32.gmra.mrb[190].mxu0 %v20402_v8  ;;  %v11306_v57 = vpop.f32.mrb[85].mxu0  ;;  %v20405_v39 = vld [vmem:[#allocation144_spill] sm:$0xff] }
 0x652   : > { %v18099_v25 = vadd.f32 %v6068_v16, %v5502_v56  ;;  %v11521_v18 = vpop.f32.mrb[81].mxu1  ;;  %11932 = vmatmul.mubr.f32.gmra.mrb[186].mxu1 %v20396_v49  ;;  %11719 = vmatprep.mubr.msk.f32.mxu0 %vm13090_vm0, %v19497_v44 }
 0x653   : > { %11934 = vmatprep.mubr.msk.f32.mxu1 %vm13090_vm0, %v19497_v44  ;;  %v20406_v18 = vld [vmem:[#allocation86_spill] sm:$0xff] }
 0x654   : > { %20401 = vst [vmem:[#allocation56_spill] sm:$0xff] %v18099_v25  ;;  %v5522_v58 = vpop.f32.mrb[86].mxu0 }
 0x655   : > { %v6076_v26 = vpop.f32.mrb[82].mxu1  ;;  %v5523_v62 = vadd.f32 %v5522_v58, %v20403_v19  ;;  %11720 = vmatmul.mubr.f32.gmra.mrb[192].mxu0 %v20405_v39  ;;  %v11309_v16 = vpop.f32.mrb[87].mxu0  ;;  %v20408_v58 = vld [vmem:[#allocation146_spill] sm:$0xff] }
 0x656   : > { %v18108_v36 = vadd.f32 %v6076_v26, %v5509_v55  ;;  %v11524_v56 = vpop.f32.mrb[83].mxu1  ;;  %11935 = vmatmul.mubr.f32.gmra.mrb[188].mxu1 %v20399_v12  ;;  %11722 = vmatprep.mubr.msk.f32.mxu0 %vm13090_vm0, %v19497_v44 }
 0x657   : > { %11937 = vmatprep.mubr.msk.f32.mxu1 %vm13090_vm0, %v19497_v44  ;;  %v20409_v56 = vld [vmem:[#allocation73_spill] sm:$0xff] }
 0x658   : > { %20404 = vst [vmem:[#allocation112_spill] sm:$0xff] %v18108_v36  ;;  %v5529_v49 = vpop.f32.mrb[88].mxu0 }
 0x659   : > { %v6084_v20 = vpop.f32.mrb[84].mxu1  ;;  %v5530_v57 = vadd.f32 %v5529_v49, %v20406_v18  ;;  %11723 = vmatmul.mubr.f32.gmra.mrb[194].mxu0 %v20408_v58  ;;  %v11312_v26 = vpop.f32.mrb[89].mxu0  ;;  %v20411_v49 = vld [vmem:[#allocation148_spill] sm:$0xff] }
 0x65a   : > { %v18117_v25 = vadd.f32 %v6084_v20, %v5516_v60  ;;  %v11527_v55 = vpop.f32.mrb[85].mxu1  ;;  %11938 = vmatmul.mubr.f32.gmra.mrb[190].mxu1 %v20402_v8  ;;  %11725 = vmatprep.mubr.msk.f32.mxu0 %vm13090_vm0, %v19497_v44 }
 0x65b   : > { %11940 = vmatprep.mubr.msk.f32.mxu1 %vm13090_vm0, %v19497_v44  ;;  %v20412_v55 = vld [vmem:[#allocation90_spill] sm:$0xff] }
 0x65c   : > { %20407 = vst [vmem:[#allocation22_spill] sm:$0xff] %v18117_v25  ;;  %v5536_v12 = vpop.f32.mrb[90].mxu0 }
 0x65d   : > { %v6092_v19 = vpop.f32.mrb[86].mxu1  ;;  %v5537_v16 = vadd.f32 %v5536_v12, %v20409_v56  ;;  %11726 = vmatmul.mubr.f32.gmra.mrb[196].mxu0 %v20411_v49  ;;  %v11315_v20 = vpop.f32.mrb[91].mxu0  ;;  %v20414_v12 = vld [vmem:[#allocation150_spill] sm:$0xff] }
 0x65e   : > { %v18126_v36 = vadd.f32 %v6092_v19, %v5523_v62  ;;  %v11530_v60 = vpop.f32.mrb[87].mxu1  ;;  %11941 = vmatmul.mubr.f32.gmra.mrb[192].mxu1 %v20405_v39  ;;  %11728 = vmatprep.mubr.msk.f32.mxu0 %vm13090_vm0, %v19497_v44 }
 0x65f   : > { %11943 = vmatprep.mubr.msk.f32.mxu1 %vm13090_vm0, %v19497_v44  ;;  %v20415_v60 = vld [vmem:[#allocation94_spill] sm:$0xff] }
 0x660   : > { %20410 = vst [vmem:[#allocation23_spill] sm:$0xff] %v18126_v36  ;;  %v5543_v8 = vpop.f32.mrb[92].mxu0 }
 0x661   : > { %v6100_v18 = vpop.f32.mrb[88].mxu1  ;;  %v5544_v26 = vadd.f32 %v5543_v8, %v20412_v55  ;;  %11729 = vmatmul.mubr.f32.gmra.mrb[198].mxu0 %v20414_v12  ;;  %v11318_v19 = vpop.f32.mrb[93].mxu0  ;;  %v20417_v8 = vld [vmem:[#allocation152_spill] sm:$0xff] }
 0x662   : > { %v18135_v25 = vadd.f32 %v6100_v18, %v5530_v57  ;;  %v11533_v62 = vpop.f32.mrb[89].mxu1  ;;  %11944 = vmatmul.mubr.f32.gmra.mrb[194].mxu1 %v20408_v58  ;;  %11731 = vmatprep.mubr.msk.f32.mxu0 %vm13090_vm0, %v19497_v44 }
 0x663   : > { %11946 = vmatprep.mubr.msk.f32.mxu1 %vm13090_vm0, %v19497_v44  ;;  %v20418_v62 = vld [vmem:[#allocation44_spill] sm:$0xff] }
 0x664   : > { %20413 = vst [vmem:[#allocation61_spill] sm:$0xff] %v18135_v25  ;;  %v5550_v39 = vpop.f32.mrb[94].mxu0 }
 0x665   : > { %v6108_v56 = vpop.f32.mrb[90].mxu1  ;;  %v5551_v20 = vadd.f32 %v5550_v39, %v20415_v60  ;;  %11732 = vmatmul.mubr.f32.gmra.mrb[200].mxu0 %v20417_v8  ;;  %v11321_v18 = vpop.f32.mrb[95].mxu0  ;;  %v20420_v39 = vld [vmem:[#allocation154_spill] sm:$0xff] }
 0x666   : > { %v18144_v36 = vadd.f32 %v6108_v56, %v5537_v16  ;;  %v11536_v57 = vpop.f32.mrb[91].mxu1  ;;  %11947 = vmatmul.mubr.f32.gmra.mrb[196].mxu1 %v20411_v49  ;;  %11734 = vmatprep.mubr.msk.f32.mxu0 %vm13090_vm0, %v19497_v44 }
 0x667   : > { %11949 = vmatprep.mubr.msk.f32.mxu1 %vm13090_vm0, %v19497_v44  ;;  %v20421_v57 = vld [vmem:[#allocation81_spill] sm:$0xff] }
 0x668   : > { %20416 = vst [vmem:[#allocation62_spill] sm:$0xff] %v18144_v36  ;;  %v5557_v58 = vpop.f32.mrb[96].mxu0 }
 0x669   : > { %v6116_v55 = vpop.f32.mrb[92].mxu1  ;;  %v5558_v19 = vadd.f32 %v5557_v58, %v20418_v62  ;;  %11735 = vmatmul.mubr.f32.gmra.mrb[202].mxu0 %v20420_v39  ;;  %v11324_v56 = vpop.f32.mrb[97].mxu0  ;;  %v20423_v58 = vld [vmem:[#allocation156_spill] sm:$0xff] }
 0x66a   : > { %v18153_v25 = vadd.f32 %v6116_v55, %v5544_v26  ;;  %v11539_v16 = vpop.f32.mrb[93].mxu1  ;;  %11950 = vmatmul.mubr.f32.gmra.mrb[198].mxu1 %v20414_v12  ;;  %11737 = vmatprep.mubr.msk.f32.mxu0 %vm13090_vm0, %v19497_v44 }
 0x66b   : > { %11952 = vmatprep.mubr.msk.f32.mxu1 %vm13090_vm0, %v19497_v44  ;;  %v20424_v16 = vld [vmem:[#allocation102_spill] sm:$0xff] }
 0x66c   : > { %20419 = vst [vmem:[#allocation64_spill] sm:$0xff] %v18153_v25  ;;  %v5564_v49 = vpop.f32.mrb[98].mxu0 }
 0x66d   : > { %v6124_v60 = vpop.f32.mrb[94].mxu1  ;;  %v5565_v18 = vadd.f32 %v5564_v49, %v20421_v57  ;;  %11738 = vmatmul.mubr.f32.gmra.mrb[204].mxu0 %v20423_v58  ;;  %v11327_v55 = vpop.f32.mrb[99].mxu0  ;;  %v20426_v49 = vld [vmem:[#allocation158_spill] sm:$0xff] }
 0x66e   : > { %v18162_v36 = vadd.f32 %v6124_v60, %v5551_v20  ;;  %v11542_v26 = vpop.f32.mrb[95].mxu1  ;;  %11953 = vmatmul.mubr.f32.gmra.mrb[200].mxu1 %v20417_v8  ;;  %11740 = vmatprep.mubr.msk.f32.mxu0 %vm13090_vm0, %v19497_v44 }
 0x66f   : > { %11955 = vmatprep.mubr.msk.f32.mxu1 %vm13090_vm0, %v19497_v44  ;;  %v20427_v26 = vld [vmem:[#allocation106_spill] sm:$0xff] }
 0x670   : > { %20422 = vst [vmem:[#allocation67_spill] sm:$0xff] %v18162_v36  ;;  %v5571_v12 = vpop.f32.mrb[100].mxu0 }
 0x671   : > { %v6132_v62 = vpop.f32.mrb[96].mxu1  ;;  %v5572_v56 = vadd.f32 %v5571_v12, %v20424_v16  ;;  %11741 = vmatmul.mubr.f32.gmra.mrb[206].mxu0 %v20426_v49  ;;  %v11330_v60 = vpop.f32.mrb[101].mxu0  ;;  %v20429_v12 = vld [vmem:[#allocation160_spill] sm:$0xff] }
 0x672   : > { %v18171_v25 = vadd.f32 %v6132_v62, %v5558_v19  ;;  %v11545_v20 = vpop.f32.mrb[97].mxu1  ;;  %11956 = vmatmul.mubr.f32.gmra.mrb[202].mxu1 %v20420_v39  ;;  %11743 = vmatprep.mubr.msk.f32.mxu0 %vm13090_vm0, %v19497_v44 }
 0x673   : > { %11958 = vmatprep.mubr.msk.f32.mxu1 %vm13090_vm0, %v19497_v44  ;;  %v20430_v20 = vld [vmem:[#allocation83_spill] sm:$0xff] }
 0x674   : > { %20425 = vst [vmem:[#allocation69_spill] sm:$0xff] %v18171_v25  ;;  %v5578_v8 = vpop.f32.mrb[102].mxu0 }
 0x675   : > { %v6140_v57 = vpop.f32.mrb[98].mxu1  ;;  %v5579_v55 = vadd.f32 %v5578_v8, %v20427_v26  ;;  %11744 = vmatmul.mubr.f32.gmra.mrb[208].mxu0 %v20429_v12  ;;  %v11333_v62 = vpop.f32.mrb[103].mxu0  ;;  %v20432_v8 = vld [vmem:[#allocation162_spill] sm:$0xff] }
 0x676   : > { %v18180_v36 = vadd.f32 %v6140_v57, %v5565_v18  ;;  %v11548_v19 = vpop.f32.mrb[99].mxu1  ;;  %11959 = vmatmul.mubr.f32.gmra.mrb[204].mxu1 %v20423_v58  ;;  %11746 = vmatprep.mubr.msk.f32.mxu0 %vm13090_vm0, %v19497_v44 }
 0x677   : > { %11961 = vmatprep.mubr.msk.f32.mxu1 %vm13090_vm0, %v19497_v44  ;;  %v20433_v19 = vld [vmem:[#allocation105_spill] sm:$0xff] }
 0x678   : > { %20428 = vst [vmem:[#allocation82_spill] sm:$0xff] %v18180_v36  ;;  %v5585_v39 = vpop.f32.mrb[104].mxu0 }
 0x679   : > { %v6148_v16 = vpop.f32.mrb[100].mxu1  ;;  %v5586_v60 = vadd.f32 %v5585_v39, %v20430_v20  ;;  %11747 = vmatmul.mubr.f32.gmra.mrb[210].mxu0 %v20432_v8  ;;  %v11336_v57 = vpop.f32.mrb[105].mxu0  ;;  %v20435_v39 = vld [vmem:[#allocation164_spill] sm:$0xff] }
 0x67a   : > { %v18189_v25 = vadd.f32 %v6148_v16, %v5572_v56  ;;  %v11551_v18 = vpop.f32.mrb[101].mxu1  ;;  %11962 = vmatmul.mubr.f32.gmra.mrb[206].mxu1 %v20426_v49  ;;  %11749 = vmatprep.mubr.msk.f32.mxu0 %vm13090_vm0, %v19497_v44 }
 0x67b   : > { %11964 = vmatprep.mubr.msk.f32.mxu1 %vm13090_vm0, %v19497_v44  ;;  %v20436_v18 = vld [vmem:[#allocation52_spill] sm:$0xff] }
 0x67c   : > { %20431 = vst [vmem:[#allocation70_spill] sm:$0xff] %v18189_v25  ;;  %v5592_v58 = vpop.f32.mrb[106].mxu0 }
 0x67d   : > { %v6156_v26 = vpop.f32.mrb[102].mxu1  ;;  %v5593_v62 = vadd.f32 %v5592_v58, %v20433_v19  ;;  %11750 = vmatmul.mubr.f32.gmra.mrb[212].mxu0 %v20435_v39  ;;  %v11339_v16 = vpop.f32.mrb[107].mxu0  ;;  %v20437_v58 = vld [vmem:[#allocation166_spill] sm:$0xff] }
 0x67e   : > { %v18198_v36 = vadd.f32 %v6156_v26, %v5579_v55  ;;  %v11554_v56 = vpop.f32.mrb[103].mxu1  ;;  %11965 = vmatmul.mubr.f32.gmra.mrb[208].mxu1 %v20429_v12  ;;  %11752 = vmatprep.mubr.msk.f32.mxu0 %vm13090_vm0, %v19497_v44 }
 0x67f   : > { %11967 = vmatprep.mubr.msk.f32.mxu1 %vm13090_vm0, %v19497_v44  ;;  %v20438_v56 = vld [vmem:[#allocation110_spill] sm:$0xff] }
 0x680   : > { %20434 = vst [vmem:[#allocation92_spill] sm:$0xff] %v18198_v36  ;;  %v5599_v49 = vpop.f32.mrb[108].mxu0 }
 0x681   : > { %v6164_v20 = vpop.f32.mrb[104].mxu1  ;;  %v5600_v57 = vadd.f32 %v5599_v49, %v20436_v18  ;;  %11753 = vmatmul.mubr.f32.gmra.mrb[214].mxu0 %v20437_v58  ;;  %v11342_v26 = vpop.f32.mrb[109].mxu0  ;;  %v20439_v49 = vld [vmem:[#allocation168_spill] sm:$0xff] }
 0x682   : > { %v18207_v25 = vadd.f32 %v6164_v20, %v5586_v60  ;;  %v11557_v55 = vpop.f32.mrb[105].mxu1  ;;  %11968 = vmatmul.mubr.f32.gmra.mrb[210].mxu1 %v20432_v8  ;;  %11755 = vmatprep.mubr.msk.f32.mxu0 %vm13090_vm0, %v19497_v44 }
 0x683   : > { %11970 = vmatprep.mubr.msk.f32.mxu1 %vm13090_vm0, %v19497_v44 }
 0x684   : > { %v5606_v12 = vpop.f32.mrb[110].mxu0 }
 0x685   : > { %v6172_v19 = vpop.f32.mrb[106].mxu1  ;;  %v5607_v16 = vadd.f32 %v5606_v12, %v20438_v56  ;;  %11756 = vmatmul.mubr.f32.gmra.mrb[216].mxu0 %v20439_v49  ;;  %v11345_v20 = vpop.f32.mrb[111].mxu0  ;;  %v20440_v12 = vld [vmem:[#allocation170_spill] sm:$0xff] }
 0x686   : > { %v18216_v36 = vadd.f32 %v6172_v19, %v5593_v62  ;;  %v11560_v60 = vpop.f32.mrb[107].mxu1  ;;  %11971 = vmatmul.mubr.f32.gmra.mrb[212].mxu1 %v20435_v39  ;;  %11758 = vmatprep.mubr.msk.f32.mxu0 %vm13090_vm0, %v19497_v44 }
 0x687   : > { %11973 = vmatprep.mubr.msk.f32.mxu1 %vm13090_vm0, %v19497_v44 }
 0x688   : > { %v5613_v8 = vpop.f32.mrb[112].mxu0 }
 0x689   : > { %v6180_v18 = vpop.f32.mrb[108].mxu1  ;;  %v5614_v55 = vadd.f32 %v5613_v8, %v17666_v15  ;;  %11759 = vmatmul.mubr.f32.gmra.mrb[218].mxu0 %v20440_v12  ;;  %v11348_v19 = vpop.f32.mrb[113].mxu0 }
 0x68a   : > { %v18225_v26 = vadd.f32 %v6180_v18, %v5600_v57  ;;  %v11563_v62 = vpop.f32.mrb[109].mxu1  ;;  %11974 = vmatmul.mubr.f32.gmra.mrb[214].mxu1 %v20437_v58  ;;  %11761 = vmatprep.mubr.msk.f32.mxu0 %vm13090_vm0, %v19497_v44  ;;  %v20441_v57 = vld [vmem:[#allocation172_spill] sm:$0xff] }
 0x68b   : > { %11976 = vmatprep.mubr.msk.f32.mxu1 %vm13090_vm0, %v19497_v44 }
 0x68c   : > { %v5620_v39 = vpop.f32.mrb[114].mxu0 }
 0x68d   : > { %v6188_v56 = vpop.f32.mrb[110].mxu1  ;;  %v5621_v60 = vadd.f32 %v5620_v39, %v17672_v17  ;;  %11762 = vmatmul.mubr.f32.gmra.mrb[220].mxu0 %v20441_v57  ;;  %v11351_v8 = vpop.f32.mrb[115].mxu0 }
 0x68e   : > { %v18234_v20 = vadd.f32 %v6188_v56, %v5607_v16  ;;  %v11566_v15 = vpop.f32.mrb[111].mxu1  ;;  %11977 = vmatmul.mubr.f32.gmra.mrb[216].mxu1 %v20439_v49  ;;  %11764 = vmatprep.mubr.msk.f32.mxu0 %vm13090_vm0, %v19497_v44  ;;  %v20442_v16 = vld [vmem:[#allocation174_spill] sm:$0xff]  ;;  %v20443_v8 = vld [vmem:[#allocation176_spill] sm:$0xff] }
 0x68f   : > { %11979 = vmatprep.mubr.msk.f32.mxu1 %vm13090_vm0, %v19497_v44 }
 0x690   : > { %v5627_v58 = vpop.f32.mrb[116].mxu0 }
 0x691   : > { %v6196_v18 = vpop.f32.mrb[112].mxu1  ;;  %v5628_v62 = vadd.f32 %v5627_v58, %v17682_v10  ;;  %11765 = vmatmul.mubr.f32.gmra.mrb[222].mxu0 %v20442_v16  ;;  %v11354_v39 = vpop.f32.mrb[117].mxu0 }
 0x692   : > { %v18243_v19 = vadd.f32 %v6196_v18, %v5614_v55  ;;  %v11569_v17 = vpop.f32.mrb[113].mxu1  ;;  %11980 = vmatmul.mubr.f32.gmra.mrb[218].mxu1 %v20440_v12  ;;  %11767 = vmatprep.mubr.msk.f32.mxu0 %vm13090_vm0, %v19497_v44 }
 0x693   : > { %11982 = vmatprep.mubr.msk.f32.mxu1 %vm13090_vm0, %v19497_v44 }
 0x694   : > { %v6331_v56 = vpop.f32.mrb[118].mxu0 }
 0x695   : > { %v6204_v49 = vpop.f32.mrb[114].mxu1  ;;  %v6332_v10 = vadd.f32 %v6331_v56, %v17693_v31  ;;  %11768 = vmatmul.mubr.f32.gmra.mrb[224].mxu0 %v20443_v8  ;;  %v11610_v58 = vpop.f32.mrb[119].mxu0  ;;  %v20444_v31 = vld [vmem:[#allocation178_spill] sm:$0xff] }
 0x696   : > { %v18251_v15 = vadd.f32 %v6204_v49, %v5621_v60  ;;  %v11572_v55 = vpop.f32.mrb[115].mxu1  ;;  %11983 = vmatmul.mubr.f32.gmra.mrb[220].mxu1 %v20441_v57  ;;  %11770 = vmatprep.mubr.msk.f32.mxu0 %vm13090_vm0, %v19497_v44  ;;  %v20445_v58 = vld [vmem:[#allocation180_spill] sm:$0xff] }
 0x697   : > { %11985 = vmatprep.mubr.msk.f32.mxu1 %vm13090_vm0, %v19497_v44 }
 0x698   : > { %v6337_v18 = vpop.f32.mrb[120].mxu0 }
 0x699   : > { %v6212_v12 = vpop.f32.mrb[116].mxu1  ;;  %v6338_v60 = vadd.f32 %v6337_v18, %v17703_v46  ;;  %11771 = vmatmul.mubr.f32.gmra.mrb[226].mxu0 %v20444_v31  ;;  %v11613_v49 = vpop.f32.mrb[121].mxu0 }
 0x69a   : > { %v18260_v17 = vadd.f32 %v6212_v12, %v5628_v62  ;;  %v11575_v39 = vpop.f32.mrb[117].mxu1  ;;  %11986 = vmatmul.mubr.f32.gmra.mrb[222].mxu1 %v20442_v16  ;;  %11773 = vmatprep.mubr.msk.f32.mxu0 %vm13090_vm0, %v19497_v44  ;;  %v18272_v62 = vld [vmem:[%s18850_s4] ss:$0 sm:$0xff] }
 0x69b   : > { %11988 = vmatprep.mubr.msk.f32.mxu1 %vm13090_vm0, %v19497_v44 }
 0x69c   : > { %v6343_v57 = vpop.f32.mrb[122].mxu0 }
 0x69d   : > { %v6790_v56 = vpop.f32.mrb[118].mxu1  ;;  %v6344_v46 = vadd.f32 %v6343_v57, %v17713_v21  ;;  %11774 = vmatmul.mubr.f32.gmra.mrb[228].mxu0 %v20445_v58  ;;  %v11616_v12 = vpop.f32.mrb[123].mxu0  ;;  %v20446_v57 = vld [vmem:[#allocation182_spill] sm:$0xff] }
 0x69e   : > { %v6791_v55 = vadd.f32 %v6790_v56, %v6332_v10  ;;  %v11831_v16 = vpop.f32.mrb[119].mxu1  ;;  %11989 = vmatmul.mubr.f32.gmra.mrb[224].mxu1 %v20443_v8  ;;  %11776 = vmatprep.mubr.msk.f32.mxu0 %vm13090_vm0, %v19497_v44 }
 0x69f   : > { %11991 = vmatprep.mubr.msk.f32.mxu1 %vm13090_vm0, %v19497_v44 }
 0x6a0   : > { %v7173_v18 = vadd.f32 %v18272_v62, %v6791_v55  ;;  %v6349_v39 = vpop.f32.mrb[124].mxu0 }
 0x6a1   : > { %v6796_v49 = vpop.f32.mrb[120].mxu1  ;;  %v6350_v21 = vadd.f32 %v6349_v39, %v17723_v13  ;;  %11777 = vmatmul.mubr.f32.gmra.mrb[230].mxu0 %v20446_v57  ;;  %v11619_v8 = vpop.f32.mrb[125].mxu0 }
 0x6a2   : > { %12381 = vtanh.f32 %v7173_v18  ;;  %v6797_v10 = vadd.f32 %v6796_v49, %v6338_v60  ;;  %v11834_v56 = vpop.f32.mrb[121].mxu1  ;;  %11992 = vmatmul.mubr.f32.gmra.mrb[226].mxu1 %v20444_v31  ;;  %11779 = vmatprep.mubr.msk.f32.mxu0 %vm13090_vm0, %v19497_v44  ;;  %v20447_v18 = vld [vmem:[#allocation184_spill] sm:$0xff]  ;;  %v20448_v8 = vld [vmem:[#allocation186_spill] sm:$0xff] }
 0x6a3   : > { %11994 = vmatprep.mubr.msk.f32.mxu1 %vm13090_vm0, %v19497_v44 }
 0x6a4   : > { %v7174_v55 = vadd.f32 %v18272_v62, %v6797_v10  ;;  %v6355_v16 = vpop.f32.mrb[126].mxu0 }
 0x6a5   : > { %v6802_v12 = vpop.f32.mrb[122].mxu1  ;;  %v6356_v13 = vadd.f32 %v6355_v16, %v17733_v50  ;;  %11780 = vmatmul.mubr.f32.gmra.mrb[232].mxu0 %v20447_v18  ;;  %v11622_v31 = vpop.f32.mrb[127].mxu0  ;;  %v18304_v16 = vld [vmem:[%s18851_s5] ss:$0 sm:$0xff] }
 0x6a6   : > { %12383 = vtanh.f32 %v7174_v55  ;;  %v6803_v60 = vadd.f32 %v6802_v12, %v6344_v46  ;;  %v11837_v39 = vpop.f32.mrb[123].mxu1  ;;  %11995 = vmatmul.mubr.f32.gmra.mrb[228].mxu1 %v20445_v58  ;;  %11782 = vmatprep.mubr.msk.f32.mxu0 %vm13090_vm0, %v19497_v44 }
 0x6a7   : > { %11997 = vmatprep.mubr.msk.f32.mxu1 %vm13090_vm0, %v19497_v44 }
 0x6a8   : > { %v7175_v49 = vadd.f32 %v18272_v62, %v6803_v60  ;;  %v6361_v10 = vpop.f32.mrb[128].mxu0 }
 0x6a9   : > { %v6808_v56 = vpop.f32.mrb[124].mxu1  ;;  %v6362_v50 = vadd.f32 %v6361_v10, %v17743_v14  ;;  %11783 = vmatmul.mubr.f32.gmra.mrb[234].mxu0 %v20448_v8  ;;  %v11625_v58 = vpop.f32.mrb[129].mxu0 }
 0x6aa   : > { %12385 = vtanh.f32 %v7175_v49  ;;  %v6809_v46 = vadd.f32 %v6808_v56, %v6350_v21  ;;  %v11840_v55 = vpop.f32.mrb[125].mxu1  ;;  %11998 = vmatmul.mubr.f32.gmra.mrb[230].mxu1 %v20446_v57  ;;  %11785 = vmatprep.mubr.msk.f32.mxu0 %vm13090_vm0, %v19497_v44  ;;  %v20449_v49 = vld [vmem:[#allocation188_spill] sm:$0xff] }
 0x6ab   : > { %12000 = vmatprep.mubr.msk.f32.mxu1 %vm13090_vm0, %v19497_v44 }
 0x6ac   : > { %v12382_v12 = vpop.eup %12381  ;;  %v7176_v14 = vadd.f32 %v18272_v62, %v6809_v46  ;;  %v6367_v21 = vpop.f32.mrb[130].mxu0 }
 0x6ad   : > { %v6814_v60 = vpop.f32.mrb[126].mxu1  ;;  %v7306_v39 = vmul.f32 %v12382_v12, %v18304_v16  ;;  %v6368_v57 = vadd.f32 %v6367_v21, %v17753_v2  ;;  %11786 = vmatmul.mubr.f32.gmra.mrb[236].mxu0 %v20449_v49  ;;  %v11628_v56 = vpop.f32.mrb[131].mxu0 }
 0x6ae   : > { %12387 = vtanh.f32 %v7176_v14  ;;  %v6815_v31 = vadd.f32 %v6814_v60, %v6356_v13  ;;  %v11843_v10 = vpop.f32.mrb[127].mxu1  ;;  %12001 = vmatmul.mubr.f32.gmra.mrb[232].mxu1 %v20447_v18  ;;  %11788 = vmatprep.mubr.msk.f32.mxu0 %vm13090_vm0, %v19497_v44  ;;  %v20450_v18 = vld [vmem:[#allocation190_spill] sm:$0xff] }
 0x6af   : > { %7369 = vadd.xlane.f32.xlu0 %v7306_v39  ;;  %12003 = vmatprep.mubr.msk.f32.mxu1 %vm13090_vm0, %v19497_v44 }
 0x6b0   : > { %v12384_v55 = vpop.eup %12383  ;;  %v7177_v46 = vadd.f32 %v18272_v62, %v6815_v31  ;;  %v6373_v58 = vpop.f32.mrb[132].mxu0 }
 0x6b1   : > { %v6820_v12 = vpop.f32.mrb[128].mxu1  ;;  %v7307_v2 = vmul.f32 %v12384_v55, %v18304_v16  ;;  %v6374_v13 = vadd.f32 %v6373_v58, %v17763_v5  ;;  %11789 = vmatmul.mubr.f32.gmra.mrb[238].mxu0 %v20450_v18  ;;  %v11631_v60 = vpop.f32.mrb[133].mxu0 }
 0x6b2   : > { %12389 = vtanh.f32 %v7177_v46  ;;  %v6821_v14 = vadd.f32 %v6820_v12, %v6362_v50  ;;  %v11846_v21 = vpop.f32.mrb[129].mxu1  ;;  %12004 = vmatmul.mubr.f32.gmra.mrb[234].mxu1 %v20448_v8  ;;  %11791 = vmatprep.mubr.msk.f32.mxu0 %vm13090_vm0, %v19497_v44  ;;  %v20451_v8 = vld [vmem:[#allocation191_spill] sm:$0xff] }
 0x6b3   : > { %7371 = vadd.xlane.f32.xlu0 %v7307_v2  ;;  %12006 = vmatprep.mubr.msk.f32.mxu1 %vm13090_vm0, %v19497_v44 }
 0x6b4   : > { %v12386_v39 = vpop.eup %12385  ;;  %v7178_v31 = vadd.f32 %v18272_v62, %v6821_v14  ;;  %v6379_v10 = vpop.f32.mrb[134].mxu0 }
 0x6b5   : > { %v6826_v56 = vpop.f32.mrb[130].mxu1  ;;  %v7308_v5 = vmul.f32 %v12386_v39, %v18304_v16  ;;  %v6380_v50 = vadd.f32 %v6379_v10, %v17773_v32  ;;  %11792 = vmatmul.mubr.f32.gmra.mrb[240].mxu0 %v20451_v8  ;;  %v11634_v58 = vpop.f32.mrb[135].mxu0 }
 0x6b6   : > { %12391 = vtanh.f32 %v7178_v31  ;;  %v6827_v55 = vadd.f32 %v6826_v56, %v6368_v57  ;;  %v11849_v46 = vpop.f32.mrb[131].mxu1  ;;  %12007 = vmatmul.mubr.f32.gmra.mrb[236].mxu1 %v20449_v49  ;;  %11794 = vmatprep.mubr.msk.f32.mxu0 %vm13090_vm0, %v19497_v44  ;;  %v20452_v49 = vld [vmem:[#allocation42_spill] sm:$0xff] }
 0x6b7   : > { %7373 = vadd.xlane.f32.xlu1 %v7308_v5  ;;  %12009 = vmatprep.mubr.msk.f32.mxu1 %vm13090_vm0, %v19497_v44 }
 0x6b8   : > { %v12388_v12 = vpop.eup %12387  ;;  %v7179_v2 = vadd.f32 %v18272_v62, %v6827_v55  ;;  %v6385_v14 = vpop.f32.mrb[136].mxu0 }
 0x6b9   : > { %v6832_v21 = vpop.f32.mrb[132].mxu1  ;;  %v7309_v32 = vmul.f32 %v12388_v12, %v18304_v16  ;;  %v6386_v57 = vadd.f32 %v6385_v14, %v17783_v11  ;;  %11795 = vmatmul.mubr.f32.gmra.mrb[242].mxu0 %v20452_v49  ;;  %v11637_v31 = vpop.f32.mrb[137].mxu0 }
 0x6ba   : > { %12393 = vtanh.f32 %v7179_v2  ;;  %v6833_v60 = vadd.f32 %v6832_v21, %v6374_v13  ;;  %v11852_v39 = vpop.f32.mrb[133].mxu1  ;;  %12010 = vmatmul.mubr.f32.gmra.mrb[238].mxu1 %v20450_v18 }
 0x6bb   : > { %7375 = vadd.xlane.f32.xlu1 %v7309_v32  ;;  %12012 = vmatprep.mubr.msk.f32.mxu1 %vm13090_vm0, %v19497_v44 }
 0x6bc   : > { %v12390_v10 = vpop.eup %12389  ;;  %v7180_v56 = vadd.f32 %v18272_v62, %v6833_v60  ;;  %v6391_v5 = vpop.f32.mrb[138].mxu0 }
 0x6bd   : > { %v6838_v55 = vpop.f32.mrb[134].mxu1  ;;  %v7310_v46 = vmul.f32 %v12390_v10, %v18304_v16  ;;  %v6392_v11 = vadd.f32 %v6391_v5, %v17793_v37  ;;  %v11640_v18 = vpop.f32.mrb[139].mxu0 }
 0x6be   : > { %12395 = vtanh.f32 %v7180_v56  ;;  %v6839_v13 = vadd.f32 %v6838_v55, %v6380_v50  ;;  %v11855_v58 = vpop.f32.mrb[135].mxu1  ;;  %12013 = vmatmul.mubr.f32.gmra.mrb[240].mxu1 %v20451_v8 }
 0x6bf   : > { %7377 = vadd.xlane.f32.xlu0 %v7310_v46  ;;  %12015 = vmatprep.mubr.msk.f32.mxu1 %vm13090_vm0, %v19497_v44 }
 0x6c0   : > { %v12392_v12 = vpop.eup %12391  ;;  %v7181_v2 = vadd.f32 %v18272_v62, %v6839_v13  ;;  %v6397_v14 = vpop.f32.mrb[140].mxu0 }
 0x6c1   : > { %v6844_v21 = vpop.f32.mrb[136].mxu1  ;;  %v7311_v32 = vmul.f32 %v12392_v12, %v18304_v16  ;;  %v6398_v60 = vadd.f32 %v6397_v14, %v17802_v59  ;;  %v11643_v8 = vpop.f32.mrb[141].mxu0 }
 0x6c2   : > { %12397 = vtanh.f32 %v7181_v2  ;;  %v6845_v37 = vadd.f32 %v6844_v21, %v6386_v57  ;;  %v11858_v50 = vpop.f32.mrb[137].mxu1  ;;  %12016 = vmatmul.mubr.f32.gmra.mrb[242].mxu1 %v20452_v49 }
 0x6c3   : > { %7379 = vadd.xlane.f32.xlu1 %v7311_v32 }
 0x6c4   : > { %v12394_v39 = vpop.eup %12393  ;;  %v7182_v31 = vadd.f32 %v18272_v62, %v6845_v37  ;;  %v6403_v44 = vpop.f32.mrb[142].mxu0 }
 0x6c5   : > { %v6850_v10 = vpop.f32.mrb[138].mxu1  ;;  %v7312_v56 = vmul.f32 %v12394_v39, %v18304_v16  ;;  %v6404_v5 = vadd.f32 %v6403_v44, %v17811_v0  ;;  %v11646_v13 = vpop.f32.mrb[143].mxu0 }
 0x6c6   : > { %12399 = vtanh.f32 %v7182_v31  ;;  %v6851_v55 = vadd.f32 %v6850_v10, %v6392_v11  ;;  %v11861_v46 = vpop.f32.mrb[139].mxu1 }
 0x6c7   : > { %7381 = vadd.xlane.f32.xlu0 %v7312_v56 }
 0x6c8   : > { %v12396_v59 = vpop.eup %12395  ;;  %v7183_v57 = vadd.f32 %v18272_v62, %v6851_v55  ;;  %v6409_v49 = vpop.f32.mrb[144].mxu0 }
 0x6c9   : > { %v6856_v58 = vpop.f32.mrb[140].mxu1  ;;  %v7313_v18 = vmul.f32 %v12396_v59, %v18304_v16  ;;  %v6410_v12 = vadd.f32 %v6409_v49, %v17820_v42  ;;  %v11649_v21 = vpop.f32.mrb[145].mxu0 }
 0x6ca   : > { %12401 = vtanh.f32 %v7183_v57  ;;  %v6857_v2 = vadd.f32 %v6856_v58, %v6398_v60  ;;  %v11864_v14 = vpop.f32.mrb[141].mxu1 }
 0x6cb   : > { %7383 = vadd.xlane.f32.xlu1 %v7313_v18 }
 0x6cc   : > { %v12398_v32 = vpop.eup %12397  ;;  %v7184_v0 = vadd.f32 %v18272_v62, %v6857_v2  ;;  %v6415_v11 = vpop.f32.mrb[146].mxu0 }
 0x6cd   : > { %v6862_v37 = vpop.f32.mrb[142].mxu1  ;;  %v7314_v50 = vmul.f32 %v12398_v32, %v18304_v16  ;;  %v6416_v8 = vadd.f32 %v6415_v11, %v17829_v54  ;;  %v11652_v44 = vpop.f32.mrb[147].mxu0 }
 0x6ce   : > { %12403 = vtanh.f32 %v7184_v0  ;;  %v6863_v39 = vadd.f32 %v6862_v37, %v6404_v5  ;;  %v11867_v31 = vpop.f32.mrb[143].mxu1 }
 0x6cf   : > { %7385 = vadd.xlane.f32.xlu0 %v7314_v50 }
 0x6d0   : > { %v12400_v10 = vpop.eup %12399  ;;  %v7185_v42 = vadd.f32 %v18272_v62, %v6863_v39  ;;  %v6421_v60 = vpop.f32.mrb[148].mxu0 }
 0x6d1   : > { %v6868_v56 = vpop.f32.mrb[144].mxu1  ;;  %v7315_v55 = vmul.f32 %v12400_v10, %v18304_v16  ;;  %v6422_v46 = vadd.f32 %v6421_v60, %v17838_v34  ;;  %v11655_v57 = vpop.f32.mrb[149].mxu0 }
 0x6d2   : > { %12405 = vtanh.f32 %v7185_v42  ;;  %v6869_v13 = vadd.f32 %v6868_v56, %v6410_v12  ;;  %v11870_v59 = vpop.f32.mrb[145].mxu1 }
 0x6d3   : > { %7387 = vadd.xlane.f32.xlu1 %v7315_v55 }
 0x6d4   : > { %v12402_v49 = vpop.eup %12401  ;;  %v7186_v54 = vadd.f32 %v18272_v62, %v6869_v13  ;;  %v6427_v5 = vpop.f32.mrb[150].mxu0 }
 0x6d5   : > { %v6874_v58 = vpop.f32.mrb[146].mxu1  ;;  %v7316_v18 = vmul.f32 %v12402_v49, %v18304_v16  ;;  %v6428_v2 = vadd.f32 %v6427_v5, %v17847_v29  ;;  %v11658_v32 = vpop.f32.mrb[151].mxu0 }
 0x6d6   : > { %12407 = vtanh.f32 %v7186_v54  ;;  %v6875_v14 = vadd.f32 %v6874_v58, %v6416_v8  ;;  %v11873_v21 = vpop.f32.mrb[147].mxu1 }
 0x6d7   : > { %7389 = vadd.xlane.f32.xlu0 %v7316_v18 }
 0x6d8   : > { %v12404_v0 = vpop.eup %12403  ;;  %v7187_v34 = vadd.f32 %v18272_v62, %v6875_v14  ;;  %v6433_v12 = vpop.f32.mrb[152].mxu0 }
 0x6d9   : > { %v6880_v11 = vpop.f32.mrb[148].mxu1  ;;  %v7317_v37 = vmul.f32 %v12404_v0, %v18304_v16  ;;  %v6434_v50 = vadd.f32 %v6433_v12, %v17856_v51  ;;  %v11661_v44 = vpop.f32.mrb[153].mxu0 }
 0x6da   : > { %12409 = vtanh.f32 %v7187_v34  ;;  %v6881_v39 = vadd.f32 %v6880_v11, %v6422_v46  ;;  %v11876_v31 = vpop.f32.mrb[149].mxu1 }
 0x6db   : > { %7391 = vadd.xlane.f32.xlu1 %v7317_v37 }
 0x6dc   : > { %v12406_v10 = vpop.eup %12405  ;;  %v7188_v29 = vadd.f32 %v18272_v62, %v6881_v39  ;;  %v6439_v8 = vpop.f32.mrb[154].mxu0 }
 0x6dd   : > { %v6886_v42 = vpop.f32.mrb[150].mxu1  ;;  %v7318_v60 = vmul.f32 %v12406_v10, %v18304_v16  ;;  %v6440_v56 = vadd.f32 %v6439_v8, %v17865_v7  ;;  %v11664_v59 = vpop.f32.mrb[155].mxu0 }
 0x6de   : > { %12411 = vtanh.f32 %v7188_v29  ;;  %v6887_v55 = vadd.f32 %v6886_v42, %v6428_v2  ;;  %v11879_v13 = vpop.f32.mrb[151].mxu1 }
 0x6df   : > { %7393 = vadd.xlane.f32.xlu0 %v7318_v60 }
 0x6e0   : > { %v12408_v57 = vpop.eup %12407  ;;  %v7189_v51 = vadd.f32 %v18272_v62, %v6887_v55  ;;  %v6445_v46 = vpop.f32.mrb[156].mxu0 }
 0x6e1   : > { %v6892_v49 = vpop.f32.mrb[152].mxu1  ;;  %v7319_v54 = vmul.f32 %v12408_v57, %v18304_v16  ;;  %v6446_v5 = vadd.f32 %v6445_v46, %v17874_v9  ;;  %v11667_v14 = vpop.f32.mrb[157].mxu0 }
 0x6e2   : > { %12413 = vtanh.f32 %v7189_v51  ;;  %v6893_v58 = vadd.f32 %v6892_v49, %v6434_v50  ;;  %v11882_v18 = vpop.f32.mrb[153].mxu1 }
 0x6e3   : > { %7395 = vadd.xlane.f32.xlu1 %v7319_v54 }
 0x6e4   : > { %v12410_v21 = vpop.eup %12409  ;;  %v7190_v7 = vadd.f32 %v18272_v62, %v6893_v58  ;;  %v6451_v2 = vpop.f32.mrb[158].mxu0 }
 0x6e5   : > { %v6898_v32 = vpop.f32.mrb[154].mxu1  ;;  %v7320_v0 = vmul.f32 %v12410_v21, %v18304_v16  ;;  %v6452_v34 = vadd.f32 %v6451_v2, %v17883_v52  ;;  %v11670_v37 = vpop.f32.mrb[159].mxu0 }
 0x6e6   : > { %12415 = vtanh.f32 %v7190_v7  ;;  %v6899_v12 = vadd.f32 %v6898_v32, %v6440_v56  ;;  %v11885_v11 = vpop.f32.mrb[155].mxu1 }
 0x6e7   : > { %7397 = vadd.xlane.f32.xlu0 %v7320_v0 }
 0x6e8   : > { %v12412_v39 = vpop.eup %12411  ;;  %v7191_v9 = vadd.f32 %v18272_v62, %v6899_v12  ;;  %v6457_v50 = vpop.f32.mrb[160].mxu0 }
 0x6e9   : > { %v6904_v31 = vpop.f32.mrb[156].mxu1  ;;  %v7321_v44 = vmul.f32 %v12412_v39, %v18304_v16  ;;  %v6458_v10 = vadd.f32 %v6457_v50, %v17892_v33  ;;  %v11673_v42 = vpop.f32.mrb[161].mxu0 }
 0x6ea   : > { %12417 = vtanh.f32 %v7191_v9  ;;  %v6905_v29 = vadd.f32 %v6904_v31, %v6446_v5  ;;  %v11888_v8 = vpop.f32.mrb[157].mxu1 }
 0x6eb   : > { %7399 = vadd.xlane.f32.xlu1 %v7321_v44 }
 0x6ec   : > { %v12414_v60 = vpop.eup %12413  ;;  %v7192_v52 = vadd.f32 %v18272_v62, %v6905_v29  ;;  %v6463_v56 = vpop.f32.mrb[162].mxu0 }
 0x6ed   : > { %v6910_v55 = vpop.f32.mrb[158].mxu1  ;;  %v7322_v13 = vmul.f32 %v12414_v60, %v18304_v16  ;;  %v6464_v59 = vadd.f32 %v6463_v56, %v17901_v53  ;;  %v11676_v46 = vpop.f32.mrb[163].mxu0 }
 0x6ee   : > { %12419 = vtanh.f32 %v7192_v52  ;;  %v6911_v57 = vadd.f32 %v6910_v55, %v6452_v34  ;;  %v11891_v51 = vpop.f32.mrb[159].mxu1 }
 0x6ef   : > { %7401 = vadd.xlane.f32.xlu0 %v7322_v13 }
 0x6f0   : > { %v12416_v49 = vpop.eup %12415  ;;  %v7193_v33 = vadd.f32 %v18272_v62, %v6911_v57  ;;  %v6469_v54 = vpop.f32.mrb[164].mxu0 }
 0x6f1   : > { %v6916_v5 = vpop.f32.mrb[160].mxu1  ;;  %v7323_v58 = vmul.f32 %v12416_v49, %v18304_v16  ;;  %v6470_v18 = vadd.f32 %v6469_v54, %v17910_v22  ;;  %v11679_v7 = vpop.f32.mrb[165].mxu0 }
 0x6f2   : > { %12421 = vtanh.f32 %v7193_v33  ;;  %v6917_v14 = vadd.f32 %v6916_v5, %v6458_v10  ;;  %v11894_v21 = vpop.f32.mrb[161].mxu1 }
 0x6f3   : > { %7403 = vadd.xlane.f32.xlu1 %v7323_v58 }
 0x6f4   : > { %v12418_v2 = vpop.eup %12417  ;;  %v7194_v53 = vadd.f32 %v18272_v62, %v6917_v14  ;;  %v6475_v32 = vpop.f32.mrb[166].mxu0 }
 0x6f5   : > { %v6922_v0 = vpop.f32.mrb[162].mxu1  ;;  %v7324_v34 = vmul.f32 %v12418_v2, %v18304_v16  ;;  %v6476_v12 = vadd.f32 %v6475_v32, %v17919_v43  ;;  %v11682_v39 = vpop.f32.mrb[167].mxu0 }
 0x6f6   : > { %12423 = vtanh.f32 %v7194_v53  ;;  %v6923_v11 = vadd.f32 %v6922_v0, %v6464_v59  ;;  %v11897_v37 = vpop.f32.mrb[163].mxu1 }
 0x6f7   : > { %7405 = vadd.xlane.f32.xlu0 %v7324_v34 }
 0x6f8   : > { %v12420_v9 = vpop.eup %12419  ;;  %v7195_v22 = vadd.f32 %v18272_v62, %v6923_v11  ;;  %v6481_v50 = vpop.f32.mrb[168].mxu0 }
 0x6f9   : > { %v6928_v31 = vpop.f32.mrb[164].mxu1  ;;  %v7325_v44 = vmul.f32 %v12420_v9, %v18304_v16  ;;  %v6482_v10 = vadd.f32 %v6481_v50, %v17928_v6  ;;  %v11685_v42 = vpop.f32.mrb[169].mxu0 }
 0x6fa   : > { %12425 = vtanh.f32 %v7195_v22  ;;  %v6929_v29 = vadd.f32 %v6928_v31, %v6470_v18  ;;  %v11900_v8 = vpop.f32.mrb[165].mxu1 }
 0x6fb   : > { %7407 = vadd.xlane.f32.xlu1 %v7325_v44 }
 0x6fc   : > { %v12422_v60 = vpop.eup %12421  ;;  %v7196_v43 = vadd.f32 %v18272_v62, %v6929_v29  ;;  %v6487_v52 = vpop.f32.mrb[170].mxu0 }
 0x6fd   : > { %v6934_v56 = vpop.f32.mrb[166].mxu1  ;;  %v7326_v55 = vmul.f32 %v12422_v60, %v18304_v16  ;;  %v6488_v13 = vadd.f32 %v6487_v52, %v17937_v1  ;;  %v11688_v51 = vpop.f32.mrb[171].mxu0 }
 0x6fe   : > { %12427 = vtanh.f32 %v7196_v43  ;;  %v6935_v59 = vadd.f32 %v6934_v56, %v6476_v12  ;;  %v11903_v57 = vpop.f32.mrb[167].mxu1 }
 0x6ff   : > { %7409 = vadd.xlane.f32.xlu0 %v7326_v55 }
 0x700   : > { %v12424_v46 = vpop.eup %12423  ;;  %v7197_v6 = vadd.f32 %v18272_v62, %v6935_v59  ;;  %v6493_v49 = vpop.f32.mrb[172].mxu0 }
 0x701   : > { %v6940_v33 = vpop.f32.mrb[168].mxu1  ;;  %v7327_v54 = vmul.f32 %v12424_v46, %v18304_v16  ;;  %v6494_v5 = vadd.f32 %v6493_v49, %v17946_v41  ;;  %v11691_v14 = vpop.f32.mrb[173].mxu0 }
 0x702   : > { %12429 = vtanh.f32 %v7197_v6  ;;  %v6941_v58 = vadd.f32 %v6940_v33, %v6482_v10  ;;  %v11906_v18 = vpop.f32.mrb[169].mxu1 }
 0x703   : > { %7411 = vadd.xlane.f32.xlu1 %v7327_v54 }
 0x704   : > { %v12426_v21 = vpop.eup %12425  ;;  %v7198_v1 = vadd.f32 %v18272_v62, %v6941_v58  ;;  %v6499_v7 = vpop.f32.mrb[174].mxu0 }
 0x705   : > { %v6946_v2 = vpop.f32.mrb[170].mxu1  ;;  %v7328_v53 = vmul.f32 %v12426_v21, %v18304_v16  ;;  %v6500_v32 = vadd.f32 %v6499_v7, %v17955_v3  ;;  %v11694_v12 = vpop.f32.mrb[175].mxu0 }
 0x706   : > { %12431 = vtanh.f32 %v7198_v1  ;;  %v6947_v0 = vadd.f32 %v6946_v2, %v6488_v13  ;;  %v11909_v34 = vpop.f32.mrb[171].mxu1 }
 0x707   : > { %7413 = vadd.xlane.f32.xlu0 %v7328_v53 }
 0x708   : > { %v12428_v11 = vpop.eup %12427  ;;  %v7199_v41 = vadd.f32 %v18272_v62, %v6947_v0  ;;  %v6505_v37 = vpop.f32.mrb[176].mxu0 }
 0x709   : > { %v6952_v39 = vpop.f32.mrb[172].mxu1  ;;  %v7329_v9 = vmul.f32 %v12428_v11, %v18304_v16  ;;  %v6506_v22 = vadd.f32 %v6505_v37, %v17964_v28  ;;  %v11697_v44 = vpop.f32.mrb[177].mxu0 }
 0x70a   : > { %12433 = vtanh.f32 %v7199_v41  ;;  %v6953_v50 = vadd.f32 %v6952_v39, %v6494_v5  ;;  %v11912_v31 = vpop.f32.mrb[173].mxu1 }
 0x70b   : > { %7415 = vadd.xlane.f32.xlu1 %v7329_v9 }
 0x70c   : > { %v12430_v10 = vpop.eup %12429  ;;  %v7200_v3 = vadd.f32 %v18272_v62, %v6953_v50  ;;  %v6511_v29 = vpop.f32.mrb[178].mxu0 }
 0x70d   : > { %v6958_v8 = vpop.f32.mrb[174].mxu1  ;;  %v7330_v42 = vmul.f32 %v12430_v10, %v18304_v16  ;;  %v6512_v60 = vadd.f32 %v6511_v29, %v17973_v24  ;;  %v11700_v56 = vpop.f32.mrb[179].mxu0 }
 0x70e   : > { %12435 = vtanh.f32 %v7200_v3  ;;  %v6959_v43 = vadd.f32 %v6958_v8, %v6500_v32  ;;  %v11915_v52 = vpop.f32.mrb[175].mxu1 }
 0x70f   : > { %7417 = vadd.xlane.f32.xlu0 %v7330_v42 }
 0x710   : > { %v12432_v55 = vpop.eup %12431  ;;  %v7201_v28 = vadd.f32 %v18272_v62, %v6959_v43  ;;  %v6517_v13 = vpop.f32.mrb[180].mxu0 }
 0x711   : > { %v6964_v59 = vpop.f32.mrb[176].mxu1  ;;  %v7331_v57 = vmul.f32 %v12432_v55, %v18304_v16  ;;  %v6518_v51 = vadd.f32 %v6517_v13, %v17982_v27  ;;  %v11703_v49 = vpop.f32.mrb[181].mxu0 }
 0x712   : > { %12437 = vtanh.f32 %v7201_v28  ;;  %v6965_v46 = vadd.f32 %v6964_v59, %v6506_v22  ;;  %v11918_v6 = vpop.f32.mrb[177].mxu1 }
 0x713   : > { %7419 = vadd.xlane.f32.xlu1 %v7331_v57 }
 0x714   : > { %v12434_v33 = vpop.eup %12433  ;;  %v7202_v24 = vadd.f32 %v18272_v62, %v6965_v46  ;;  %v6523_v54 = vpop.f32.mrb[182].mxu0 }
 0x715   : > { %v6970_v5 = vpop.f32.mrb[178].mxu1  ;;  %v7332_v58 = vmul.f32 %v12434_v33, %v18304_v16  ;;  %v6524_v18 = vadd.f32 %v6523_v54, %v17991_v61  ;;  %v11706_v1 = vpop.f32.mrb[183].mxu0 }
 0x716   : > { %12439 = vtanh.f32 %v7202_v24  ;;  %v6971_v14 = vadd.f32 %v6970_v5, %v6512_v60  ;;  %v11921_v21 = vpop.f32.mrb[179].mxu1 }
 0x717   : > { %7421 = vadd.xlane.f32.xlu0 %v7332_v58 }
 0x718   : > { %v12436_v7 = vpop.eup %12435  ;;  %v7203_v27 = vadd.f32 %v18272_v62, %v6971_v14  ;;  %v6529_v2 = vpop.f32.mrb[184].mxu0 }
 0x719   : > { %v6976_v53 = vpop.f32.mrb[180].mxu1  ;;  %v7333_v32 = vmul.f32 %v12436_v7, %v18304_v16  ;;  %v6530_v0 = vadd.f32 %v6529_v2, %v18000_v48  ;;  %v11709_v11 = vpop.f32.mrb[185].mxu0 }
 0x71a   : > { %12441 = vtanh.f32 %v7203_v27  ;;  %v6977_v34 = vadd.f32 %v6976_v53, %v6518_v51  ;;  %v11924_v12 = vpop.f32.mrb[181].mxu1 }
 0x71b   : > { %7423 = vadd.xlane.f32.xlu1 %v7333_v32 }
 0x71c   : > { %v12438_v41 = vpop.eup %12437  ;;  %v7204_v61 = vadd.f32 %v18272_v62, %v6977_v34  ;;  %v6535_v37 = vpop.f32.mrb[186].mxu0 }
 0x71d   : > { %v6982_v39 = vpop.f32.mrb[182].mxu1  ;;  %v7334_v9 = vmul.f32 %v12438_v41, %v18304_v16  ;;  %v6536_v22 = vadd.f32 %v6535_v37, %v18009_v35  ;;  %v11712_v44 = vpop.f32.mrb[187].mxu0 }
 0x71e   : > { %12443 = vtanh.f32 %v7204_v61  ;;  %v6983_v50 = vadd.f32 %v6982_v39, %v6524_v18  ;;  %v11927_v31 = vpop.f32.mrb[183].mxu1 }
 0x71f   : > { %7425 = vadd.xlane.f32.xlu0 %v7334_v9 }
 0x720   : > { %v12440_v10 = vpop.eup %12439  ;;  %v7205_v48 = vadd.f32 %v18272_v62, %v6983_v50  ;;  %v6541_v3 = vpop.f32.mrb[188].mxu0 }
 0x721   : > { %v6988_v29 = vpop.f32.mrb[184].mxu1  ;;  %v7335_v8 = vmul.f32 %v12440_v10, %v18304_v16  ;;  %v6542_v42 = vadd.f32 %v6541_v3, %v18018_v63  ;;  %v11715_v52 = vpop.f32.mrb[189].mxu0 }
 0x722   : > { %12445 = vtanh.f32 %v7205_v48  ;;  %v6989_v60 = vadd.f32 %v6988_v29, %v6530_v0  ;;  %v11930_v43 = vpop.f32.mrb[185].mxu1 }
 0x723   : > { %7427 = vadd.xlane.f32.xlu1 %v7335_v8 }
 0x724   : > { %v12442_v56 = vpop.eup %12441  ;;  %v7206_v35 = vadd.f32 %v18272_v62, %v6989_v60  ;;  %v6547_v55 = vpop.f32.mrb[190].mxu0 }
 0x725   : > { %v6994_v28 = vpop.f32.mrb[186].mxu1  ;;  %v7336_v13 = vmul.f32 %v12442_v56, %v18304_v16  ;;  %v6548_v59 = vadd.f32 %v6547_v55, %v18027_v47  ;;  %v11718_v46 = vpop.f32.mrb[191].mxu0 }
 0x726   : > { %12447 = vtanh.f32 %v7206_v35  ;;  %v6995_v57 = vadd.f32 %v6994_v28, %v6536_v22  ;;  %v11933_v51 = vpop.f32.mrb[187].mxu1  ;;  %v18444_v35 = vstv %s7495_s17 }
 0x727   : > { %7429 = vadd.xlane.f32.xlu0 %v7336_v13 }
 0x728   : > { %v12444_v6 = vpop.eup %12443  ;;  %v7207_v63 = vadd.f32 %v18272_v62, %v6995_v57  ;;  %v6553_v49 = vpop.f32.mrb[192].mxu0 }
 0x729   : > { %v7000_v33 = vpop.f32.mrb[188].mxu1  ;;  %v7337_v24 = vmul.f32 %v12444_v6, %v18304_v16  ;;  %v6554_v54 = vadd.f32 %v6553_v49, %v18036_v45  ;;  %v11721_v18 = vpop.f32.mrb[193].mxu0 }
 0x72a   : > { %12449 = vtanh.f32 %v7207_v63  ;;  %v7001_v5 = vadd.f32 %v7000_v33, %v6542_v42  ;;  %v11936_v58 = vpop.f32.mrb[189].mxu1 }
 0x72b   : > { %7431 = vadd.xlane.f32.xlu1 %v7337_v24 }
 0x72c   : > { %v12446_v14 = vpop.eup %12445  ;;  %v7208_v47 = vadd.f32 %v18272_v62, %v7001_v5  ;;  %v6559_v21 = vpop.f32.mrb[194].mxu0 }
 0x72d   : > { %v7006_v1 = vpop.f32.mrb[190].mxu1  ;;  %v7338_v7 = vmul.f32 %v12446_v14, %v18304_v16  ;;  %v6560_v27 = vadd.f32 %v6559_v21, %v18045_v30  ;;  %v11724_v32 = vpop.f32.mrb[195].mxu0  ;;  %v20453_v21 = vld [vmem:[#allocation54_spill] sm:$0xff] }
 0x72e   : > { %12451 = vtanh.f32 %v7208_v47  ;;  %v7007_v2 = vadd.f32 %v7006_v1, %v6548_v59  ;;  %v11939_v53 = vpop.f32.mrb[191].mxu1 }
 0x72f   : > { %7433 = vadd.xlane.f32.xlu0 %v7338_v7 }
 0x730   : > { %v12448_v0 = vpop.eup %12447  ;;  %v7209_v45 = vadd.f32 %v18272_v62, %v7007_v2  ;;  %v6565_v34 = vpop.f32.mrb[196].mxu0 }
 0x731   : > { %v7012_v12 = vpop.f32.mrb[192].mxu1  ;;  %v7339_v11 = vmul.f32 %v12448_v0, %v18304_v16  ;;  %v6566_v41 = vadd.f32 %v6565_v34, %v18054_v23  ;;  %v11727_v39 = vpop.f32.mrb[197].mxu0 }
 0x732   : > { %12453 = vtanh.f32 %v7209_v45  ;;  %v7013_v61 = vadd.f32 %v7012_v12, %v6554_v54  ;;  %v11942_v37 = vpop.f32.mrb[193].mxu1 }
 0x733   : > { %7435 = vadd.xlane.f32.xlu1 %v7339_v11 }
 0x734   : > { %v12450_v30 = vpop.eup %12449  ;;  %v7210_v9 = vadd.f32 %v18272_v62, %v7013_v61  ;;  %v6571_v22 = vpop.f32.mrb[198].mxu0 }
 0x735   : > { %v7018_v50 = vpop.f32.mrb[194].mxu1  ;;  %v7340_v31 = vmul.f32 %v12450_v30, %v18304_v16  ;;  %v6572_v44 = vadd.f32 %v6571_v22, %v18063_v38  ;;  %v11730_v3 = vpop.f32.mrb[199].mxu0 }
 0x736   : > { %12455 = vtanh.f32 %v7210_v9  ;;  %v7019_v10 = vadd.f32 %v7018_v50, %v6560_v27  ;;  %v11945_v48 = vpop.f32.mrb[195].mxu1 }
 0x737   : > { %7437 = vadd.xlane.f32.xlu0 %v7340_v31 }
 0x738   : > { %v12452_v23 = vpop.eup %12451  ;;  %v7211_v29 = vadd.f32 %v18272_v62, %v7019_v10  ;;  %v6577_v8 = vpop.f32.mrb[200].mxu0 }
 0x739   : > { %v7024_v42 = vpop.f32.mrb[196].mxu1  ;;  %v7341_v60 = vmul.f32 %v12452_v23, %v18304_v16  ;;  %v6578_v43 = vadd.f32 %v6577_v8, %v18072_v40  ;;  %v11733_v55 = vpop.f32.mrb[201].mxu0  ;;  %v20455_v23 = vld [vmem:[#allocation112_spill] sm:$0xff] }
 0x73a   : > { %12457 = vtanh.f32 %v7211_v29  ;;  %v7025_v52 = vadd.f32 %v7024_v42, %v6566_v41  ;;  %v11948_v56 = vpop.f32.mrb[197].mxu1  ;;  %v20454_v41 = vld [vmem:[#allocation56_spill] sm:$0xff] }
 0x73b   : > { %7439 = vadd.xlane.f32.xlu1 %v7341_v60 }
 0x73c   : > { %v12454_v38 = vpop.eup %12453  ;;  %v7212_v28 = vadd.f32 %v18272_v62, %v7025_v52  ;;  %v7370_v13 = vpop.xlane.xlu0 %7369 }
 0x73d   : > { %v7497_v59 = vadd.f32 %v18444_v35, %v7370_v13  ;;  %v6583_v57 = vpop.f32.mrb[202].mxu0  ;;  %v7030_v51 = vpop.f32.mrb[198].mxu1  ;;  %v7342_v46 = vmul.f32 %v12454_v38, %v18304_v16 }
 0x73e   : > { %12459 = vtanh.f32 %v7212_v28  ;;  %v6584_v6 = vadd.f32 %v6583_v57, %v18081_v4  ;;  %v7031_v40 = vadd.f32 %v7030_v51, %v6572_v44  ;;  %v11951_v63 = vpop.f32.mrb[199].mxu1  ;;  %v11736_v49 = vpop.f32.mrb[203].mxu0 }
 0x73f   : > { %v8345_v33 = vmul.f32 -1.442695, %v7497_v59  ;;  %7441 = vadd.xlane.f32.xlu0 %v7342_v46  ;;  %v20456_v46 = vld [vmem:[#allocation22_spill] sm:$0xff] }
 0x740   : > { %v12456_v24 = vpop.eup %12455  ;;  %v7213_v54 = vadd.f32 %v18272_v62, %v7031_v40  ;;  %v7372_v5 = vpop.xlane.xlu0 %7371 }
 0x741   : > { %12461 = vpow2.f32 %v8345_v33  ;;  %v7498_v58 = vadd.f32 %v18444_v35, %v7372_v5  ;;  %v6589_v18 = vpop.f32.mrb[204].mxu0  ;;  %v7036_v14 = vpop.f32.mrb[200].mxu1  ;;  %v7343_v47 = vmul.f32 %v12456_v24, %v18304_v16 }
 0x742   : > { %12463 = vtanh.f32 %v7213_v54  ;;  %v6590_v1 = vadd.f32 %v6589_v18, %v20453_v21  ;;  %v7037_v4 = vadd.f32 %v7036_v14, %v6578_v43  ;;  %v11954_v7 = vpop.f32.mrb[201].mxu1  ;;  %v11739_v27 = vpop.f32.mrb[205].mxu0 }
 0x743   : > { %v8346_v2 = vmul.f32 -1.442695, %v7498_v58  ;;  %7443 = vadd.xlane.f32.xlu1 %v7343_v47 }
 0x744   : > { %v12458_v53 = vpop.eup %12457  ;;  %v7214_v32 = vadd.f32 %v18272_v62, %v7037_v4  ;;  %v7374_v0 = vpop.xlane.xlu1 %7373  ;;  %v20457_v4 = vld [vmem:[#allocation23_spill] sm:$0xff] }
 0x745   : > { %12465 = vpow2.f32 %v8346_v2  ;;  %v7499_v45 = vadd.f32 %v18444_v35, %v7374_v0  ;;  %v6595_v34 = vpop.f32.mrb[206].mxu0  ;;  %v7042_v12 = vpop.f32.mrb[202].mxu1  ;;  %v7344_v11 = vmul.f32 %v12458_v53, %v18304_v16 }
 0x746   : > { %12467 = vtanh.f32 %v7214_v32  ;;  %v6596_v61 = vadd.f32 %v6595_v34, %v20454_v41  ;;  %v7043_v37 = vadd.f32 %v7042_v12, %v6584_v6  ;;  %v11957_v39 = vpop.f32.mrb[203].mxu1  ;;  %v11742_v30 = vpop.f32.mrb[207].mxu0  ;;  %v12760_v41 = vld [vmem:[%s13369_s18] sm:$0xff] }
 0x747   : > { %v8347_v9 = vmul.f32 -1.442695, %v7499_v45  ;;  %7445 = vadd.xlane.f32.xlu0 %v7344_v11 }
 0x748   : > { %v12460_v22 = vpop.eup %12459  ;;  %v7215_v50 = vadd.f32 %v18272_v62, %v7043_v37  ;;  %v7376_v31 = vpop.xlane.xlu1 %7375  ;;  %v18465_v62 = vld [vmem:[%s18850_s4] ss:$0 sm:$0xff] }
 0x749   : > { %12469 = vpow2.f32 %v8347_v9  ;;  %v7500_v44 = vadd.f32 %v18444_v35, %v7376_v31  ;;  %v6601_v10 = vpop.f32.mrb[208].mxu0  ;;  %v7048_v48 = vpop.f32.mrb[204].mxu1  ;;  %v7345_v3 = vmul.f32 %v12460_v22, %v18304_v16  ;;  %v18482_v9 = vld [vmem:[%s18851_s5] ss:$0 sm:$0xff] }
 0x74a   : > { %12471 = vtanh.f32 %v7215_v50  ;;  %v6602_v29 = vadd.f32 %v6601_v10, %v20455_v23  ;;  %v7049_v8 = vadd.f32 %v7048_v48, %v6590_v1  ;;  %v11960_v42 = vpop.f32.mrb[205].mxu1  ;;  %v11745_v60 = vpop.f32.mrb[209].mxu0  ;;  %v20458_v50 = vld [vmem:[#allocation61_spill] sm:$0xff] }
 0x74b   : > { %v12462_v43 = vpop.eup %12461  ;;  %v8348_v52 = vmul.f32 -1.442695, %v7500_v44  ;;  %7447 = vadd.xlane.f32.xlu1 %v7345_v3 }
 0x74c   : > { %v12464_v56 = vpop.eup %12463  ;;  %v7749_v55 = vadd.f32 1.0, %v12462_v43  ;;  %v7216_v38 = vadd.f32 %v18465_v62, %v7049_v8  ;;  %v7378_v28 = vpop.xlane.xlu0 %7377 }
 0x74d   : > { %12473 = vpow2.f32 %v8348_v52  ;;  %v7501_v13 = vadd.f32 %v18444_v35, %v7378_v28  ;;  %v6607_v59 = vpop.f32.mrb[210].mxu0  ;;  %v7054_v57 = vpop.f32.mrb[206].mxu1  ;;  %v7346_v51 = vmul.f32 %v12464_v56, %v18304_v16  ;;  %v12763_v52 = vld [vmem:[%s13369_s18 + $0x8] sm:$0xff]  ;;  %v12764_v56 = vld [vmem:[%s13361_s21 + $0x8] sm:$0xff] }
 0x74e   : > { %12475 = vrcp.f32 %v7749_v55  ;;  %v6608_v6 = vadd.f32 %v6607_v59, %v20456_v46  ;;  %v7055_v40 = vadd.f32 %v7054_v57, %v6596_v61  ;;  %v11963_v63 = vpop.f32.mrb[207].mxu1  ;;  %v11748_v49 = vpop.f32.mrb[211].mxu0  ;;  %v12761_v61 = vld [vmem:[%s13361_s21] sm:$0xff]  ;;  %v7939_v55 = vsub.f32 %v12764_v56, %v12763_v52  ;;  %v20459_v57 = vld [vmem:[#allocation62_spill] sm:$0xff] }
 0x74f   : > { %v12466_v33 = vpop.eup %12465  ;;  %12477 = vtanh.f32 %v7216_v38  ;;  %v8349_v24 = vmul.f32 -1.442695, %v7501_v13  ;;  %7449 = vadd.xlane.f32.xlu0 %v7346_v51  ;;  %v7938_v37 = vsub.f32 %v12761_v61, %v12760_v41 }
 0x750   : > { %v12468_v54 = vpop.eup %12467  ;;  %v7750_v5 = vadd.f32 1.0, %v12466_v33  ;;  %v7217_v58 = vadd.f32 %v18465_v62, %v7055_v40  ;;  %v7380_v18 = vpop.xlane.xlu1 %7379 }
 0x751   : > { %12479 = vpow2.f32 %v8349_v24  ;;  %v7502_v14 = vadd.f32 %v18444_v35, %v7380_v18  ;;  %v6613_v47 = vpop.f32.mrb[212].mxu0  ;;  %v7060_v21 = vpop.f32.mrb[208].mxu1  ;;  %v7347_v1 = vmul.f32 %v12468_v54, %v18304_v16 }
 0x752   : > { %12481 = vrcp.f32 %v7750_v5  ;;  %v6614_v7 = vadd.f32 %v6613_v47, %v20457_v4  ;;  %v7061_v27 = vadd.f32 %v7060_v21, %v6602_v29  ;;  %v11966_v2 = vpop.f32.mrb[209].mxu1  ;;  %v11751_v53 = vpop.f32.mrb[213].mxu0  ;;  %v12765_v47 = vld [vmem:[%s13369_s18 + $0x10] sm:$0xff]  ;;  %v12766_v21 = vld [vmem:[%s13361_s21 + $0x10] sm:$0xff] }
 0x753   : > { %v12470_v32 = vpop.eup %12469  ;;  %12483 = vtanh.f32 %v7217_v58  ;;  %v8350_v0 = vmul.f32 -1.442695, %v7502_v14  ;;  %7451 = vadd.xlane.f32.xlu1 %v7347_v1  ;;  %v7940_v1 = vsub.f32 %v12766_v21, %v12765_v47  ;;  %v20460_v53 = vld [vmem:[#allocation64_spill] sm:$0xff] }
 0x754   : > { %v12472_v45 = vpop.eup %12471  ;;  %v7751_v34 = vadd.f32 1.0, %v12470_v32  ;;  %v7218_v12 = vadd.f32 %v18465_v62, %v7061_v27  ;;  %v7382_v11 = vpop.xlane.xlu0 %7381 }
 0x755   : > { %12485 = vpow2.f32 %v8350_v0  ;;  %v7503_v16 = vadd.f32 %v18444_v35, %v7382_v11  ;;  %v6619_v39 = vpop.f32.mrb[214].mxu0  ;;  %v7066_v30 = vpop.f32.mrb[210].mxu1  ;;  %v7348_v22 = vmul.f32 %v18482_v9, %v12472_v45 }
 0x756   : > { %12487 = vrcp.f32 %v7751_v34  ;;  %v6620_v31 = vadd.f32 %v6619_v39, %v20458_v50  ;;  %v7067_v44 = vadd.f32 %v7066_v30, %v6608_v6  ;;  %v11969_v10 = vpop.f32.mrb[211].mxu1  ;;  %v11754_v48 = vpop.f32.mrb[215].mxu0  ;;  %v12767_v50 = vld [vmem:[%s13369_s18 + $0x18] sm:$0xff] }
 0x757   : > { %v12474_v3 = vpop.eup %12473  ;;  %12489 = vtanh.f32 %v7218_v12  ;;  %v8351_v23 = vmul.f32 -1.442695, %v7503_v16  ;;  %7453 = vadd.xlane.f32.xlu0 %v7348_v22 }
 0x758   : > { %v12476_v29 = vpop.eup %12475  ;;  %v7752_v8 = vadd.f32 1.0, %v12474_v3  ;;  %v7219_v42 = vadd.f32 %v18465_v62, %v7067_v44  ;;  %v7384_v60 = vpop.xlane.xlu1 %7383  ;;  %v12768_v44 = vld [vmem:[%s13361_s21 + $0x18] sm:$0xff] }
 0x759   : > { %v12478_v43 = vpop.eup %12477  ;;  %v8001_v38 = vmul.f32 %v12476_v29, %v7938_v37  ;;  %12491 = vpow2.f32 %v8351_v23  ;;  %v7504_v28 = vadd.f32 %v18444_v35, %v7384_v60  ;;  %v6625_v13 = vpop.f32.mrb[216].mxu0  ;;  %v7941_v10 = vsub.f32 %v12768_v44, %v12767_v50  ;;  %v20461_v29 = vld [vmem:[#allocation67_spill] sm:$0xff] }
 0x75a   : > { %v7072_v59 = vpop.f32.mrb[212].mxu1  ;;  %12493 = vrcp.f32 %v7752_v8  ;;  %v6626_v51 = vadd.f32 %v6625_v13, %v20459_v57  ;;  %v7349_v40 = vmul.f32 %v18482_v9, %v12478_v43  ;;  %v11757_v63 = vpop.f32.mrb[217].mxu0 }
 0x75b   : > { %v7073_v46 = vadd.f32 %v7072_v59, %v6614_v7  ;;  %v11972_v6 = vpop.f32.mrb[213].mxu1  ;;  %v12480_v49 = vpop.eup %12479  ;;  %v8064_v33 = vadd.f32 %v12760_v41, %v8001_v38  ;;  %12495 = vtanh.f32 %v7219_v42  ;;  %v8352_v24 = vmul.f32 -1.442695, %v7504_v28 }
 0x75c   : > { %v12482_v54 = vpop.eup %12481  ;;  %v7753_v5 = vadd.f32 1.0, %v12480_v49  ;;  %7455 = vadd.xlane.f32.xlu1 %v7349_v40  ;;  %v7386_v18 = vpop.xlane.xlu0 %7385  ;;  %v12769_v6 = vld [vmem:[%s13369_s18 + $0x20] sm:$0xff]  ;;  %v12770_v40 = vld [vmem:[%s13361_s21 + $0x20] sm:$0xff] }
 0x75d   : > { %v7220_v58 = vadd.f32 %v18465_v62, %v7073_v46  ;;  %v12484_v14 = vpop.eup %12483  ;;  %8127 = vst [vmem:[%s18496_s23] sm:$0xff] %v8064_v33  ;;  %v8002_v4 = vmul.f32 %v12482_v54, %v7939_v55  ;;  %12497 = vpow2.f32 %v8352_v24  ;;  %v7505_v7 = vadd.f32 %v18444_v35, %v7386_v18  ;;  %v6631_v27 = vpop.f32.mrb[218].mxu0  ;;  %v20462_v54 = vld [vmem:[#allocation69_spill] sm:$0xff] }
 0x75e   : > { %v7078_v2 = vpop.f32.mrb[214].mxu1  ;;  %12499 = vrcp.f32 %v7753_v5  ;;  %v6632_v32 = vadd.f32 %v6631_v27, %v20460_v53  ;;  %v7350_v34 = vmul.f32 %v18482_v9, %v12484_v14  ;;  %v11760_v12 = vpop.f32.mrb[219].mxu0  ;;  %v7942_v63 = vsub.f32 %v12770_v40, %v12769_v6 }
 0x75f   : > { %v7079_v0 = vadd.f32 %v7078_v2, %v6620_v31  ;;  %v11975_v45 = vpop.f32.mrb[215].mxu1  ;;  %v12486_v11 = vpop.eup %12485  ;;  %v8065_v41 = vadd.f32 %v12763_v52, %v8002_v4  ;;  %12501 = vtanh.f32 %v7220_v58  ;;  %v8353_v61 = vmul.f32 -1.442695, %v7505_v7 }
 0x760   : > { %v12488_v37 = vpop.eup %12487  ;;  %v7754_v16 = vadd.f32 1.0, %v12486_v11  ;;  %7457 = vadd.xlane.f32.xlu0 %v7350_v34  ;;  %v7388_v30 = vpop.xlane.xlu1 %7387  ;;  %v12771_v45 = vld [vmem:[%s13369_s18 + $0x28] sm:$0xff]  ;;  %v12772_v34 = vld [vmem:[%s13361_s21 + $0x28] sm:$0xff] }
 0x761   : > { %v7221_v39 = vadd.f32 %v18465_v62, %v7079_v0  ;;  %v12490_v22 = vpop.eup %12489  ;;  %8128 = vst [vmem:[%s18496_s23 + $0x8] sm:$0xff] %v8065_v41  ;;  %v8003_v31 = vmul.f32 %v12488_v37, %v7940_v1  ;;  %12503 = vpow2.f32 %v8353_v61  ;;  %v7506_v48 = vadd.f32 %v18444_v35, %v7388_v30  ;;  %v6637_v3 = vpop.f32.mrb[220].mxu0  ;;  %v20463_v37 = vld [vmem:[#allocation82_spill] sm:$0xff] }
 0x762   : > { %v7084_v23 = vpop.f32.mrb[216].mxu1  ;;  %12505 = vrcp.f32 %v7754_v16  ;;  %v6638_v8 = vadd.f32 %v6637_v3, %v20461_v29  ;;  %v7351_v43 = vmul.f32 %v18482_v9, %v12490_v22  ;;  %v11763_v52 = vpop.f32.mrb[221].mxu0  ;;  %v7943_v12 = vsub.f32 %v12772_v34, %v12771_v45 }
 0x763   : > { %v7085_v42 = vadd.f32 %v7084_v23, %v6626_v51  ;;  %v11978_v60 = vpop.f32.mrb[217].mxu1  ;;  %v12492_v56 = vpop.eup %12491  ;;  %v8066_v55 = vadd.f32 %v12765_v47, %v8003_v31  ;;  %12507 = vtanh.f32 %v7221_v39  ;;  %v8354_v38 = vmul.f32 -1.442695, %v7506_v48 }
 0x764   : > { %v12494_v28 = vpop.eup %12493  ;;  %v7755_v13 = vadd.f32 1.0, %v12492_v56  ;;  %7459 = vadd.xlane.f32.xlu1 %v7351_v43  ;;  %v7390_v57 = vpop.xlane.xlu0 %7389  ;;  %v12773_v60 = vld [vmem:[%s13369_s18 + $0x30] sm:$0xff]  ;;  %v12774_v43 = vld [vmem:[%s13361_s21 + $0x30] sm:$0xff] }
 0x765   : > { %v7222_v59 = vadd.f32 %v18465_v62, %v7085_v42  ;;  %v12496_v46 = vpop.eup %12495  ;;  %8129 = vst [vmem:[%s18496_s23 + $0x10] sm:$0xff] %v8066_v55  ;;  %v8004_v51 = vmul.f32 %v12494_v28, %v7941_v10  ;;  %12509 = vpow2.f32 %v8354_v38  ;;  %v7507_v49 = vadd.f32 %v18444_v35, %v7390_v57  ;;  %v6643_v33 = vpop.f32.mrb[222].mxu0  ;;  %v20464_v28 = vld [vmem:[#allocation70_spill] sm:$0xff] }
 0x766   : > { %v7090_v24 = vpop.f32.mrb[218].mxu1  ;;  %12511 = vrcp.f32 %v7755_v13  ;;  %v6644_v5 = vadd.f32 %v6643_v33, %v20462_v54  ;;  %v7352_v14 = vmul.f32 %v18482_v9, %v12496_v46  ;;  %v11766_v47 = vpop.f32.mrb[223].mxu0  ;;  %v7944_v52 = vsub.f32 %v12774_v43, %v12773_v60 }
 0x767   : > { %v7091_v58 = vadd.f32 %v7090_v24, %v6632_v32  ;;  %v11981_v18 = vpop.f32.mrb[219].mxu1  ;;  %v12498_v21 = vpop.eup %12497  ;;  %v8067_v1 = vadd.f32 %v12767_v50, %v8004_v51  ;;  %12513 = vtanh.f32 %v7222_v59  ;;  %v8355_v4 = vmul.f32 -1.442695, %v7507_v49 }
 0x768   : > { %v12500_v7 = vpop.eup %12499  ;;  %v7756_v27 = vadd.f32 1.0, %v12498_v21  ;;  %7461 = vadd.xlane.f32.xlu0 %v7352_v14  ;;  %v7392_v53 = vpop.xlane.xlu1 %7391  ;;  %v12775_v18 = vld [vmem:[%s13369_s18 + $0x38] sm:$0xff]  ;;  %v12776_v14 = vld [vmem:[%s13361_s21 + $0x38] sm:$0xff] }
 0x769   : > { %v7223_v2 = vadd.f32 %v18465_v62, %v7091_v58  ;;  %v12502_v0 = vpop.eup %12501  ;;  %8130 = vst [vmem:[%s18496_s23 + $0x18] sm:$0xff] %v8067_v1  ;;  %v8005_v32 = vmul.f32 %v12500_v7, %v7942_v63  ;;  %12515 = vpow2.f32 %v8355_v4  ;;  %v7508_v11 = vadd.f32 %v18444_v35, %v7392_v53  ;;  %v6649_v41 = vpop.f32.mrb[224].mxu0  ;;  %v20465_v7 = vld [vmem:[#allocation92_spill] sm:$0xff] }
 0x76a   : > { %v7096_v61 = vpop.f32.mrb[220].mxu1  ;;  %12517 = vrcp.f32 %v7756_v27  ;;  %v6650_v16 = vadd.f32 %v6649_v41, %v20463_v37  ;;  %v7353_v22 = vmul.f32 %v18482_v9, %v12502_v0  ;;  %v11769_v50 = vpop.f32.mrb[225].mxu0  ;;  %v7945_v47 = vsub.f32 %v12776_v14, %v12775_v18 }
 0x76b   : > { %v7097_v39 = vadd.f32 %v7096_v61, %v6638_v8  ;;  %v11984_v30 = vpop.f32.mrb[221].mxu1  ;;  %v12504_v44 = vpop.eup %12503  ;;  %v8068_v10 = vadd.f32 %v12769_v6, %v8005_v32  ;;  %12519 = vtanh.f32 %v7223_v2  ;;  %v8356_v31 = vmul.f32 -1.442695, %v7508_v11 }
 0x76c   : > { %v12506_v48 = vpop.eup %12505  ;;  %v7757_v3 = vadd.f32 1.0, %v12504_v44  ;;  %7463 = vadd.xlane.f32.xlu1 %v7353_v22  ;;  %v7394_v29 = vpop.xlane.xlu0 %7393  ;;  %v12777_v30 = vld [vmem:[%s13369_s18 + $0x40] sm:$0xff]  ;;  %v12778_v22 = vld [vmem:[%s13361_s21 + $0x40] sm:$0xff] }
 0x76d   : > { %v7224_v23 = vadd.f32 %v18465_v62, %v7097_v39  ;;  %v12508_v42 = vpop.eup %12507  ;;  %8131 = vst [vmem:[%s18496_s23 + $0x20] sm:$0xff] %v8068_v10  ;;  %v8006_v8 = vmul.f32 %v12506_v48, %v7943_v12  ;;  %12521 = vpow2.f32 %v8356_v31  ;;  %v7509_v56 = vadd.f32 %v18444_v35, %v7394_v29  ;;  %v6655_v55 = vpop.f32.mrb[226].mxu0 }
 0x76e   : > { %v7102_v38 = vpop.f32.mrb[222].mxu1  ;;  %12523 = vrcp.f32 %v7757_v3  ;;  %v6656_v13 = vadd.f32 %v6655_v55, %v20464_v28  ;;  %v7354_v46 = vmul.f32 %v18482_v9, %v12508_v42  ;;  %v11772_v6 = vpop.f32.mrb[227].mxu0  ;;  %v7946_v50 = vsub.f32 %v12778_v22, %v12777_v30 }
 0x76f   : > { %v7103_v59 = vadd.f32 %v7102_v38, %v6644_v5  ;;  %v11987_v57 = vpop.f32.mrb[223].mxu1  ;;  %v12510_v40 = vpop.eup %12509  ;;  %v8069_v63 = vadd.f32 %v12771_v45, %v8006_v8  ;;  %12525 = vtanh.f32 %v7224_v23  ;;  %v8357_v51 = vmul.f32 -1.442695, %v7509_v56 }
 0x770   : > { %v12512_v49 = vpop.eup %12511  ;;  %v7758_v33 = vadd.f32 1.0, %v12510_v40  ;;  %7465 = vadd.xlane.f32.xlu0 %v7354_v46  ;;  %v7396_v54 = vpop.xlane.xlu1 %7395 }
 0x771   : > { %v7225_v24 = vadd.f32 %v18465_v62, %v7103_v59  ;;  %v12514_v58 = vpop.eup %12513  ;;  %8132 = vst [vmem:[%s18496_s23 + $0x28] sm:$0xff] %v8069_v63  ;;  %v8007_v5 = vmul.f32 %v12512_v49, %v7944_v52  ;;  %12527 = vpow2.f32 %v8357_v51  ;;  %v7510_v21 = vadd.f32 %v18444_v35, %v7396_v54  ;;  %v6661_v1 = vpop.f32.mrb[228].mxu0  ;;  %v12779_v59 = vld [vmem:[%s13369_s18 + $0x48] sm:$0xff] }
 0x772   : > { %v7108_v4 = vpop.f32.mrb[224].mxu1  ;;  %12529 = vrcp.f32 %v7758_v33  ;;  %v6662_v27 = vadd.f32 %v6661_v1, %v20465_v7  ;;  %v7355_v0 = vmul.f32 %v18482_v9, %v12514_v58  ;;  %v11775_v45 = vpop.f32.mrb[229].mxu0 }
 0x773   : > { %v7109_v2 = vadd.f32 %v7108_v4, %v6650_v16  ;;  %v11990_v53 = vpop.f32.mrb[225].mxu1  ;;  %v12516_v34 = vpop.eup %12515  ;;  %v8070_v12 = vadd.f32 %v12773_v60, %v8007_v5  ;;  %12531 = vtanh.f32 %v7225_v24  ;;  %v8358_v32 = vmul.f32 -1.442695, %v7510_v21  ;;  %v12781_v4 = vld [vmem:[%s13369_s18 + $0x50] sm:$0xff] }
 0x774   : > { %v12518_v11 = vpop.eup %12517  ;;  %v7759_v41 = vadd.f32 1.0, %v12516_v34  ;;  %7467 = vadd.xlane.f32.xlu1 %v7355_v0  ;;  %v7398_v37 = vpop.xlane.xlu0 %7397 }
 0x775   : > { %v7226_v61 = vadd.f32 %v18465_v62, %v7109_v2  ;;  %v12520_v39 = vpop.eup %12519  ;;  %8133 = vst [vmem:[%s18496_s23 + $0x30] sm:$0xff] %v8070_v12  ;;  %v8008_v16 = vmul.f32 %v12518_v11, %v7945_v47  ;;  %12533 = vpow2.f32 %v8358_v32  ;;  %v7511_v44 = vadd.f32 %v18444_v35, %v7398_v37  ;;  %v6667_v10 = vpop.f32.mrb[230].mxu0 }
 0x776   : > { %v7114_v31 = vpop.f32.mrb[226].mxu1  ;;  %12535 = vrcp.f32 %v7759_v41  ;;  %v6668_v48 = vadd.f32 %v6667_v10, %v18207_v25  ;;  %v7356_v29 = vmul.f32 %v18482_v9, %v12520_v39  ;;  %v11778_v42 = vpop.f32.mrb[231].mxu0  ;;  %v12780_v25 = vld [vmem:[%s13361_s21 + $0x48] sm:$0xff] }
 0x777   : > { %v7115_v3 = vadd.f32 %v7114_v31, %v6656_v13  ;;  %v11993_v23 = vpop.f32.mrb[227].mxu1  ;;  %v12522_v60 = vpop.eup %12521  ;;  %v8071_v43 = vadd.f32 %v12775_v18, %v8008_v16  ;;  %12537 = vtanh.f32 %v7226_v61  ;;  %v8359_v52 = vmul.f32 -1.442695, %v7511_v44  ;;  %v12783_v44 = vld [vmem:[%s13369_s18 + $0x58] sm:$0xff] }
 0x778   : > { %v12524_v8 = vpop.eup %12523  ;;  %v7760_v56 = vadd.f32 1.0, %v12522_v60  ;;  %7469 = vadd.xlane.f32.xlu0 %v7356_v29  ;;  %v7400_v38 = vpop.xlane.xlu1 %7399  ;;  %v7947_v57 = vsub.f32 %v12780_v25, %v12779_v59 }
 0x779   : > { %v7227_v55 = vadd.f32 %v18465_v62, %v7115_v3  ;;  %v12526_v28 = vpop.eup %12525  ;;  %8134 = vst [vmem:[%s18496_s23 + $0x38] sm:$0xff] %v8071_v43  ;;  %v8009_v13 = vmul.f32 %v12524_v8, %v7946_v50  ;;  %12539 = vpow2.f32 %v8359_v52  ;;  %v7512_v46 = vadd.f32 %v18444_v35, %v7400_v38  ;;  %v6673_v6 = vpop.f32.mrb[232].mxu0 }
 0x77a   : > { %v7120_v40 = vpop.f32.mrb[228].mxu1  ;;  %12541 = vrcp.f32 %v7760_v56  ;;  %v6674_v63 = vadd.f32 %v6673_v6, %v18216_v36  ;;  %v7357_v33 = vmul.f32 %v18482_v9, %v12526_v28  ;;  %v11781_v24 = vpop.f32.mrb[233].mxu0  ;;  %v12782_v36 = vld [vmem:[%s13361_s21 + $0x50] sm:$0xff] }
 0x77b   : > { %v7121_v51 = vadd.f32 %v7120_v40, %v6662_v27  ;;  %v11996_v49 = vpop.f32.mrb[229].mxu1  ;;  %v12528_v54 = vpop.eup %12527  ;;  %v8072_v58 = vadd.f32 %v12777_v30, %v8009_v13  ;;  %12543 = vtanh.f32 %v7227_v55  ;;  %v8360_v18 = vmul.f32 -1.442695, %v7512_v46  ;;  %v12785_v13 = vld [vmem:[%s13369_s18 + $0x60] sm:$0xff] }
 0x77c   : > { %v12530_v14 = vpop.eup %12529  ;;  %v7761_v47 = vadd.f32 1.0, %v12528_v54  ;;  %7471 = vadd.xlane.f32.xlu1 %v7357_v33  ;;  %v7402_v21 = vpop.xlane.xlu0 %7401  ;;  %v7948_v7 = vsub.f32 %v12782_v36, %v12781_v4 }
 0x77d   : > { %v7228_v5 = vadd.f32 %v18465_v62, %v7121_v51  ;;  %v12532_v1 = vpop.eup %12531  ;;  %8135 = vst [vmem:[%s18496_s23 + $0x40] sm:$0xff] %v8072_v58  ;;  %v8010_v27 = vmul.f32 %v12530_v14, %v7947_v57  ;;  %12545 = vpow2.f32 %v8360_v18  ;;  %v7513_v2 = vadd.f32 %v18444_v35, %v7402_v21  ;;  %v6679_v53 = vpop.f32.mrb[234].mxu0 }
 0x77e   : > { %v7126_v0 = vpop.f32.mrb[230].mxu1  ;;  %12547 = vrcp.f32 %v7761_v47  ;;  %v6680_v45 = vadd.f32 %v6679_v53, %v18225_v26  ;;  %v7358_v32 = vmul.f32 %v18482_v9, %v12532_v1  ;;  %v11784_v11 = vpop.f32.mrb[235].mxu0  ;;  %v12784_v26 = vld [vmem:[%s13361_s21 + $0x58] sm:$0xff] }
 0x77f   : > { %v7127_v34 = vadd.f32 %v7126_v0, %v6668_v48  ;;  %v11999_v12 = vpop.f32.mrb[231].mxu1  ;;  %v12534_v41 = vpop.eup %12533  ;;  %v8073_v61 = vadd.f32 %v12779_v59, %v8010_v27  ;;  %12549 = vtanh.f32 %v7228_v5  ;;  %v8361_v37 = vmul.f32 -1.442695, %v7513_v2 }
 0x780   : > { %v12536_v39 = vpop.eup %12535  ;;  %v7762_v30 = vadd.f32 1.0, %v12534_v41  ;;  %7473 = vadd.xlane.f32.xlu0 %v7358_v32  ;;  %v7404_v50 = vpop.xlane.xlu1 %7403  ;;  %v7949_v10 = vsub.f32 %v12784_v26, %v12783_v44  ;;  %v12789_v26 = vld [vmem:[%s13369_s18 + $0x70] sm:$0xff] }
 0x781   : > { %v7229_v22 = vadd.f32 %v18465_v62, %v7127_v34  ;;  %v12538_v16 = vpop.eup %12537  ;;  %8136 = vst [vmem:[%s18496_s23 + $0x48] sm:$0xff] %v8073_v61  ;;  %v8011_v31 = vmul.f32 %v12536_v39, %v7948_v7  ;;  %12551 = vpow2.f32 %v8361_v37  ;;  %v7514_v48 = vadd.f32 %v18444_v35, %v7404_v50  ;;  %v6685_v3 = vpop.f32.mrb[236].mxu0  ;;  %v12787_v7 = vld [vmem:[%s13369_s18 + $0x68] sm:$0xff] }
 0x782   : > { %v7132_v23 = vpop.f32.mrb[232].mxu1  ;;  %12553 = vrcp.f32 %v7762_v30  ;;  %v6686_v29 = vadd.f32 %v6685_v3, %v18234_v20  ;;  %v7359_v43 = vmul.f32 %v18482_v9, %v12538_v16  ;;  %v11787_v52 = vpop.f32.mrb[237].mxu0  ;;  %v12786_v20 = vld [vmem:[%s13361_s21 + $0x60] sm:$0xff] }
 0x783   : > { %v7133_v42 = vadd.f32 %v7132_v23, %v6674_v63  ;;  %v12002_v60 = vpop.f32.mrb[233].mxu1  ;;  %v12540_v8 = vpop.eup %12539  ;;  %v8074_v56 = vadd.f32 %v12781_v4, %v8011_v31  ;;  %12555 = vtanh.f32 %v7229_v22  ;;  %v8362_v55 = vmul.f32 -1.442695, %v7514_v48 }
 0x784   : > { %v12542_v38 = vpop.eup %12541  ;;  %v7763_v28 = vadd.f32 1.0, %v12540_v8  ;;  %7475 = vadd.xlane.f32.xlu1 %v7359_v43  ;;  %v7406_v25 = vpop.xlane.xlu0 %7405  ;;  %v7950_v46 = vsub.f32 %v12786_v20, %v12785_v13 }
 0x785   : > { %v7230_v59 = vadd.f32 %v18465_v62, %v7133_v42  ;;  %v12544_v57 = vpop.eup %12543  ;;  %8137 = vst [vmem:[%s18496_s23 + $0x50] sm:$0xff] %v8074_v56  ;;  %v8012_v6 = vmul.f32 %v12542_v38, %v7949_v10  ;;  %12557 = vpow2.f32 %v8362_v55  ;;  %v7515_v40 = vadd.f32 %v18444_v35, %v7406_v25  ;;  %v6691_v63 = vpop.f32.mrb[238].mxu0 }
 0x786   : > { %v7138_v51 = vpop.f32.mrb[234].mxu1  ;;  %12559 = vrcp.f32 %v7763_v28  ;;  %v6692_v49 = vadd.f32 %v6691_v63, %v18243_v19  ;;  %v7360_v54 = vmul.f32 %v18482_v9, %v12544_v57  ;;  %v11790_v58 = vpop.f32.mrb[239].mxu0  ;;  %v12788_v19 = vld [vmem:[%s13361_s21 + $0x68] sm:$0xff] }
 0x787   : > { %v7139_v33 = vadd.f32 %v7138_v51, %v6680_v45  ;;  %v12005_v24 = vpop.f32.mrb[235].mxu1  ;;  %v12546_v18 = vpop.eup %12545  ;;  %v8075_v14 = vadd.f32 %v12783_v44, %v8012_v6  ;;  %12561 = vtanh.f32 %v7230_v59  ;;  %v8363_v47 = vmul.f32 -1.442695, %v7515_v40 }
 0x788   : > { %v12548_v5 = vpop.eup %12547  ;;  %v7764_v21 = vadd.f32 1.0, %v12546_v18  ;;  %7477 = vadd.xlane.f32.xlu0 %v7360_v54  ;;  %v7408_v4 = vpop.xlane.xlu1 %7407  ;;  %v7951_v27 = vsub.f32 %v12788_v19, %v12787_v7 }
 0x789   : > { %v7231_v1 = vadd.f32 %v18465_v62, %v7139_v33  ;;  %v12550_v36 = vpop.eup %12549  ;;  %8138 = vst [vmem:[%s18496_s23 + $0x58] sm:$0xff] %v8075_v14  ;;  %v8013_v2 = vmul.f32 %v12548_v5, %v7950_v46  ;;  %12563 = vpow2.f32 %v8363_v47  ;;  %v7516_v53 = vadd.f32 %v18444_v35, %v7408_v4  ;;  %v6697_v0 = vpop.f32.mrb[240].mxu0 }
 0x78a   : > { %v7144_v45 = vpop.f32.mrb[236].mxu1  ;;  %12565 = vrcp.f32 %v7764_v21  ;;  %v6698_v34 = vadd.f32 %v6697_v0, %v18251_v15  ;;  %v7361_v11 = vmul.f32 %v18482_v9, %v12550_v36  ;;  %v11793_v41 = vpop.f32.mrb[241].mxu0  ;;  %v12790_v15 = vld [vmem:[%s13361_s21 + $0x70] sm:$0xff] }
 0x78b   : > { %v7145_v12 = vadd.f32 %v7144_v45, %v6686_v29  ;;  %v12008_v32 = vpop.f32.mrb[237].mxu1  ;;  %v12552_v61 = vpop.eup %12551  ;;  %v8076_v37 = vadd.f32 %v12785_v13, %v8013_v2  ;;  %12567 = vtanh.f32 %v7231_v1  ;;  %v8364_v39 = vmul.f32 -1.442695, %v7516_v53  ;;  %v12791_v13 = vld [vmem:[%s13369_s18 + $0x78] sm:$0xff]  ;;  %v12793_v21 = vld [vmem:[%s13369_s18 + $0x80] sm:$0xff]  ;;  %v12794_v1 = vld [vmem:[%s13361_s21 + $0x80] sm:$0xff] }
 0x78c   : > { %v12554_v30 = vpop.eup %12553  ;;  %v7765_v22 = vadd.f32 1.0, %v12552_v61  ;;  %7479 = vadd.xlane.f32.xlu1 %v7361_v11  ;;  %v7410_v16 = vpop.xlane.xlu0 %7409  ;;  %v7952_v10 = vsub.f32 %v12790_v15, %v12789_v26  ;;  %v7954_v4 = vsub.f32 %v12794_v1, %v12793_v21 }
 0x78d   : > { %v7232_v50 = vadd.f32 %v18465_v62, %v7145_v12  ;;  %v12556_v44 = vpop.eup %12555  ;;  %8139 = vst [vmem:[%s18496_s23 + $0x60] sm:$0xff] %v8076_v37  ;;  %v8014_v31 = vmul.f32 %v12554_v30, %v7951_v27  ;;  %12569 = vpow2.f32 %v8364_v39  ;;  %v7517_v48 = vadd.f32 %v18444_v35, %v7410_v16  ;;  %v6703_v3 = vpop.f32.mrb[242].mxu0  ;;  %v12795_v37 = vld [vmem:[%s13369_s18 + $0x88] sm:$0xff]  ;;  %v12796_v39 = vld [vmem:[%s13361_s21 + $0x88] sm:$0xff] }
 0x78e   : > { %v7150_v23 = vpop.f32.mrb[238].mxu1  ;;  %12571 = vrcp.f32 %v7765_v22  ;;  %v6704_v29 = vadd.f32 %v6703_v3, %v18260_v17  ;;  %v7362_v43 = vmul.f32 %v18482_v9, %v12556_v44  ;;  %v11796_v52 = vpop.f32.mrb[243].mxu0  ;;  %v12792_v17 = vld [vmem:[%s13361_s21 + $0x78] sm:$0xff]  ;;  %v7955_v30 = vsub.f32 %v12796_v39, %v12795_v37  ;;  %v12797_v3 = vld [vmem:[%s13369_s18 + $0x90] sm:$0xff] }
 0x78f   : > { %v7151_v42 = vadd.f32 %v7150_v23, %v6692_v49  ;;  %v12011_v60 = vpop.f32.mrb[239].mxu1  ;;  %v12558_v8 = vpop.eup %12557  ;;  %v8077_v56 = vadd.f32 %v12787_v7, %v8014_v31  ;;  %12573 = vtanh.f32 %v7232_v50  ;;  %v8365_v55 = vmul.f32 -1.442695, %v7517_v48  ;;  %v12798_v23 = vld [vmem:[%s13361_s21 + $0x90] sm:$0xff] }
 0x790   : > { %v12560_v38 = vpop.eup %12559  ;;  %v7766_v28 = vadd.f32 1.0, %v12558_v8  ;;  %7481 = vadd.xlane.f32.xlu0 %v7362_v43  ;;  %v7412_v25 = vpop.xlane.xlu1 %7411  ;;  %v7953_v20 = vsub.f32 %v12792_v17, %v12791_v13 }
 0x791   : > { %v7233_v59 = vadd.f32 %v18465_v62, %v7151_v42  ;;  %v12562_v57 = vpop.eup %12561  ;;  %8140 = vst [vmem:[%s18496_s23 + $0x68] sm:$0xff] %v8077_v56  ;;  %v8015_v46 = vmul.f32 %v12560_v38, %v7952_v10  ;;  %12575 = vpow2.f32 %v8365_v55  ;;  %v7518_v6 = vadd.f32 %v18444_v35, %v7412_v25  ;;  %v7156_v40 = vpop.f32.mrb[240].mxu1  ;;  %v12799_v25 = vld [vmem:[%s13369_s18 + $0x98] sm:$0xff] }
 0x792   : > { %12577 = vrcp.f32 %v7766_v28  ;;  %v7157_v63 = vadd.f32 %v7156_v40, %v6698_v34  ;;  %v12014_v51 = vpop.f32.mrb[241].mxu1  ;;  %v7363_v49 = vmul.f32 %v18482_v9, %v12562_v57  ;;  %v12800_v57 = vld [vmem:[%s13361_s21 + $0x98] sm:$0xff] }
 0x793   : > { %v12564_v33 = vpop.eup %12563  ;;  %v8078_v24 = vadd.f32 %v12789_v26, %v8015_v46  ;;  %12579 = vtanh.f32 %v7233_v59  ;;  %v8366_v54 = vmul.f32 -1.442695, %v7518_v6 }
 0x794   : > { %v12566_v58 = vpop.eup %12565  ;;  %v7767_v18 = vadd.f32 1.0, %v12564_v33  ;;  %v7234_v14 = vadd.f32 %v18465_v62, %v7157_v63  ;;  %7483 = vadd.xlane.f32.xlu1 %v7363_v49  ;;  %v7414_v47 = vpop.xlane.xlu0 %7413 }
 0x795   : > { %v12568_v5 = vpop.eup %12567  ;;  %8141 = vst [vmem:[%s18496_s23 + $0x70] sm:$0xff] %v8078_v24  ;;  %v8016_v36 = vmul.f32 %v12566_v58, %v7953_v20  ;;  %12581 = vpow2.f32 %v8366_v54  ;;  %v7519_v7 = vadd.f32 %v18444_v35, %v7414_v47  ;;  %v7162_v19 = vpop.f32.mrb[242].mxu1  ;;  %v12801_v54 = vld [vmem:[%s13369_s18 + $0xa0] sm:$0xff]  ;;  %v12802_v58 = vld [vmem:[%s13361_s21 + $0xa0] sm:$0xff] }
 0x796   : > { %12583 = vrcp.f32 %v7767_v18  ;;  %v7163_v27 = vadd.f32 %v7162_v19, %v6704_v29  ;;  %v12017_v2 = vpop.f32.mrb[243].mxu1  ;;  %v7364_v53 = vmul.f32 %v18482_v9, %v12568_v5  ;;  %v7956_v29 = vsub.f32 %v12798_v23, %v12797_v3 }
 0x797   : > { %v12570_v0 = vpop.eup %12569  ;;  %v8079_v45 = vadd.f32 %v12791_v13, %v8016_v36  ;;  %12585 = vtanh.f32 %v7234_v14  ;;  %v8367_v34 = vmul.f32 -1.442695, %v7519_v7  ;;  %v7957_v13 = vsub.f32 %v12800_v57, %v12799_v25  ;;  %v12804_v2 = vld [vmem:[%s13361_s21 + $0xa8] sm:$0xff] }
 0x798   : > { %v12572_v12 = vpop.eup %12571  ;;  %v7768_v32 = vadd.f32 1.0, %v12570_v0  ;;  %v7235_v11 = vadd.f32 %v18465_v62, %v7163_v27  ;;  %7485 = vadd.xlane.f32.xlu0 %v7364_v53  ;;  %v7416_v41 = vpop.xlane.xlu1 %7415  ;;  %v7958_v18 = vsub.f32 %v12802_v58, %v12801_v54  ;;  %v12803_v27 = vld [vmem:[%s13369_s18 + $0xa8] sm:$0xff] }
 0x799   : > { %v12574_v61 = vpop.eup %12573  ;;  %8142 = vst [vmem:[%s18496_s23 + $0x78] sm:$0xff] %v8079_v45  ;;  %v8017_v22 = vmul.f32 %v12572_v12, %v7954_v4  ;;  %12587 = vpow2.f32 %v8367_v34  ;;  %v7520_v50 = vadd.f32 %v18444_v35, %v7416_v41  ;;  %v7959_v53 = vsub.f32 %v12804_v2, %v12803_v27 }
 0x79a   : > { %12589 = vrcp.f32 %v7768_v32  ;;  %v7365_v16 = vmul.f32 %v18482_v9, %v12574_v61  ;;  %v12805_v61 = vld [vmem:[%s13369_s18 + $0xb0] sm:$0xff] }
 0x79b   : > { %v12576_v44 = vpop.eup %12575  ;;  %v8080_v26 = vadd.f32 %v12793_v21, %v8017_v22  ;;  %12591 = vtanh.f32 %v7235_v11  ;;  %v8368_v62 = vmul.f32 -1.442695, %v7520_v50 }
 0x79c   : > { %v12578_v15 = vpop.eup %12577  ;;  %v7769_v10 = vadd.f32 1.0, %v12576_v44  ;;  %7487 = vadd.xlane.f32.xlu1 %v7365_v16  ;;  %v7418_v31 = vpop.xlane.xlu0 %7417 }
 0x79d   : > { %v12580_v48 = vpop.eup %12579  ;;  %8143 = vst [vmem:[%s18496_s23 + $0x80] sm:$0xff] %v8080_v26  ;;  %v8018_v42 = vmul.f32 %v12578_v15, %v7955_v30  ;;  %12593 = vpow2.f32 %v8368_v62  ;;  %v7521_v60 = vadd.f32 %v18444_v35, %v7418_v31  ;;  %v12808_v31 = vld [vmem:[%s13361_s21 + $0xb8] sm:$0xff] }
 0x79e   : > { %12595 = vrcp.f32 %v7769_v10  ;;  %v7366_v43 = vmul.f32 %v18482_v9, %v12580_v48  ;;  %v12807_v10 = vld [vmem:[%s13369_s18 + $0xb8] sm:$0xff] }
 0x79f   : > { %v12582_v52 = vpop.eup %12581  ;;  %v8081_v8 = vadd.f32 %v12795_v37, %v8018_v42  ;;  %v8369_v56 = vmul.f32 -1.442695, %v7521_v60  ;;  %v12806_v37 = vld [vmem:[%s13361_s21 + $0xb0] sm:$0xff]  ;;  %v7961_v48 = vsub.f32 %v12808_v31, %v12807_v10 }
 0x7a0   : > { %v12584_v55 = vpop.eup %12583  ;;  %v7770_v38 = vadd.f32 1.0, %v12582_v52  ;;  %7489 = vadd.xlane.f32.xlu0 %v7366_v43  ;;  %v7420_v28 = vpop.xlane.xlu1 %7419  ;;  %v7960_v39 = vsub.f32 %v12806_v37, %v12805_v61 }
 0x7a1   : > { %v12586_v59 = vpop.eup %12585  ;;  %8144 = vst [vmem:[%s18496_s23 + $0x88] sm:$0xff] %v8081_v8  ;;  %v8019_v17 = vmul.f32 %v12584_v55, %v7956_v29  ;;  %12597 = vpow2.f32 %v8369_v56  ;;  %v7522_v20 = vadd.f32 %v18444_v35, %v7420_v28  ;;  %v12809_v56 = vld [vmem:[%s13369_s18 + $0xc0] sm:$0xff]  ;;  %v12810_v55 = vld [vmem:[%s13361_s21 + $0xc0] sm:$0xff] }
 0x7a2   : > { %12599 = vrcp.f32 %v7770_v38  ;;  %v7367_v46 = vmul.f32 %v18482_v9, %v12586_v59  ;;  %v7962_v38 = vsub.f32 %v12810_v55, %v12809_v56 }
 0x7a3   : > { %v12588_v6 = vpop.eup %12587  ;;  %v8082_v40 = vadd.f32 %v12797_v3, %v8019_v17  ;;  %v8370_v63 = vmul.f32 -1.442695, %v7522_v20 }
 0x7a4   : > { %v12590_v51 = vpop.eup %12589  ;;  %v7771_v49 = vadd.f32 1.0, %v12588_v6  ;;  %7491 = vadd.xlane.f32.xlu1 %v7367_v46  ;;  %v7422_v33 = vpop.xlane.xlu0 %7421  ;;  %v12811_v6 = vld [vmem:[%s13369_s18 + $0xc8] sm:$0xff] }
 0x7a5   : > { %v12592_v24 = vpop.eup %12591  ;;  %8145 = vst [vmem:[%s18496_s23 + $0x90] sm:$0xff] %v8082_v40  ;;  %v8020_v14 = vmul.f32 %v12590_v51, %v7957_v13  ;;  %12601 = vpow2.f32 %v8370_v63  ;;  %v7523_v47 = vadd.f32 %v18444_v35, %v7422_v33  ;;  %v12812_v40 = vld [vmem:[%s13361_s21 + $0xc8] sm:$0xff] }
 0x7a6   : > { %12603 = vrcp.f32 %v7771_v49  ;;  %v7368_v5 = vmul.f32 %v18482_v9, %v12592_v24  ;;  %v7963_v63 = vsub.f32 %v12812_v40, %v12811_v6 }
 0x7a7   : > { %v12594_v21 = vpop.eup %12593  ;;  %v8083_v1 = vadd.f32 %v12799_v25, %v8020_v14  ;;  %v8371_v4 = vmul.f32 -1.442695, %v7523_v47  ;;  %v12813_v47 = vld [vmem:[%s13369_s18 + $0xd0] sm:$0xff] }
 0x7a8   : > { %v12596_v36 = vpop.eup %12595  ;;  %v7772_v7 = vadd.f32 1.0, %v12594_v21  ;;  %7493 = vadd.xlane.f32.xlu0 %v7368_v5  ;;  %v7424_v19 = vpop.xlane.xlu1 %7423  ;;  %v12814_v5 = vld [vmem:[%s13361_s21 + $0xd0] sm:$0xff] }
 0x7a9   : > { %8146 = vst [vmem:[%s18496_s23 + $0x98] sm:$0xff] %v8083_v1  ;;  %v8021_v0 = vmul.f32 %v12596_v36, %v7958_v18  ;;  %12605 = vpow2.f32 %v8371_v4  ;;  %v7524_v45 = vadd.f32 %v18444_v35, %v7424_v19  ;;  %v7964_v21 = vsub.f32 %v12814_v5, %v12813_v47 }
 0x7aa   : > { %12607 = vrcp.f32 %v7772_v7 }
 0x7ab   : > { %v12598_v9 = vpop.eup %12597  ;;  %v8084_v34 = vadd.f32 %v12801_v54, %v8021_v0  ;;  %v8372_v12 = vmul.f32 -1.442695, %v7524_v45  ;;  %v12815_v0 = vld [vmem:[%s13369_s18 + $0xd8] sm:$0xff]  ;;  %v12816_v45 = vld [vmem:[%s13361_s21 + $0xd8] sm:$0xff] }
 0x7ac   : > { %v12600_v32 = vpop.eup %12599  ;;  %v7773_v11 = vadd.f32 1.0, %v12598_v9  ;;  %v7426_v41 = vpop.xlane.xlu0 %7425  ;;  %v7965_v9 = vsub.f32 %v12816_v45, %v12815_v0 }
 0x7ad   : > { %8147 = vst [vmem:[%s18496_s23 + $0xa0] sm:$0xff] %v8084_v34  ;;  %v8022_v30 = vmul.f32 %v12600_v32, %v7959_v53  ;;  %12609 = vpow2.f32 %v8372_v12  ;;  %v7525_v22 = vadd.f32 %v18444_v35, %v7426_v41 }
 0x7ae   : > { %12611 = vrcp.f32 %v7773_v11 }
 0x7af   : > { %v12602_v50 = vpop.eup %12601  ;;  %v8085_v16 = vadd.f32 %v12803_v27, %v8022_v30  ;;  %v8373_v44 = vmul.f32 -1.442695, %v7525_v22  ;;  %v12817_v30 = vld [vmem:[%s13369_s18 + $0xe0] sm:$0xff]  ;;  %v12818_v22 = vld [vmem:[%s13361_s21 + $0xe0] sm:$0xff] }
 0x7b0   : > { %v12604_v26 = vpop.eup %12603  ;;  %v7774_v62 = vadd.f32 1.0, %v12602_v50  ;;  %v7428_v15 = vpop.xlane.xlu1 %7427  ;;  %v7966_v50 = vsub.f32 %v12818_v22, %v12817_v30 }
 0x7b1   : > { %8148 = vst [vmem:[%s18496_s23 + $0xa8] sm:$0xff] %v8085_v16  ;;  %v8023_v3 = vmul.f32 %v12604_v26, %v7960_v39  ;;  %12613 = vpow2.f32 %v8373_v44  ;;  %v7526_v23 = vadd.f32 %v18444_v35, %v7428_v15 }
 0x7b2   : > { %12615 = vrcp.f32 %v7774_v62 }
 0x7b3   : > { %v12606_v29 = vpop.eup %12605  ;;  %v8086_v42 = vadd.f32 %v12805_v61, %v8023_v3  ;;  %v8374_v60 = vmul.f32 -1.442695, %v7526_v23  ;;  %v12819_v3 = vld [vmem:[%s13369_s18 + $0xe8] sm:$0xff]  ;;  %v12820_v23 = vld [vmem:[%s13361_s21 + $0xe8] sm:$0xff] }
 0x7b4   : > { %v12608_v43 = vpop.eup %12607  ;;  %v7775_v52 = vadd.f32 1.0, %v12606_v29  ;;  %v7430_v8 = vpop.xlane.xlu0 %7429  ;;  %v7967_v29 = vsub.f32 %v12820_v23, %v12819_v3 }
 0x7b5   : > { %8149 = vst [vmem:[%s18496_s23 + $0xb0] sm:$0xff] %v8086_v42  ;;  %v8024_v28 = vmul.f32 %v12608_v43, %v7961_v48  ;;  %12617 = vpow2.f32 %v8374_v60  ;;  %v7527_v59 = vadd.f32 %v18444_v35, %v7430_v8 }
 0x7b6   : > { %12619 = vrcp.f32 %v7775_v52 }
 0x7b7   : > { %v12610_v25 = vpop.eup %12609  ;;  %v8087_v57 = vadd.f32 %v12807_v10, %v8024_v28  ;;  %v8375_v13 = vmul.f32 -1.442695, %v7527_v59  ;;  %v12821_v28 = vld [vmem:[%s13369_s18 + $0xf0] sm:$0xff]  ;;  %v12822_v59 = vld [vmem:[%s13361_s21 + $0xf0] sm:$0xff] }
 0x7b8   : > { %v12612_v17 = vpop.eup %12611  ;;  %v7776_v20 = vadd.f32 1.0, %v12610_v25  ;;  %v7432_v46 = vpop.xlane.xlu1 %7431  ;;  %v7968_v25 = vsub.f32 %v12822_v59, %v12821_v28 }
 0x7b9   : > { %8150 = vst [vmem:[%s18496_s23 + $0xb8] sm:$0xff] %v8087_v57  ;;  %v8025_v51 = vmul.f32 %v12612_v17, %v7962_v38  ;;  %12621 = vpow2.f32 %v8375_v13  ;;  %v7528_v49 = vadd.f32 %v18444_v35, %v7432_v46 }
 0x7ba   : > { %12623 = vrcp.f32 %v7776_v20 }
 0x7bb   : > { %v12614_v33 = vpop.eup %12613  ;;  %v8088_v24 = vadd.f32 %v12809_v56, %v8025_v51  ;;  %v8376_v54 = vmul.f32 -1.442695, %v7528_v49  ;;  %v12823_v51 = vld [vmem:[%s13369_s18 + $0xf8] sm:$0xff]  ;;  %v12824_v49 = vld [vmem:[%s13361_s21 + $0xf8] sm:$0xff] }
 0x7bc   : > { %v12616_v58 = vpop.eup %12615  ;;  %v7777_v18 = vadd.f32 1.0, %v12614_v33  ;;  %v7434_v14 = vpop.xlane.xlu0 %7433  ;;  %v7969_v33 = vsub.f32 %v12824_v49, %v12823_v51 }
 0x7bd   : > { %8151 = vst [vmem:[%s18496_s23 + $0xc0] sm:$0xff] %v8088_v24  ;;  %v8026_v1 = vmul.f32 %v12616_v58, %v7963_v63  ;;  %12625 = vpow2.f32 %v8376_v54  ;;  %v7529_v4 = vadd.f32 %v18444_v35, %v7434_v14 }
 0x7be   : > { %12627 = vrcp.f32 %v7777_v18 }
 0x7bf   : > { %v12618_v36 = vpop.eup %12617  ;;  %v8089_v7 = vadd.f32 %v12811_v6, %v8026_v1  ;;  %v8377_v19 = vmul.f32 -1.442695, %v7529_v4  ;;  %v12825_v1 = vld [vmem:[%s13369_s18 + $0x100] sm:$0xff]  ;;  %v12826_v4 = vld [vmem:[%s13361_s21 + $0x100] sm:$0xff] }
 0x7c0   : > { %v12620_v27 = vpop.eup %12619  ;;  %v7778_v2 = vadd.f32 1.0, %v12618_v36  ;;  %v7436_v53 = vpop.xlane.xlu1 %7435  ;;  %v7970_v36 = vsub.f32 %v12826_v4, %v12825_v1 }
 0x7c1   : > { %8152 = vst [vmem:[%s18496_s23 + $0xc8] sm:$0xff] %v8089_v7  ;;  %v8027_v34 = vmul.f32 %v12620_v27, %v7964_v21  ;;  %12629 = vpow2.f32 %v8377_v19  ;;  %v7530_v12 = vadd.f32 %v18444_v35, %v7436_v53 }
 0x7c2   : > { %12631 = vrcp.f32 %v7778_v2 }
 0x7c3   : > { %v12622_v32 = vpop.eup %12621  ;;  %v8090_v11 = vadd.f32 %v12813_v47, %v8027_v34  ;;  %v8378_v41 = vmul.f32 -1.442695, %v7530_v12  ;;  %v12827_v34 = vld [vmem:[%s13369_s18 + $0x108] sm:$0xff]  ;;  %v12828_v12 = vld [vmem:[%s13361_s21 + $0x108] sm:$0xff] }
 0x7c4   : > { %v12624_v61 = vpop.eup %12623  ;;  %v7779_v37 = vadd.f32 1.0, %v12622_v32  ;;  %v7438_v39 = vpop.xlane.xlu0 %7437  ;;  %v7971_v32 = vsub.f32 %v12828_v12, %v12827_v34 }
 0x7c5   : > { %8153 = vst [vmem:[%s18496_s23 + $0xd0] sm:$0xff] %v8090_v11  ;;  %v8028_v16 = vmul.f32 %v12624_v61, %v7965_v9  ;;  %12633 = vpow2.f32 %v8378_v41  ;;  %v7531_v44 = vadd.f32 %v18444_v35, %v7438_v39 }
 0x7c6   : > { %12635 = vrcp.f32 %v7779_v37 }
 0x7c7   : > { %v12626_v26 = vpop.eup %12625  ;;  %v8091_v62 = vadd.f32 %v12815_v0, %v8028_v16  ;;  %v8379_v15 = vmul.f32 -1.442695, %v7531_v44  ;;  %v12829_v16 = vld [vmem:[%s13369_s18 + $0x110] sm:$0xff]  ;;  %v12830_v44 = vld [vmem:[%s13361_s21 + $0x110] sm:$0xff] }
 0x7c8   : > { %v12628_v10 = vpop.eup %12627  ;;  %v7780_v31 = vadd.f32 1.0, %v12626_v26  ;;  %v7440_v48 = vpop.xlane.xlu1 %7439  ;;  %v7972_v26 = vsub.f32 %v12830_v44, %v12829_v16 }
 0x7c9   : > { %8154 = vst [vmem:[%s18496_s23 + $0xd8] sm:$0xff] %v8091_v62  ;;  %v8029_v42 = vmul.f32 %v12628_v10, %v7966_v50  ;;  %12637 = vpow2.f32 %v8379_v15  ;;  %v7532_v60 = vadd.f32 %v18444_v35, %v7440_v48 }
 0x7ca   : > { %12639 = vrcp.f32 %v7780_v31 }
 0x7cb   : > { %v12630_v43 = vpop.eup %12629  ;;  %v8092_v52 = vadd.f32 %v12817_v30, %v8029_v42  ;;  %v8380_v8 = vmul.f32 -1.442695, %v7532_v60  ;;  %v12831_v42 = vld [vmem:[%s13369_s18 + $0x118] sm:$0xff]  ;;  %v12832_v60 = vld [vmem:[%s13361_s21 + $0x118] sm:$0xff] }
 0x7cc   : > { %v12632_v56 = vpop.eup %12631  ;;  %v7781_v55 = vadd.f32 1.0, %v12630_v43  ;;  %v7442_v38 = vpop.xlane.xlu0 %7441  ;;  %v7973_v43 = vsub.f32 %v12832_v60, %v12831_v42  ;;  %v12843_v60 = vld [vmem:[%s13369_s18 + $0x148] sm:$0xff] }
 0x7cd   : > { %8155 = vst [vmem:[%s18496_s23 + $0xe0] sm:$0xff] %v8092_v52  ;;  %v8030_v57 = vmul.f32 %v12632_v56, %v7967_v29  ;;  %12641 = vpow2.f32 %v8380_v8  ;;  %v7533_v13 = vadd.f32 %v18444_v35, %v7442_v38 }
 0x7ce   : > { %12643 = vrcp.f32 %v7781_v55 }
 0x7cf   : > { %v12634_v17 = vpop.eup %12633  ;;  %v8093_v20 = vadd.f32 %v12819_v3, %v8030_v57  ;;  %v8381_v46 = vmul.f32 -1.442695, %v7533_v13  ;;  %v12833_v57 = vld [vmem:[%s13369_s18 + $0x120] sm:$0xff]  ;;  %v12834_v13 = vld [vmem:[%s13361_s21 + $0x120] sm:$0xff] }
 0x7d0   : > { %v12636_v6 = vpop.eup %12635  ;;  %v7782_v40 = vadd.f32 1.0, %v12634_v17  ;;  %v7444_v63 = vpop.xlane.xlu1 %7443  ;;  %v7974_v17 = vsub.f32 %v12834_v13, %v12833_v57  ;;  %v12845_v13 = vld [vmem:[%s13369_s18 + $0x150] sm:$0xff] }
 0x7d1   : > { %8156 = vst [vmem:[%s18496_s23 + $0xe8] sm:$0xff] %v8093_v20  ;;  %v8031_v24 = vmul.f32 %v12636_v6, %v7968_v25  ;;  %12645 = vpow2.f32 %v8381_v46  ;;  %v7534_v54 = vadd.f32 %v18444_v35, %v7444_v63 }
 0x7d2   : > { %12647 = vrcp.f32 %v7782_v40 }
 0x7d3   : > { %v12638_v58 = vpop.eup %12637  ;;  %v8094_v18 = vadd.f32 %v12821_v28, %v8031_v24  ;;  %v8382_v14 = vmul.f32 -1.442695, %v7534_v54  ;;  %v12836_v24 = vld [vmem:[%s13361_s21 + $0x128] sm:$0xff] }
 0x7d4   : > { %v12640_v47 = vpop.eup %12639  ;;  %v7783_v5 = vadd.f32 1.0, %v12638_v58  ;;  %v7446_v21 = vpop.xlane.xlu0 %7445 }
 0x7d5   : > { %8157 = vst [vmem:[%s18496_s23 + $0xf0] sm:$0xff] %v8094_v18  ;;  %v8032_v7 = vmul.f32 %v12640_v47, %v7969_v33  ;;  %12649 = vpow2.f32 %v8382_v14  ;;  %v7535_v19 = vadd.f32 %v18444_v35, %v7446_v21  ;;  %v12835_v33 = vld [vmem:[%s13369_s18 + $0x128] sm:$0xff] }
 0x7d6   : > { %12651 = vrcp.f32 %v7783_v5  ;;  %v7975_v54 = vsub.f32 %v12836_v24, %v12835_v33 }
 0x7d7   : > { %v12642_v27 = vpop.eup %12641  ;;  %v8095_v2 = vadd.f32 %v12823_v51, %v8032_v7  ;;  %v8383_v53 = vmul.f32 -1.442695, %v7535_v19  ;;  %v12838_v7 = vld [vmem:[%s13361_s21 + $0x130] sm:$0xff] }
 0x7d8   : > { %v12644_v0 = vpop.eup %12643  ;;  %v7784_v45 = vadd.f32 1.0, %v12642_v27  ;;  %v7448_v9 = vpop.xlane.xlu1 %7447 }
 0x7d9   : > { %8158 = vst [vmem:[%s18496_s23 + $0xf8] sm:$0xff] %v8095_v2  ;;  %v8033_v11 = vmul.f32 %v12644_v0, %v7970_v36  ;;  %12653 = vpow2.f32 %v8383_v53  ;;  %v7536_v41 = vadd.f32 %v18444_v35, %v7448_v9  ;;  %v12837_v36 = vld [vmem:[%s13369_s18 + $0x130] sm:$0xff] }
 0x7da   : > { %12655 = vrcp.f32 %v7784_v45  ;;  %v7976_v19 = vsub.f32 %v12838_v7, %v12837_v36 }
 0x7db   : > { %v12646_v61 = vpop.eup %12645  ;;  %v8096_v37 = vadd.f32 %v12825_v1, %v8033_v11  ;;  %v8384_v39 = vmul.f32 -1.442695, %v7536_v41  ;;  %v12840_v11 = vld [vmem:[%s13361_s21 + $0x138] sm:$0xff] }
 0x7dc   : > { %v12648_v30 = vpop.eup %12647  ;;  %v7785_v22 = vadd.f32 1.0, %v12646_v61  ;;  %v7450_v50 = vpop.xlane.xlu0 %7449 }
 0x7dd   : > { %8159 = vst [vmem:[%s18496_s23 + $0x100] sm:$0xff] %v8096_v37  ;;  %v8034_v62 = vmul.f32 %v12648_v30, %v7971_v32  ;;  %12657 = vpow2.f32 %v8384_v39  ;;  %v7537_v15 = vadd.f32 %v18444_v35, %v7450_v50  ;;  %v12839_v32 = vld [vmem:[%s13369_s18 + $0x138] sm:$0xff] }
 0x7de   : > { %12659 = vrcp.f32 %v7785_v22  ;;  %v7977_v41 = vsub.f32 %v12840_v11, %v12839_v32 }
 0x7df   : > { %v12650_v10 = vpop.eup %12649  ;;  %v8097_v31 = vadd.f32 %v12827_v34, %v8034_v62  ;;  %v8385_v48 = vmul.f32 -1.442695, %v7537_v15  ;;  %v12842_v62 = vld [vmem:[%s13361_s21 + $0x140] sm:$0xff] }
 0x7e0   : > { %v12652_v3 = vpop.eup %12651  ;;  %v7786_v23 = vadd.f32 1.0, %v12650_v10  ;;  %v7452_v29 = vpop.xlane.xlu1 %7451 }
 0x7e1   : > { %8160 = vst [vmem:[%s18496_s23 + $0x108] sm:$0xff] %v8097_v31  ;;  %v8035_v52 = vmul.f32 %v12652_v3, %v7972_v26  ;;  %12661 = vpow2.f32 %v8385_v48  ;;  %v7538_v8 = vadd.f32 %v18444_v35, %v7452_v29  ;;  %v12841_v26 = vld [vmem:[%s13369_s18 + $0x140] sm:$0xff] }
 0x7e2   : > { %12663 = vrcp.f32 %v7786_v23  ;;  %v7978_v15 = vsub.f32 %v12842_v62, %v12841_v26 }
 0x7e3   : > { %v12654_v56 = vpop.eup %12653  ;;  %v8098_v55 = vadd.f32 %v12829_v16, %v8035_v52  ;;  %v8386_v38 = vmul.f32 -1.442695, %v7538_v8 }
 0x7e4   : > { %v12656_v28 = vpop.eup %12655  ;;  %v7787_v59 = vadd.f32 1.0, %v12654_v56  ;;  %v7454_v25 = vpop.xlane.xlu0 %7453 }
 0x7e5   : > { %8161 = vst [vmem:[%s18496_s23 + $0x110] sm:$0xff] %v8098_v55  ;;  %v8036_v20 = vmul.f32 %v12656_v28, %v7973_v43  ;;  %12665 = vpow2.f32 %v8386_v38  ;;  %v7539_v46 = vadd.f32 %v18444_v35, %v7454_v25  ;;  %v12844_v43 = vld [vmem:[%s13361_s21 + $0x148] sm:$0xff] }
 0x7e6   : > { %12667 = vrcp.f32 %v7787_v59  ;;  %v7979_v52 = vsub.f32 %v12844_v43, %v12843_v60 }
 0x7e7   : > { %v12658_v6 = vpop.eup %12657  ;;  %v8099_v40 = vadd.f32 %v12831_v42, %v8036_v20  ;;  %v8387_v63 = vmul.f32 -1.442695, %v7539_v46 }
 0x7e8   : > { %v12660_v51 = vpop.eup %12659  ;;  %v7788_v49 = vadd.f32 1.0, %v12658_v6 }
 0x7e9   : > { %8162 = vst [vmem:[%s18496_s23 + $0x118] sm:$0xff] %v8099_v40  ;;  %v8037_v58 = vmul.f32 %v12660_v51, %v7974_v17  ;;  %12669 = vpow2.f32 %v8387_v63  ;;  %v7456_v18 = vpop.xlane.xlu1 %7455  ;;  %v12846_v17 = vld [vmem:[%s13361_s21 + $0x150] sm:$0xff] }
 0x7ea   : > { %12671 = vrcp.f32 %v7788_v49  ;;  %v7540_v14 = vadd.f32 %v18444_v35, %v7456_v18  ;;  %v7980_v20 = vsub.f32 %v12846_v17, %v12845_v13 }
 0x7eb   : > { %v12662_v47 = vpop.eup %12661  ;;  %v8100_v5 = vadd.f32 %v12833_v57, %v8037_v58 }
 0x7ec   : > { %v12664_v21 = vpop.eup %12663  ;;  %v7789_v1 = vadd.f32 1.0, %v12662_v47  ;;  %v8388_v4 = vmul.f32 -1.442695, %v7540_v14  ;;  %v12847_v47 = vld [vmem:[%s13369_s18 + $0x158] sm:$0xff] }
 0x7ed   : > { %8163 = vst [vmem:[%s18496_s23 + $0x120] sm:$0xff] %v8100_v5  ;;  %v8038_v27 = vmul.f32 %v12664_v21, %v7975_v54  ;;  %v7458_v2 = vpop.xlane.xlu0 %7457  ;;  %v12848_v5 = vld [vmem:[%s13361_s21 + $0x158] sm:$0xff] }
 0x7ee   : > { %12673 = vrcp.f32 %v7789_v1  ;;  %v7541_v53 = vadd.f32 %v18444_v35, %v7458_v2  ;;  %v7981_v21 = vsub.f32 %v12848_v5, %v12847_v47  ;;  %v12859_v5 = vld [vmem:[%s13369_s18 + $0x188] sm:$0xff] }
 0x7ef   : > { %v12666_v0 = vpop.eup %12665  ;;  %v8101_v45 = vadd.f32 %v12835_v33, %v8038_v27  ;;  %12675 = vpow2.f32 %v8388_v4 }
 0x7f0   : > { %v12668_v9 = vpop.eup %12667  ;;  %v7790_v34 = vadd.f32 1.0, %v12666_v0  ;;  %v8389_v12 = vmul.f32 -1.442695, %v7541_v53  ;;  %v12849_v53 = vld [vmem:[%s13369_s18 + $0x160] sm:$0xff]  ;;  %v12850_v0 = vld [vmem:[%s13361_s21 + $0x160] sm:$0xff] }
 0x7f1   : > { %8164 = vst [vmem:[%s18496_s23 + $0x128] sm:$0xff] %v8101_v45  ;;  %v8039_v61 = vmul.f32 %v12668_v9, %v7976_v19  ;;  %v7460_v37 = vpop.xlane.xlu1 %7459  ;;  %v7982_v45 = vsub.f32 %v12850_v0, %v12849_v53 }
 0x7f2   : > { %12677 = vrcp.f32 %v7790_v34  ;;  %v7542_v39 = vadd.f32 %v18444_v35, %v7460_v37 }
 0x7f3   : > { %v12670_v30 = vpop.eup %12669  ;;  %v8102_v22 = vadd.f32 %v12837_v36, %v8039_v61  ;;  %12679 = vpow2.f32 %v8389_v12 }
 0x7f4   : > { %v12672_v50 = vpop.eup %12671  ;;  %v7791_v16 = vadd.f32 1.0, %v12670_v30  ;;  %v8390_v44 = vmul.f32 -1.442695, %v7542_v39  ;;  %v12851_v39 = vld [vmem:[%s13369_s18 + $0x168] sm:$0xff]  ;;  %v12852_v30 = vld [vmem:[%s13361_s21 + $0x168] sm:$0xff] }
 0x7f5   : > { %8165 = vst [vmem:[%s18496_s23 + $0x130] sm:$0xff] %v8102_v22  ;;  %v8040_v10 = vmul.f32 %v12672_v50, %v7977_v41  ;;  %v7462_v31 = vpop.xlane.xlu0 %7461  ;;  %v7983_v22 = vsub.f32 %v12852_v30, %v12851_v39 }
 0x7f6   : > { %12681 = vrcp.f32 %v7791_v16  ;;  %v7543_v48 = vadd.f32 %v18444_v35, %v7462_v31  ;;  %v12853_v31 = vld [vmem:[%s13369_s18 + $0x170] sm:$0xff] }
 0x7f7   : > { %v8103_v3 = vadd.f32 %v12839_v32, %v8040_v10  ;;  %12683 = vpow2.f32 %v8390_v44 }
 0x7f8   : > { %v12674_v23 = vpop.eup %12673  ;;  %v8391_v29 = vmul.f32 -1.442695, %v7543_v48  ;;  %v12854_v48 = vld [vmem:[%s13361_s21 + $0x170] sm:$0xff] }
 0x7f9   : > { %v12676_v42 = vpop.eup %12675  ;;  %8166 = vst [vmem:[%s18496_s23 + $0x138] sm:$0xff] %v8103_v3  ;;  %v8041_v8 = vmul.f32 %v12674_v23, %v7978_v15  ;;  %v7464_v56 = vpop.xlane.xlu1 %7463  ;;  %v7984_v3 = vsub.f32 %v12854_v48, %v12853_v31 }
 0x7fa   : > { %v7792_v55 = vadd.f32 1.0, %v12676_v42  ;;  %12685 = vpow2.f32 %v8391_v29  ;;  %v7544_v38 = vadd.f32 %v18444_v35, %v7464_v56 }
 0x7fb   : > { %v8104_v28 = vadd.f32 %v12841_v26, %v8041_v8 }
 0x7fc   : > { %v12678_v59 = vpop.eup %12677  ;;  %12687 = vrcp.f32 %v7792_v55  ;;  %v8392_v25 = vmul.f32 -1.442695, %v7544_v38  ;;  %v12855_v55 = vld [vmem:[%s13369_s18 + $0x178] sm:$0xff]  ;;  %v12856_v38 = vld [vmem:[%s13361_s21 + $0x178] sm:$0xff] }
 0x7fd   : > { %v12680_v57 = vpop.eup %12679  ;;  %8167 = vst [vmem:[%s18496_s23 + $0x140] sm:$0xff] %v8104_v28  ;;  %v8042_v46 = vmul.f32 %v12678_v59, %v7979_v52  ;;  %v7466_v6 = vpop.xlane.xlu0 %7465  ;;  %v7985_v28 = vsub.f32 %v12856_v38, %v12855_v55 }
 0x7fe   : > { %v7793_v40 = vadd.f32 1.0, %v12680_v57  ;;  %12689 = vpow2.f32 %v8392_v25  ;;  %v7545_v63 = vadd.f32 %v18444_v35, %v7466_v6 }
 0x7ff   : > { %v8105_v51 = vadd.f32 %v12843_v60, %v8042_v46 }
 0x800   : > { %v12682_v49 = vpop.eup %12681  ;;  %12691 = vrcp.f32 %v7793_v40  ;;  %v8393_v33 = vmul.f32 -1.442695, %v7545_v63  ;;  %v12857_v40 = vld [vmem:[%s13369_s18 + $0x180] sm:$0xff]  ;;  %v12858_v63 = vld [vmem:[%s13361_s21 + $0x180] sm:$0xff] }
 0x801   : > { %v12684_v24 = vpop.eup %12683  ;;  %8168 = vst [vmem:[%s18496_s23 + $0x148] sm:$0xff] %v8105_v51  ;;  %v8043_v54 = vmul.f32 %v12682_v49, %v7980_v20  ;;  %v7468_v58 = vpop.xlane.xlu1 %7467  ;;  %v7986_v51 = vsub.f32 %v12858_v63, %v12857_v40 }
 0x802   : > { %v7794_v18 = vadd.f32 1.0, %v12684_v24  ;;  %12693 = vpow2.f32 %v8393_v33  ;;  %v7546_v14 = vadd.f32 %v18444_v35, %v7468_v58 }
 0x803   : > { %v8106_v1 = vadd.f32 %v12845_v13, %v8043_v54 }
 0x804   : > { %v12686_v4 = vpop.eup %12685  ;;  %12695 = vrcp.f32 %v7794_v18  ;;  %v8394_v36 = vmul.f32 -1.442695, %v7546_v14 }
 0x805   : > { %8169 = vst [vmem:[%s18496_s23 + $0x150] sm:$0xff] %v8106_v1  ;;  %v7795_v7 = vadd.f32 1.0, %v12686_v4  ;;  %v7470_v19 = vpop.xlane.xlu0 %7469 }
 0x806   : > { %v12688_v27 = vpop.eup %12687  ;;  %12697 = vpow2.f32 %v8394_v36  ;;  %v7547_v2 = vadd.f32 %v18444_v35, %v7470_v19 }
 0x807   : > { %v8044_v9 = vmul.f32 %v12688_v27, %v7981_v21  ;;  %12699 = vrcp.f32 %v7795_v7  ;;  %v12860_v21 = vld [vmem:[%s13361_s21 + $0x188] sm:$0xff] }
 0x808   : > { %v12690_v34 = vpop.eup %12689  ;;  %v8395_v12 = vmul.f32 -1.442695, %v7547_v2  ;;  %v7987_v1 = vsub.f32 %v12860_v21, %v12859_v5 }
 0x809   : > { %v8107_v32 = vadd.f32 %v12847_v47, %v8044_v9  ;;  %v7796_v11 = vadd.f32 1.0, %v12690_v34  ;;  %v7472_v41 = vpop.xlane.xlu1 %7471  ;;  %v12862_v9 = vld [vmem:[%s13361_s21 + $0x190] sm:$0xff] }
 0x80a   : > { %v12692_v61 = vpop.eup %12691  ;;  %12701 = vpow2.f32 %v8395_v12  ;;  %v7548_v37 = vadd.f32 %v18444_v35, %v7472_v41 }
 0x80b   : > { %8170 = vst [vmem:[%s18496_s23 + $0x158] sm:$0xff] %v8107_v32  ;;  %v8045_v50 = vmul.f32 %v12692_v61, %v7982_v45  ;;  %12703 = vrcp.f32 %v7796_v11  ;;  %v12861_v45 = vld [vmem:[%s13369_s18 + $0x190] sm:$0xff] }
 0x80c   : > { %v12694_v16 = vpop.eup %12693  ;;  %v8396_v44 = vmul.f32 -1.442695, %v7548_v37  ;;  %v7988_v34 = vsub.f32 %v12862_v9, %v12861_v45 }
 0x80d   : > { %v8108_v26 = vadd.f32 %v12849_v53, %v8045_v50  ;;  %v7797_v62 = vadd.f32 1.0, %v12694_v16  ;;  %v7474_v15 = vpop.xlane.xlu0 %7473  ;;  %v12864_v50 = vld [vmem:[%s13361_s21 + $0x198] sm:$0xff] }
 0x80e   : > { %v12696_v10 = vpop.eup %12695  ;;  %12705 = vpow2.f32 %v8396_v44  ;;  %v7549_v23 = vadd.f32 %v18444_v35, %v7474_v15 }
 0x80f   : > { %8171 = vst [vmem:[%s18496_s23 + $0x160] sm:$0xff] %v8108_v26  ;;  %v8046_v29 = vmul.f32 %v12696_v10, %v7983_v22  ;;  %12707 = vrcp.f32 %v7797_v62  ;;  %v12863_v22 = vld [vmem:[%s13369_s18 + $0x198] sm:$0xff] }
 0x810   : > { %v12698_v42 = vpop.eup %12697  ;;  %v8397_v60 = vmul.f32 -1.442695, %v7549_v23  ;;  %v7989_v16 = vsub.f32 %v12864_v50, %v12863_v22  ;;  %v12865_v23 = vld [vmem:[%s13369_s18 + $0x1a0] sm:$0xff] }
 0x811   : > { %v12700_v43 = vpop.eup %12699  ;;  %v8109_v52 = vadd.f32 %v12851_v39, %v8046_v29  ;;  %v7798_v8 = vadd.f32 1.0, %v12698_v42  ;;  %v7476_v56 = vpop.xlane.xlu1 %7475  ;;  %v12866_v29 = vld [vmem:[%s13361_s21 + $0x1a0] sm:$0xff] }
 0x812   : > { %v8047_v59 = vmul.f32 %v12700_v43, %v7984_v3  ;;  %12709 = vpow2.f32 %v8397_v60  ;;  %v7550_v25 = vadd.f32 %v18444_v35, %v7476_v56  ;;  %v7990_v42 = vsub.f32 %v12866_v29, %v12865_v23 }
 0x813   : > { %8172 = vst [vmem:[%s18496_s23 + $0x168] sm:$0xff] %v8109_v52  ;;  %12711 = vrcp.f32 %v7798_v8 }
 0x814   : > { %v12702_v57 = vpop.eup %12701  ;;  %v8110_v13 = vadd.f32 %v12853_v31, %v8047_v59  ;;  %v8398_v17 = vmul.f32 -1.442695, %v7550_v25  ;;  %v12867_v59 = vld [vmem:[%s13369_s18 + $0x1a8] sm:$0xff]  ;;  %v12868_v25 = vld [vmem:[%s13361_s21 + $0x1a8] sm:$0xff] }
 0x815   : > { %v12704_v20 = vpop.eup %12703  ;;  %v7799_v46 = vadd.f32 1.0, %v12702_v57  ;;  %v7478_v6 = vpop.xlane.xlu0 %7477  ;;  %v7991_v57 = vsub.f32 %v12868_v25, %v12867_v59 }
 0x816   : > { %8173 = vst [vmem:[%s18496_s23 + $0x170] sm:$0xff] %v8110_v13  ;;  %v8048_v49 = vmul.f32 %v12704_v20, %v7985_v28  ;;  %12713 = vpow2.f32 %v8398_v17  ;;  %v7551_v33 = vadd.f32 %v18444_v35, %v7478_v6 }
 0x817   : > { %12715 = vrcp.f32 %v7799_v46 }
 0x818   : > { %v12706_v24 = vpop.eup %12705  ;;  %v8111_v54 = vadd.f32 %v12855_v55, %v8048_v49  ;;  %v8399_v58 = vmul.f32 -1.442695, %v7551_v33  ;;  %v12869_v49 = vld [vmem:[%s13369_s18 + $0x1b0] sm:$0xff]  ;;  %v12870_v33 = vld [vmem:[%s13361_s21 + $0x1b0] sm:$0xff] }
 0x819   : > { %v12708_v18 = vpop.eup %12707  ;;  %v7800_v14 = vadd.f32 1.0, %v12706_v24  ;;  %v7480_v47 = vpop.xlane.xlu1 %7479  ;;  %v7992_v24 = vsub.f32 %v12870_v33, %v12869_v49 }
 0x81a   : > { %8174 = vst [vmem:[%s18496_s23 + $0x178] sm:$0xff] %v8111_v54  ;;  %v8049_v4 = vmul.f32 %v12708_v18, %v7986_v51  ;;  %12717 = vpow2.f32 %v8399_v58  ;;  %v7552_v36 = vadd.f32 %v18444_v35, %v7480_v47 }
 0x81b   : > { %12719 = vrcp.f32 %v7800_v14 }
 0x81c   : > { %v12710_v7 = vpop.eup %12709  ;;  %v8112_v19 = vadd.f32 %v12857_v40, %v8049_v4  ;;  %v8400_v27 = vmul.f32 -1.442695, %v7552_v36  ;;  %v12871_v4 = vld [vmem:[%s13369_s18 + $0x1b8] sm:$0xff]  ;;  %v12872_v36 = vld [vmem:[%s13361_s21 + $0x1b8] sm:$0xff] }
 0x81d   : > { %v12712_v2 = vpop.eup %12711  ;;  %v7801_v53 = vadd.f32 1.0, %v12710_v7  ;;  %v7482_v0 = vpop.xlane.xlu0 %7481  ;;  %v7993_v7 = vsub.f32 %v12872_v36, %v12871_v4 }
 0x81e   : > { %8175 = vst [vmem:[%s18496_s23 + $0x180] sm:$0xff] %v8112_v19  ;;  %v8050_v12 = vmul.f32 %v12712_v2, %v7987_v1  ;;  %12721 = vpow2.f32 %v8400_v27  ;;  %v7553_v32 = vadd.f32 %v18444_v35, %v7482_v0 }
 0x81f   : > { %12723 = vrcp.f32 %v7801_v53 }
 0x820   : > { %v12714_v11 = vpop.eup %12713  ;;  %v8113_v41 = vadd.f32 %v12859_v5, %v8050_v12  ;;  %v8401_v61 = vmul.f32 -1.442695, %v7553_v32  ;;  %v12873_v12 = vld [vmem:[%s13369_s18 + $0x1c0] sm:$0xff]  ;;  %v12874_v32 = vld [vmem:[%s13361_s21 + $0x1c0] sm:$0xff] }
 0x821   : > { %v12716_v37 = vpop.eup %12715  ;;  %v7802_v39 = vadd.f32 1.0, %v12714_v11  ;;  %v7484_v30 = vpop.xlane.xlu1 %7483  ;;  %v7994_v11 = vsub.f32 %v12874_v32, %v12873_v12 }
 0x822   : > { %8176 = vst [vmem:[%s18496_s23 + $0x188] sm:$0xff] %v8113_v41  ;;  %v8051_v44 = vmul.f32 %v12716_v37, %v7988_v34  ;;  %12725 = vpow2.f32 %v8401_v61  ;;  %v7554_v26 = vadd.f32 %v18444_v35, %v7484_v30 }
 0x823   : > { %12727 = vrcp.f32 %v7802_v39 }
 0x824   : > { %v12718_v62 = vpop.eup %12717  ;;  %v8114_v15 = vadd.f32 %v12861_v45, %v8051_v44  ;;  %v8402_v10 = vmul.f32 -1.442695, %v7554_v26  ;;  %v12876_v44 = vld [vmem:[%s13361_s21 + $0x1c8] sm:$0xff] }
 0x825   : > { %v12720_v31 = vpop.eup %12719  ;;  %v7803_v48 = vadd.f32 1.0, %v12718_v62  ;;  %v7486_v3 = vpop.xlane.xlu0 %7485 }
 0x826   : > { %8177 = vst [vmem:[%s18496_s23 + $0x190] sm:$0xff] %v8114_v15  ;;  %v8052_v60 = vmul.f32 %v12720_v31, %v7989_v16  ;;  %12729 = vpow2.f32 %v8402_v10  ;;  %v7555_v43 = vadd.f32 %v18444_v35, %v7486_v3  ;;  %v12875_v16 = vld [vmem:[%s13369_s18 + $0x1c8] sm:$0xff]  ;;  %v12878_v3 = vld [vmem:[%s13361_s21 + $0x1d0] sm:$0xff] }
 0x827   : > { %12731 = vrcp.f32 %v7803_v48  ;;  %v7995_v26 = vsub.f32 %v12876_v44, %v12875_v16  ;;  %v12877_v48 = vld [vmem:[%s13369_s18 + $0x1d0] sm:$0xff] }
 0x828   : > { %v12722_v52 = vpop.eup %12721  ;;  %v8115_v8 = vadd.f32 %v12863_v22, %v8052_v60  ;;  %v8403_v56 = vmul.f32 -1.442695, %v7555_v43 }
 0x829   : > { %v12724_v55 = vpop.eup %12723  ;;  %v7804_v38 = vadd.f32 1.0, %v12722_v52  ;;  %v7488_v28 = vpop.xlane.xlu1 %7487 }
 0x82a   : > { %8178 = vst [vmem:[%s18496_s23 + $0x198] sm:$0xff] %v8115_v8  ;;  %v8053_v13 = vmul.f32 %v12724_v55, %v7990_v42  ;;  %12733 = vpow2.f32 %v8403_v56  ;;  %v7556_v17 = vadd.f32 %v18444_v35, %v7488_v28  ;;  %v12879_v8 = vld [vmem:[%s13369_s18 + $0x1d8] sm:$0xff]  ;;  %v12880_v56 = vld [vmem:[%s13361_s21 + $0x1d8] sm:$0xff] }
 0x82b   : > { %12735 = vrcp.f32 %v7804_v38  ;;  %v7997_v55 = vsub.f32 %v12880_v56, %v12879_v8 }
 0x82c   : > { %v12726_v20 = vpop.eup %12725  ;;  %v8116_v46 = vadd.f32 %v12865_v23, %v8053_v13  ;;  %v8404_v6 = vmul.f32 -1.442695, %v7556_v17  ;;  %v7996_v23 = vsub.f32 %v12878_v3, %v12877_v48  ;;  %v12881_v13 = vld [vmem:[%s13369_s18 + $0x1e0] sm:$0xff]  ;;  %v12882_v17 = vld [vmem:[%s13361_s21 + $0x1e0] sm:$0xff] }
 0x82d   : > { %v12728_v40 = vpop.eup %12727  ;;  %v7805_v63 = vadd.f32 1.0, %v12726_v20  ;;  %v7490_v51 = vpop.xlane.xlu0 %7489  ;;  %v7998_v20 = vsub.f32 %v12882_v17, %v12881_v13 }
 0x82e   : > { %8179 = vst [vmem:[%s18496_s23 + $0x1a0] sm:$0xff] %v8116_v46  ;;  %v8054_v54 = vmul.f32 %v12728_v40, %v7991_v57  ;;  %12737 = vpow2.f32 %v8404_v6  ;;  %v7557_v58 = vadd.f32 %v18444_v35, %v7490_v51  ;;  %v12884_v51 = vld [vmem:[%s13361_s21 + $0x1e8] sm:$0xff] }
 0x82f   : > { %12739 = vrcp.f32 %v7805_v63  ;;  %v12883_v63 = vld [vmem:[%s13369_s18 + $0x1e8] sm:$0xff] }
 0x830   : > { %v12730_v18 = vpop.eup %12729  ;;  %v8117_v14 = vadd.f32 %v12867_v59, %v8054_v54  ;;  %v8405_v47 = vmul.f32 -1.442695, %v7557_v58  ;;  %v12885_v58 = vld [vmem:[%s13369_s18 + $0x1f0] sm:$0xff] }
 0x831   : > { %v12732_v5 = vpop.eup %12731  ;;  %v7806_v21 = vadd.f32 1.0, %v12730_v18  ;;  %v7492_v1 = vpop.xlane.xlu1 %7491  ;;  %v12886_v18 = vld [vmem:[%s13361_s21 + $0x1f0] sm:$0xff] }
 0x832   : > { %8180 = vst [vmem:[%s18496_s23 + $0x1a8] sm:$0xff] %v8117_v14  ;;  %v8055_v19 = vmul.f32 %v12732_v5, %v7992_v24  ;;  %12741 = vpow2.f32 %v8405_v47  ;;  %v7558_v27 = vadd.f32 %v18444_v35, %v7492_v1  ;;  %v8000_v14 = vsub.f32 %v12886_v18, %v12885_v58 }
 0x833   : > { %12743 = vrcp.f32 %v7806_v21 }
 0x834   : > { %v12734_v2 = vpop.eup %12733  ;;  %v8118_v53 = vadd.f32 %v12869_v49, %v8055_v19  ;;  %v8406_v0 = vmul.f32 -1.442695, %v7558_v27  ;;  %v7999_v49 = vsub.f32 %v12884_v51, %v12883_v63 }
 0x835   : > { %v12736_v45 = vpop.eup %12735  ;;  %v7807_v9 = vadd.f32 1.0, %v12734_v2  ;;  %v7494_v34 = vpop.xlane.xlu0 %7493 }
 0x836   : > { %8181 = vst [vmem:[%s18496_s23 + $0x1b0] sm:$0xff] %v8118_v53  ;;  %v8056_v41 = vmul.f32 %v12736_v45, %v7993_v7  ;;  %12745 = vpow2.f32 %v8406_v0  ;;  %v7559_v61 = vadd.f32 %v18444_v35, %v7494_v34 }
 0x837   : > { %12747 = vrcp.f32 %v7807_v9 }
 0x838   : > { %v12738_v37 = vpop.eup %12737  ;;  %v8119_v39 = vadd.f32 %v12871_v4, %v8056_v41  ;;  %v8407_v30 = vmul.f32 -1.442695, %v7559_v61 }
 0x839   : > { %v12740_v22 = vpop.eup %12739  ;;  %v7808_v50 = vadd.f32 1.0, %v12738_v37 }
 0x83a   : > { %8182 = vst [vmem:[%s18496_s23 + $0x1b8] sm:$0xff] %v8119_v39  ;;  %v8057_v62 = vmul.f32 %v12740_v22, %v7994_v11  ;;  %12749 = vpow2.f32 %v8407_v30 }
 0x83b   : > { %12751 = vrcp.f32 %v7808_v50 }
 0x83c   : > { %v12742_v15 = vpop.eup %12741  ;;  %v8120_v35 = vadd.f32 %v12873_v12, %v8057_v62 }
 0x83d   : > { %v12744_v10 = vpop.eup %12743  ;;  %v7809_v31 = vadd.f32 1.0, %v12742_v15 }
 0x83e   : > { %8183 = vst [vmem:[%s18496_s23 + $0x1c0] sm:$0xff] %v8120_v35  ;;  %v8058_v29 = vmul.f32 %v12744_v10, %v7995_v26 }
 0x83f   : > { %12753 = vrcp.f32 %v7809_v31 }
 0x840   : > { %v12746_v42 = vpop.eup %12745  ;;  %v8121_v60 = vadd.f32 %v12875_v16, %v8058_v29 }
 0x841   : > { %v12748_v43 = vpop.eup %12747  ;;  %v7810_v52 = vadd.f32 1.0, %v12746_v42 }
 0x842   : > { %8184 = vst [vmem:[%s18496_s23 + $0x1c8] sm:$0xff] %v8121_v60  ;;  %v8059_v38 = vmul.f32 %v12748_v43, %v7996_v23 }
 0x843   : > { %12755 = vrcp.f32 %v7810_v52 }
 0x844   : > { %v12750_v28 = vpop.eup %12749  ;;  %v8122_v59 = vadd.f32 %v12877_v48, %v8059_v38 }
 0x845   : > { %v12752_v25 = vpop.eup %12751  ;;  %v7811_v57 = vadd.f32 1.0, %v12750_v28 }
 0x846   : > { %8185 = vst [vmem:[%s18496_s23 + $0x1d0] sm:$0xff] %v8122_v59  ;;  %v8060_v46 = vmul.f32 %v12752_v25, %v7997_v55 }
 0x847   : > { %12757 = vrcp.f32 %v7811_v57 }
 0x848   : > { %v8123_v6 = vadd.f32 %v12879_v8, %v8060_v46 }
 0x849   : > { %v12754_v40 = vpop.eup %12753 }
 0x84a   : > { %8186 = vst [vmem:[%s18496_s23 + $0x1d8] sm:$0xff] %v8123_v6  ;;  %v8061_v33 = vmul.f32 %v12754_v40, %v7998_v20 }
 0x84c   : > { %v8124_v24 = vadd.f32 %v12881_v13, %v8061_v33 }
 0x84d   : > { %v12756_v54 = vpop.eup %12755 }
 0x84e   : > { %8187 = vst [vmem:[%s18496_s23 + $0x1e0] sm:$0xff] %v8124_v24  ;;  %v8062_v47 = vmul.f32 %v12756_v54, %v7999_v49 }
 0x850   : > { %v8125_v5 = vadd.f32 %v12883_v63, %v8062_v47  ;;  %8197 = sbr.rel (!%p20466_p0) target bundleno = 2163 (0x873), region = 68 }
 0x851   : > { %v12758_v21 = vpop.eup %12757 }
 0x852   : > { %8188 = vst [vmem:[%s18496_s23 + $0x1e8] sm:$0xff] %v8125_v5  ;;  %v8063_v1 = vmul.f32 %v12758_v21, %v8000_v14 }
 0x854   : > { %v8126_v4 = vadd.f32 %v12885_v58, %v8063_v1 }
 0x856   : > { %8189 = vst [vmem:[%s18496_s23 + $0x1f0] sm:$0xff] %v8126_v4 }
 0x857   : > { %s20478_s16 = smov (!%p8200_p12, %s8199_s16), 63 }
 0x858   : > { %s18787_s21 = sshll.u32 %s20478_s16, 7 }
 0x859   : > { %s8204_s9 = ssub.s32 8064, %s18787_s21 }
 0x85a   : > { %8205 = vsyncadd %s8191_s25, %s8204_s9  ;;  %p8409_p7 = scmp.ne.s32.totalorder %s18787_s21, 0  ;;  %s8417_s14 = smul.u32 8064, %s13159_s6 }
 0x85b   : > { %s8210_s18 = sshll.u32 %s18496_s23, 4  ;;  %s13092_s17 = smov [#allocation11]   ;;  %s18800_s18 = int_to_ptr.vmem [resolvable:$true] %s8210_s18 }
 0x85c   : > { %s18798_s11 = scalar_lea.hbm %s18853_s7, %s8417_s14  ;;  %s12999_s22 = scalar_lea.vmem %s18800_s18, %s18787_s21 }
 0x85d   : > { %p13000_p8 = scmp.ne.s32.totalorder %s18800_s18, %s12999_s22  ;;  %s13003_s19 = sshll.u32 %s13092_s17, 4  ;;  %s13004_s19 = int_to_ptr.vmem [resolvable:$false] %s13003_s19 }
 0x85e   : > { %s13005_s6 = scalar_lea.vmem %s13004_s19, 16128  ;;  %p13006_p3 = scmp.lt.s32.totalorder %s18800_s18, %s13004_s19 }
 0x85f   : > { %p13001_p9 = pnand %p13000_p8, %p8409_p7  ;;  %p13007_p10 = scmp.lt.s32.totalorder %s13005_s6, %s12999_s22 }
 0x861   : > { %p13002_p1 = pneg %p13001_p9  ;;  %p13008_p5 = por %p13007_p10, %p13006_p3 }
 0x863   : > { %p13009_p2 = pnand %p13008_p5, %p13002_p1 }
 0x865   : > { %13012 = shalt.err (!%p13009_p2)
}
 0x866   : > { %s13013_s12 = scalar_lea.hbm %s18798_s11, %s18787_s21  ;;  %s13017_s23 = scalar_lea.hbm %s18853_s7, 16000 }
 0x867   : > { %p13014_p6 = scmp.ne.s32.totalorder %s18798_s11, %s13013_s12  ;;  %p13018_p0 = scmp.lt.u32.totalorder %s18798_s11, %s18853_s7 }
 0x868   : > { %p13019_p12 = scmp.lt.u32.totalorder %s13017_s23, %s13013_s12  ;;  %p13021_p9 = scmp.lt.u32.totalorder %s13013_s12, %s18798_s11 }
 0x869   : > { %p13015_p11 = pnand %p13014_p6, %p8409_p7 }
 0x86a   : > { %p13020_p8 = por %p13019_p12, %p13018_p0 }
 0x86b   : > { %p13016_p13 = pneg %p13015_p11 }
 0x86c   : > { %p13022_p1 = por %p13021_p9, %p13020_p8 }
 0x86e   : > { %p13023_p3 = pnand %p13022_p1, %p13016_p13 }
 0x870   : > { %13026 = shalt.err (!%p13023_p3)
}
 0x871   : > { %s13093_s9 = smov 128   ;;  %s13094_s14 = smov 8  }
 0x872   : > { %8216 = dma.vmem_to_hbm [thread:$0]  (%p8409_p7), %s18800_s18, %s18787_s21, %s18798_s11, %s8191_s25, %s13093_s9, %s13093_s9, %s13094_s14  }
 0x873 PF: > { %s8225_s13 = sand.u32 1, %s13065_s26   ;;  %p20467_p10 = scmp.ne.s32.totalorder %s19466_s15, 0 }
 0x874   : > { %s8226_s20 = scalar_lea.sflag [#allocation5], %s8225_s13 }
 0x875   : > { %p12328_p5 = pnand %p8329_p4, %p20467_p10 }
 0x877   : > { %13060 = dma.done.wait (!%p12328_p5), %s8226_s20, 8064  }
 0x878   : > { %13062 = vsyncadd (!%p12328_p5), %s8226_s20, 4294959232  ;;  %s20468_s29 = sld [smem:[#allocation17_spill]]  ;;  %s20469_s22 = sld [smem:[#allocation18_spill]] }
 0x879   : > { %s20470_s26 = smov %s13069_s27  ;;  %s20471_s27 = smov %s13073_s28 }
 0x87e   : > { %p25_p2 = scmp.ge.s32.totalorder %s20468_s29, 4   ;;  %s20472_s28 = smov %s20469_s22 }
 0x880   :  { %27 = sbr.rel (!%p25_p2) target bundleno = 10 (0xa), region = 114 }
 0x887   :  { %8231 = vsyncpa [#allocation4], 1 }
 0x888   :  { %8233 = vsyncpa [#allocation4 + $0x1], 1 }
 0x889   :  { %8234 = vsyncpa [#allocation7], 1 }
 0x88a   :  { %8236 = vsyncpa [#allocation7 + $0x1], 1 }
 0x88b   :  { %8237 = vsyncpa [#allocation10], 1 }
 0x88c   :  { %8238 = vsyncpa [#allocation5], 1 }
 0x88d   :  { %8240 = vsyncpa [#allocation5 + $0x1], 1 }

</bundles_post_ra>
